<compile_context>
chip_gen: v7x
topology: tpu7x:2x2x1
jax: 0.10.0
libtpu: 0.0.40
codegen_flags: <defaults>
</compile_context>

<pallas_src>
import jax
import jax.numpy as jnp
from jax import lax
from jax.experimental import pallas as pl
from jax.experimental.pallas import tpu as pltpu

E_DIM = 256      # fixed by MiniModel.__init__
H_DIM = 256      # fixed by MiniModel.__init__
LABELS = 2


def _vmem_spec():
    # Whole-array block resident in VMEM (no grid -> single invocation).
    return pl.BlockSpec(memory_space=pltpu.MemorySpace.VMEM)


# --------------------------------------------------------------------------
# Kernel A: hoisted input projection for the forward direction.
#   (T*B, E) @ (E, 4H) + bias  ->  (T*B, 4H)   -- one dense MXU matmul.
# --------------------------------------------------------------------------
def input_proj_kernel(x_ref, w_ref, b_ref, out_ref):
    out_ref[...] = (
        jnp.dot(x_ref[...], w_ref[...], preferred_element_type=jnp.float32)
        + b_ref[...])


def input_projection(x_flat, w_t, bias):
    M = x_flat.shape[0]
    N = w_t.shape[1]
    return pl.pallas_call(
        input_proj_kernel,
        out_shape=jax.ShapeDtypeStruct((M, N), jnp.float32),
        in_specs=[_vmem_spec(), _vmem_spec(), _vmem_spec()],
        out_specs=_vmem_spec(),
    )(x_flat, w_t, bias)


# --------------------------------------------------------------------------
# Kernel B: forward recurrence (loop inside the kernel) + backward single
#           cell step + fc + softmax + log_softmax, all fused.
# --------------------------------------------------------------------------
def lstm_head_kernel(gxf_ref, whh_ref, xlast_ref, wihb_ref, bb_ref,
                     wfc_f_ref, wfc_b_ref, bfc_ref, sm_ref, lsm_ref):
    T, B, G = gxf_ref.shape
    H = G // 4

    whh = whh_ref[...]                       # (H, 4H) stays resident in vregs/VMEM

    # ---- forward direction: only h @ W_hh^T on the serial critical path ----
    def step(t, carry):
        h, c = carry
        gates = gxf_ref[t] + jnp.dot(h, whh, preferred_element_type=jnp.float32)
        i = jax.nn.sigmoid(gates[:, 0 * H:1 * H])
        f = jax.nn.sigmoid(gates[:, 1 * H:2 * H])
        g = jnp.tanh(gates[:, 2 * H:3 * H])
        o = jax.nn.sigmoid(gates[:, 3 * H:4 * H])
        c = f * c + i * g
        h = o * jnp.tanh(c)
        return h, c

    zeros = jnp.zeros((B, H), jnp.float32)
    h_f, _ = lax.fori_loop(0, T, step, (zeros, zeros), unroll=True)

    # ---- backward direction at position T-1: one cell step from zero state.
    # h_prev = 0  => no W_hh matmul;  c_prev = 0 => forget gate multiplies 0.
    gates_b = (jnp.dot(xlast_ref[...], wihb_ref[...],
                       preferred_element_type=jnp.float32) + bb_ref[...])
    i_b = jax.nn.sigmoid(gates_b[:, 0 * H:1 * H])
    g_b = jnp.tanh(gates_b[:, 2 * H:3 * H])
    o_b = jax.nn.sigmoid(gates_b[:, 3 * H:4 * H])
    h_b = o_b * jnp.tanh(i_b * g_b)

    # ---- fused fc + softmax + log_softmax (concat avoided via split W_fc) ----
    logits = (jnp.dot(h_f, wfc_f_ref[...], preferred_element_type=jnp.float32)
              + jnp.dot(h_b, wfc_b_ref[...], preferred_element_type=jnp.float32)
              + bfc_ref[...])                                   # (B, LABELS)
    m = jnp.max(logits, axis=1, keepdims=True)
    z = logits - m
    e = jnp.exp(z)
    s = jnp.sum(e, axis=1, keepdims=True)
    sm_ref[...] = e / s
    lsm_ref[...] = z - jnp.log(s)


def lstm_head(gxf, whh_t, x_last, wihb_t, bias_b, wfc_f, wfc_b, bfc):
    B = gxf.shape[1]
    return pl.pallas_call(
        lstm_head_kernel,
        out_shape=(jax.ShapeDtypeStruct((B, LABELS), jnp.float32),
                   jax.ShapeDtypeStruct((B, LABELS), jnp.float32)),
        in_specs=[_vmem_spec()] * 8,
        out_specs=(_vmem_spec(), _vmem_spec()),
    )(gxf, whh_t, x_last, wihb_t, bias_b, wfc_f, wfc_b, bfc)


# --------------------------------------------------------------------------
# Full MiniModel forward.
# --------------------------------------------------------------------------
def mini_model_forward(params, x_tokens, lens):
    # `lens` is accepted but unused, exactly like the PyTorch forward
    # (no pack_padded_sequence in the reference).
    del lens
    B, T = x_tokens.shape

    # Embedding gather; nn.Dropout(0.2) is identity in eval mode.
    # TODO(synk): training-mode dropout (PRNG mask) not implemented.
    embed = jnp.take(params["emb"], x_tokens, axis=0).astype(jnp.float32)  # (B,T,E)

    x_tbe = jnp.transpose(embed, (1, 0, 2))            # (T, B, E) — small glue
    x_flat = x_tbe.reshape(T * B, E_DIM)               # (T*B, E)
    x_last = x_tbe[T - 1]                              # (B, E) == embed[:, -1, :]

    # Hoisted forward-direction input projection: one dense matmul over all T.
    wih_f_t = jnp.transpose(params["w_ih_f"])                          # (E, 4H)
    bias_f = (params["b_ih_f"] + params["b_hh_f"]).reshape(1, 4 * H_DIM)
    gxf = input_projection(x_flat, wih_f_t, bias_f)                    # (T*B, 4H)
    gxf = gxf.reshape(T, B, 4 * H_DIM)                                 # (T, B, 4H)

    whh_f_t = jnp.transpose(params["w_hh_f"])                          # (H, 4H)
    wih_b_t = jnp.transpose(params["w_ih_b"])                          # (E, 4H)
    bias_b = (params["b_ih_b"] + params["b_hh_b"]).reshape(1, 4 * H_DIM)
    # Note: w_hh_b is mathematically unused (backward h_prev == 0 at T-1).

    wfc_t = jnp.transpose(params["w_fc"])                              # (2H, 2)
    wfc_f = wfc_t[:H_DIM]                                              # (H, 2)
    wfc_b = wfc_t[H_DIM:]                                              # (H, 2)
    bfc = params["b_fc"].reshape(1, LABELS)

    return lstm_head(gxf, whh_f_t, x_last, wih_b_t, bias_b,
                     wfc_f, wfc_b, bfc)               # (softmax, log_softmax)


# --------------------------------------------------------------------------
# Deterministic parameter init (PyTorch-style uniform(-1/sqrt(H), 1/sqrt(H))).
# --------------------------------------------------------------------------
def init_params(key, vocab_size):
    ks = jax.random.split(key, 11)
    scale = 1.0 / float(jnp.sqrt(jnp.float32(H_DIM)))

    def u(k, shape):
        return jax.random.uniform(k, shape, jnp.float32, -scale, scale)

    emb = jax.random.normal(ks[0], (vocab_size, E_DIM), jnp.float32) * 0.02
    emb = emb.at[0].set(0.0)   # padding_idx=0

    return dict(
        emb=emb,
        w_ih_f=u(ks[1], (4 * H_DIM, E_DIM)),
        w_hh_f=u(ks[2], (4 * H_DIM, H_DIM)),
        b_ih_f=u(ks[3], (4 * H_DIM,)),
        b_hh_f=u(ks[4], (4 * H_DIM,)),
        w_ih_b=u(ks[5], (4 * H_DIM, E_DIM)),
        w_hh_b=u(ks[6], (4 * H_DIM, H_DIM)),
        b_ih_b=u(ks[7], (4 * H_DIM,)),
        b_hh_b=u(ks[8], (4 * H_DIM,)),
        w_fc=u(ks[9], (LABELS, 2 * H_DIM)),
        b_fc=u(ks[10], (LABELS,)),
    )


if __name__ == "__main__":
    key = jax.random.PRNGKey(0)
    vocab_size = 100
    B, T = 2, 8

    k_params, k_tokens = jax.random.split(key)
    params = init_params(k_params, vocab_size)
    x = jax.random.randint(k_tokens, (B, T), 0, vocab_size, dtype=jnp.int32)
    lens = jnp.full((B,), T, dtype=jnp.int32)

    fwd = jax.jit(mini_model_forward)
    softmax_out, log_softmax_out = fwd(params, x, lens)
    jax.block_until_ready((softmax_out, log_softmax_out))

    assert softmax_out.shape == (B, LABELS)
    assert log_softmax_out.shape == (B, LABELS)
    # Sanity: softmax rows sum to 1, log_softmax == log(softmax).
    assert bool(jnp.allclose(jnp.sum(softmax_out, axis=1), 1.0, atol=1e-5))
    assert bool(jnp.allclose(jnp.exp(log_softmax_out), softmax_out, atol=1e-5))
    print("KERNEL_OK")
</pallas_src>

<mosaic_0001>
module attributes {stable_mosaic.version = 11 : i64} {
  func.func @input_proj_kernel(%arg0: memref<16x256xf32, #tpu.memory_space<vmem>>, %arg1: memref<256x1024xf32, #tpu.memory_space<vmem>>, %arg2: memref<1x1024xf32, #tpu.memory_space<vmem>>, %arg3: memref<16x1024xf32, #tpu.memory_space<vmem>>) attributes {dimension_semantics = [], scalar_prefetch = 0 : i64, scratch_operands = 0 : i64, tpu.core_type = #tpu.core_type<tc>} {
    %c0 = arith.constant 0 : index
    %c0_0 = arith.constant 0 : index
    %0 = vector.load %arg0[%c0, %c0_0] : memref<16x256xf32, #tpu.memory_space<vmem>>, vector<16x256xf32>
    %c0_1 = arith.constant 0 : index
    %c0_2 = arith.constant 0 : index
    %1 = vector.load %arg1[%c0_1, %c0_2] : memref<256x1024xf32, #tpu.memory_space<vmem>>, vector<256x1024xf32>
    %cst = arith.constant dense<0.000000e+00> : vector<16x1024xf32>
    %2 = tpu.matmul %0, %1, %cst {dimension_numbers = #tpu.dot_dimension_numbers<[1], [0], [0], [1], [0, 0, 1, 1], [], []>} : vector<16x256xf32>, vector<256x1024xf32>, vector<16x1024xf32> -> vector<16x1024xf32>
    %c0_3 = arith.constant 0 : index
    %c0_4 = arith.constant 0 : index
    %3 = vector.load %arg2[%c0_3, %c0_4] : memref<1x1024xf32, #tpu.memory_space<vmem>>, vector<1x1024xf32>
    %4 = vector.broadcast %3 : vector<1x1024xf32> to vector<16x1024xf32>
    %5 = arith.addf %2, %4 : vector<16x1024xf32>
    %c0_5 = arith.constant 0 : index
    %c0_6 = arith.constant 0 : index
    %6 = vector.load %arg3[%c0_5, %c0_6] : memref<16x1024xf32, #tpu.memory_space<vmem>>, vector<16x1024xf32>
    tpu.vector_store %arg3[%c0_5, %c0_6], %5 {strides = array<i32>} : memref<16x1024xf32, #tpu.memory_space<vmem>>, vector<16x1024xf32>,
    return
  }
}

module attributes {stable_mosaic.version = 11 : i64} {
  func.func @lstm_head_kernel(%arg0: memref<8x2x1024xf32, #tpu.memory_space<vmem>>, %arg1: memref<256x1024xf32, #tpu.memory_space<vmem>>, %arg2: memref<2x256xf32, #tpu.memory_space<vmem>>, %arg3: memref<256x1024xf32, #tpu.memory_space<vmem>>, %arg4: memref<1x1024xf32, #tpu.memory_space<vmem>>, %arg5: memref<256x2xf32, #tpu.memory_space<vmem>>, %arg6: memref<256x2xf32, #tpu.memory_space<vmem>>, %arg7: memref<1x2xf32, #tpu.memory_space<vmem>>, %arg8: memref<2x2xf32, #tpu.memory_space<vmem>>, %arg9: memref<2x2xf32, #tpu.memory_space<vmem>>) attributes {dimension_semantics = [], scalar_prefetch = 0 : i64, scratch_operands = 0 : i64, tpu.core_type = #tpu.core_type<tc>} {
    %c0 = arith.constant 0 : index
    %c0_0 = arith.constant 0 : index
    %0 = vector.load %arg1[%c0, %c0_0] : memref<256x1024xf32, #tpu.memory_space<vmem>>, vector<256x1024xf32>
    %cst = arith.constant 0.000000e+00 : f32
    %1 = vector.broadcast %cst : f32 to vector<2x256xf32>
    %c0_i32 = arith.constant 0 : i32
    %2 = arith.index_cast %c0_i32 : i32 to index
    %c0_1 = arith.constant 0 : index
    %c0_2 = arith.constant 0 : index
    %3 = vector.load %arg0[%2, %c0_1, %c0_2] : memref<8x2x1024xf32, #tpu.memory_space<vmem>>, vector<1x2x1024xf32>
    %4 = vector.shape_cast %3 : vector<1x2x1024xf32> to vector<2x1024xf32>
    %cst_3 = arith.constant dense<0.000000e+00> : vector<2x1024xf32>
    %5 = tpu.matmul %1, %0, %cst_3 {dimension_numbers = #tpu.dot_dimension_numbers<[1], [0], [0], [1], [0, 0, 1, 1], [], []>} : vector<2x256xf32>, vector<256x1024xf32>, vector<2x1024xf32> -> vector<2x1024xf32>
    %6 = arith.addf %4, %5 : vector<2x1024xf32>
    %7 = vector.extract_strided_slice %6 {offsets = [0, 0], sizes = [2, 256], strides = [1, 1]} : vector<2x1024xf32> to vector<2x256xf32>
    %8 = arith.negf %7 : vector<2x256xf32>
    %9 = math.exp %8 : vector<2x256xf32>
    %cst_4 = arith.constant 1.000000e+00 : f32
    %10 = vector.broadcast %cst_4 : f32 to vector<2x256xf32>
    %11 = arith.addf %10, %9 : vector<2x256xf32>
    %12 = arith.divf %10, %11 : vector<2x256xf32>
    %13 = vector.extract_strided_slice %6 {offsets = [0, 256], sizes = [2, 256], strides = [1, 1]} : vector<2x1024xf32> to vector<2x256xf32>
    %14 = arith.negf %13 : vector<2x256xf32>
    %15 = math.exp %14 : vector<2x256xf32>
    %cst_5 = arith.constant 1.000000e+00 : f32
    %16 = vector.broadcast %cst_5 : f32 to vector<2x256xf32>
    %17 = arith.addf %16, %15 : vector<2x256xf32>
    %18 = arith.divf %16, %17 : vector<2x256xf32>
    %19 = vector.extract_strided_slice %6 {offsets = [0, 512], sizes = [2, 256], strides = [1, 1]} : vector<2x1024xf32> to vector<2x256xf32>
    %20 = math.tanh %19 : vector<2x256xf32>
    %21 = vector.extract_strided_slice %6 {offsets = [0, 768], sizes = [2, 256], strides = [1, 1]} : vector<2x1024xf32> to vector<2x256xf32>
    %22 = arith.negf %21 : vector<2x256xf32>
    %23 = math.exp %22 : vector<2x256xf32>
    %cst_6 = arith.constant 1.000000e+00 : f32
    %24 = vector.broadcast %cst_6 : f32 to vector<2x256xf32>
    %25 = arith.addf %24, %23 : vector<2x256xf32>
    %26 = arith.divf %24, %25 : vector<2x256xf32>
    %27 = arith.mulf %18, %1 : vector<2x256xf32>
    %28 = arith.mulf %12, %20 : vector<2x256xf32>
    %29 = arith.addf %27, %28 : vector<2x256xf32>
    %30 = math.tanh %29 : vector<2x256xf32>
    %31 = arith.mulf %26, %30 : vector<2x256xf32>
    %c1_i32 = arith.constant 1 : i32
    %32 = arith.index_cast %c1_i32 : i32 to index
    %c0_7 = arith.constant 0 : index
    %c0_8 = arith.constant 0 : index
    %33 = vector.load %arg0[%32, %c0_7, %c0_8] : memref<8x2x1024xf32, #tpu.memory_space<vmem>>, vector<1x2x1024xf32>
    %34 = vector.shape_cast %33 : vector<1x2x1024xf32> to vector<2x1024xf32>
    %cst_9 = arith.constant dense<0.000000e+00> : vector<2x1024xf32>
    %35 = tpu.matmul %31, %0, %cst_9 {dimension_numbers = #tpu.dot_dimension_numbers<[1], [0], [0], [1], [0, 0, 1, 1], [], []>} : vector<2x256xf32>, vector<256x1024xf32>, vector<2x1024xf32> -> vector<2x1024xf32>
    %36 = arith.addf %34, %35 : vector<2x1024xf32>
    %37 = vector.extract_strided_slice %36 {offsets = [0, 0], sizes = [2, 256], strides = [1, 1]} : vector<2x1024xf32> to vector<2x256xf32>
    %38 = arith.negf %37 : vector<2x256xf32>
    %39 = math.exp %38 : vector<2x256xf32>
    %cst_10 = arith.constant 1.000000e+00 : f32
    %40 = vector.broadcast %cst_10 : f32 to vector<2x256xf32>
    %41 = arith.addf %40, %39 : vector<2x256xf32>
    %42 = arith.divf %40, %41 : vector<2x256xf32>
    %43 = vector.extract_strided_slice %36 {offsets = [0, 256], sizes = [2, 256], strides = [1, 1]} : vector<2x1024xf32> to vector<2x256xf32>
    %44 = arith.negf %43 : vector<2x256xf32>
    %45 = math.exp %44 : vector<2x256xf32>
    %cst_11 = arith.constant 1.000000e+00 : f32
    %46 = vector.broadcast %cst_11 : f32 to vector<2x256xf32>
    %47 = arith.addf %46, %45 : vector<2x256xf32>
    %48 = arith.divf %46, %47 : vector<2x256xf32>
    %49 = vector.extract_strided_slice %36 {offsets = [0, 512], sizes = [2, 256], strides = [1, 1]} : vector<2x1024xf32> to vector<2x256xf32>
    %50 = math.tanh %49 : vector<2x256xf32>
    %51 = vector.extract_strided_slice %36 {offsets = [0, 768], sizes = [2, 256], strides = [1, 1]} : vector<2x1024xf32> to vector<2x256xf32>
    %52 = arith.negf %51 : vector<2x256xf32>
    %53 = math.exp %52 : vector<2x256xf32>
    %cst_12 = arith.constant 1.000000e+00 : f32
    %54 = vector.broadcast %cst_12 : f32 to vector<2x256xf32>
    %55 = arith.addf %54, %53 : vector<2x256xf32>
    %56 = arith.divf %54, %55 : vector<2x256xf32>
    %57 = arith.mulf %48, %29 : vector<2x256xf32>
    %58 = arith.mulf %42, %50 : vector<2x256xf32>
    %59 = arith.addf %57, %58 : vector<2x256xf32>
    %60 = math.tanh %59 : vector<2x256xf32>
    %61 = arith.mulf %56, %60 : vector<2x256xf32>
    %c2_i32 = arith.constant 2 : i32
    %62 = arith.index_cast %c2_i32 : i32 to index
    %c0_13 = arith.constant 0 : index
    %c0_14 = arith.constant 0 : index
    %63 = vector.load %arg0[%62, %c0_13, %c0_14] : memref<8x2x1024xf32, #tpu.memory_space<vmem>>, vector<1x2x1024xf32>
    %64 = vector.shape_cast %63 : vector<1x2x1024xf32> to vector<2x1024xf32>
    %cst_15 = arith.constant dense<0.000000e+00> : vector<2x1024xf32>
    %65 = tpu.matmul %61, %0, %cst_15 {dimension_numbers = #tpu.dot_dimension_numbers<[1], [0], [0], [1], [0, 0, 1, 1], [], []>} : vector<2x256xf32>, vector<256x1024xf32>, vector<2x1024xf32> -> vector<2x1024xf32>
    %66 = arith.addf %64, %65 : vector<2x1024xf32>
    %67 = vector.extract_strided_slice %66 {offsets = [0, 0], sizes = [2, 256], strides = [1, 1]} : vector<2x1024xf32> to vector<2x256xf32>
    %68 = arith.negf %67 : vector<2x256xf32>
    %69 = math.exp %68 : vector<2x256xf32>
    %cst_16 = arith.constant 1.000000e+00 : f32
    %70 = vector.broadcast %cst_16 : f32 to vector<2x256xf32>
    %71 = arith.addf %70, %69 : vector<2x256xf32>
    %72 = arith.divf %70, %71 : vector<2x256xf32>
    %73 = vector.extract_strided_slice %66 {offsets = [0, 256], sizes = [2, 256], strides = [1, 1]} : vector<2x1024xf32> to vector<2x256xf32>
    %74 = arith.negf %73 : vector<2x256xf32>
    %75 = math.exp %74 : vector<2x256xf32>
    %cst_17 = arith.constant 1.000000e+00 : f32
    %76 = vector.broadcast %cst_17 : f32 to vector<2x256xf32>
    %77 = arith.addf %76, %75 : vector<2x256xf32>
    %78 = arith.divf %76, %77 : vector<2x256xf32>
    %79 = vector.extract_strided_slice %66 {offsets = [0, 512], sizes = [2, 256], strides = [1, 1]} : vector<2x1024xf32> to vector<2x256xf32>
    %80 = math.tanh %79 : vector<2x256xf32>
    %81 = vector.extract_strided_slice %66 {offsets = [0, 768], sizes = [2, 256], strides = [1, 1]} : vector<2x1024xf32> to vector<2x256xf32>
    %82 = arith.negf %81 : vector<2x256xf32>
    %83 = math.exp %82 : vector<2x256xf32>
    %cst_18 = arith.constant 1.000000e+00 : f32
    %84 = vector.broadcast %cst_18 : f32 to vector<2x256xf32>
    %85 = arith.addf %84, %83 : vector<2x256xf32>
    %86 = arith.divf %84, %85 : vector<2x256xf32>
    %87 = arith.mulf %78, %59 : vector<2x256xf32>
    %88 = arith.mulf %72, %80 : vector<2x256xf32>
    %89 = arith.addf %87, %88 : vector<2x256xf32>
    %90 = math.tanh %89 : vector<2x256xf32>
    %91 = arith.mulf %86, %90 : vector<2x256xf32>
    %c3_i32 = arith.constant 3 : i32
    %92 = arith.index_cast %c3_i32 : i32 to index
    %c0_19 = arith.constant 0 : index
    %c0_20 = arith.constant 0 : index
    %93 = vector.load %arg0[%92, %c0_19, %c0_20] : memref<8x2x1024xf32, #tpu.memory_space<vmem>>, vector<1x2x1024xf32>
    %94 = vector.shape_cast %93 : vector<1x2x1024xf32> to vector<2x1024xf32>
    %cst_21 = arith.constant dense<0.000000e+00> : vector<2x1024xf32>
    %95 = tpu.matmul %91, %0, %cst_21 {dimension_numbers = #tpu.dot_dimension_numbers<[1], [0], [0], [1], [0, 0, 1, 1], [], []>} : vector<2x256xf32>, vector<256x1024xf32>, vector<2x1024xf32> -> vector<2x1024xf32>
    %96 = arith.addf %94, %95 : vector<2x1024xf32>
    %97 = vector.extract_strided_slice %96 {offsets = [0, 0], sizes = [2, 256], strides = [1, 1]} : vector<2x1024xf32> to vector<2x256xf32>
    %98 = arith.negf %97 : vector<2x256xf32>
    %99 = math.exp %98 : vector<2x256xf32>
    %cst_22 = arith.constant 1.000000e+00 : f32
    %100 = vector.broadcast %cst_22 : f32 to vector<2x256xf32>
    %101 = arith.addf %100, %99 : vector<2x256xf32>
    %102 = arith.divf %100, %101 : vector<2x256xf32>
    %103 = vector.extract_strided_slice %96 {offsets = [0, 256], sizes = [2, 256], strides = [1, 1]} : vector<2x1024xf32> to vector<2x256xf32>
    %104 = arith.negf %103 : vector<2x256xf32>
    %105 = math.exp %104 : vector<2x256xf32>
    %cst_23 = arith.constant 1.000000e+00 : f32
    %106 = vector.broadcast %cst_23 : f32 to vector<2x256xf32>
    %107 = arith.addf %106, %105 : vector<2x256xf32>
    %108 = arith.divf %106, %107 : vector<2x256xf32>
    %109 = vector.extract_strided_slice %96 {offsets = [0, 512], sizes = [2, 256], strides = [1, 1]} : vector<2x1024xf32> to vector<2x256xf32>
    %110 = math.tanh %109 : vector<2x256xf32>
    %111 = vector.extract_strided_slice %96 {offsets = [0, 768], sizes = [2, 256], strides = [1, 1]} : vector<2x1024xf32> to vector<2x256xf32>
    %112 = arith.negf %111 : vector<2x256xf32>
    %113 = math.exp %112 : vector<2x256xf32>
    %cst_24 = arith.constant 1.000000e+00 : f32
    %114 = vector.broadcast %cst_24 : f32 to vector<2x256xf32>
    %115 = arith.addf %114, %113 : vector<2x256xf32>
    %116 = arith.divf %114, %115 : vector<2x256xf32>
    %117 = arith.mulf %108, %89 : vector<2x256xf32>
    %118 = arith.mulf %102, %110 : vector<2x256xf32>
    %119 = arith.addf %117, %118 : vector<2x256xf32>
    %120 = math.tanh %119 : vector<2x256xf32>
    %121 = arith.mulf %116, %120 : vector<2x256xf32>
    %c4_i32 = arith.constant 4 : i32
    %122 = arith.index_cast %c4_i32 : i32 to index
    %c0_25 = arith.constant 0 : index
    %c0_26 = arith.constant 0 : index
    %123 = vector.load %arg0[%122, %c0_25, %c0_26] : memref<8x2x1024xf32, #tpu.memory_space<vmem>>, vector<1x2x1024xf32>
    %124 = vector.shape_cast %123 : vector<1x2x1024xf32> to vector<2x1024xf32>
    %cst_27 = arith.constant dense<0.000000e+00> : vector<2x1024xf32>
    %125 = tpu.matmul %121, %0, %cst_27 {dimension_numbers = #tpu.dot_dimension_numbers<[1], [0], [0], [1], [0, 0, 1, 1], [], []>} : vector<2x256xf32>, vector<256x1024xf32>, vector<2x1024xf32> -> vector<2x1024xf32>
    %126 = arith.addf %124, %125 : vector<2x1024xf32>
    %127 = vector.extract_strided_slice %126 {offsets = [0, 0], sizes = [2, 256], strides = [1, 1]} : vector<2x1024xf32> to vector<2x256xf32>
    %128 = arith.negf %127 : vector<2x256xf32>
    %129 = math.exp %128 : vector<2x256xf32>
    %cst_28 = arith.constant 1.000000e+00 : f32
    %130 = vector.broadcast %cst_28 : f32 to vector<2x256xf32>
    %131 = arith.addf %130, %129 : vector<2x256xf32>
    %132 = arith.divf %130, %131 : vector<2x256xf32>
    %133 = vector.extract_strided_slice %126 {offsets = [0, 256], sizes = [2, 256], strides = [1, 1]} : vector<2x1024xf32> to vector<2x256xf32>
    %134 = arith.negf %133 : vector<2x256xf32>
    %135 = math.exp %134 : vector<2x256xf32>
    %cst_29 = arith.constant 1.000000e+00 : f32
    %136 = vector.broadcast %cst_29 : f32 to vector<2x256xf32>
    %137 = arith.addf %136, %135 : vector<2x256xf32>
    %138 = arith.divf %136, %137 : vector<2x256xf32>
    %139 = vector.extract_strided_slice %126 {offsets = [0, 512], sizes = [2, 256], strides = [1, 1]} : vector<2x1024xf32> to vector<2x256xf32>
    %140 = math.tanh %139 : vector<2x256xf32>
    %141 = vector.extract_strided_slice %126 {offsets = [0, 768], sizes = [2, 256], strides = [1, 1]} : vector<2x1024xf32> to vector<2x256xf32>
    %142 = arith.negf %141 : vector<2x256xf32>
    %143 = math.exp %142 : vector<2x256xf32>
    %cst_30 = arith.constant 1.000000e+00 : f32
    %144 = vector.broadcast %cst_30 : f32 to vector<2x256xf32>
    %145 = arith.addf %144, %143 : vector<2x256xf32>
    %146 = arith.divf %144, %145 : vector<2x256xf32>
    %147 = arith.mulf %138, %119 : vector<2x256xf32>
    %148 = arith.mulf %132, %140 : vector<2x256xf32>
    %149 = arith.addf %147, %148 : vector<2x256xf32>
    %150 = math.tanh %149 : vector<2x256xf32>
    %151 = arith.mulf %146, %150 : vector<2x256xf32>
    %c5_i32 = arith.constant 5 : i32
    %152 = arith.index_cast %c5_i32 : i32 to index
    %c0_31 = arith.constant 0 : index
    %c0_32 = arith.constant 0 : index
    %153 = vector.load %arg0[%152, %c0_31, %c0_32] : memref<8x2x1024xf32, #tpu.memory_space<vmem>>, vector<1x2x1024xf32>
    %154 = vector.shape_cast %153 : vector<1x2x1024xf32> to vector<2x1024xf32>
    %cst_33 = arith.constant dense<0.000000e+00> : vector<2x1024xf32>
    %155 = tpu.matmul %151, %0, %cst_33 {dimension_numbers = #tpu.dot_dimension_numbers<[1], [0], [0], [1], [0, 0, 1, 1], [], []>} : vector<2x256xf32>, vector<256x1024xf32>, vector<2x1024xf32> -> vector<2x1024xf32>
    %156 = arith.addf %154, %155 : vector<2x1024xf32>
    %157 = vector.extract_strided_slice %156 {offsets = [0, 0], sizes = [2, 256], strides = [1, 1]} : vector<2x1024xf32> to vector<2x256xf32>
    %158 = arith.negf %157 : vector<2x256xf32>
    %159 = math.exp %158 : vector<2x256xf32>
    %cst_34 = arith.constant 1.000000e+00 : f32
    %160 = vector.broadcast %cst_34 : f32 to vector<2x256xf32>
    %161 = arith.addf %160, %159 : vector<2x256xf32>
    %162 = arith.divf %160, %161 : vector<2x256xf32>
    %163 = vector.extract_strided_slice %156 {offsets = [0, 256], sizes = [2, 256], strides = [1, 1]} : vector<2x1024xf32> to vector<2x256xf32>
    %164 = arith.negf %163 : vector<2x256xf32>
    %165 = math.exp %164 : vector<2x256xf32>
    %cst_35 = arith.constant 1.000000e+00 : f32
    %166 = vector.broadcast %cst_35 : f32 to vector<2x256xf32>
    %167 = arith.addf %166, %165 : vector<2x256xf32>
    %168 = arith.divf %166, %167 : vector<2x256xf32>
    %169 = vector.extract_strided_slice %156 {offsets = [0, 512], sizes = [2, 256], strides = [1, 1]} : vector<2x1024xf32> to vector<2x256xf32>
    %170 = math.tanh %169 : vector<2x256xf32>
    %171 = vector.extract_strided_slice %156 {offsets = [0, 768], sizes = [2, 256], strides = [1, 1]} : vector<2x1024xf32> to vector<2x256xf32>
    %172 = arith.negf %171 : vector<2x256xf32>
    %173 = math.exp %172 : vector<2x256xf32>
    %cst_36 = arith.constant 1.000000e+00 : f32
    %174 = vector.broadcast %cst_36 : f32 to vector<2x256xf32>
    %175 = arith.addf %174, %173 : vector<2x256xf32>
    %176 = arith.divf %174, %175 : vector<2x256xf32>
    %177 = arith.mulf %168, %149 : vector<2x256xf32>
    %178 = arith.mulf %162, %170 : vector<2x256xf32>
    %179 = arith.addf %177, %178 : vector<2x256xf32>
    %180 = math.tanh %179 : vector<2x256xf32>
    %181 = arith.mulf %176, %180 : vector<2x256xf32>
    %c6_i32 = arith.constant 6 : i32
    %182 = arith.index_cast %c6_i32 : i32 to index
    %c0_37 = arith.constant 0 : index
    %c0_38 = arith.constant 0 : index
    %183 = vector.load %arg0[%182, %c0_37, %c0_38] : memref<8x2x1024xf32, #tpu.memory_space<vmem>>, vector<1x2x1024xf32>
    %184 = vector.shape_cast %183 : vector<1x2x1024xf32> to vector<2x1024xf32>
    %cst_39 = arith.constant dense<0.000000e+00> : vector<2x1024xf32>
    %185 = tpu.matmul %181, %0, %cst_39 {dimension_numbers = #tpu.dot_dimension_numbers<[1], [0], [0], [1], [0, 0, 1, 1], [], []>} : vector<2x256xf32>, vector<256x1024xf32>, vector<2x1024xf32> -> vector<2x1024xf32>
    %186 = arith.addf %184, %185 : vector<2x1024xf32>
    %187 = vector.extract_strided_slice %186 {offsets = [0, 0], sizes = [2, 256], strides = [1, 1]} : vector<2x1024xf32> to vector<2x256xf32>
    %188 = arith.negf %187 : vector<2x256xf32>
    %189 = math.exp %188 : vector<2x256xf32>
    %cst_40 = arith.constant 1.000000e+00 : f32
    %190 = vector.broadcast %cst_40 : f32 to vector<2x256xf32>
    %191 = arith.addf %190, %189 : vector<2x256xf32>
    %192 = arith.divf %190, %191 : vector<2x256xf32>
    %193 = vector.extract_strided_slice %186 {offsets = [0, 256], sizes = [2, 256], strides = [1, 1]} : vector<2x1024xf32> to vector<2x256xf32>
    %194 = arith.negf %193 : vector<2x256xf32>
    %195 = math.exp %194 : vector<2x256xf32>
    %cst_41 = arith.constant 1.000000e+00 : f32
    %196 = vector.broadcast %cst_41 : f32 to vector<2x256xf32>
    %197 = arith.addf %196, %195 : vector<2x256xf32>
    %198 = arith.divf %196, %197 : vector<2x256xf32>
    %199 = vector.extract_strided_slice %186 {offsets = [0, 512], sizes = [2, 256], strides = [1, 1]} : vector<2x1024xf32> to vector<2x256xf32>
    %200 = math.tanh %199 : vector<2x256xf32>
    %201 = vector.extract_strided_slice %186 {offsets = [0, 768], sizes = [2, 256], strides = [1, 1]} : vector<2x1024xf32> to vector<2x256xf32>
    %202 = arith.negf %201 : vector<2x256xf32>
    %203 = math.exp %202 : vector<2x256xf32>
    %cst_42 = arith.constant 1.000000e+00 : f32
    %204 = vector.broadcast %cst_42 : f32 to vector<2x256xf32>
    %205 = arith.addf %204, %203 : vector<2x256xf32>
    %206 = arith.divf %204, %205 : vector<2x256xf32>
    %207 = arith.mulf %198, %179 : vector<2x256xf32>
    %208 = arith.mulf %192, %200 : vector<2x256xf32>
    %209 = arith.addf %207, %208 : vector<2x256xf32>
    %210 = math.tanh %209 : vector<2x256xf32>
    %211 = arith.mulf %206, %210 : vector<2x256xf32>
    %c7_i32 = arith.constant 7 : i32
    %212 = arith.index_cast %c7_i32 : i32 to index
    %c0_43 = arith.constant 0 : index
    %c0_44 = arith.constant 0 : index
    %213 = vector.load %arg0[%212, %c0_43, %c0_44] : memref<8x2x1024xf32, #tpu.memory_space<vmem>>, vector<1x2x1024xf32>
    %214 = vector.shape_cast %213 : vector<1x2x1024xf32> to vector<2x1024xf32>
    %cst_45 = arith.constant dense<0.000000e+00> : vector<2x1024xf32>
    %215 = tpu.matmul %211, %0, %cst_45 {dimension_numbers = #tpu.dot_dimension_numbers<[1], [0], [0], [1], [0, 0, 1, 1], [], []>} : vector<2x256xf32>, vector<256x1024xf32>, vector<2x1024xf32> -> vector<2x1024xf32>
    %216 = arith.addf %214, %215 : vector<2x1024xf32>
    %217 = vector.extract_strided_slice %216 {offsets = [0, 0], sizes = [2, 256], strides = [1, 1]} : vector<2x1024xf32> to vector<2x256xf32>
    %218 = arith.negf %217 : vector<2x256xf32>
    %219 = math.exp %218 : vector<2x256xf32>
    %cst_46 = arith.constant 1.000000e+00 : f32
    %220 = vector.broadcast %cst_46 : f32 to vector<2x256xf32>
    %221 = arith.addf %220, %219 : vector<2x256xf32>
    %222 = arith.divf %220, %221 : vector<2x256xf32>
    %223 = vector.extract_strided_slice %216 {offsets = [0, 256], sizes = [2, 256], strides = [1, 1]} : vector<2x1024xf32> to vector<2x256xf32>
    %224 = arith.negf %223 : vector<2x256xf32>
    %225 = math.exp %224 : vector<2x256xf32>
    %cst_47 = arith.constant 1.000000e+00 : f32
    %226 = vector.broadcast %cst_47 : f32 to vector<2x256xf32>
    %227 = arith.addf %226, %225 : vector<2x256xf32>
    %228 = arith.divf %226, %227 : vector<2x256xf32>
    %229 = vector.extract_strided_slice %216 {offsets = [0, 512], sizes = [2, 256], strides = [1, 1]} : vector<2x1024xf32> to vector<2x256xf32>
    %230 = math.tanh %229 : vector<2x256xf32>
    %231 = vector.extract_strided_slice %216 {offsets = [0, 768], sizes = [2, 256], strides = [1, 1]} : vector<2x1024xf32> to vector<2x256xf32>
    %232 = arith.negf %231 : vector<2x256xf32>
    %233 = math.exp %232 : vector<2x256xf32>
    %cst_48 = arith.constant 1.000000e+00 : f32
    %234 = vector.broadcast %cst_48 : f32 to vector<2x256xf32>
    %235 = arith.addf %234, %233 : vector<2x256xf32>
    %236 = arith.divf %234, %235 : vector<2x256xf32>
    %237 = arith.mulf %228, %209 : vector<2x256xf32>
    %238 = arith.mulf %222, %230 : vector<2x256xf32>
    %239 = arith.addf %237, %238 : vector<2x256xf32>
    %240 = math.tanh %239 : vector<2x256xf32>
    %241 = arith.mulf %236, %240 : vector<2x256xf32>
    %c8_i32 = arith.constant 8 : i32
    %c0_49 = arith.constant 0 : index
    %c0_50 = arith.constant 0 : index
    %242 = vector.load %arg2[%c0_49, %c0_50] : memref<2x256xf32, #tpu.memory_space<vmem>>, vector<2x256xf32>
    %c0_51 = arith.constant 0 : index
    %c0_52 = arith.constant 0 : index
    %243 = vector.load %arg3[%c0_51, %c0_52] : memref<256x1024xf32, #tpu.memory_space<vmem>>, vector<256x1024xf32>
    %cst_53 = arith.constant dense<0.000000e+00> : vector<2x1024xf32>
    %244 = tpu.matmul %242, %243, %cst_53 {dimension_numbers = #tpu.dot_dimension_numbers<[1], [0], [0], [1], [0, 0, 1, 1], [], []>} : vector<2x256xf32>, vector<256x1024xf32>, vector<2x1024xf32> -> vector<2x1024xf32>
    %c0_54 = arith.constant 0 : index
    %c0_55 = arith.constant 0 : index
    %245 = vector.load %arg4[%c0_54, %c0_55] : memref<1x1024xf32, #tpu.memory_space<vmem>>, vector<1x1024xf32>
    %246 = vector.broadcast %245 : vector<1x1024xf32> to vector<2x1024xf32>
    %247 = arith.addf %244, %246 : vector<2x1024xf32>
    %248 = vector.extract_strided_slice %247 {offsets = [0, 0], sizes = [2, 256], strides = [1, 1]} : vector<2x1024xf32> to vector<2x256xf32>
    %249 = arith.negf %248 : vector<2x256xf32>
    %250 = math.exp %249 : vector<2x256xf32>
    %cst_56 = arith.constant 1.000000e+00 : f32
    %251 = vector.broadcast %cst_56 : f32 to vector<2x256xf32>
    %252 = arith.addf %251, %250 : vector<2x256xf32>
    %253 = arith.divf %251, %252 : vector<2x256xf32>
    %254 = vector.extract_strided_slice %247 {offsets = [0, 512], sizes = [2, 256], strides = [1, 1]} : vector<2x1024xf32> to vector<2x256xf32>
    %255 = math.tanh %254 : vector<2x256xf32>
    %256 = vector.extract_strided_slice %247 {offsets = [0, 768], sizes = [2, 256], strides = [1, 1]} : vector<2x1024xf32> to vector<2x256xf32>
    %257 = arith.negf %256 : vector<2x256xf32>
    %258 = math.exp %257 : vector<2x256xf32>
    %cst_57 = arith.constant 1.000000e+00 : f32
    %259 = vector.broadcast %cst_57 : f32 to vector<2x256xf32>
    %260 = arith.addf %259, %258 : vector<2x256xf32>
    %261 = arith.divf %259, %260 : vector<2x256xf32>
    %262 = arith.mulf %253, %255 : vector<2x256xf32>
    %263 = math.tanh %262 : vector<2x256xf32>
    %264 = arith.mulf %261, %263 : vector<2x256xf32>
    %c0_58 = arith.constant 0 : index
    %c0_59 = arith.constant 0 : index
    %265 = vector.load %arg5[%c0_58, %c0_59] : memref<256x2xf32, #tpu.memory_space<vmem>>, vector<256x2xf32>
    %cst_60 = arith.constant dense<0.000000e+00> : vector<2x2xf32>
    %266 = tpu.matmul %241, %265, %cst_60 {dimension_numbers = #tpu.dot_dimension_numbers<[1], [0], [0], [1], [0, 0, 1, 1], [], []>} : vector<2x256xf32>, vector<256x2xf32>, vector<2x2xf32> -> vector<2x2xf32>
    %c0_61 = arith.constant 0 : index
    %c0_62 = arith.constant 0 : index
    %267 = vector.load %arg6[%c0_61, %c0_62] : memref<256x2xf32, #tpu.memory_space<vmem>>, vector<256x2xf32>
    %cst_63 = arith.constant dense<0.000000e+00> : vector<2x2xf32>
    %268 = tpu.matmul %264, %267, %cst_63 {dimension_numbers = #tpu.dot_dimension_numbers<[1], [0], [0], [1], [0, 0, 1, 1], [], []>} : vector<2x256xf32>, vector<256x2xf32>, vector<2x2xf32> -> vector<2x2xf32>
    %269 = arith.addf %266, %268 : vector<2x2xf32>
    %c0_64 = arith.constant 0 : index
    %c0_65 = arith.constant 0 : index
    %270 = vector.load %arg7[%c0_64, %c0_65] : memref<1x2xf32, #tpu.memory_space<vmem>>, vector<1x2xf32>
    %271 = vector.broadcast %270 : vector<1x2xf32> to vector<2x2xf32>
    %272 = arith.addf %269, %271 : vector<2x2xf32>
    %cst_66 = arith.constant dense<0xFF800000> : vector<2xf32>
    %273 = vector.multi_reduction <maximumf>, %272, %cst_66 [1] : vector<2x2xf32> to vector<2xf32>
    %274 = vector.shape_cast %273 : vector<2xf32> to vector<2x1xf32>
    %275 = vector.broadcast %274 : vector<2x1xf32> to vector<2x2xf32>
    %276 = arith.subf %272, %275 : vector<2x2xf32>
    %277 = math.exp %276 : vector<2x2xf32>
    %cst_67 = arith.constant dense<0.000000e+00> : vector<2xf32>
    %278 = vector.multi_reduction <add>, %277, %cst_67 [1] : vector<2x2xf32> to vector<2xf32>
    %279 = vector.shape_cast %278 : vector<2xf32> to vector<2x1xf32>
    %280 = vector.broadcast %279 : vector<2x1xf32> to vector<2x2xf32>
    %281 = arith.divf %277, %280 : vector<2x2xf32>
    %c0_68 = arith.constant 0 : index
    %c0_69 = arith.constant 0 : index
    %282 = vector.load %arg8[%c0_68, %c0_69] : memref<2x2xf32, #tpu.memory_space<vmem>>, vector<2x2xf32>
    tpu.vector_store %arg8[%c0_68, %c0_69], %281 {strides = array<i32>} : memref<2x2xf32, #tpu.memory_space<vmem>>, vector<2x2xf32>,
    %283 = math.log %279 : vector<2x1xf32>
    %284 = vector.broadcast %283 : vector<2x1xf32> to vector<2x2xf32>
    %285 = arith.subf %276, %284 : vector<2x2xf32>
    %c0_70 = arith.constant 0 : index
    %c0_71 = arith.constant 0 : index
    %286 = vector.load %arg9[%c0_70, %c0_71] : memref<2x2xf32, #tpu.memory_space<vmem>>, vector<2x2xf32>
    tpu.vector_store %arg9[%c0_70, %c0_71], %285 {strides = array<i32>} : memref<2x2xf32, #tpu.memory_space<vmem>>, vector<2x2xf32>,
    return
  }
}

</mosaic_0001>

<bundles_post_ra>
// kernel: mini_model_forward.2
= control target key start
LH: loop header
LB: loop body
LE: loop exit
PB: predicated region body
PF: predicated region fallthrough
CT: control target
= control target key end

     0   :  { %s1775_s1 = inlined_call_operand.vmem [shape: f32[256,1024], index: 1, kind: input, shape index: {}]   ;;  %s1776_s0 = inlined_call_operand.vmem [shape: f32[16,256], index: 0, kind: input, shape index: {}]   ;;  %s1777_s2 = inlined_call_operand.vmem [shape: f32[1,1024], index: 2, kind: input, shape index: {}]   ;;  %s1778_s3 = inlined_call_operand.vmem [shape: f32[16,1024], index: 3, kind: output, shape index: {}]  }
   0x1   :  { %v19_v0 = vld [vmem:[%s1775_s1 + $0x8] sm:$0xff]  ;;  %v21_v2 = vld [vmem:[%s1775_s1 + $0x18] sm:$0xff]  ;;  %v18_v5 = vld [vmem:[%s1775_s1] sm:$0xff] }
   0x2   :  { %v27_v1 = vld [vmem:[%s1775_s1 + $0x48] sm:$0xff]  ;;  %v29_v4 = vld [vmem:[%s1775_s1 + $0x58] sm:$0xff]  ;;  %v26_v6 = vld [vmem:[%s1775_s1 + $0x40] sm:$0xff] }
   0x3   :  { %v644_v3 = vpack.c.bf16 %v27_v1, %v19_v0  ;;  %v708_v7 = vpack.c.bf16 %v29_v4, %v21_v2  ;;  %v646_v8 = vpack.c.bf16 %v26_v6, %v18_v5  ;;  %v20_v9 = vld [vmem:[%s1775_s1 + $0x10] sm:$0xff]  ;;  %v35_v11 = vld [vmem:[%s1775_s1 + $0x88] sm:$0xff]  ;;  %v37_v14 = vld [vmem:[%s1775_s1 + $0x98] sm:$0xff] }
   0x4   :  { %v28_v10 = vld [vmem:[%s1775_s1 + $0x50] sm:$0xff]  ;;  %v43_v13 = vld [vmem:[%s1775_s1 + $0xc8] sm:$0xff]  ;;  %v45_v15 = vld [vmem:[%s1775_s1 + $0xd8] sm:$0xff] }
   0x5   :  { %645 = vmatprep.subr.bf16.mxu0 %v644_v3  ;;  %v710_v12 = vpack.c.bf16 %v28_v10, %v20_v9  ;;  %709 = vmatprep.subr.bf16.mxu1 %v708_v7  ;;  %v648_v16 = vpack.c.bf16 %v43_v13, %v35_v11  ;;  %v712_v17 = vpack.c.bf16 %v45_v15, %v37_v14  ;;  %v34_v18 = vld [vmem:[%s1775_s1 + $0x80] sm:$0xff]  ;;  %v36_v20 = vld [vmem:[%s1775_s1 + $0x90] sm:$0xff]  ;;  %v51_v23 = vld [vmem:[%s1775_s1 + $0x108] sm:$0xff] }
   0x6   :  { %647 = vmatpush1.bf16.msra.mxu0 %v646_v8  ;;  %v42_v19 = vld [vmem:[%s1775_s1 + $0xc0] sm:$0xff]  ;;  %v44_v22 = vld [vmem:[%s1775_s1 + $0xd0] sm:$0xff]  ;;  %v59_v24 = vld [vmem:[%s1775_s1 + $0x148] sm:$0xff] }
   0x7   :  { %711 = vmatpush1.bf16.msra.mxu1 %v710_v12  ;;  %v650_v21 = vpack.c.bf16 %v42_v19, %v34_v18  ;;  %649 = vmatprep.subr.bf16.mxu0 %v648_v16  ;;  %v714_v25 = vpack.c.bf16 %v44_v22, %v36_v20  ;;  %v652_v26 = vpack.c.bf16 %v59_v24, %v51_v23  ;;  %v53_v27 = vld [vmem:[%s1775_s1 + $0x118] sm:$0xff]  ;;  %v50_v29 = vld [vmem:[%s1775_s1 + $0x100] sm:$0xff]  ;;  %v52_v32 = vld [vmem:[%s1775_s1 + $0x110] sm:$0xff] }
   0x8   :  { %713 = vmatprep.subr.bf16.mxu1 %v712_v17  ;;  %v61_v28 = vld [vmem:[%s1775_s1 + $0x158] sm:$0xff]  ;;  %v58_v31 = vld [vmem:[%s1775_s1 + $0x140] sm:$0xff]  ;;  %v60_v33 = vld [vmem:[%s1775_s1 + $0x150] sm:$0xff] }
   0x9   :  { %v716_v30 = vpack.c.bf16 %v61_v28, %v53_v27  ;;  %v654_v34 = vpack.c.bf16 %v58_v31, %v50_v29  ;;  %v67_v35 = vld [vmem:[%s1775_s1 + $0x188] sm:$0xff]  ;;  %v69_v37 = vld [vmem:[%s1775_s1 + $0x198] sm:$0xff]  ;;  %v718_v38 = vpack.c.bf16 %v60_v33, %v52_v32  ;;  %v66_v41 = vld [vmem:[%s1775_s1 + $0x180] sm:$0xff] }
   0xa   :  { %651 = vmatpush1.bf16.msra.mxu0 %v650_v21  ;;  %v75_v36 = vld [vmem:[%s1775_s1 + $0x1c8] sm:$0xff]  ;;  %v77_v40 = vld [vmem:[%s1775_s1 + $0x1d8] sm:$0xff]  ;;  %v74_v42 = vld [vmem:[%s1775_s1 + $0x1c0] sm:$0xff] }
   0xb   :  { %715 = vmatpush1.bf16.msra.mxu1 %v714_v25  ;;  %653 = vmatprep.subr.bf16.mxu0 %v652_v26  ;;  %v656_v39 = vpack.c.bf16 %v75_v36, %v67_v35  ;;  %v720_v43 = vpack.c.bf16 %v77_v40, %v69_v37  ;;  %v68_v44 = vld [vmem:[%s1775_s1 + $0x190] sm:$0xff]  ;;  %v83_v46 = vld [vmem:[%s1775_s1 + $0x208] sm:$0xff]  ;;  %v85_v48 = vld [vmem:[%s1775_s1 + $0x218] sm:$0xff]  ;;  %v658_v50 = vpack.c.bf16 %v74_v42, %v66_v41 }
   0xc   :  { %717 = vmatprep.subr.bf16.mxu1 %v716_v30  ;;  %v76_v45 = vld [vmem:[%s1775_s1 + $0x1d0] sm:$0xff]  ;;  %v91_v47 = vld [vmem:[%s1775_s1 + $0x248] sm:$0xff]  ;;  %v93_v49 = vld [vmem:[%s1775_s1 + $0x258] sm:$0xff] }
   0xd   :  { %v722_v51 = vpack.c.bf16 %v76_v45, %v68_v44  ;;  %v660_v52 = vpack.c.bf16 %v91_v47, %v83_v46  ;;  %v82_v53 = vld [vmem:[%s1775_s1 + $0x200] sm:$0xff]  ;;  %v84_v55 = vld [vmem:[%s1775_s1 + $0x210] sm:$0xff]  ;;  %v724_v56 = vpack.c.bf16 %v93_v49, %v85_v48  ;;  %v99_v58 = vld [vmem:[%s1775_s1 + $0x288] sm:$0xff] }
   0xe   :  { %655 = vmatpush1.bf16.msra.mxu0 %v654_v34  ;;  %v90_v54 = vld [vmem:[%s1775_s1 + $0x240] sm:$0xff]  ;;  %v92_v57 = vld [vmem:[%s1775_s1 + $0x250] sm:$0xff]  ;;  %v107_v59 = vld [vmem:[%s1775_s1 + $0x2c8] sm:$0xff] }
   0xf   :  { %719 = vmatpush1.bf16.msra.mxu1 %v718_v38  ;;  %657 = vmatprep.subr.bf16.mxu0 %v656_v39  ;;  %v101_v60 = vld [vmem:[%s1775_s1 + $0x298] sm:$0xff]  ;;  %v662_v62 = vpack.c.bf16 %v90_v54, %v82_v53  ;;  %v726_v63 = vpack.c.bf16 %v92_v57, %v84_v55  ;;  %v664_v0 = vpack.c.bf16 %v107_v59, %v99_v58  ;;  %v98_v1 = vld [vmem:[%s1775_s1 + $0x280] sm:$0xff]  ;;  %v100_v3 = vld [vmem:[%s1775_s1 + $0x290] sm:$0xff] }
  0x10   :  { %721 = vmatprep.subr.bf16.mxu1 %v720_v43  ;;  %v109_v61 = vld [vmem:[%s1775_s1 + $0x2d8] sm:$0xff]  ;;  %v106_v2 = vld [vmem:[%s1775_s1 + $0x2c0] sm:$0xff]  ;;  %v108_v5 = vld [vmem:[%s1775_s1 + $0x2d0] sm:$0xff] }
  0x11   :  { %v728_v4 = vpack.c.bf16 %v109_v61, %v101_v60  ;;  %v115_v6 = vld [vmem:[%s1775_s1 + $0x308] sm:$0xff]  ;;  %v117_v8 = vld [vmem:[%s1775_s1 + $0x318] sm:$0xff]  ;;  %v666_v10 = vpack.c.bf16 %v106_v2, %v98_v1  ;;  %v730_v11 = vpack.c.bf16 %v108_v5, %v100_v3  ;;  %v114_v13 = vld [vmem:[%s1775_s1 + $0x300] sm:$0xff] }
  0x12   :  { %659 = vmatpush1.bf16.msra.mxu0 %v658_v50  ;;  %v123_v7 = vld [vmem:[%s1775_s1 + $0x348] sm:$0xff]  ;;  %v125_v9 = vld [vmem:[%s1775_s1 + $0x358] sm:$0xff]  ;;  %v122_v14 = vld [vmem:[%s1775_s1 + $0x340] sm:$0xff] }
  0x13   :  { %723 = vmatpush1.bf16.msra.mxu1 %v722_v51  ;;  %661 = vmatprep.subr.bf16.mxu0 %v660_v52  ;;  %v668_v12 = vpack.c.bf16 %v123_v7, %v115_v6  ;;  %v116_v15 = vld [vmem:[%s1775_s1 + $0x310] sm:$0xff]  ;;  %v732_v16 = vpack.c.bf16 %v125_v9, %v117_v8  ;;  %v131_v18 = vld [vmem:[%s1775_s1 + $0x388] sm:$0xff]  ;;  %v133_v20 = vld [vmem:[%s1775_s1 + $0x398] sm:$0xff]  ;;  %v670_v22 = vpack.c.bf16 %v122_v14, %v114_v13 }
  0x14   :  { %725 = vmatprep.subr.bf16.mxu1 %v724_v56  ;;  %v124_v17 = vld [vmem:[%s1775_s1 + $0x350] sm:$0xff]  ;;  %v139_v19 = vld [vmem:[%s1775_s1 + $0x3c8] sm:$0xff]  ;;  %v141_v21 = vld [vmem:[%s1775_s1 + $0x3d8] sm:$0xff] }
  0x15   :  { %v734_v23 = vpack.c.bf16 %v124_v17, %v116_v15  ;;  %v672_v24 = vpack.c.bf16 %v139_v19, %v131_v18  ;;  %v130_v25 = vld [vmem:[%s1775_s1 + $0x380] sm:$0xff]  ;;  %v132_v27 = vld [vmem:[%s1775_s1 + $0x390] sm:$0xff]  ;;  %v736_v28 = vpack.c.bf16 %v141_v21, %v133_v20  ;;  %v147_v30 = vld [vmem:[%s1775_s1 + $0x408] sm:$0xff] }
  0x16   :  { %663 = vmatpush1.bf16.msra.mxu0 %v662_v62  ;;  %v138_v26 = vld [vmem:[%s1775_s1 + $0x3c0] sm:$0xff]  ;;  %v140_v29 = vld [vmem:[%s1775_s1 + $0x3d0] sm:$0xff]  ;;  %v155_v31 = vld [vmem:[%s1775_s1 + $0x448] sm:$0xff] }
  0x17   :  { %727 = vmatpush1.bf16.msra.mxu1 %v726_v63  ;;  %665 = vmatprep.subr.bf16.mxu0 %v664_v0  ;;  %v149_v32 = vld [vmem:[%s1775_s1 + $0x418] sm:$0xff]  ;;  %v674_v34 = vpack.c.bf16 %v138_v26, %v130_v25  ;;  %v738_v35 = vpack.c.bf16 %v140_v29, %v132_v27  ;;  %v676_v36 = vpack.c.bf16 %v155_v31, %v147_v30  ;;  %v146_v37 = vld [vmem:[%s1775_s1 + $0x400] sm:$0xff]  ;;  %v148_v39 = vld [vmem:[%s1775_s1 + $0x410] sm:$0xff] }
  0x18   :  { %729 = vmatprep.subr.bf16.mxu1 %v728_v4  ;;  %v157_v33 = vld [vmem:[%s1775_s1 + $0x458] sm:$0xff]  ;;  %v154_v38 = vld [vmem:[%s1775_s1 + $0x440] sm:$0xff]  ;;  %v156_v41 = vld [vmem:[%s1775_s1 + $0x450] sm:$0xff] }
  0x19   :  { %v740_v40 = vpack.c.bf16 %v157_v33, %v149_v32  ;;  %v163_v42 = vld [vmem:[%s1775_s1 + $0x488] sm:$0xff]  ;;  %v165_v44 = vld [vmem:[%s1775_s1 + $0x498] sm:$0xff]  ;;  %v678_v46 = vpack.c.bf16 %v154_v38, %v146_v37  ;;  %v742_v47 = vpack.c.bf16 %v156_v41, %v148_v39  ;;  %v162_v49 = vld [vmem:[%s1775_s1 + $0x480] sm:$0xff] }
  0x1a   :  { %667 = vmatpush1.bf16.msra.mxu0 %v666_v10  ;;  %v171_v43 = vld [vmem:[%s1775_s1 + $0x4c8] sm:$0xff]  ;;  %v173_v45 = vld [vmem:[%s1775_s1 + $0x4d8] sm:$0xff]  ;;  %v170_v50 = vld [vmem:[%s1775_s1 + $0x4c0] sm:$0xff] }
  0x1b   :  { %731 = vmatpush1.bf16.msra.mxu1 %v730_v11  ;;  %669 = vmatprep.subr.bf16.mxu0 %v668_v12  ;;  %v680_v48 = vpack.c.bf16 %v171_v43, %v163_v42  ;;  %v164_v51 = vld [vmem:[%s1775_s1 + $0x490] sm:$0xff]  ;;  %v744_v52 = vpack.c.bf16 %v173_v45, %v165_v44  ;;  %v179_v54 = vld [vmem:[%s1775_s1 + $0x508] sm:$0xff]  ;;  %v181_v56 = vld [vmem:[%s1775_s1 + $0x518] sm:$0xff]  ;;  %v682_v58 = vpack.c.bf16 %v170_v50, %v162_v49 }
  0x1c   :  { %733 = vmatprep.subr.bf16.mxu1 %v732_v16  ;;  %v172_v53 = vld [vmem:[%s1775_s1 + $0x4d0] sm:$0xff]  ;;  %v187_v55 = vld [vmem:[%s1775_s1 + $0x548] sm:$0xff]  ;;  %v189_v57 = vld [vmem:[%s1775_s1 + $0x558] sm:$0xff] }
  0x1d   :  { %v746_v59 = vpack.c.bf16 %v172_v53, %v164_v51  ;;  %v684_v60 = vpack.c.bf16 %v187_v55, %v179_v54  ;;  %v178_v61 = vld [vmem:[%s1775_s1 + $0x500] sm:$0xff]  ;;  %v180_v63 = vld [vmem:[%s1775_s1 + $0x510] sm:$0xff]  ;;  %v748_v0 = vpack.c.bf16 %v189_v57, %v181_v56  ;;  %v195_v2 = vld [vmem:[%s1775_s1 + $0x588] sm:$0xff] }
  0x1e   :  { %671 = vmatpush1.bf16.msra.mxu0 %v670_v22  ;;  %v186_v62 = vld [vmem:[%s1775_s1 + $0x540] sm:$0xff]  ;;  %v188_v1 = vld [vmem:[%s1775_s1 + $0x550] sm:$0xff]  ;;  %v203_v3 = vld [vmem:[%s1775_s1 + $0x5c8] sm:$0xff] }
  0x1f   :  { %735 = vmatpush1.bf16.msra.mxu1 %v734_v23  ;;  %673 = vmatprep.subr.bf16.mxu0 %v672_v24  ;;  %v197_v4 = vld [vmem:[%s1775_s1 + $0x598] sm:$0xff]  ;;  %v686_v6 = vpack.c.bf16 %v186_v62, %v178_v61  ;;  %v194_v7 = vld [vmem:[%s1775_s1 + $0x580] sm:$0xff]  ;;  %v750_v8 = vpack.c.bf16 %v188_v1, %v180_v63  ;;  %v688_v9 = vpack.c.bf16 %v203_v3, %v195_v2  ;;  %v196_v11 = vld [vmem:[%s1775_s1 + $0x590] sm:$0xff] }
  0x20   :  { %737 = vmatprep.subr.bf16.mxu1 %v736_v28  ;;  %v205_v5 = vld [vmem:[%s1775_s1 + $0x5d8] sm:$0xff]  ;;  %v202_v10 = vld [vmem:[%s1775_s1 + $0x5c0] sm:$0xff]  ;;  %v204_v12 = vld [vmem:[%s1775_s1 + $0x5d0] sm:$0xff] }
  0x21   :  { %v752_v13 = vpack.c.bf16 %v205_v5, %v197_v4  ;;  %v211_v14 = vld [vmem:[%s1775_s1 + $0x608] sm:$0xff]  ;;  %v213_v17 = vld [vmem:[%s1775_s1 + $0x618] sm:$0xff]  ;;  %v690_v19 = vpack.c.bf16 %v202_v10, %v194_v7  ;;  %v754_v20 = vpack.c.bf16 %v204_v12, %v196_v11  ;;  %v210_v22 = vld [vmem:[%s1775_s1 + $0x600] sm:$0xff] }
  0x22   :  { %675 = vmatpush1.bf16.msra.mxu0 %v674_v34  ;;  %v219_v15 = vld [vmem:[%s1775_s1 + $0x648] sm:$0xff]  ;;  %v221_v18 = vld [vmem:[%s1775_s1 + $0x658] sm:$0xff]  ;;  %v218_v23 = vld [vmem:[%s1775_s1 + $0x640] sm:$0xff] }
  0x23   :  { %739 = vmatpush1.bf16.msra.mxu1 %v738_v35  ;;  %677 = vmatprep.subr.bf16.mxu0 %v676_v36  ;;  %v1217_v16 = vld [vmem:[%s1776_s0 + $0x8] sm:$0xff]  ;;  %v692_v21 = vpack.c.bf16 %v219_v15, %v211_v14  ;;  %v212_v24 = vld [vmem:[%s1775_s1 + $0x610] sm:$0xff]  ;;  %v756_v25 = vpack.c.bf16 %v221_v18, %v213_v17  ;;  %v229_v29 = vld [vmem:[%s1775_s1 + $0x698] sm:$0xff]  ;;  %v694_v31 = vpack.c.bf16 %v218_v23, %v210_v22 }
  0x24   :  { %741 = vmatprep.subr.bf16.mxu1 %v740_v40  ;;  %380 = vmatprep.mubr.f32.mxu0 %v1217_v16  ;;  %v220_v26 = vld [vmem:[%s1775_s1 + $0x650] sm:$0xff]  ;;  %v227_v27 = vld [vmem:[%s1775_s1 + $0x688] sm:$0xff]  ;;  %v237_v30 = vld [vmem:[%s1775_s1 + $0x6d8] sm:$0xff] }
  0x25   :  { %457 = vmatprep.mubr.f32.mxu1 %v1217_v16  ;;  %v235_v28 = vld [vmem:[%s1775_s1 + $0x6c8] sm:$0xff]  ;;  %v758_v32 = vpack.c.bf16 %v220_v26, %v212_v24  ;;  %v226_v34 = vld [vmem:[%s1775_s1 + $0x680] sm:$0xff]  ;;  %v228_v36 = vld [vmem:[%s1775_s1 + $0x690] sm:$0xff]  ;;  %v760_v37 = vpack.c.bf16 %v237_v30, %v229_v29 }
  0x26   :  { %679 = vmatpush1.bf16.msra.mxu0 %v678_v46  ;;  %v696_v33 = vpack.c.bf16 %v235_v28, %v227_v27  ;;  %v234_v35 = vld [vmem:[%s1775_s1 + $0x6c0] sm:$0xff]  ;;  %v236_v38 = vld [vmem:[%s1775_s1 + $0x6d0] sm:$0xff]  ;;  %v243_v39 = vld [vmem:[%s1775_s1 + $0x708] sm:$0xff] }
  0x27   :  { %743 = vmatpush1.bf16.msra.mxu1 %v742_v47  ;;  %681 = vmatprep.subr.bf16.mxu0 %v680_v48  ;;  %v251_v40 = vld [vmem:[%s1775_s1 + $0x748] sm:$0xff]  ;;  %v245_v41 = vld [vmem:[%s1775_s1 + $0x718] sm:$0xff]  ;;  %v698_v43 = vpack.c.bf16 %v234_v35, %v226_v34  ;;  %v762_v44 = vpack.c.bf16 %v236_v38, %v228_v36  ;;  %v242_v46 = vld [vmem:[%s1775_s1 + $0x700] sm:$0xff] }
  0x28   :  { %745 = vmatprep.subr.bf16.mxu1 %v744_v52  ;;  %v253_v42 = vld [vmem:[%s1775_s1 + $0x758] sm:$0xff]  ;;  %v700_v45 = vpack.c.bf16 %v251_v40, %v243_v39  ;;  %v250_v47 = vld [vmem:[%s1775_s1 + $0x740] sm:$0xff]  ;;  %v244_v48 = vld [vmem:[%s1775_s1 + $0x710] sm:$0xff] }
  0x29   :  { %v764_v49 = vpack.c.bf16 %v253_v42, %v245_v41  ;;  %v252_v50 = vld [vmem:[%s1775_s1 + $0x750] sm:$0xff]  ;;  %v259_v51 = vld [vmem:[%s1775_s1 + $0x788] sm:$0xff]  ;;  %v261_v53 = vld [vmem:[%s1775_s1 + $0x798] sm:$0xff]  ;;  %v702_v55 = vpack.c.bf16 %v250_v47, %v242_v46 }
  0x2a   :  { %683 = vmatpush1.bf16.msra.mxu0 %v682_v58  ;;  %v267_v52 = vld [vmem:[%s1775_s1 + $0x7c8] sm:$0xff]  ;;  %v269_v54 = vld [vmem:[%s1775_s1 + $0x7d8] sm:$0xff]  ;;  %v766_v56 = vpack.c.bf16 %v252_v50, %v244_v48  ;;  %v258_v58 = vld [vmem:[%s1775_s1 + $0x780] sm:$0xff] }
  0x2b   :  { %747 = vmatpush1.bf16.msra.mxu1 %v746_v59  ;;  %685 = vmatprep.subr.bf16.mxu0 %v684_v60  ;;  %v704_v57 = vpack.c.bf16 %v267_v52, %v259_v51  ;;  %v266_v59 = vld [vmem:[%s1775_s1 + $0x7c0] sm:$0xff]  ;;  %v260_v60 = vld [vmem:[%s1775_s1 + $0x790] sm:$0xff]  ;;  %v768_v61 = vpack.c.bf16 %v269_v54, %v261_v53  ;;  %v23_v63 = vld [vmem:[%s1775_s1 + $0x28] sm:$0xff] }
  0x2c   :  { %749 = vmatprep.subr.bf16.mxu1 %v748_v0  ;;  %v268_v62 = vld [vmem:[%s1775_s1 + $0x7d0] sm:$0xff]  ;;  %v31_v0 = vld [vmem:[%s1775_s1 + $0x68] sm:$0xff]  ;;  %v25_v1 = vld [vmem:[%s1775_s1 + $0x38] sm:$0xff]  ;;  %v706_v3 = vpack.c.bf16 %v266_v59, %v258_v58 }
  0x2d   :  { %v33_v2 = vld [vmem:[%s1775_s1 + $0x78] sm:$0xff]  ;;  %v770_v4 = vpack.c.bf16 %v268_v62, %v260_v60  ;;  %v772_v5 = vpack.c.bf16 %v31_v0, %v23_v63  ;;  %v30_v7 = vld [vmem:[%s1775_s1 + $0x60] sm:$0xff]  ;;  %v32_v10 = vld [vmem:[%s1775_s1 + $0x70] sm:$0xff] }
  0x2e   :  { %687 = vmatpush1.bf16.msra.mxu0 %v686_v6  ;;  %v22_v6 = vld [vmem:[%s1775_s1 + $0x20] sm:$0xff]  ;;  %v39_v11 = vld [vmem:[%s1775_s1 + $0xa8] sm:$0xff]  ;;  %v49_v14 = vld [vmem:[%s1775_s1 + $0xf8] sm:$0xff] }
  0x2f   :  { %751 = vmatpush1.bf16.msra.mxu1 %v750_v8  ;;  %689 = vmatprep.subr.bf16.mxu0 %v688_v9  ;;  %v24_v8 = vld [vmem:[%s1775_s1 + $0x30] sm:$0xff]  ;;  %v836_v9 = vpack.c.bf16 %v33_v2, %v25_v1  ;;  %v47_v12 = vld [vmem:[%s1775_s1 + $0xe8] sm:$0xff]  ;;  %v1350_v15 = vld [vmem:[%s1776_s0] sm:$0xff]  ;;  %v774_v17 = vpack.c.bf16 %v30_v7, %v22_v6 }
  0x30   :  { %753 = vmatprep.subr.bf16.mxu1 %v752_v13  ;;  %v41_v13 = vld [vmem:[%s1775_s1 + $0xb8] sm:$0xff]  ;;  %v838_v18 = vpack.c.bf16 %v32_v10, %v24_v8  ;;  %v40_v22 = vld [vmem:[%s1775_s1 + $0xb0] sm:$0xff]  ;;  %v63_v26 = vld [vmem:[%s1775_s1 + $0x168] sm:$0xff] }
  0x31   :  { %v840_v23 = vpack.c.bf16 %v49_v14, %v41_v13  ;;  %v48_v24 = vld [vmem:[%s1775_s1 + $0xf0] sm:$0xff]  ;;  %v57_v27 = vld [vmem:[%s1775_s1 + $0x138] sm:$0xff]  ;;  %v79_v38 = vld [vmem:[%s1775_s1 + $0x1e8] sm:$0xff] }
  0x32   :  { %691 = vmatpush1.bf16.msra.mxu0 %v690_v19  ;;  %v776_v19 = vpack.c.bf16 %v47_v12, %v39_v11  ;;  %v65_v28 = vld [vmem:[%s1775_s1 + $0x178] sm:$0xff]  ;;  %v842_v30 = vpack.c.bf16 %v48_v24, %v40_v22  ;;  %v56_v34 = vld [vmem:[%s1775_s1 + $0x130] sm:$0xff]  ;;  %v95_v50 = vld [vmem:[%s1775_s1 + $0x268] sm:$0xff] }
  0x33   :  { %755 = vmatpush1.bf16.msra.mxu1 %v754_v20  ;;  %693 = vmatprep.subr.bf16.mxu0 %v692_v21  ;;  %v38_v20 = vld [vmem:[%s1775_s1 + $0xa0] sm:$0xff]  ;;  %v844_v35 = vpack.c.bf16 %v65_v28, %v57_v27  ;;  %v64_v36 = vld [vmem:[%s1775_s1 + $0x170] sm:$0xff]  ;;  %v73_v39 = vld [vmem:[%s1775_s1 + $0x1b8] sm:$0xff] }
  0x34   :  { %757 = vmatprep.subr.bf16.mxu1 %v756_v25  ;;  %v46_v21 = vld [vmem:[%s1775_s1 + $0xe0] sm:$0xff]  ;;  %v55_v25 = vld [vmem:[%s1775_s1 + $0x128] sm:$0xff]  ;;  %v81_v40 = vld [vmem:[%s1775_s1 + $0x1f8] sm:$0xff]  ;;  %v846_v42 = vpack.c.bf16 %v64_v36, %v56_v34 }
  0x35   :  { %v778_v29 = vpack.c.bf16 %v46_v21, %v38_v20  ;;  %v72_v46 = vld [vmem:[%s1775_s1 + $0x1b0] sm:$0xff]  ;;  %v848_v47 = vpack.c.bf16 %v81_v40, %v73_v39  ;;  %v89_v51 = vld [vmem:[%s1775_s1 + $0x238] sm:$0xff]  ;;  %v111_v62 = vld [vmem:[%s1775_s1 + $0x2e8] sm:$0xff] }
  0x36   :  { %695 = vmatpush1.bf16.msra.mxu0 %v694_v31  ;;  %v780_v31 = vpack.c.bf16 %v63_v26, %v55_v25  ;;  %v80_v48 = vld [vmem:[%s1775_s1 + $0x1f0] sm:$0xff]  ;;  %v97_v52 = vld [vmem:[%s1775_s1 + $0x278] sm:$0xff]  ;;  %v127_v10 = vld [vmem:[%s1775_s1 + $0x368] sm:$0xff] }
  0x37   :  { %759 = vmatpush1.bf16.msra.mxu1 %v758_v32  ;;  %697 = vmatprep.subr.bf16.mxu0 %v696_v33  ;;  %v54_v32 = vld [vmem:[%s1775_s1 + $0x120] sm:$0xff]  ;;  %v850_v54 = vpack.c.bf16 %v80_v48, %v72_v46  ;;  %v88_v58 = vld [vmem:[%s1775_s1 + $0x230] sm:$0xff]  ;;  %v852_v59 = vpack.c.bf16 %v97_v52, %v89_v51  ;;  %v105_v63 = vld [vmem:[%s1775_s1 + $0x2b8] sm:$0xff] }
  0x38   :  { %761 = vmatprep.subr.bf16.mxu1 %v760_v37  ;;  %v62_v33 = vld [vmem:[%s1775_s1 + $0x160] sm:$0xff]  ;;  %v71_v37 = vld [vmem:[%s1775_s1 + $0x1a8] sm:$0xff]  ;;  %v96_v60 = vld [vmem:[%s1775_s1 + $0x270] sm:$0xff] }
  0x39   :  { %v782_v41 = vpack.c.bf16 %v62_v33, %v54_v32  ;;  %v113_v0 = vld [vmem:[%s1775_s1 + $0x2f8] sm:$0xff]  ;;  %v854_v2 = vpack.c.bf16 %v96_v60, %v88_v58  ;;  %v104_v6 = vld [vmem:[%s1775_s1 + $0x2b0] sm:$0xff]  ;;  %v118_v20 = vld [vmem:[%s1775_s1 + $0x320] sm:$0xff] }
  0x3a   :  { %699 = vmatpush1.bf16.msra.mxu0 %v698_v43  ;;  %v784_v43 = vpack.c.bf16 %v79_v38, %v71_v37  ;;  %v856_v7 = vpack.c.bf16 %v113_v0, %v105_v63  ;;  %v112_v8 = vld [vmem:[%s1775_s1 + $0x2f0] sm:$0xff]  ;;  %v121_v11 = vld [vmem:[%s1775_s1 + $0x338] sm:$0xff]  ;;  %v126_v21 = vld [vmem:[%s1775_s1 + $0x360] sm:$0xff] }
  0x3b   :  { %763 = vmatpush1.bf16.msra.mxu1 %v762_v44  ;;  %701 = vmatprep.subr.bf16.mxu0 %v700_v45  ;;  %v70_v44 = vld [vmem:[%s1775_s1 + $0x1a0] sm:$0xff]  ;;  %v129_v12 = vld [vmem:[%s1775_s1 + $0x378] sm:$0xff]  ;;  %v120_v22 = vld [vmem:[%s1775_s1 + $0x330] sm:$0xff] }
  0x3c   :  { %765 = vmatprep.subr.bf16.mxu1 %v764_v49  ;;  %v78_v45 = vld [vmem:[%s1775_s1 + $0x1e0] sm:$0xff]  ;;  %v87_v49 = vld [vmem:[%s1775_s1 + $0x228] sm:$0xff]  ;;  %v1477_v13 = vld [vmem:[%s1776_s0 + $0x18] sm:$0xff] }
  0x3d   :  { %v786_v53 = vpack.c.bf16 %v78_v45, %v70_v44  ;;  %v128_v24 = vld [vmem:[%s1775_s1 + $0x370] sm:$0xff]  ;;  %v135_v25 = vld [vmem:[%s1775_s1 + $0x3a8] sm:$0xff]  ;;  %v137_v27 = vld [vmem:[%s1775_s1 + $0x3b8] sm:$0xff] }
  0x3e   :  { %703 = vmatpush1.bf16.msra.mxu0 %v702_v55  ;;  %v788_v55 = vpack.c.bf16 %v95_v50, %v87_v49  ;;  %v143_v26 = vld [vmem:[%s1775_s1 + $0x3e8] sm:$0xff]  ;;  %v145_v28 = vld [vmem:[%s1775_s1 + $0x3f8] sm:$0xff]  ;;  %v134_v32 = vld [vmem:[%s1775_s1 + $0x3a0] sm:$0xff] }
  0x3f   :  { %767 = vmatpush1.bf16.msra.mxu1 %v766_v56  ;;  %705 = vmatprep.subr.bf16.mxu0 %v704_v57  ;;  %v86_v56 = vld [vmem:[%s1775_s1 + $0x220] sm:$0xff]  ;;  %v136_v34 = vld [vmem:[%s1775_s1 + $0x3b0] sm:$0xff]  ;;  %v151_v37 = vld [vmem:[%s1775_s1 + $0x428] sm:$0xff] }
  0x40   :  { %769 = vmatprep.subr.bf16.mxu1 %v768_v61  ;;  %v94_v57 = vld [vmem:[%s1775_s1 + $0x260] sm:$0xff]  ;;  %v103_v61 = vld [vmem:[%s1775_s1 + $0x2a8] sm:$0xff]  ;;  %v144_v36 = vld [vmem:[%s1775_s1 + $0x3f0] sm:$0xff] }
  0x41   :  { %v790_v1 = vpack.c.bf16 %v94_v57, %v86_v56  ;;  %v142_v33 = vld [vmem:[%s1775_s1 + $0x3e0] sm:$0xff]  ;;  %v159_v38 = vld [vmem:[%s1775_s1 + $0x468] sm:$0xff]  ;;  %v153_v39 = vld [vmem:[%s1775_s1 + $0x438] sm:$0xff] }
  0x42   :  { %707 = vmatpush1.bf16.msra.mxu0 %v706_v3  ;;  %v792_v3 = vpack.c.bf16 %v111_v62, %v103_v61  ;;  %v161_v40 = vld [vmem:[%s1775_s1 + $0x478] sm:$0xff]  ;;  %v150_v44 = vld [vmem:[%s1775_s1 + $0x420] sm:$0xff]  ;;  %v152_v45 = vld [vmem:[%s1775_s1 + $0x430] sm:$0xff] }
  0x43   :  { %771 = vmatpush1.bf16.msra.mxu1 %v770_v4  ;;  %773 = vmatprep.subr.bf16.mxu0 %v772_v5  ;;  %v102_v4 = vld [vmem:[%s1775_s1 + $0x2a0] sm:$0xff]  ;;  %v868_v46 = vpack.c.bf16 %v161_v40, %v153_v39  ;;  %v167_v48 = vld [vmem:[%s1775_s1 + $0x4a8] sm:$0xff]  ;;  %v169_v50 = vld [vmem:[%s1775_s1 + $0x4b8] sm:$0xff] }
  0x44   :  { %837 = vmatprep.subr.bf16.mxu1 %v836_v9  ;;  %v110_v5 = vld [vmem:[%s1775_s1 + $0x2e0] sm:$0xff]  ;;  %v119_v9 = vld [vmem:[%s1775_s1 + $0x328] sm:$0xff]  ;;  %v177_v51 = vld [vmem:[%s1775_s1 + $0x4f8] sm:$0xff] }
  0x45   :  { %381 = vmatmul.mubr.f32.vlgmr.msra.gmra.mrb[0].mxu0 %v1350_v15  ;;  %v794_v14 = vpack.c.bf16 %v110_v5, %v102_v4  ;;  %v175_v49 = vld [vmem:[%s1775_s1 + $0x4e8] sm:$0xff]  ;;  %v174_v56 = vld [vmem:[%s1775_s1 + $0x4e0] sm:$0xff]  ;;  %v168_v57 = vld [vmem:[%s1775_s1 + $0x4b0] sm:$0xff]  ;;  %v872_v58 = vpack.c.bf16 %v177_v51, %v169_v50 }
  0x46   :  { %458 = vmatmul.mubr.f32.vlgmr.msra.gmra.mrb[0].mxu1 %v1350_v15  ;;  %775 = vmatpush1.bf16.msra.mxu0 %v774_v17  ;;  %v1483_v17 = vld [vmem:[%s1776_s0 + $0x10] sm:$0xff]  ;;  %v183_v60 = vld [vmem:[%s1775_s1 + $0x528] sm:$0xff]  ;;  %v185_v62 = vld [vmem:[%s1775_s1 + $0x538] sm:$0xff] }
  0x47   :  { %839 = vmatpush1.bf16.msra.mxu1 %v838_v18  ;;  %777 = vmatprep.subr.bf16.mxu0 %v776_v19  ;;  %v858_v18 = vpack.c.bf16 %v112_v8, %v104_v6  ;;  %v796_v19 = vpack.c.bf16 %v127_v10, %v119_v9  ;;  %v191_v61 = vld [vmem:[%s1775_s1 + $0x568] sm:$0xff]  ;;  %v193_v63 = vld [vmem:[%s1775_s1 + $0x578] sm:$0xff]  ;;  %v190_v4 = vld [vmem:[%s1775_s1 + $0x560] sm:$0xff] }
  0x48   :  { %841 = vmatprep.subr.bf16.mxu1 %v840_v23  ;;  %386 = vmatprep.mubr.f32.mxu0 %v1477_v13  ;;  %v860_v23 = vpack.c.bf16 %v129_v12, %v121_v11  ;;  %v184_v5 = vld [vmem:[%s1775_s1 + $0x530] sm:$0xff]  ;;  %v876_v6 = vpack.c.bf16 %v193_v63, %v185_v62  ;;  %v199_v8 = vld [vmem:[%s1775_s1 + $0x5a8] sm:$0xff]  ;;  %v201_v10 = vld [vmem:[%s1775_s1 + $0x5b8] sm:$0xff] }
  0x49   :  { %463 = vmatprep.mubr.f32.mxu1 %v1477_v13  ;;  %387 = vmatmul.mubr.f32.gmra.mrb[2].mxu0 %v1483_v17  ;;  %v207_v9 = vld [vmem:[%s1775_s1 + $0x5e8] sm:$0xff]  ;;  %v209_v11 = vld [vmem:[%s1775_s1 + $0x5f8] sm:$0xff] }
  0x4a   :  { %779 = vmatpush1.bf16.msra.mxu0 %v778_v29  ;;  %464 = vmatmul.mubr.f32.gmra.mrb[2].mxu1 %v1483_v17  ;;  %v798_v29 = vpack.c.bf16 %v126_v21, %v118_v20  ;;  %v206_v20 = vld [vmem:[%s1775_s1 + $0x5e0] sm:$0xff]  ;;  %v200_v21 = vld [vmem:[%s1775_s1 + $0x5b0] sm:$0xff]  ;;  %v241_v39 = vld [vmem:[%s1775_s1 + $0x6f8] sm:$0xff] }
  0x4b   :  { %843 = vmatpush1.bf16.msra.mxu1 %v842_v30  ;;  %781 = vmatprep.subr.bf16.mxu0 %v780_v31  ;;  %v862_v30 = vpack.c.bf16 %v128_v24, %v120_v22  ;;  %v800_v31 = vpack.c.bf16 %v143_v26, %v135_v25  ;;  %v880_v22 = vpack.c.bf16 %v209_v11, %v201_v10  ;;  %v215_v24 = vld [vmem:[%s1775_s1 + $0x628] sm:$0xff]  ;;  %v217_v26 = vld [vmem:[%s1775_s1 + $0x638] sm:$0xff] }
  0x4c   :  { %845 = vmatprep.subr.bf16.mxu1 %v844_v35  ;;  %534 = vmatprep.mubr.f32.mxu0 %v1217_v16  ;;  %v864_v35 = vpack.c.bf16 %v145_v28, %v137_v27  ;;  %v223_v25 = vld [vmem:[%s1775_s1 + $0x668] sm:$0xff]  ;;  %v225_v27 = vld [vmem:[%s1775_s1 + $0x678] sm:$0xff] }
  0x4d   :  { %611 = vmatprep.mubr.f32.mxu1 %v1217_v16  ;;  %v158_v16 = vld [vmem:[%s1775_s1 + $0x460] sm:$0xff]  ;;  %v257_v50 = vld [vmem:[%s1775_s1 + $0x778] sm:$0xff] }
  0x4e   :  { %783 = vmatpush1.bf16.msra.mxu0 %v782_v41  ;;  %v802_v41 = vpack.c.bf16 %v142_v33, %v134_v32  ;;  %v806_v52 = vpack.c.bf16 %v158_v16, %v150_v44  ;;  %v222_v32 = vld [vmem:[%s1775_s1 + $0x660] sm:$0xff]  ;;  %v216_v33 = vld [vmem:[%s1775_s1 + $0x630] sm:$0xff]  ;;  %v273_v62 = vld [vmem:[%s1775_s1 + $0x7f8] sm:$0xff] }
  0x4f   :  { %847 = vmatpush1.bf16.msra.mxu1 %v846_v42  ;;  %785 = vmatprep.subr.bf16.mxu0 %v784_v43  ;;  %v866_v42 = vpack.c.bf16 %v144_v36, %v136_v34  ;;  %v804_v43 = vpack.c.bf16 %v159_v38, %v151_v37  ;;  %v884_v34 = vpack.c.bf16 %v225_v27, %v217_v26  ;;  %v231_v36 = vld [vmem:[%s1775_s1 + $0x6a8] sm:$0xff]  ;;  %v233_v38 = vld [vmem:[%s1775_s1 + $0x6b8] sm:$0xff]  ;;  %v238_v44 = vld [vmem:[%s1775_s1 + $0x6e0] sm:$0xff] }
  0x50   :  { %849 = vmatprep.subr.bf16.mxu1 %v848_v47  ;;  %v160_v47 = vld [vmem:[%s1775_s1 + $0x470] sm:$0xff]  ;;  %v239_v37 = vld [vmem:[%s1775_s1 + $0x6e8] sm:$0xff] }
  0x51   :  { %v232_v16 = vld [vmem:[%s1775_s1 + $0x6b0] sm:$0xff] }
  0x52   :  { %787 = vmatpush1.bf16.msra.mxu0 %v786_v53  ;;  %v870_v53 = vpack.c.bf16 %v160_v47, %v152_v45  ;;  %v888_v45 = vpack.c.bf16 %v241_v39, %v233_v38  ;;  %v247_v47 = vld [vmem:[%s1775_s1 + $0x728] sm:$0xff] }
  0x53   :  { %851 = vmatpush1.bf16.msra.mxu1 %v850_v54  ;;  %789 = vmatprep.subr.bf16.mxu0 %v788_v55  ;;  %v808_v54 = vpack.c.bf16 %v175_v49, %v167_v48  ;;  %v166_v55 = vld [vmem:[%s1775_s1 + $0x4a0] sm:$0xff]  ;;  %v255_v48 = vld [vmem:[%s1775_s1 + $0x768] sm:$0xff]  ;;  %v249_v49 = vld [vmem:[%s1775_s1 + $0x738] sm:$0xff] }
  0x54   :  { %853 = vmatprep.subr.bf16.mxu1 %v852_v59  ;;  %v176_v59 = vld [vmem:[%s1775_s1 + $0x4f0] sm:$0xff]  ;;  %v810_v0 = vpack.c.bf16 %v174_v56, %v166_v55  ;;  %v254_v55 = vld [vmem:[%s1775_s1 + $0x760] sm:$0xff] }
  0x55   :  { %v248_v56 = vld [vmem:[%s1775_s1 + $0x730] sm:$0xff] }
  0x56   :  { %791 = vmatpush1.bf16.msra.mxu0 %v790_v1  ;;  %v874_v1 = vpack.c.bf16 %v176_v59, %v168_v57  ;;  %v892_v57 = vpack.c.bf16 %v257_v50, %v249_v49  ;;  %v263_v59 = vld [vmem:[%s1775_s1 + $0x7a8] sm:$0xff] }
  0x57   :  { %855 = vmatpush1.bf16.msra.mxu1 %v854_v2  ;;  %793 = vmatprep.subr.bf16.mxu0 %v792_v3  ;;  %v812_v2 = vpack.c.bf16 %v191_v61, %v183_v60  ;;  %v182_v3 = vld [vmem:[%s1775_s1 + $0x520] sm:$0xff]  ;;  %v271_v60 = vld [vmem:[%s1775_s1 + $0x7e8] sm:$0xff]  ;;  %v265_v61 = vld [vmem:[%s1775_s1 + $0x7b8] sm:$0xff] }
  0x58   :  { %857 = vmatprep.subr.bf16.mxu1 %v856_v7  ;;  %v192_v7 = vld [vmem:[%s1775_s1 + $0x570] sm:$0xff]  ;;  %v814_v12 = vpack.c.bf16 %v190_v4, %v182_v3  ;;  %v270_v3 = vld [vmem:[%s1775_s1 + $0x7e0] sm:$0xff]  ;;  %v896_v4 = vpack.c.bf16 %v273_v62, %v265_v61 }
  0x5a   :  { %795 = vmatpush1.bf16.msra.mxu0 %v794_v14  ;;  %v878_v14 = vpack.c.bf16 %v192_v7, %v184_v5  ;;  %v264_v5 = vld [vmem:[%s1775_s1 + $0x7b0] sm:$0xff] }
  0x5b   :  { %859 = vmatpush1.bf16.msra.mxu1 %v858_v18  ;;  %797 = vmatprep.subr.bf16.mxu0 %v796_v19  ;;  %v816_v18 = vpack.c.bf16 %v207_v9, %v199_v8  ;;  %v198_v19 = vld [vmem:[%s1775_s1 + $0x5a0] sm:$0xff]  ;;  %v276_v9 = vlaneseq }
  0x5c   :  { %861 = vmatprep.subr.bf16.mxu1 %v860_v23  ;;  %v208_v23 = vld [vmem:[%s1775_s1 + $0x5f0] sm:$0xff]  ;;  %v818_v28 = vpack.c.bf16 %v206_v20, %v198_v19 }
  0x5d   :  { %v277_v10 = vshrl.u32 %v276_v9, 7 }
  0x5e   :  { %799 = vmatpush1.bf16.msra.mxu0 %v798_v29  ;;  %v882_v29 = vpack.c.bf16 %v208_v23, %v200_v21 }
  0x5f   :  { %863 = vmatpush1.bf16.msra.mxu1 %v862_v30  ;;  %801 = vmatprep.subr.bf16.mxu0 %v800_v31  ;;  %v820_v30 = vpack.c.bf16 %v223_v25, %v215_v24  ;;  %v214_v31 = vld [vmem:[%s1775_s1 + $0x620] sm:$0xff]  ;;  %v278_v11 = vsub.s32 0, %v277_v10  ;;  %v290_v19 = vsub.s32 3, %v277_v10  ;;  %v302_v38 = vsub.s32 6, %v277_v10 }
  0x60   :  { %865 = vmatprep.subr.bf16.mxu1 %v864_v35  ;;  %v224_v35 = vld [vmem:[%s1775_s1 + $0x670] sm:$0xff]  ;;  %v822_v40 = vpack.c.bf16 %v222_v32, %v214_v31  ;;  %v298_v39 = vsub.s32 5, %v277_v10 }
  0x62   :  { %803 = vmatpush1.bf16.msra.mxu0 %v802_v41  ;;  %v886_v41 = vpack.c.bf16 %v224_v35, %v216_v33 }
  0x63   :  { %867 = vmatpush1.bf16.msra.mxu1 %v866_v42  ;;  %805 = vmatprep.subr.bf16.mxu0 %v804_v43  ;;  %v824_v42 = vpack.c.bf16 %v239_v37, %v231_v36  ;;  %v230_v43 = vld [vmem:[%s1775_s1 + $0x6a0] sm:$0xff]  ;;  %v294_v37 = vsub.s32 4, %v277_v10 }
  0x64   :  { %869 = vmatprep.subr.bf16.mxu1 %v868_v46  ;;  %v240_v46 = vld [vmem:[%s1775_s1 + $0x6f0] sm:$0xff]  ;;  %v826_v51 = vpack.c.bf16 %v238_v44, %v230_v43 }
  0x66   :  { %807 = vmatpush1.bf16.msra.mxu0 %v806_v52  ;;  %v890_v52 = vpack.c.bf16 %v240_v46, %v232_v16 }
  0x67   :  { %871 = vmatpush1.bf16.msra.mxu1 %v870_v53  ;;  %809 = vmatprep.subr.bf16.mxu0 %v808_v54  ;;  %v828_v53 = vpack.c.bf16 %v255_v48, %v247_v47  ;;  %v246_v54 = vld [vmem:[%s1775_s1 + $0x720] sm:$0xff] }
  0x68   :  { %873 = vmatprep.subr.bf16.mxu1 %v872_v58  ;;  %v256_v58 = vld [vmem:[%s1775_s1 + $0x770] sm:$0xff]  ;;  %v830_v63 = vpack.c.bf16 %v254_v55, %v246_v54 }
  0x6a   :  { %811 = vmatpush1.bf16.msra.mxu0 %v810_v0  ;;  %v894_v0 = vpack.c.bf16 %v256_v58, %v248_v56 }
  0x6b   :  { %875 = vmatpush1.bf16.msra.mxu1 %v874_v1  ;;  %813 = vmatprep.subr.bf16.mxu0 %v812_v2  ;;  %v832_v1 = vpack.c.bf16 %v271_v60, %v263_v59  ;;  %v262_v2 = vld [vmem:[%s1775_s1 + $0x7a0] sm:$0xff] }
  0x6c   :  { %877 = vmatprep.subr.bf16.mxu1 %v876_v6  ;;  %v272_v6 = vld [vmem:[%s1775_s1 + $0x7f0] sm:$0xff]  ;;  %v834_v7 = vpack.c.bf16 %v270_v3, %v262_v2 }
  0x6d   :  { %v898_v8 = vpack.c.bf16 %v272_v6, %v264_v5 }
  0x6e   :  { %815 = vmatpush1.bf16.msra.mxu0 %v814_v12  ;;  %v274_v12 = vld [vmem:[%s1777_s2] sm:$0xff] }
  0x6f   :  { %879 = vmatpush1.bf16.msra.mxu1 %v878_v14  ;;  %817 = vmatprep.subr.bf16.mxu0 %v816_v18  ;;  %v286_v14 = vsub.s32 2, %v277_v10  ;;  %v282_v18 = vsub.s32 1, %v277_v10  ;;  %v279_v20 = vrot.slane %v274_v12, %v278_v11  ;;  %v299_v43 = vrot.slane %v274_v12, %v298_v39 }
  0x70   :  { %881 = vmatprep.subr.bf16.mxu1 %v880_v22  ;;  %v291_v22 = vrot.slane %v274_v12, %v290_v19 }
  0x71   :  { %v283_v21 = vrot.slane %v274_v12, %v282_v18 }
  0x72   :  { %819 = vmatpush1.bf16.msra.mxu0 %v818_v28 }
  0x73   :  { %883 = vmatpush1.bf16.msra.mxu1 %v882_v29  ;;  %821 = vmatprep.subr.bf16.mxu0 %v820_v30 }
  0x74   :  { %885 = vmatprep.subr.bf16.mxu1 %v884_v34 }
  0x76   :  { %823 = vmatpush1.bf16.msra.mxu0 %v822_v40  ;;  %v306_v40 = vsub.s32 7, %v277_v10 }
  0x77   :  { %887 = vmatpush1.bf16.msra.mxu1 %v886_v41  ;;  %825 = vmatprep.subr.bf16.mxu0 %v824_v42  ;;  %v295_v41 = vrot.slane %v274_v12, %v294_v37  ;;  %v303_v42 = vrot.slane %v274_v12, %v302_v38 }
  0x78   :  { %889 = vmatprep.subr.bf16.mxu1 %v888_v45  ;;  %v307_v44 = vrot.slane %v274_v12, %v306_v40 }
  0x7a   :  { %827 = vmatpush1.bf16.msra.mxu0 %v826_v51 }
  0x7b   :  { %891 = vmatpush1.bf16.msra.mxu1 %v890_v52  ;;  %829 = vmatprep.subr.bf16.mxu0 %v828_v53 }
  0x7c   :  { %893 = vmatprep.subr.bf16.mxu1 %v892_v57 }
  0x7e   :  { %831 = vmatpush1.bf16.msra.mxu0 %v830_v63 }
  0x7f   :  { %895 = vmatpush1.bf16.msra.mxu1 %v894_v0  ;;  %833 = vmatprep.subr.bf16.mxu0 %v832_v1 }
  0x80   :  { %897 = vmatprep.subr.bf16.mxu1 %v896_v4 }
  0x82   :  { %835 = vmatpush1.bf16.msra.mxu0 %v834_v7 }
  0x83   :  { %899 = vmatpush1.bf16.msra.mxu1 %v898_v8 }
  0x85   :  { %535 = vmatmul.mubr.f32.vlgmr.msra.gmra.mrb[4].mxu0 %v1350_v15 }
  0x86   :  { %612 = vmatmul.mubr.f32.vlgmr.msra.gmra.mrb[4].mxu1 %v1350_v15  ;;  %540 = vmatprep.mubr.f32.mxu0 %v1477_v13  ;;  %v287_v15 = vrot.slane %v274_v12, %v286_v14 }
  0x87   :  { %617 = vmatprep.mubr.f32.mxu1 %v1477_v13 }
  0x89   :  { %541 = vmatmul.mubr.f32.gmra.mrb[6].mxu0 %v1483_v17 }
  0x8a   :  { %618 = vmatmul.mubr.f32.gmra.mrb[6].mxu1 %v1483_v17 }
 0x118   :  { %v382_v23 = vpop.f32.mrb[0].mxu0 }
 0x119   :  { %v383_v13 = vadd.f32 %v382_v23, %v279_v20  ;;  %v459_v24 = vpop.f32.mrb[0].mxu1  ;;  %v384_v25 = vpop.f32.mrb[1].mxu0 }
 0x11a   :  { %v460_v26 = vadd.f32 %v459_v24, %v287_v15  ;;  %v385_v17 = vadd.f32 %v384_v25, %v283_v21  ;;  %v461_v27 = vpop.f32.mrb[1].mxu1 }
 0x11b   :  { %624 = vst [vmem:[%s1778_s3] sm:$0xff] %v383_v13  ;;  %v462_v28 = vadd.f32 %v461_v27, %v291_v22 }
 0x11c   :  { %626 = vst [vmem:[%s1778_s3 + $0x10] sm:$0xff] %v460_v26  ;;  %625 = vst [vmem:[%s1778_s3 + $0x8] sm:$0xff] %v385_v17  ;;  %v388_v29 = vpop.f32.mrb[2].mxu0 }
 0x11d   :  { %627 = vst [vmem:[%s1778_s3 + $0x18] sm:$0xff] %v462_v28  ;;  %v465_v30 = vpop.f32.mrb[2].mxu1  ;;  %v389_v31 = vadd.f32 %v388_v29, %v279_v20  ;;  %v390_v33 = vpop.f32.mrb[3].mxu0 }
 0x11e   :  { %v466_v32 = vadd.f32 %v465_v30, %v287_v15  ;;  %v467_v34 = vpop.f32.mrb[3].mxu1  ;;  %v391_v35 = vadd.f32 %v390_v33, %v283_v21 }
 0x11f   :  { %v468_v36 = vadd.f32 %v467_v34, %v291_v22  ;;  %632 = vst [vmem:[%s1778_s3 + $0x40] sm:$0xff] %v389_v31 }
 0x120   :  { %634 = vst [vmem:[%s1778_s3 + $0x50] sm:$0xff] %v466_v32  ;;  %633 = vst [vmem:[%s1778_s3 + $0x48] sm:$0xff] %v391_v35 }
 0x121   :  { %635 = vst [vmem:[%s1778_s3 + $0x58] sm:$0xff] %v468_v36 }
 0x158   :  { %v536_v16 = vpop.f32.mrb[4].mxu0 }
 0x159   :  { %v537_v45 = vadd.f32 %v536_v16, %v295_v41  ;;  %v613_v46 = vpop.f32.mrb[4].mxu1  ;;  %v538_v47 = vpop.f32.mrb[5].mxu0 }
 0x15a   :  { %v614_v48 = vadd.f32 %v613_v46, %v303_v42  ;;  %v539_v49 = vadd.f32 %v538_v47, %v299_v43  ;;  %v615_v50 = vpop.f32.mrb[5].mxu1 }
 0x15b   :  { %628 = vst [vmem:[%s1778_s3 + $0x20] sm:$0xff] %v537_v45  ;;  %v616_v51 = vadd.f32 %v615_v50, %v307_v44 }
 0x15c   :  { %630 = vst [vmem:[%s1778_s3 + $0x30] sm:$0xff] %v614_v48  ;;  %629 = vst [vmem:[%s1778_s3 + $0x28] sm:$0xff] %v539_v49  ;;  %v542_v52 = vpop.f32.mrb[6].mxu0 }
 0x15d   :  { %631 = vst [vmem:[%s1778_s3 + $0x38] sm:$0xff] %v616_v51  ;;  %v543_v53 = vadd.f32 %v542_v52, %v295_v41  ;;  %v619_v54 = vpop.f32.mrb[6].mxu1  ;;  %v544_v55 = vpop.f32.mrb[7].mxu0 }
 0x15e   :  { %v620_v56 = vadd.f32 %v619_v54, %v303_v42  ;;  %v545_v57 = vadd.f32 %v544_v55, %v299_v43  ;;  %v621_v58 = vpop.f32.mrb[7].mxu1 }
 0x15f   :  { %636 = vst [vmem:[%s1778_s3 + $0x60] sm:$0xff] %v543_v53  ;;  %v622_v59 = vadd.f32 %v621_v58, %v307_v44 }
 0x160   :  { %638 = vst [vmem:[%s1778_s3 + $0x70] sm:$0xff] %v620_v56  ;;  %637 = vst [vmem:[%s1778_s3 + $0x68] sm:$0xff] %v545_v57 }
 0x161   :  { %639 = vst [vmem:[%s1778_s3 + $0x78] sm:$0xff] %v622_v59 }

// kernel: mini_model_forward.3
= control target key start
LH: loop header
LB: loop body
LE: loop exit
PB: predicated region body
PF: predicated region fallthrough
CT: control target
= control target key end

     0   :  { %15 = vsyncpa [#allocation3], 0  ;;  %v9771_v7 = vmov 0.0   ;;  %s9761_s0 = inlined_call_operand.vmem [shape: f32[8,2,1024], index: 0, kind: input, shape index: {}]   ;;  %s9762_s1 = inlined_call_operand.vmem [shape: f32[256,1024], index: 1, kind: input, shape index: {}]   ;;  %s9763_s2 = inlined_call_operand.vmem [shape: f32[2,256], index: 2, kind: input, shape index: {}]   ;;  %s9764_s3 = inlined_call_operand.vmem [shape: f32[256,1024], index: 3, kind: input, shape index: {}]   ;;  %s9765_s4 = inlined_call_operand.vmem [shape: f32[1,1024], index: 4, kind: input, shape index: {}]   ;;  %s9766_s5 = inlined_call_operand.vmem [shape: f32[256,2], index: 5, kind: input, shape index: {}]   ;;  %s9767_s6 = inlined_call_operand.vmem [shape: f32[256,2], index: 6, kind: input, shape index: {}]   ;;  %s9768_s7 = inlined_call_operand.vmem [shape: f32[1,2], index: 7, kind: input, shape index: {}]   ;;  %s9769_s8 = inlined_call_operand.hbm [shape: f32[2,2], index: 8, kind: output, shape index: {0}]   ;;  %s9770_s9 = inlined_call_operand.hbm [shape: f32[2,2], index: 9, kind: output, shape index: {1}]  }
   0x1   :  { %v34_v0 = vld [vmem:[%s9762_s1 + $0x8] sm:$0xff]  ;;  %v36_v2 = vld [vmem:[%s9762_s1 + $0x18] sm:$0xff]  ;;  %v33_v5 = vld [vmem:[%s9762_s1] sm:$0xff]  ;;  %355 = vmatprep.mubr.f32.mxu0 %v9771_v7  ;;  %426 = vmatprep.mubr.f32.mxu1 %v9771_v7 }
   0x2   :  { %v42_v1 = vld [vmem:[%s9762_s1 + $0x48] sm:$0xff]  ;;  %v44_v4 = vld [vmem:[%s9762_s1 + $0x58] sm:$0xff]  ;;  %v41_v6 = vld [vmem:[%s9762_s1 + $0x40] sm:$0xff] }
   0x3   :  { %v6709_v3 = vpack.c.bf16 %v42_v1, %v34_v0  ;;  %v6722_v8 = vpack.c.bf16 %v44_v4, %v36_v2  ;;  %v6724_v9 = vpack.c.bf16 %v41_v6, %v33_v5  ;;  %v35_v10 = vld [vmem:[%s9762_s1 + $0x10] sm:$0xff]  ;;  %v50_v12 = vld [vmem:[%s9762_s1 + $0x88] sm:$0xff]  ;;  %v52_v15 = vld [vmem:[%s9762_s1 + $0x98] sm:$0xff] }
   0x4   :  { %v43_v11 = vld [vmem:[%s9762_s1 + $0x50] sm:$0xff]  ;;  %v58_v14 = vld [vmem:[%s9762_s1 + $0xc8] sm:$0xff]  ;;  %v60_v16 = vld [vmem:[%s9762_s1 + $0xd8] sm:$0xff] }
   0x5   :  { %10039 = vst [vmem:[#allocation8_spill] sm:$0xff] %v6709_v3  ;;  %10040 = vst [vmem:[#allocation9_spill] sm:$0xff] %v6722_v8  ;;  %4133 = vmatprep.subr.bf16.mxu0 %v6709_v3  ;;  %v6736_v13 = vpack.c.bf16 %v43_v11, %v35_v10  ;;  %4197 = vmatprep.subr.bf16.mxu1 %v6722_v8  ;;  %v6749_v17 = vpack.c.bf16 %v58_v14, %v50_v12  ;;  %v49_v19 = vld [vmem:[%s9762_s1 + $0x80] sm:$0xff]  ;;  %v51_v21 = vld [vmem:[%s9762_s1 + $0x90] sm:$0xff] }
   0x6   :  { %10041 = vst [vmem:[#allocation10_spill] sm:$0xff] %v6724_v9  ;;  %4135 = vmatpush1.bf16.msra.mxu0 %v6724_v9  ;;  %v6751_v18 = vpack.c.bf16 %v60_v16, %v52_v15  ;;  %v57_v20 = vld [vmem:[%s9762_s1 + $0xc0] sm:$0xff]  ;;  %v59_v23 = vld [vmem:[%s9762_s1 + $0xd0] sm:$0xff]  ;;  %v66_v24 = vld [vmem:[%s9762_s1 + $0x108] sm:$0xff] }
   0x7   :  { %10042 = vst [vmem:[#allocation11_spill] sm:$0xff] %v6736_v13  ;;  %10043 = vst [vmem:[#allocation12_spill] sm:$0xff] %v6749_v17  ;;  %4199 = vmatpush1.bf16.msra.mxu1 %v6736_v13  ;;  %v6763_v22 = vpack.c.bf16 %v57_v20, %v49_v19  ;;  %v74_v25 = vld [vmem:[%s9762_s1 + $0x148] sm:$0xff]  ;;  %4137 = vmatprep.subr.bf16.mxu0 %v6749_v17  ;;  %v6776_v26 = vpack.c.bf16 %v59_v23, %v51_v21  ;;  %v68_v28 = vld [vmem:[%s9762_s1 + $0x118] sm:$0xff] }
   0x8   :  { %10044 = vst [vmem:[#allocation13_spill] sm:$0xff] %v6751_v18  ;;  %4201 = vmatprep.subr.bf16.mxu1 %v6751_v18  ;;  %v6778_v27 = vpack.c.bf16 %v74_v25, %v66_v24  ;;  %v76_v29 = vld [vmem:[%s9762_s1 + $0x158] sm:$0xff]  ;;  %v65_v30 = vld [vmem:[%s9762_s1 + $0x100] sm:$0xff]  ;;  %v67_v33 = vld [vmem:[%s9762_s1 + $0x110] sm:$0xff] }
   0x9   :  { %10045 = vst [vmem:[#allocation14_spill] sm:$0xff] %v6763_v22  ;;  %10046 = vst [vmem:[#allocation15_spill] sm:$0xff] %v6776_v26  ;;  %v6789_v31 = vpack.c.bf16 %v76_v29, %v68_v28  ;;  %v73_v32 = vld [vmem:[%s9762_s1 + $0x140] sm:$0xff]  ;;  %v75_v34 = vld [vmem:[%s9762_s1 + $0x150] sm:$0xff] }
   0xa   :  { %10047 = vst [vmem:[#allocation16_spill] sm:$0xff] %v6778_v27  ;;  %4139 = vmatpush1.bf16.msra.mxu0 %v6763_v22  ;;  %v6801_v35 = vpack.c.bf16 %v73_v32, %v65_v30  ;;  %v82_v36 = vld [vmem:[%s9762_s1 + $0x188] sm:$0xff]  ;;  %v84_v38 = vld [vmem:[%s9762_s1 + $0x198] sm:$0xff]  ;;  %v6814_v39 = vpack.c.bf16 %v75_v34, %v67_v33  ;;  %v81_v42 = vld [vmem:[%s9762_s1 + $0x180] sm:$0xff] }
   0xb   :  { %10048 = vst [vmem:[#allocation17_spill] sm:$0xff] %v6789_v31  ;;  %v90_v37 = vld [vmem:[%s9762_s1 + $0x1c8] sm:$0xff]  ;;  %4203 = vmatpush1.bf16.msra.mxu1 %v6776_v26  ;;  %4141 = vmatprep.subr.bf16.mxu0 %v6778_v27  ;;  %v92_v41 = vld [vmem:[%s9762_s1 + $0x1d8] sm:$0xff]  ;;  %v89_v43 = vld [vmem:[%s9762_s1 + $0x1c0] sm:$0xff] }
   0xc   :  { %10049 = vst [vmem:[#allocation18_spill] sm:$0xff] %v6801_v35  ;;  %10050 = vst [vmem:[#allocation19_spill] sm:$0xff] %v6814_v39  ;;  %v6816_v40 = vpack.c.bf16 %v90_v37, %v82_v36  ;;  %4205 = vmatprep.subr.bf16.mxu1 %v6789_v31  ;;  %v6828_v44 = vpack.c.bf16 %v92_v41, %v84_v38  ;;  %v83_v45 = vld [vmem:[%s9762_s1 + $0x190] sm:$0xff]  ;;  %v98_v47 = vld [vmem:[%s9762_s1 + $0x208] sm:$0xff]  ;;  %v6849_v51 = vpack.c.bf16 %v89_v43, %v81_v42 }
   0xd   :  { %v91_v46 = vld [vmem:[%s9762_s1 + $0x1d0] sm:$0xff]  ;;  %v106_v48 = vld [vmem:[%s9762_s1 + $0x248] sm:$0xff]  ;;  %v100_v49 = vld [vmem:[%s9762_s1 + $0x218] sm:$0xff] }
   0xe   :  { %10051 = vst [vmem:[#allocation20_spill] sm:$0xff] %v6816_v40  ;;  %10052 = vst [vmem:[#allocation21_spill] sm:$0xff] %v6828_v44  ;;  %v108_v50 = vld [vmem:[%s9762_s1 + $0x258] sm:$0xff]  ;;  %4143 = vmatpush1.bf16.msra.mxu0 %v6801_v35  ;;  %v6853_v52 = vpack.c.bf16 %v91_v46, %v83_v45  ;;  %v6855_v53 = vpack.c.bf16 %v106_v48, %v98_v47  ;;  %v97_v54 = vld [vmem:[%s9762_s1 + $0x200] sm:$0xff] }
   0xf   :  { %10053 = vst [vmem:[#allocation22_spill] sm:$0xff] %v6849_v51  ;;  %4207 = vmatpush1.bf16.msra.mxu1 %v6814_v39  ;;  %4145 = vmatprep.subr.bf16.mxu0 %v6816_v40  ;;  %v105_v55 = vld [vmem:[%s9762_s1 + $0x240] sm:$0xff]  ;;  %v99_v56 = vld [vmem:[%s9762_s1 + $0x210] sm:$0xff]  ;;  %v6867_v57 = vpack.c.bf16 %v108_v50, %v100_v49  ;;  %v114_v59 = vld [vmem:[%s9762_s1 + $0x288] sm:$0xff] }
  0x10   :  { %10054 = vst [vmem:[#allocation23_spill] sm:$0xff] %v6853_v52  ;;  %10055 = vst [vmem:[#allocation24_spill] sm:$0xff] %v6855_v53  ;;  %4209 = vmatprep.subr.bf16.mxu1 %v6828_v44  ;;  %v107_v58 = vld [vmem:[%s9762_s1 + $0x250] sm:$0xff]  ;;  %v122_v60 = vld [vmem:[%s9762_s1 + $0x2c8] sm:$0xff]  ;;  %v6885_v63 = vpack.c.bf16 %v105_v55, %v97_v54 }
  0x11   :  { %10056 = vst [vmem:[#allocation25_spill] sm:$0xff] %v6867_v57  ;;  %v116_v61 = vld [vmem:[%s9762_s1 + $0x298] sm:$0xff]  ;;  %v6889_v0 = vpack.c.bf16 %v107_v58, %v99_v56  ;;  %v6891_v1 = vpack.c.bf16 %v122_v60, %v114_v59  ;;  %v113_v2 = vld [vmem:[%s9762_s1 + $0x280] sm:$0xff]  ;;  %v115_v5 = vld [vmem:[%s9762_s1 + $0x290] sm:$0xff] }
  0x12   :  { %v124_v62 = vld [vmem:[%s9762_s1 + $0x2d8] sm:$0xff]  ;;  %4147 = vmatpush1.bf16.msra.mxu0 %v6849_v51  ;;  %10057 = vst [vmem:[#allocation26_spill] sm:$0xff] %v6885_v63  ;;  %v121_v4 = vld [vmem:[%s9762_s1 + $0x2c0] sm:$0xff]  ;;  %v123_v10 = vld [vmem:[%s9762_s1 + $0x2d0] sm:$0xff] }
  0x13   :  { %4211 = vmatpush1.bf16.msra.mxu1 %v6853_v52  ;;  %4149 = vmatprep.subr.bf16.mxu0 %v6855_v53  ;;  %10058 = vst [vmem:[#allocation27_spill] sm:$0xff] %v6889_v0  ;;  %10059 = vst [vmem:[#allocation28_spill] sm:$0xff] %v6891_v1  ;;  %v6903_v6 = vpack.c.bf16 %v124_v62, %v116_v61  ;;  %v130_v11 = vld [vmem:[%s9762_s1 + $0x308] sm:$0xff]  ;;  %v132_v14 = vld [vmem:[%s9762_s1 + $0x318] sm:$0xff]  ;;  %v6921_v16 = vpack.c.bf16 %v121_v4, %v113_v2 }
  0x14   :  { %4213 = vmatprep.subr.bf16.mxu1 %v6867_v57  ;;  %v138_v12 = vld [vmem:[%s9762_s1 + $0x348] sm:$0xff]  ;;  %v140_v15 = vld [vmem:[%s9762_s1 + $0x358] sm:$0xff]  ;;  %v6925_v19 = vpack.c.bf16 %v123_v10, %v115_v5  ;;  %v129_v21 = vld [vmem:[%s9762_s1 + $0x300] sm:$0xff] }
  0x15   :  { %10060 = vst [vmem:[#allocation29_spill] sm:$0xff] %v6903_v6  ;;  %10061 = vst [vmem:[#allocation30_spill] sm:$0xff] %v6921_v16  ;;  %v6927_v20 = vpack.c.bf16 %v138_v12, %v130_v11  ;;  %v137_v23 = vld [vmem:[%s9762_s1 + $0x340] sm:$0xff]  ;;  %v131_v24 = vld [vmem:[%s9762_s1 + $0x310] sm:$0xff]  ;;  %v6939_v25 = vpack.c.bf16 %v140_v15, %v132_v14 }
  0x16   :  { %4151 = vmatpush1.bf16.msra.mxu0 %v6885_v63  ;;  %10062 = vst [vmem:[#allocation31_spill] sm:$0xff] %v6925_v19  ;;  %v139_v28 = vld [vmem:[%s9762_s1 + $0x350] sm:$0xff]  ;;  %v146_v29 = vld [vmem:[%s9762_s1 + $0x388] sm:$0xff]  ;;  %v148_v32 = vld [vmem:[%s9762_s1 + $0x398] sm:$0xff]  ;;  %v6957_v34 = vpack.c.bf16 %v137_v23, %v129_v21 }
  0x17   :  { %4215 = vmatpush1.bf16.msra.mxu1 %v6889_v0  ;;  %4153 = vmatprep.subr.bf16.mxu0 %v6891_v1  ;;  %10063 = vst [vmem:[#allocation32_spill] sm:$0xff] %v6927_v20  ;;  %10064 = vst [vmem:[#allocation33_spill] sm:$0xff] %v6939_v25  ;;  %v154_v30 = vld [vmem:[%s9762_s1 + $0x3c8] sm:$0xff]  ;;  %v156_v33 = vld [vmem:[%s9762_s1 + $0x3d8] sm:$0xff]  ;;  %v6961_v36 = vpack.c.bf16 %v139_v28, %v131_v24 }
  0x18   :  { %4217 = vmatprep.subr.bf16.mxu1 %v6903_v6  ;;  %10065 = vst [vmem:[#allocation34_spill] sm:$0xff] %v6957_v34  ;;  %v6963_v37 = vpack.c.bf16 %v154_v30, %v146_v29  ;;  %v145_v38 = vld [vmem:[%s9762_s1 + $0x380] sm:$0xff]  ;;  %v147_v42 = vld [vmem:[%s9762_s1 + $0x390] sm:$0xff]  ;;  %v6975_v43 = vpack.c.bf16 %v156_v33, %v148_v32  ;;  %v162_v46 = vld [vmem:[%s9762_s1 + $0x408] sm:$0xff] }
  0x19   :  { %10066 = vst [vmem:[#allocation35_spill] sm:$0xff] %v6961_v36  ;;  %v153_v41 = vld [vmem:[%s9762_s1 + $0x3c0] sm:$0xff]  ;;  %v155_v45 = vld [vmem:[%s9762_s1 + $0x3d0] sm:$0xff]  ;;  %v170_v47 = vld [vmem:[%s9762_s1 + $0x448] sm:$0xff] }
  0x1a   :  { %4155 = vmatpush1.bf16.msra.mxu0 %v6921_v16  ;;  %10067 = vst [vmem:[#allocation36_spill] sm:$0xff] %v6963_v37  ;;  %10068 = vst [vmem:[#allocation37_spill] sm:$0xff] %v6975_v43  ;;  %v164_v48 = vld [vmem:[%s9762_s1 + $0x418] sm:$0xff]  ;;  %v6993_v50 = vpack.c.bf16 %v153_v41, %v145_v38  ;;  %v6997_v54 = vpack.c.bf16 %v155_v45, %v147_v42  ;;  %v6999_v55 = vpack.c.bf16 %v170_v47, %v162_v46  ;;  %v161_v56 = vld [vmem:[%s9762_s1 + $0x400] sm:$0xff] }
  0x1b   :  { %4219 = vmatpush1.bf16.msra.mxu1 %v6925_v19  ;;  %4157 = vmatprep.subr.bf16.mxu0 %v6927_v20  ;;  %v172_v49 = vld [vmem:[%s9762_s1 + $0x458] sm:$0xff]  ;;  %v169_v58 = vld [vmem:[%s9762_s1 + $0x440] sm:$0xff]  ;;  %v163_v59 = vld [vmem:[%s9762_s1 + $0x410] sm:$0xff] }
  0x1c   :  { %4221 = vmatprep.subr.bf16.mxu1 %v6939_v25  ;;  %10069 = vst [vmem:[#allocation38_spill] sm:$0xff] %v6993_v50  ;;  %10070 = vst [vmem:[#allocation39_spill] sm:$0xff] %v6997_v54  ;;  %v7011_v60 = vpack.c.bf16 %v172_v49, %v164_v48  ;;  %v171_v61 = vld [vmem:[%s9762_s1 + $0x450] sm:$0xff]  ;;  %v178_v62 = vld [vmem:[%s9762_s1 + $0x488] sm:$0xff]  ;;  %v7029_v10 = vpack.c.bf16 %v169_v58, %v161_v56 }
  0x1d   :  { %10071 = vst [vmem:[#allocation40_spill] sm:$0xff] %v6999_v55  ;;  %v186_v2 = vld [vmem:[%s9762_s1 + $0x4c8] sm:$0xff]  ;;  %v180_v4 = vld [vmem:[%s9762_s1 + $0x498] sm:$0xff]  ;;  %v7033_v11 = vpack.c.bf16 %v171_v61, %v163_v59  ;;  %v177_v14 = vld [vmem:[%s9762_s1 + $0x480] sm:$0xff] }
  0x1e   :  { %4159 = vmatpush1.bf16.msra.mxu0 %v6957_v34  ;;  %10072 = vst [vmem:[#allocation41_spill] sm:$0xff] %v7011_v60  ;;  %v188_v5 = vld [vmem:[%s9762_s1 + $0x4d8] sm:$0xff]  ;;  %10073 = vst [vmem:[#allocation42_spill] sm:$0xff] %v7029_v10  ;;  %v7035_v12 = vpack.c.bf16 %v186_v2, %v178_v62  ;;  %v185_v15 = vld [vmem:[%s9762_s1 + $0x4c0] sm:$0xff] }
  0x1f   :  { %4223 = vmatpush1.bf16.msra.mxu1 %v6961_v36  ;;  %4161 = vmatprep.subr.bf16.mxu0 %v6963_v37  ;;  %10074 = vst [vmem:[#allocation43_spill] sm:$0xff] %v7033_v11  ;;  %v179_v21 = vld [vmem:[%s9762_s1 + $0x490] sm:$0xff]  ;;  %v7047_v23 = vpack.c.bf16 %v188_v5, %v180_v4  ;;  %v194_v28 = vld [vmem:[%s9762_s1 + $0x508] sm:$0xff]  ;;  %v196_v30 = vld [vmem:[%s9762_s1 + $0x518] sm:$0xff]  ;;  %v7065_v33 = vpack.c.bf16 %v185_v15, %v177_v14 }
  0x20   :  { %4225 = vmatprep.subr.bf16.mxu1 %v6975_v43  ;;  %10075 = vst [vmem:[#allocation44_spill] sm:$0xff] %v7035_v12  ;;  %v187_v24 = vld [vmem:[%s9762_s1 + $0x4d0] sm:$0xff]  ;;  %v202_v29 = vld [vmem:[%s9762_s1 + $0x548] sm:$0xff]  ;;  %v204_v32 = vld [vmem:[%s9762_s1 + $0x558] sm:$0xff] }
  0x21   :  { %10076 = vst [vmem:[#allocation45_spill] sm:$0xff] %v7047_v23  ;;  %10077 = vst [vmem:[#allocation46_spill] sm:$0xff] %v7065_v33  ;;  %v7069_v38 = vpack.c.bf16 %v187_v24, %v179_v21  ;;  %v7071_v41 = vpack.c.bf16 %v202_v29, %v194_v28  ;;  %v193_v42 = vld [vmem:[%s9762_s1 + $0x500] sm:$0xff]  ;;  %v195_v46 = vld [vmem:[%s9762_s1 + $0x510] sm:$0xff]  ;;  %v7083_v47 = vpack.c.bf16 %v204_v32, %v196_v30 }
  0x22   :  { %4163 = vmatpush1.bf16.msra.mxu0 %v6993_v50  ;;  %v201_v45 = vld [vmem:[%s9762_s1 + $0x540] sm:$0xff]  ;;  %v203_v48 = vld [vmem:[%s9762_s1 + $0x550] sm:$0xff]  ;;  %v210_v49 = vld [vmem:[%s9762_s1 + $0x588] sm:$0xff] }
  0x23   :  { %4227 = vmatpush1.bf16.msra.mxu1 %v6997_v54  ;;  %4165 = vmatprep.subr.bf16.mxu0 %v6999_v55  ;;  %10078 = vst [vmem:[#allocation47_spill] sm:$0xff] %v7069_v38  ;;  %10079 = vst [vmem:[#allocation48_spill] sm:$0xff] %v7071_v41  ;;  %v218_v56 = vld [vmem:[%s9762_s1 + $0x5c8] sm:$0xff]  ;;  %v212_v58 = vld [vmem:[%s9762_s1 + $0x598] sm:$0xff]  ;;  %v7101_v61 = vpack.c.bf16 %v201_v45, %v193_v42  ;;  %v7105_v62 = vpack.c.bf16 %v203_v48, %v195_v46 }
  0x24   :  { %4229 = vmatprep.subr.bf16.mxu1 %v7011_v60  ;;  %10080 = vst [vmem:[#allocation49_spill] sm:$0xff] %v7083_v47  ;;  %v220_v59 = vld [vmem:[%s9762_s1 + $0x5d8] sm:$0xff]  ;;  %v7107_v2 = vpack.c.bf16 %v218_v56, %v210_v49  ;;  %v209_v4 = vld [vmem:[%s9762_s1 + $0x580] sm:$0xff]  ;;  %v211_v14 = vld [vmem:[%s9762_s1 + $0x590] sm:$0xff] }
  0x25   :  { %10081 = vst [vmem:[#allocation50_spill] sm:$0xff] %v7101_v61  ;;  %10082 = vst [vmem:[#allocation51_spill] sm:$0xff] %v7105_v62  ;;  %v217_v5 = vld [vmem:[%s9762_s1 + $0x5c0] sm:$0xff]  ;;  %v7119_v15 = vpack.c.bf16 %v220_v59, %v212_v58  ;;  %v219_v21 = vld [vmem:[%s9762_s1 + $0x5d0] sm:$0xff] }
  0x26   :  { %4167 = vmatpush1.bf16.msra.mxu0 %v7029_v10  ;;  %10083 = vst [vmem:[#allocation52_spill] sm:$0xff] %v7107_v2  ;;  %v226_v24 = vld [vmem:[%s9762_s1 + $0x608] sm:$0xff]  ;;  %v228_v29 = vld [vmem:[%s9762_s1 + $0x618] sm:$0xff]  ;;  %v7137_v32 = vpack.c.bf16 %v217_v5, %v209_v4  ;;  %v7141_v42 = vpack.c.bf16 %v219_v21, %v211_v14  ;;  %v225_v46 = vld [vmem:[%s9762_s1 + $0x600] sm:$0xff] }
  0x27   :  { %4231 = vmatpush1.bf16.msra.mxu1 %v7033_v11  ;;  %4169 = vmatprep.subr.bf16.mxu0 %v7035_v12  ;;  %10084 = vst [vmem:[#allocation53_spill] sm:$0xff] %v7119_v15  ;;  %v234_v28 = vld [vmem:[%s9762_s1 + $0x648] sm:$0xff]  ;;  %v236_v30 = vld [vmem:[%s9762_s1 + $0x658] sm:$0xff]  ;;  %v233_v48 = vld [vmem:[%s9762_s1 + $0x640] sm:$0xff] }
  0x28   :  { %4233 = vmatprep.subr.bf16.mxu1 %v7047_v23  ;;  %10085 = vst [vmem:[#allocation54_spill] sm:$0xff] %v7137_v32  ;;  %10086 = vst [vmem:[#allocation55_spill] sm:$0xff] %v7141_v42  ;;  %v7143_v45 = vpack.c.bf16 %v234_v28, %v226_v24  ;;  %v227_v49 = vld [vmem:[%s9762_s1 + $0x610] sm:$0xff]  ;;  %v7155_v56 = vpack.c.bf16 %v236_v30, %v228_v29  ;;  %v242_v59 = vld [vmem:[%s9762_s1 + $0x688] sm:$0xff]  ;;  %v7173_v21 = vpack.c.bf16 %v233_v48, %v225_v46 }
  0x29   :  { %v235_v58 = vld [vmem:[%s9762_s1 + $0x650] sm:$0xff]  ;;  %v250_v4 = vld [vmem:[%s9762_s1 + $0x6c8] sm:$0xff]  ;;  %v244_v5 = vld [vmem:[%s9762_s1 + $0x698] sm:$0xff] }
  0x2a   :  { %4171 = vmatpush1.bf16.msra.mxu0 %v7065_v33  ;;  %10087 = vst [vmem:[#allocation56_spill] sm:$0xff] %v7143_v45  ;;  %10088 = vst [vmem:[#allocation57_spill] sm:$0xff] %v7155_v56  ;;  %v252_v14 = vld [vmem:[%s9762_s1 + $0x6d8] sm:$0xff]  ;;  %v7177_v24 = vpack.c.bf16 %v235_v58, %v227_v49  ;;  %v7179_v28 = vpack.c.bf16 %v250_v4, %v242_v59  ;;  %v241_v29 = vld [vmem:[%s9762_s1 + $0x680] sm:$0xff] }
  0x2b   :  { %4235 = vmatpush1.bf16.msra.mxu1 %v7069_v38  ;;  %4173 = vmatprep.subr.bf16.mxu0 %v7071_v41  ;;  %10089 = vst [vmem:[#allocation58_spill] sm:$0xff] %v7173_v21  ;;  %v249_v30 = vld [vmem:[%s9762_s1 + $0x6c0] sm:$0xff]  ;;  %v243_v46 = vld [vmem:[%s9762_s1 + $0x690] sm:$0xff]  ;;  %v7191_v48 = vpack.c.bf16 %v252_v14, %v244_v5  ;;  %v258_v58 = vld [vmem:[%s9762_s1 + $0x708] sm:$0xff] }
  0x2c   :  { %4237 = vmatprep.subr.bf16.mxu1 %v7083_v47  ;;  %10090 = vst [vmem:[#allocation59_spill] sm:$0xff] %v7177_v24  ;;  %10091 = vst [vmem:[#allocation60_spill] sm:$0xff] %v7179_v28  ;;  %v251_v49 = vld [vmem:[%s9762_s1 + $0x6d0] sm:$0xff]  ;;  %v266_v59 = vld [vmem:[%s9762_s1 + $0x748] sm:$0xff]  ;;  %v7209_v14 = vpack.c.bf16 %v249_v30, %v241_v29 }
  0x2d   :  { %10092 = vst [vmem:[#allocation61_spill] sm:$0xff] %v7191_v48  ;;  %v260_v4 = vld [vmem:[%s9762_s1 + $0x718] sm:$0xff]  ;;  %v7213_v7 = vpack.c.bf16 %v251_v49, %v243_v46  ;;  %v259_v29 = vld [vmem:[%s9762_s1 + $0x710] sm:$0xff]  ;;  %v274_v49 = vld [vmem:[%s9762_s1 + $0x788] sm:$0xff] }
  0x2e   :  { %4175 = vmatpush1.bf16.msra.mxu0 %v7101_v61  ;;  %v268_v5 = vld [vmem:[%s9762_s1 + $0x758] sm:$0xff]  ;;  %10093 = vst [vmem:[#allocation62_spill] sm:$0xff] %v7209_v14  ;;  %v267_v46 = vld [vmem:[%s9762_s1 + $0x750] sm:$0xff] }
  0x2f   :  { %4239 = vmatpush1.bf16.msra.mxu1 %v7105_v62  ;;  %4177 = vmatprep.subr.bf16.mxu0 %v7107_v2  ;;  %10094 = vst [vmem:[#allocation63_spill] sm:$0xff] %v7213_v7  ;;  %v7227_v30 = vpack.c.bf16 %v268_v5, %v260_v4  ;;  %v284_v4 = vld [vmem:[%s9762_s1 + $0x7d8] sm:$0xff] }
  0x30   :  { %4241 = vmatprep.subr.bf16.mxu1 %v7119_v15 }
  0x31   :  { %10096 = vst [vmem:[#allocation65_spill] sm:$0xff] %v7227_v30 }
  0x32   :  { %4179 = vmatpush1.bf16.msra.mxu0 %v7137_v32  ;;  %v77_v32 = vld [vmem:[%s9762_s1 + $0x160] sm:$0xff] }
  0x33   :  { %4243 = vmatpush1.bf16.msra.mxu1 %v7141_v42  ;;  %4181 = vmatprep.subr.bf16.mxu0 %v7143_v45  ;;  %v257_v45 = vld [vmem:[%s9762_s1 + $0x700] sm:$0xff] }
  0x34   :  { %4245 = vmatprep.subr.bf16.mxu1 %v7155_v56  ;;  %v7215_v56 = vpack.c.bf16 %v266_v59, %v258_v58  ;;  %v265_v42 = vld [vmem:[%s9762_s1 + $0x740] sm:$0xff]  ;;  %v282_v58 = vld [vmem:[%s9762_s1 + $0x7c8] sm:$0xff]  ;;  %v276_v59 = vld [vmem:[%s9762_s1 + $0x798] sm:$0xff] }
  0x35   :  { %v7245_v5 = vpack.c.bf16 %v265_v42, %v257_v45  ;;  %v275_v42 = vld [vmem:[%s9762_s1 + $0x790] sm:$0xff]  ;;  %v7263_v45 = vpack.c.bf16 %v284_v4, %v276_v59  ;;  %v48_v59 = vld [vmem:[%s9762_s1 + $0x78] sm:$0xff] }
  0x36   :  { %4183 = vmatpush1.bf16.msra.mxu0 %v7173_v21  ;;  %10095 = vst [vmem:[#allocation64_spill] sm:$0xff] %v7215_v56  ;;  %v281_v21 = vld [vmem:[%s9762_s1 + $0x7c0] sm:$0xff] }
  0x37   :  { %4247 = vmatpush1.bf16.msra.mxu1 %v7177_v24  ;;  %4185 = vmatprep.subr.bf16.mxu0 %v7179_v28  ;;  %10097 = vst [vmem:[#allocation66_spill] sm:$0xff] %v7245_v5  ;;  %v7251_v28 = vpack.c.bf16 %v282_v58, %v274_v49  ;;  %v273_v24 = vld [vmem:[%s9762_s1 + $0x780] sm:$0xff]  ;;  %10100 = vst [vmem:[#allocation69_spill] sm:$0xff] %v7263_v45  ;;  %v46_v49 = vld [vmem:[%s9762_s1 + $0x68] sm:$0xff] }
  0x38   :  { %4249 = vmatprep.subr.bf16.mxu1 %v7191_v48  ;;  %v7249_v48 = vpack.c.bf16 %v267_v46, %v259_v29  ;;  %v283_v29 = vld [vmem:[%s9762_s1 + $0x7d0] sm:$0xff]  ;;  %v38_v46 = vld [vmem:[%s9762_s1 + $0x28] sm:$0xff]  ;;  %v40_v58 = vld [vmem:[%s9762_s1 + $0x38] sm:$0xff]  ;;  %v7281_v4 = vpack.c.bf16 %v281_v21, %v273_v24 }
  0x39   :  { %10099 = vst [vmem:[#allocation68_spill] sm:$0xff] %v7251_v28  ;;  %v39_v21 = vld [vmem:[%s9762_s1 + $0x30] sm:$0xff]  ;;  %v7299_v24 = vpack.c.bf16 %v48_v59, %v40_v58  ;;  %v64_v58 = vld [vmem:[%s9762_s1 + $0xf8] sm:$0xff] }
  0x3a   :  { %4187 = vmatpush1.bf16.msra.mxu0 %v7209_v14  ;;  %10098 = vst [vmem:[#allocation67_spill] sm:$0xff] %v7249_v48  ;;  %10101 = vst [vmem:[#allocation70_spill] sm:$0xff] %v7281_v4  ;;  %v45_v14 = vld [vmem:[%s9762_s1 + $0x60] sm:$0xff] }
  0x3b   :  { %4251 = vmatpush1.bf16.msra.mxu1 %v7213_v7  ;;  %4189 = vmatprep.subr.bf16.mxu0 %v7215_v56  ;;  %v7287_v56 = vpack.c.bf16 %v46_v49, %v38_v46  ;;  %v37_v7 = vld [vmem:[%s9762_s1 + $0x20] sm:$0xff]  ;;  %10104 = vst [vmem:[#allocation73_spill] sm:$0xff] %v7299_v24  ;;  %v62_v46 = vld [vmem:[%s9762_s1 + $0xe8] sm:$0xff]  ;;  %v56_v49 = vld [vmem:[%s9762_s1 + $0xb8] sm:$0xff] }
  0x3c   :  { %4253 = vmatprep.subr.bf16.mxu1 %v7227_v30  ;;  %v7285_v30 = vpack.c.bf16 %v283_v29, %v275_v42  ;;  %v47_v42 = vld [vmem:[%s9762_s1 + $0x70] sm:$0xff]  ;;  %v54_v29 = vld [vmem:[%s9762_s1 + $0xa8] sm:$0xff]  ;;  %v7317_v59 = vpack.c.bf16 %v45_v14, %v37_v7  ;;  %v7335_v14 = vpack.c.bf16 %v64_v58, %v56_v49  ;;  %v80_v49 = vld [vmem:[%s9762_s1 + $0x178] sm:$0xff] }
  0x3d   :  { %10103 = vst [vmem:[#allocation72_spill] sm:$0xff] %v7287_v56  ;;  %v55_v7 = vld [vmem:[%s9762_s1 + $0xb0] sm:$0xff] }
  0x3e   :  { %4191 = vmatpush1.bf16.msra.mxu0 %v7245_v5  ;;  %10102 = vst [vmem:[#allocation71_spill] sm:$0xff] %v7285_v30  ;;  %10105 = vst [vmem:[#allocation74_spill] sm:$0xff] %v7317_v59  ;;  %v61_v5 = vld [vmem:[%s9762_s1 + $0xe0] sm:$0xff] }
  0x3f   :  { %4255 = vmatpush1.bf16.msra.mxu1 %v7249_v48  ;;  %4193 = vmatprep.subr.bf16.mxu0 %v7251_v28  ;;  %v7323_v28 = vpack.c.bf16 %v62_v46, %v54_v29  ;;  %v53_v48 = vld [vmem:[%s9762_s1 + $0xa0] sm:$0xff]  ;;  %10108 = vst [vmem:[#allocation77_spill] sm:$0xff] %v7335_v14  ;;  %v78_v29 = vld [vmem:[%s9762_s1 + $0x168] sm:$0xff]  ;;  %v10109_v46 = vmov 0.0  }
  0x40   :  { %4257 = vmatprep.subr.bf16.mxu1 %v7263_v45  ;;  %v7321_v45 = vpack.c.bf16 %v47_v42, %v39_v21  ;;  %v63_v21 = vld [vmem:[%s9762_s1 + $0xf0] sm:$0xff]  ;;  %v70_v42 = vld [vmem:[%s9762_s1 + $0x128] sm:$0xff]  ;;  %v7355_v58 = vpack.c.bf16 %v61_v5, %v53_v48 }
  0x41   :  { %10107 = vst [vmem:[#allocation76_spill] sm:$0xff] %v7323_v28  ;;  %v71_v48 = vld [vmem:[%s9762_s1 + $0x130] sm:$0xff] }
  0x42   :  { %4195 = vmatpush1.bf16.msra.mxu0 %v7281_v4  ;;  %10106 = vst [vmem:[#allocation75_spill] sm:$0xff] %v7321_v45  ;;  %10110 = vst [vmem:[#allocation78_spill] sm:$0xff] %v7355_v58  ;;  %v69_v4 = vld [vmem:[%s9762_s1 + $0x120] sm:$0xff] }
  0x43   :  { %4259 = vmatpush1.bf16.msra.mxu1 %v7285_v30  ;;  %4261 = vmatprep.subr.bf16.mxu0 %v7287_v56  ;;  %v7359_v56 = vpack.c.bf16 %v63_v21, %v55_v7  ;;  %v7361_v30 = vpack.c.bf16 %v78_v29, %v70_v42  ;;  %v79_v7 = vld [vmem:[%s9762_s1 + $0x170] sm:$0xff]  ;;  %v86_v21 = vld [vmem:[%s9762_s1 + $0x1a8] sm:$0xff]  ;;  %v88_v29 = vld [vmem:[%s9762_s1 + $0x1b8] sm:$0xff] }
  0x44   :  { %4325 = vmatprep.subr.bf16.mxu1 %v7299_v24  ;;  %v72_v24 = vld [vmem:[%s9762_s1 + $0x138] sm:$0xff]  ;;  %v94_v42 = vld [vmem:[%s9762_s1 + $0x1e8] sm:$0xff] }
  0x45   :  { %356 = vmatmul.mubr.f32.vlgmr.msra.gmra.mrb[0].mxu0 %v10109_v46  ;;  %10111 = vst [vmem:[#allocation79_spill] sm:$0xff] %v7359_v56  ;;  %10112 = vst [vmem:[#allocation80_spill] sm:$0xff] %v7361_v30  ;;  %v7373_v5 = vpack.c.bf16 %v80_v49, %v72_v24  ;;  %v96_v24 = vld [vmem:[%s9762_s1 + $0x1f8] sm:$0xff]  ;;  %v7393_v49 = vpack.c.bf16 %v77_v32, %v69_v4  ;;  %v87_v32 = vld [vmem:[%s9762_s1 + $0x1b0] sm:$0xff] }
  0x46   :  { %427 = vmatmul.mubr.f32.vlgmr.msra.gmra.mrb[0].mxu1 %v10109_v46  ;;  %4263 = vmatpush1.bf16.msra.mxu0 %v7317_v59  ;;  %v93_v59 = vld [vmem:[%s9762_s1 + $0x1e0] sm:$0xff]  ;;  %v7411_v4 = vpack.c.bf16 %v96_v24, %v88_v29  ;;  %v112_v29 = vld [vmem:[%s9762_s1 + $0x278] sm:$0xff] }
  0x47   :  { %4327 = vmatpush1.bf16.msra.mxu1 %v7321_v45  ;;  %4265 = vmatprep.subr.bf16.mxu0 %v7323_v28  ;;  %10113 = vst [vmem:[#allocation81_spill] sm:$0xff] %v7373_v5  ;;  %10114 = vst [vmem:[#allocation82_spill] sm:$0xff] %v7393_v49  ;;  %v7399_v28 = vpack.c.bf16 %v94_v42, %v86_v21  ;;  %v85_v45 = vld [vmem:[%s9762_s1 + $0x1a0] sm:$0xff]  ;;  %v110_v21 = vld [vmem:[%s9762_s1 + $0x268] sm:$0xff] }
  0x48   :  { %4329 = vmatprep.subr.bf16.mxu1 %v7335_v14  ;;  %497 = vmatprep.mubr.f32.mxu0 %v10109_v46  ;;  %v7397_v14 = vpack.c.bf16 %v79_v7, %v71_v48  ;;  %10117 = vst [vmem:[#allocation85_spill] sm:$0xff] %v7411_v4  ;;  %v95_v48 = vld [vmem:[%s9762_s1 + $0x1f0] sm:$0xff]  ;;  %v102_v7 = vld [vmem:[%s9762_s1 + $0x228] sm:$0xff]  ;;  %v104_v42 = vld [vmem:[%s9762_s1 + $0x238] sm:$0xff]  ;;  %v7429_v24 = vpack.c.bf16 %v93_v59, %v85_v45 }
  0x49   :  { %568 = vmatprep.mubr.f32.mxu1 %v10109_v46  ;;  %10116 = vst [vmem:[#allocation84_spill] sm:$0xff] %v7399_v28  ;;  %v103_v45 = vld [vmem:[%s9762_s1 + $0x230] sm:$0xff]  ;;  %v7447_v59 = vpack.c.bf16 %v112_v29, %v104_v42  ;;  %v128_v42 = vld [vmem:[%s9762_s1 + $0x2f8] sm:$0xff] }
  0x4a   :  { %4267 = vmatpush1.bf16.msra.mxu0 %v7355_v58  ;;  %10115 = vst [vmem:[#allocation83_spill] sm:$0xff] %v7397_v14  ;;  %10118 = vst [vmem:[#allocation86_spill] sm:$0xff] %v7429_v24  ;;  %v109_v58 = vld [vmem:[%s9762_s1 + $0x260] sm:$0xff] }
  0x4b   :  { %4331 = vmatpush1.bf16.msra.mxu1 %v7359_v56  ;;  %4269 = vmatprep.subr.bf16.mxu0 %v7361_v30  ;;  %v7435_v30 = vpack.c.bf16 %v110_v21, %v102_v7  ;;  %v101_v56 = vld [vmem:[%s9762_s1 + $0x220] sm:$0xff]  ;;  %10121 = vst [vmem:[#allocation89_spill] sm:$0xff] %v7447_v59  ;;  %v126_v7 = vld [vmem:[%s9762_s1 + $0x2e8] sm:$0xff]  ;;  %v120_v21 = vld [vmem:[%s9762_s1 + $0x2b8] sm:$0xff] }
  0x4c   :  { %4333 = vmatprep.subr.bf16.mxu1 %v7373_v5  ;;  %v7433_v5 = vpack.c.bf16 %v95_v48, %v87_v32  ;;  %v111_v32 = vld [vmem:[%s9762_s1 + $0x270] sm:$0xff]  ;;  %v118_v48 = vld [vmem:[%s9762_s1 + $0x2a8] sm:$0xff]  ;;  %v7465_v29 = vpack.c.bf16 %v109_v58, %v101_v56  ;;  %v7483_v58 = vpack.c.bf16 %v128_v42, %v120_v21  ;;  %v144_v21 = vld [vmem:[%s9762_s1 + $0x378] sm:$0xff] }
  0x4d   :  { %10120 = vst [vmem:[#allocation88_spill] sm:$0xff] %v7435_v30  ;;  %v119_v56 = vld [vmem:[%s9762_s1 + $0x2b0] sm:$0xff] }
  0x4e   :  { %4271 = vmatpush1.bf16.msra.mxu0 %v7393_v49  ;;  %10119 = vst [vmem:[#allocation87_spill] sm:$0xff] %v7433_v5  ;;  %10122 = vst [vmem:[#allocation90_spill] sm:$0xff] %v7465_v29  ;;  %v125_v49 = vld [vmem:[%s9762_s1 + $0x2e0] sm:$0xff] }
  0x4f   :  { %4335 = vmatpush1.bf16.msra.mxu1 %v7397_v14  ;;  %4273 = vmatprep.subr.bf16.mxu0 %v7399_v28  ;;  %v7471_v28 = vpack.c.bf16 %v126_v7, %v118_v48  ;;  %v117_v14 = vld [vmem:[%s9762_s1 + $0x2a0] sm:$0xff]  ;;  %10125 = vst [vmem:[#allocation93_spill] sm:$0xff] %v7483_v58  ;;  %v142_v48 = vld [vmem:[%s9762_s1 + $0x368] sm:$0xff]  ;;  %v136_v7 = vld [vmem:[%s9762_s1 + $0x338] sm:$0xff] }
  0x50   :  { %4337 = vmatprep.subr.bf16.mxu1 %v7411_v4  ;;  %v7469_v4 = vpack.c.bf16 %v111_v32, %v103_v45  ;;  %v127_v45 = vld [vmem:[%s9762_s1 + $0x2f0] sm:$0xff]  ;;  %v134_v32 = vld [vmem:[%s9762_s1 + $0x328] sm:$0xff]  ;;  %v7501_v42 = vpack.c.bf16 %v125_v49, %v117_v14 }
  0x51   :  { %10124 = vst [vmem:[#allocation92_spill] sm:$0xff] %v7471_v28  ;;  %v135_v14 = vld [vmem:[%s9762_s1 + $0x330] sm:$0xff] }
  0x52   :  { %4275 = vmatpush1.bf16.msra.mxu0 %v7429_v24  ;;  %10123 = vst [vmem:[#allocation91_spill] sm:$0xff] %v7469_v4  ;;  %10126 = vst [vmem:[#allocation94_spill] sm:$0xff] %v7501_v42  ;;  %v141_v24 = vld [vmem:[%s9762_s1 + $0x360] sm:$0xff] }
  0x53   :  { %4339 = vmatpush1.bf16.msra.mxu1 %v7433_v5  ;;  %4277 = vmatprep.subr.bf16.mxu0 %v7435_v30  ;;  %v7508_v30 = vpack.c.bf16 %v127_v45, %v119_v56  ;;  %v7510_v5 = vpack.c.bf16 %v142_v48, %v134_v32 }
  0x54   :  { %4341 = vmatprep.subr.bf16.mxu1 %v7447_v59  ;;  %v133_v59 = vld [vmem:[%s9762_s1 + $0x320] sm:$0xff] }
  0x55   :  { %10127 = vst [vmem:[#allocation95_spill] sm:$0xff] %v7508_v30  ;;  %10128 = vst [vmem:[#allocation96_spill] sm:$0xff] %v7510_v5 }
  0x56   :  { %4279 = vmatpush1.bf16.msra.mxu0 %v7465_v29 }
  0x57   :  { %4343 = vmatpush1.bf16.msra.mxu1 %v7469_v4  ;;  %4281 = vmatprep.subr.bf16.mxu0 %v7471_v28 }
  0x58   :  { %16 = vsyncpa [#allocation5], 0  ;;  %4345 = vmatprep.subr.bf16.mxu1 %v7483_v58  ;;  %v7519_v49 = vpack.c.bf16 %v144_v21, %v136_v7  ;;  %v143_v56 = vld [vmem:[%s9762_s1 + $0x370] sm:$0xff]  ;;  %v150_v45 = vld [vmem:[%s9762_s1 + $0x3a8] sm:$0xff]  ;;  %v7537_v21 = vpack.c.bf16 %v141_v24, %v133_v59  ;;  %vm3973_vm0 = vcmask 9216  }
  0x59   :  { %v158_v32 = vld [vmem:[%s9762_s1 + $0x3e8] sm:$0xff]  ;;  %v152_v48 = vld [vmem:[%s9762_s1 + $0x3b8] sm:$0xff]  ;;  %v7541_v58 = vpack.c.bf16 %v143_v56, %v135_v14  ;;  %v149_v4 = vld [vmem:[%s9762_s1 + $0x3a0] sm:$0xff] }
  0x5a   :  { %10129 = vst [vmem:[#allocation97_spill] sm:$0xff] %v7519_v49  ;;  %v160_v7 = vld [vmem:[%s9762_s1 + $0x3f8] sm:$0xff]  ;;  %4283 = vmatpush1.bf16.msra.mxu0 %v7501_v42  ;;  %10130 = vst [vmem:[#allocation98_spill] sm:$0xff] %v7537_v21  ;;  %v7543_v28 = vpack.c.bf16 %v158_v32, %v150_v45  ;;  %v157_v29 = vld [vmem:[%s9762_s1 + $0x3e0] sm:$0xff] }
  0x5b   :  { %4347 = vmatpush1.bf16.msra.mxu1 %v7508_v30  ;;  %4285 = vmatprep.subr.bf16.mxu0 %v7510_v5  ;;  %10131 = vst [vmem:[#allocation99_spill] sm:$0xff] %v7541_v58  ;;  %v151_v24 = vld [vmem:[%s9762_s1 + $0x3b0] sm:$0xff]  ;;  %v7555_v59 = vpack.c.bf16 %v160_v7, %v152_v48  ;;  %v166_v56 = vld [vmem:[%s9762_s1 + $0x428] sm:$0xff]  ;;  %v168_v32 = vld [vmem:[%s9762_s1 + $0x438] sm:$0xff]  ;;  %v7573_v7 = vpack.c.bf16 %v157_v29, %v149_v4 }
  0x5c   :  { %10132 = vst [vmem:[#allocation100_spill] sm:$0xff] %v7543_v28  ;;  %4349 = vmatprep.subr.bf16.mxu1 %v7519_v49  ;;  %v159_v14 = vld [vmem:[%s9762_s1 + $0x3f0] sm:$0xff]  ;;  %v174_v45 = vld [vmem:[%s9762_s1 + $0x468] sm:$0xff]  ;;  %v176_v48 = vld [vmem:[%s9762_s1 + $0x478] sm:$0xff] }
  0x5d   :  { %10133 = vst [vmem:[#allocation101_spill] sm:$0xff] %v7555_v59  ;;  %10134 = vst [vmem:[#allocation102_spill] sm:$0xff] %v7573_v7  ;;  %v7577_v49 = vpack.c.bf16 %v159_v14, %v151_v24  ;;  %v7579_v5 = vpack.c.bf16 %v174_v45, %v166_v56  ;;  %v165_v30 = vld [vmem:[%s9762_s1 + $0x420] sm:$0xff]  ;;  %v167_v4 = vld [vmem:[%s9762_s1 + $0x430] sm:$0xff]  ;;  %v7591_v29 = vpack.c.bf16 %v176_v48, %v168_v32 }
  0x5e   :  { %4287 = vmatpush1.bf16.msra.mxu0 %v7537_v21  ;;  %v173_v42 = vld [vmem:[%s9762_s1 + $0x460] sm:$0xff]  ;;  %v175_v24 = vld [vmem:[%s9762_s1 + $0x470] sm:$0xff]  ;;  %v182_v14 = vld [vmem:[%s9762_s1 + $0x4a8] sm:$0xff] }
  0x5f   :  { %4351 = vmatpush1.bf16.msra.mxu1 %v7541_v58  ;;  %4289 = vmatprep.subr.bf16.mxu0 %v7543_v28  ;;  %10135 = vst [vmem:[#allocation103_spill] sm:$0xff] %v7577_v49  ;;  %10136 = vst [vmem:[#allocation104_spill] sm:$0xff] %v7579_v5  ;;  %v190_v56 = vld [vmem:[%s9762_s1 + $0x4e8] sm:$0xff]  ;;  %v184_v45 = vld [vmem:[%s9762_s1 + $0x4b8] sm:$0xff]  ;;  %v7609_v48 = vpack.c.bf16 %v173_v42, %v165_v30 }
  0x60   :  { %4353 = vmatprep.subr.bf16.mxu1 %v7555_v59  ;;  %10137 = vst [vmem:[#allocation105_spill] sm:$0xff] %v7591_v29  ;;  %v192_v32 = vld [vmem:[%s9762_s1 + $0x4f8] sm:$0xff]  ;;  %v7613_v59 = vpack.c.bf16 %v175_v24, %v167_v4  ;;  %v7615_v28 = vpack.c.bf16 %v190_v56, %v182_v14  ;;  %v181_v58 = vld [vmem:[%s9762_s1 + $0x4a0] sm:$0xff]  ;;  %v183_v30 = vld [vmem:[%s9762_s1 + $0x4b0] sm:$0xff] }
  0x61   :  { %10138 = vst [vmem:[#allocation106_spill] sm:$0xff] %v7609_v48  ;;  %v189_v21 = vld [vmem:[%s9762_s1 + $0x4e0] sm:$0xff]  ;;  %v7627_v42 = vpack.c.bf16 %v192_v32, %v184_v45  ;;  %v191_v4 = vld [vmem:[%s9762_s1 + $0x4f0] sm:$0xff]  ;;  %v198_v24 = vld [vmem:[%s9762_s1 + $0x528] sm:$0xff] }
  0x62   :  { %4291 = vmatpush1.bf16.msra.mxu0 %v7573_v7  ;;  %10139 = vst [vmem:[#allocation107_spill] sm:$0xff] %v7613_v59  ;;  %10140 = vst [vmem:[#allocation108_spill] sm:$0xff] %v7615_v28  ;;  %v206_v14 = vld [vmem:[%s9762_s1 + $0x568] sm:$0xff]  ;;  %v200_v56 = vld [vmem:[%s9762_s1 + $0x538] sm:$0xff]  ;;  %v7645_v32 = vpack.c.bf16 %v189_v21, %v181_v58 }
  0x63   :  { %4355 = vmatpush1.bf16.msra.mxu1 %v7577_v49  ;;  %4293 = vmatprep.subr.bf16.mxu0 %v7579_v5  ;;  %10141 = vst [vmem:[#allocation109_spill] sm:$0xff] %v7627_v42  ;;  %v208_v45 = vld [vmem:[%s9762_s1 + $0x578] sm:$0xff]  ;;  %v7651_v5 = vpack.c.bf16 %v206_v14, %v198_v24  ;;  %v197_v49 = vld [vmem:[%s9762_s1 + $0x520] sm:$0xff]  ;;  %v199_v58 = vld [vmem:[%s9762_s1 + $0x530] sm:$0xff] }
  0x64   :  { %4357 = vmatprep.subr.bf16.mxu1 %v7591_v29  ;;  %10142 = vst [vmem:[#allocation110_spill] sm:$0xff] %v7645_v32  ;;  %v7649_v29 = vpack.c.bf16 %v191_v4, %v183_v30  ;;  %v205_v7 = vld [vmem:[%s9762_s1 + $0x560] sm:$0xff]  ;;  %v7663_v21 = vpack.c.bf16 %v208_v45, %v200_v56  ;;  %v207_v30 = vld [vmem:[%s9762_s1 + $0x570] sm:$0xff]  ;;  %v214_v4 = vld [vmem:[%s9762_s1 + $0x5a8] sm:$0xff] }
  0x65   :  { %10144 = vst [vmem:[#allocation112_spill] sm:$0xff] %v7651_v5  ;;  %v222_v24 = vld [vmem:[%s9762_s1 + $0x5e8] sm:$0xff]  ;;  %v216_v14 = vld [vmem:[%s9762_s1 + $0x5b8] sm:$0xff]  ;;  %v7681_v45 = vpack.c.bf16 %v205_v7, %v197_v49  ;;  %v215_v49 = vld [vmem:[%s9762_s1 + $0x5b0] sm:$0xff] }
  0x66   :  { %4295 = vmatpush1.bf16.msra.mxu0 %v7609_v48  ;;  %10143 = vst [vmem:[#allocation111_spill] sm:$0xff] %v7649_v29  ;;  %10145 = vst [vmem:[#allocation113_spill] sm:$0xff] %v7663_v21  ;;  %v224_v56 = vld [vmem:[%s9762_s1 + $0x5f8] sm:$0xff]  ;;  %v221_v48 = vld [vmem:[%s9762_s1 + $0x5e0] sm:$0xff] }
  0x67   :  { %4359 = vmatpush1.bf16.msra.mxu1 %v7613_v59  ;;  %4297 = vmatprep.subr.bf16.mxu0 %v7615_v28  ;;  %10146 = vst [vmem:[#allocation114_spill] sm:$0xff] %v7681_v45  ;;  %v7687_v28 = vpack.c.bf16 %v222_v24, %v214_v4  ;;  %v213_v59 = vld [vmem:[%s9762_s1 + $0x5a0] sm:$0xff]  ;;  %v7699_v7 = vpack.c.bf16 %v224_v56, %v216_v14  ;;  %v238_v4 = vld [vmem:[%s9762_s1 + $0x668] sm:$0xff]  ;;  %v232_v24 = vld [vmem:[%s9762_s1 + $0x638] sm:$0xff] }
  0x68   :  { %4361 = vmatprep.subr.bf16.mxu1 %v7627_v42  ;;  %v7685_v42 = vpack.c.bf16 %v207_v30, %v199_v58  ;;  %v223_v58 = vld [vmem:[%s9762_s1 + $0x5f0] sm:$0xff]  ;;  %v230_v30 = vld [vmem:[%s9762_s1 + $0x628] sm:$0xff]  ;;  %v240_v14 = vld [vmem:[%s9762_s1 + $0x678] sm:$0xff]  ;;  %v7717_v56 = vpack.c.bf16 %v221_v48, %v213_v59 }
  0x69   :  { %10148 = vst [vmem:[#allocation116_spill] sm:$0xff] %v7687_v28  ;;  %10149 = vst [vmem:[#allocation117_spill] sm:$0xff] %v7699_v7  ;;  %v231_v59 = vld [vmem:[%s9762_s1 + $0x630] sm:$0xff]  ;;  %v7735_v48 = vpack.c.bf16 %v240_v14, %v232_v24  ;;  %v256_v24 = vld [vmem:[%s9762_s1 + $0x6f8] sm:$0xff] }
  0x6a   :  { %4299 = vmatpush1.bf16.msra.mxu0 %v7645_v32  ;;  %10147 = vst [vmem:[#allocation115_spill] sm:$0xff] %v7685_v42  ;;  %10150 = vst [vmem:[#allocation118_spill] sm:$0xff] %v7717_v56  ;;  %v237_v32 = vld [vmem:[%s9762_s1 + $0x660] sm:$0xff] }
  0x6b   :  { %4363 = vmatpush1.bf16.msra.mxu1 %v7649_v29  ;;  %4301 = vmatprep.subr.bf16.mxu0 %v7651_v5  ;;  %v7723_v5 = vpack.c.bf16 %v238_v4, %v230_v30  ;;  %v229_v29 = vld [vmem:[%s9762_s1 + $0x620] sm:$0xff]  ;;  %10153 = vst [vmem:[#allocation121_spill] sm:$0xff] %v7735_v48  ;;  %v254_v30 = vld [vmem:[%s9762_s1 + $0x6e8] sm:$0xff]  ;;  %v248_v4 = vld [vmem:[%s9762_s1 + $0x6b8] sm:$0xff] }
  0x6c   :  { %4365 = vmatprep.subr.bf16.mxu1 %v7663_v21  ;;  %v7721_v21 = vpack.c.bf16 %v223_v58, %v215_v49  ;;  %v239_v49 = vld [vmem:[%s9762_s1 + $0x670] sm:$0xff]  ;;  %v246_v58 = vld [vmem:[%s9762_s1 + $0x6a8] sm:$0xff]  ;;  %v7753_v14 = vpack.c.bf16 %v237_v32, %v229_v29  ;;  %v7771_v32 = vpack.c.bf16 %v256_v24, %v248_v4  ;;  %v272_v4 = vld [vmem:[%s9762_s1 + $0x778] sm:$0xff] }
  0x6d   :  { %10152 = vst [vmem:[#allocation120_spill] sm:$0xff] %v7723_v5  ;;  %v247_v29 = vld [vmem:[%s9762_s1 + $0x6b0] sm:$0xff] }
  0x6e   :  { %4303 = vmatpush1.bf16.msra.mxu0 %v7681_v45  ;;  %10151 = vst [vmem:[#allocation119_spill] sm:$0xff] %v7721_v21  ;;  %10154 = vst [vmem:[#allocation122_spill] sm:$0xff] %v7753_v14  ;;  %v253_v45 = vld [vmem:[%s9762_s1 + $0x6e0] sm:$0xff] }
  0x6f   :  { %4367 = vmatpush1.bf16.msra.mxu1 %v7685_v42  ;;  %4305 = vmatprep.subr.bf16.mxu0 %v7687_v28  ;;  %v7759_v28 = vpack.c.bf16 %v254_v30, %v246_v58  ;;  %v245_v42 = vld [vmem:[%s9762_s1 + $0x6a0] sm:$0xff]  ;;  %10157 = vst [vmem:[#allocation125_spill] sm:$0xff] %v7771_v32  ;;  %v270_v58 = vld [vmem:[%s9762_s1 + $0x768] sm:$0xff]  ;;  %v264_v30 = vld [vmem:[%s9762_s1 + $0x738] sm:$0xff] }
  0x70   :  { %4369 = vmatprep.subr.bf16.mxu1 %v7699_v7  ;;  %v7757_v7 = vpack.c.bf16 %v239_v49, %v231_v59  ;;  %v255_v59 = vld [vmem:[%s9762_s1 + $0x6f0] sm:$0xff]  ;;  %v262_v49 = vld [vmem:[%s9762_s1 + $0x728] sm:$0xff]  ;;  %v7789_v24 = vpack.c.bf16 %v253_v45, %v245_v42  ;;  %v7807_v45 = vpack.c.bf16 %v272_v4, %v264_v30  ;;  %v288_v30 = vld [vmem:[%s9762_s1 + $0x7f8] sm:$0xff] }
  0x71   :  { %10156 = vst [vmem:[#allocation124_spill] sm:$0xff] %v7759_v28  ;;  %v263_v42 = vld [vmem:[%s9762_s1 + $0x730] sm:$0xff] }
  0x72   :  { %4307 = vmatpush1.bf16.msra.mxu0 %v7717_v56  ;;  %10155 = vst [vmem:[#allocation123_spill] sm:$0xff] %v7757_v7  ;;  %10158 = vst [vmem:[#allocation126_spill] sm:$0xff] %v7789_v24  ;;  %v269_v56 = vld [vmem:[%s9762_s1 + $0x760] sm:$0xff] }
  0x73   :  { %4371 = vmatpush1.bf16.msra.mxu1 %v7721_v21  ;;  %4309 = vmatprep.subr.bf16.mxu0 %v7723_v5  ;;  %v7795_v5 = vpack.c.bf16 %v270_v58, %v262_v49  ;;  %v261_v21 = vld [vmem:[%s9762_s1 + $0x720] sm:$0xff]  ;;  %10161 = vst [vmem:[#allocation129_spill] sm:$0xff] %v7807_v45  ;;  %v286_v49 = vld [vmem:[%s9762_s1 + $0x7e8] sm:$0xff]  ;;  %v280_v58 = vld [vmem:[%s9762_s1 + $0x7b8] sm:$0xff] }
  0x74   :  { %4373 = vmatprep.subr.bf16.mxu1 %v7735_v48  ;;  %v7793_v48 = vpack.c.bf16 %v255_v59, %v247_v29  ;;  %v271_v29 = vld [vmem:[%s9762_s1 + $0x770] sm:$0xff]  ;;  %v278_v59 = vld [vmem:[%s9762_s1 + $0x7a8] sm:$0xff]  ;;  %v7825_v4 = vpack.c.bf16 %v269_v56, %v261_v21  ;;  %v7840_v21 = vpack.c.bf16 %v288_v30, %v280_v58  ;;  %v10173_v30 = vld [vmem:[#allocation59_spill] sm:$0xff] }
  0x75   :  { %10160 = vst [vmem:[#allocation128_spill] sm:$0xff] %v7795_v5  ;;  %v279_v56 = vld [vmem:[%s9762_s1 + $0x7b0] sm:$0xff] }
  0x76   :  { %4311 = vmatpush1.bf16.msra.mxu0 %v7753_v14  ;;  %10159 = vst [vmem:[#allocation127_spill] sm:$0xff] %v7793_v48  ;;  %10162 = vst [vmem:[#allocation130_spill] sm:$0xff] %v7825_v4  ;;  %v285_v14 = vld [vmem:[%s9762_s1 + $0x7e0] sm:$0xff]  ;;  %v10172_v58 = vld [vmem:[#allocation58_spill] sm:$0xff] }
  0x77   :  { %4375 = vmatpush1.bf16.msra.mxu1 %v7757_v7  ;;  %4313 = vmatprep.subr.bf16.mxu0 %v7759_v28  ;;  %v7831_v28 = vpack.c.bf16 %v286_v49, %v278_v59  ;;  %v277_v7 = vld [vmem:[%s9762_s1 + $0x7a0] sm:$0xff]  ;;  %10165 = vst [vmem:[#allocation133_spill] sm:$0xff] %v7840_v21  ;;  %v10171_v49 = vld [vmem:[#allocation57_spill] sm:$0xff] }
  0x78   :  { %4377 = vmatprep.subr.bf16.mxu1 %v7771_v32  ;;  %v7829_v32 = vpack.c.bf16 %v271_v29, %v263_v42  ;;  %v287_v42 = vld [vmem:[%s9762_s1 + $0x7f0] sm:$0xff]  ;;  %v7849_v29 = vpack.c.bf16 %v285_v14, %v277_v7  ;;  %v10169_v7 = vld [vmem:[#allocation55_spill] sm:$0xff]  ;;  %v10170_v14 = vld [vmem:[#allocation56_spill] sm:$0xff] }
  0x79   :  { %10164 = vst [vmem:[#allocation132_spill] sm:$0xff] %v7831_v28  ;;  %v7853_v59 = vpack.c.bf16 %v287_v42, %v279_v56  ;;  %v10174_v56 = vld [vmem:[#allocation60_spill] sm:$0xff]  ;;  %v10175_v42 = vld [vmem:[#allocation61_spill] sm:$0xff] }
  0x7a   :  { %4315 = vmatpush1.bf16.msra.mxu0 %v7789_v24  ;;  %10163 = vst [vmem:[#allocation131_spill] sm:$0xff] %v7829_v32  ;;  %10166 = vst [vmem:[#allocation134_spill] sm:$0xff] %v7849_v29 }
  0x7b   :  { %4379 = vmatpush1.bf16.msra.mxu1 %v7793_v48  ;;  %4317 = vmatprep.subr.bf16.mxu0 %v7795_v5  ;;  %10167 = vst [vmem:[#allocation135_spill] sm:$0xff] %v7853_v59 }
  0x7c   :  { %4381 = vmatprep.subr.bf16.mxu1 %v7807_v45 }
  0x7e   :  { %4319 = vmatpush1.bf16.msra.mxu0 %v7825_v4 }
  0x7f   :  { %4383 = vmatpush1.bf16.msra.mxu1 %v7829_v32  ;;  %4321 = vmatprep.subr.bf16.mxu0 %v7831_v28 }
  0x80   :  { %4385 = vmatprep.subr.bf16.mxu1 %v7840_v21 }
  0x82   :  { %4323 = vmatpush1.bf16.msra.mxu0 %v7849_v29 }
  0x83   :  { %4387 = vmatpush1.bf16.msra.mxu1 %v7853_v59  ;;  %4389 = vmatprep.subr.bf16.mxu0 %v6709_v3 }
  0x84   :  { %4453 = vmatprep.subr.bf16.mxu1 %v6722_v8 }
  0x85   :  { %498 = vmatmul.mubr.f32.vlgmr.msra.gmra.mrb[2].mxu0 %v10109_v46 }
  0x86   :  { %569 = vmatmul.mubr.f32.vlgmr.msra.gmra.mrb[2].mxu1 %v10109_v46  ;;  %4391 = vmatpush1.bf16.msra.mxu0 %v6724_v9  ;;  %v10168_v46 = vld [vmem:[#allocation54_spill] sm:$0xff] }
  0x87   :  { %4455 = vmatpush1.bf16.msra.mxu1 %v6736_v13  ;;  %4393 = vmatprep.subr.bf16.mxu0 %v6749_v17 }
  0x88   :  { %4457 = vmatprep.subr.bf16.mxu1 %v6751_v18 }
  0x8a   :  { %4395 = vmatpush1.bf16.msra.mxu0 %v6763_v22 }
  0x8b   :  { %4459 = vmatpush1.bf16.msra.mxu1 %v6776_v26  ;;  %4397 = vmatprep.subr.bf16.mxu0 %v6778_v27 }
  0x8c   :  { %4461 = vmatprep.subr.bf16.mxu1 %v6789_v31 }
  0x8e   :  { %4399 = vmatpush1.bf16.msra.mxu0 %v6801_v35 }
  0x8f   :  { %4463 = vmatpush1.bf16.msra.mxu1 %v6814_v39  ;;  %4401 = vmatprep.subr.bf16.mxu0 %v6816_v40 }
  0x90   :  { %4465 = vmatprep.subr.bf16.mxu1 %v6828_v44 }
  0x92   :  { %4403 = vmatpush1.bf16.msra.mxu0 %v6849_v51 }
  0x93   :  { %4467 = vmatpush1.bf16.msra.mxu1 %v6853_v52  ;;  %4405 = vmatprep.subr.bf16.mxu0 %v6855_v53 }
  0x94   :  { %4469 = vmatprep.subr.bf16.mxu1 %v6867_v57 }
  0x96   :  { %4407 = vmatpush1.bf16.msra.mxu0 %v6885_v63 }
  0x97   :  { %4471 = vmatpush1.bf16.msra.mxu1 %v6889_v0  ;;  %4409 = vmatprep.subr.bf16.mxu0 %v6891_v1 }
  0x98   :  { %4473 = vmatprep.subr.bf16.mxu1 %v6903_v6 }
  0x9a   :  { %4411 = vmatpush1.bf16.msra.mxu0 %v6921_v16 }
  0x9b   :  { %4475 = vmatpush1.bf16.msra.mxu1 %v6925_v19  ;;  %4413 = vmatprep.subr.bf16.mxu0 %v6927_v20 }
  0x9c   :  { %4477 = vmatprep.subr.bf16.mxu1 %v6939_v25 }
  0x9e   :  { %4415 = vmatpush1.bf16.msra.mxu0 %v6957_v34 }
  0x9f   :  { %4479 = vmatpush1.bf16.msra.mxu1 %v6961_v36  ;;  %4417 = vmatprep.subr.bf16.mxu0 %v6963_v37 }
  0xa0   :  { %4481 = vmatprep.subr.bf16.mxu1 %v6975_v43 }
  0xa2   :  { %4419 = vmatpush1.bf16.msra.mxu0 %v6993_v50 }
  0xa3   :  { %4483 = vmatpush1.bf16.msra.mxu1 %v6997_v54  ;;  %4421 = vmatprep.subr.bf16.mxu0 %v6999_v55 }
  0xa4   :  { %4485 = vmatprep.subr.bf16.mxu1 %v7011_v60 }
  0xa6   :  { %4423 = vmatpush1.bf16.msra.mxu0 %v7029_v10 }
  0xa7   :  { %4487 = vmatpush1.bf16.msra.mxu1 %v7033_v11  ;;  %4425 = vmatprep.subr.bf16.mxu0 %v7035_v12 }
  0xa8   :  { %4489 = vmatprep.subr.bf16.mxu1 %v7047_v23 }
  0xaa   :  { %4427 = vmatpush1.bf16.msra.mxu0 %v7065_v33 }
  0xab   :  { %4491 = vmatpush1.bf16.msra.mxu1 %v7069_v38  ;;  %4429 = vmatprep.subr.bf16.mxu0 %v7071_v41 }
  0xac   :  { %4493 = vmatprep.subr.bf16.mxu1 %v7083_v47 }
  0xae   :  { %4431 = vmatpush1.bf16.msra.mxu0 %v7101_v61  ;;  %v588_v61 = vlaneseq }
  0xaf   :  { %4495 = vmatpush1.bf16.msra.mxu1 %v7105_v62  ;;  %4433 = vmatprep.subr.bf16.mxu0 %v7107_v2  ;;  %v10176_v62 = vld [vmem:[#allocation62_spill] sm:$0xff]  ;;  %v10177_v2 = vld [vmem:[#allocation63_spill] sm:$0xff] }
  0xb0   :  { %4497 = vmatprep.subr.bf16.mxu1 %v7119_v15  ;;  %v10178_v15 = vld [vmem:[#allocation64_spill] sm:$0xff]  ;;  %v7926_v47 = vshrl.u32 %v588_v61, 7 }
  0xb2   :  { %4435 = vmatpush1.bf16.msra.mxu0 %v10168_v46  ;;  %v10179_v46 = vld [vmem:[#allocation65_spill] sm:$0xff]  ;;  %10188 = vst [vmem:[#allocation136_spill] sm:$0xff] %v7926_v47 }
  0xb3   :  { %4499 = vmatpush1.bf16.msra.mxu1 %v10169_v7  ;;  %4437 = vmatprep.subr.bf16.mxu0 %v10170_v14  ;;  %v10180_v7 = vld [vmem:[#allocation66_spill] sm:$0xff]  ;;  %v10181_v14 = vld [vmem:[#allocation67_spill] sm:$0xff] }
  0xb4   :  { %4501 = vmatprep.subr.bf16.mxu1 %v10171_v49  ;;  %v10182_v49 = vld [vmem:[#allocation68_spill] sm:$0xff] }
  0xb6   :  { %4439 = vmatpush1.bf16.msra.mxu0 %v10172_v58  ;;  %v10183_v58 = vld [vmem:[#allocation69_spill] sm:$0xff] }
  0xb7   :  { %4503 = vmatpush1.bf16.msra.mxu1 %v10173_v30  ;;  %4441 = vmatprep.subr.bf16.mxu0 %v10174_v56  ;;  %v10184_v30 = vld [vmem:[#allocation70_spill] sm:$0xff]  ;;  %v10185_v56 = vld [vmem:[#allocation71_spill] sm:$0xff] }
  0xb8   :  { %4505 = vmatprep.subr.bf16.mxu1 %v10175_v42  ;;  %v10186_v42 = vld [vmem:[#allocation72_spill] sm:$0xff] }
  0xba   :  { %4443 = vmatpush1.bf16.msra.mxu0 %v10176_v62  ;;  %v10187_v62 = vld [vmem:[#allocation73_spill] sm:$0xff] }
  0xbb   :  { %4507 = vmatpush1.bf16.msra.mxu1 %v10177_v2  ;;  %4445 = vmatprep.subr.bf16.mxu0 %v10178_v15  ;;  %v6647_v2 = vmov 1983009808  }
  0xbc   :  { %4509 = vmatprep.subr.bf16.mxu1 %v10179_v46  ;;  %v586_v15 = vunpack.c.l.s4 %v6647_v2  ;;  %v289_v2 = vld [vmem:[%s9761_s0] sm:$0xff] }
  0xbe   :  { %4447 = vmatpush1.bf16.msra.mxu0 %v10180_v7  ;;  %v587_v46 = vunpack.c.0.s8 %v586_v15 }
  0xbf   :  { %4511 = vmatpush1.bf16.msra.mxu1 %v10181_v14  ;;  %4449 = vmatprep.subr.bf16.mxu0 %v10182_v49 }
  0xc0   :  { %4513 = vmatprep.subr.bf16.mxu1 %v10183_v58  ;;  %v7929_v14 = vsub.s32 %v587_v46, %v7926_v47 }
  0xc2   :  { %4451 = vmatpush1.bf16.msra.mxu0 %v10184_v30 }
  0xc3   :  { %4515 = vmatpush1.bf16.msra.mxu1 %v10185_v56  ;;  %4517 = vmatprep.subr.bf16.mxu0 %v10186_v42 }
  0xc4   :  { %4581 = vmatprep.subr.bf16.mxu1 %v10187_v62 }
 0x118   :  { %v357_v7 = vpop.f32.mrb[0].mxu0 }
 0x119   :  { %v428_v49 = vpop.f32.mrb[0].mxu1  ;;  %v359_v58 = vpop.f32.mrb[1].mxu0 }
 0x11a   :  { %v583_v41 = vcombine.low %v357_v7, %v359_v58  ;;  %v430_v30 = vpop.f32.mrb[1].mxu1 }
 0x11b   :  { %v584_v38 = vcombine.low %v428_v49, %v430_v30 }
 0x11c   :  { %v591_v56 = vrot.slane %v583_v41, %v7929_v14 }
 0x11d   :  { %v598_v42 = vrot.slane %v584_v38, %v7929_v14 }
 0x11f   :  { %v599_v62 = vcombine.low %v591_v56, %v598_v42 }
 0x121   :  { %v619_v61 = vadd.f32 %v599_v62, %v289_v2  ;;  %v290_v62 = vld [vmem:[%s9761_s0 + $0x8] sm:$0xff] }
 0x123   :  { %v628_v15 = vrot.slane %v619_v61, 4  ;;  %v4018_v23 = vmul.f32 -1.442695, %v619_v61 }
 0x125   :  { %v4019_v33 = vmul.f32 -1.442695, %v628_v15 }
 0x127   :  { %6440 = vpow2.f32 %v4019_v33 }
 0x128   :  { %6442 = vpow2.f32 %v4018_v23 }
 0x131   :  { %v6441_v58 = vpop.eup %6440 }
 0x132   :  { %v6443_v41 = vpop.eup %6442  ;;  %v633_v56 = vadd.f32 1.0, %v6441_v58 }
 0x133   :  { %v624_v11 = vadd.f32 1.0, %v6443_v41 }
 0x134   :  { %6444 = vrcp.f32 %v633_v56 }
 0x135   :  { %6446 = vrcp.f32 %v624_v11 }
 0x13e   :  { %v6445_v15 = vpop.eup %6444 }
 0x158   :  { %v499_v46 = vpop.f32.mrb[2].mxu0 }
 0x159   :  { %v570_v47 = vpop.f32.mrb[2].mxu1  ;;  %v501_v7 = vpop.f32.mrb[3].mxu0 }
 0x15a   :  { %v600_v49 = vcombine.low %v499_v46, %v501_v7  ;;  %v572_v30 = vpop.f32.mrb[3].mxu1  ;;  %v646_v7 = vmul.f32 0.0, %v6445_v15  ;;  %v10194_v15 = vld [vmem:[#allocation79_spill] sm:$0xff] }
 0x15b   :  { %v601_v12 = vcombine.low %v570_v47, %v572_v30  ;;  %v6447_v47 = vpop.eup %6446 }
 0x15c   :  { %v608_v38 = vrot.slane %v600_v49, %v7929_v14 }
 0x15d   :  { %v615_v42 = vrot.slane %v601_v12, %v7929_v14 }
 0x15f   :  { %v616_v33 = vcombine.low %v608_v38, %v615_v42 }
 0x161   :  { %v620_v23 = vadd.f32 %v616_v33, %v290_v62  ;;  %v10189_v62 = vld [vmem:[#allocation74_spill] sm:$0xff]  ;;  %v10190_v33 = vld [vmem:[#allocation75_spill] sm:$0xff] }
 0x163   :  { %6448 = vtanh.f32 %v620_v23  ;;  %v638_v2 = vrot.slane %v620_v23, 4  ;;  %v10191_v23 = vld [vmem:[#allocation76_spill] sm:$0xff] }
 0x165   :  { %v4020_v61 = vmul.f32 -1.442695, %v638_v2  ;;  %v10192_v2 = vld [vmem:[#allocation77_spill] sm:$0xff] }
 0x167   :  { %6450 = vpow2.f32 %v4020_v61  ;;  %v10193_v61 = vld [vmem:[#allocation78_spill] sm:$0xff] }
 0x16d   :  { %v6449_v46 = vpop.eup %6448 }
 0x16e   :  { %v647_v58 = vmul.f32 %v6449_v46, %v6447_v47  ;;  %v10195_v47 = vld [vmem:[#allocation80_spill] sm:$0xff]  ;;  %v10196_v46 = vld [vmem:[#allocation81_spill] sm:$0xff] }
 0x170   :  { %v7941_v49 = vadd.f32 %v647_v58, %v646_v7  ;;  %v10197_v7 = vld [vmem:[#allocation82_spill] sm:$0xff]  ;;  %v10198_v58 = vld [vmem:[#allocation83_spill] sm:$0xff] }
 0x171   :  { %v6451_v12 = vpop.eup %6450 }
 0x172   :  { %v643_v30 = vadd.f32 1.0, %v6451_v12  ;;  %6452 = vtanh.f32 %v7941_v49  ;;  %v10199_v12 = vld [vmem:[#allocation84_spill] sm:$0xff] }
 0x174   :  { %6454 = vrcp.f32 %v643_v30  ;;  %v10200_v30 = vld [vmem:[#allocation85_spill] sm:$0xff] }
 0x17c   :  { %v6453_v41 = vpop.eup %6452 }
 0x17e   :  { %v6455_v38 = vpop.eup %6454 }
 0x17f   :  { %v650_v56 = vmul.f32 %v6455_v38, %v6453_v41  ;;  %v10201_v41 = vld [vmem:[#allocation86_spill] sm:$0xff]  ;;  %v10202_v38 = vld [vmem:[#allocation87_spill] sm:$0xff] }
 0x181   :  { %v7945_v11 = vrot.slane %v650_v56, %v7929_v14  ;;  %v10203_v56 = vld [vmem:[#allocation88_spill] sm:$0xff] }
 0x183   :  { %v662_v42 = vcombine.high %v7945_v11, %v7945_v11 }
 0x185   :  { %729 = vmatprep.mubr.f32.mxu0 %v662_v42  ;;  %800 = vmatprep.mubr.f32.mxu1 %v662_v42 }
 0x186   :  { %730 = vmatmul.mubr.f32.vlgmr.msra.gmra.mrb[4].mxu0 %v7945_v11  ;;  %801 = vmatmul.mubr.f32.vlgmr.msra.gmra.mrb[4].mxu1 %v7945_v11 }
 0x187   :  { %4519 = vmatpush1.bf16.msra.mxu0 %v10189_v62  ;;  %4583 = vmatpush1.bf16.msra.mxu1 %v10190_v33 }
 0x188   :  { %871 = vmatprep.mubr.f32.mxu0 %v662_v42  ;;  %942 = vmatprep.mubr.f32.mxu1 %v662_v42  ;;  %v10204_v42 = vld [vmem:[#allocation89_spill] sm:$0xff] }
 0x189   :  { %4521 = vmatprep.subr.bf16.mxu0 %v10191_v23  ;;  %4585 = vmatprep.subr.bf16.mxu1 %v10192_v2 }
 0x18b   :  { %4523 = vmatpush1.bf16.msra.mxu0 %v10193_v61  ;;  %4587 = vmatpush1.bf16.msra.mxu1 %v10194_v15  ;;  %v10205_v15 = vld [vmem:[#allocation90_spill] sm:$0xff] }
 0x18c   :  { %4525 = vmatprep.subr.bf16.mxu0 %v10195_v47  ;;  %4589 = vmatprep.subr.bf16.mxu1 %v10196_v46  ;;  %v10206_v47 = vld [vmem:[#allocation91_spill] sm:$0xff]  ;;  %v10207_v46 = vld [vmem:[#allocation92_spill] sm:$0xff] }
 0x18f   :  { %4527 = vmatpush1.bf16.msra.mxu0 %v10197_v7  ;;  %4591 = vmatpush1.bf16.msra.mxu1 %v10198_v58  ;;  %v10208_v7 = vld [vmem:[#allocation93_spill] sm:$0xff]  ;;  %v10209_v58 = vld [vmem:[#allocation94_spill] sm:$0xff] }
 0x190   :  { %4529 = vmatprep.subr.bf16.mxu0 %v10199_v12  ;;  %4593 = vmatprep.subr.bf16.mxu1 %v10200_v30  ;;  %v10210_v12 = vld [vmem:[#allocation95_spill] sm:$0xff]  ;;  %v10211_v30 = vld [vmem:[#allocation96_spill] sm:$0xff] }
 0x193   :  { %4531 = vmatpush1.bf16.msra.mxu0 %v10201_v41  ;;  %4595 = vmatpush1.bf16.msra.mxu1 %v10202_v38  ;;  %v10212_v41 = vld [vmem:[#allocation97_spill] sm:$0xff]  ;;  %v10213_v38 = vld [vmem:[#allocation98_spill] sm:$0xff] }
 0x194   :  { %4533 = vmatprep.subr.bf16.mxu0 %v10203_v56  ;;  %4597 = vmatprep.subr.bf16.mxu1 %v10204_v42  ;;  %v10214_v56 = vld [vmem:[#allocation99_spill] sm:$0xff]  ;;  %v10215_v42 = vld [vmem:[#allocation100_spill] sm:$0xff] }
 0x197   :  { %4535 = vmatpush1.bf16.msra.mxu0 %v10205_v15  ;;  %4599 = vmatpush1.bf16.msra.mxu1 %v10206_v47  ;;  %v10216_v15 = vld [vmem:[#allocation101_spill] sm:$0xff]  ;;  %v10217_v47 = vld [vmem:[#allocation102_spill] sm:$0xff] }
 0x198   :  { %4537 = vmatprep.subr.bf16.mxu0 %v10207_v46  ;;  %4601 = vmatprep.subr.bf16.mxu1 %v10208_v7  ;;  %v10218_v46 = vld [vmem:[#allocation103_spill] sm:$0xff]  ;;  %v10219_v7 = vld [vmem:[#allocation104_spill] sm:$0xff] }
 0x19b   :  { %4539 = vmatpush1.bf16.msra.mxu0 %v10209_v58  ;;  %4603 = vmatpush1.bf16.msra.mxu1 %v10210_v12  ;;  %v10220_v58 = vld [vmem:[#allocation105_spill] sm:$0xff]  ;;  %v10221_v12 = vld [vmem:[#allocation106_spill] sm:$0xff] }
 0x19c   :  { %4541 = vmatprep.subr.bf16.mxu0 %v10211_v30  ;;  %4605 = vmatprep.subr.bf16.mxu1 %v10212_v41  ;;  %v10222_v30 = vld [vmem:[#allocation107_spill] sm:$0xff]  ;;  %v10223_v41 = vld [vmem:[#allocation108_spill] sm:$0xff] }
 0x19f   :  { %4543 = vmatpush1.bf16.msra.mxu0 %v10213_v38  ;;  %4607 = vmatpush1.bf16.msra.mxu1 %v10214_v56  ;;  %v10224_v38 = vld [vmem:[#allocation109_spill] sm:$0xff]  ;;  %v10225_v56 = vld [vmem:[#allocation110_spill] sm:$0xff] }
 0x1a0   :  { %4545 = vmatprep.subr.bf16.mxu0 %v10215_v42  ;;  %4609 = vmatprep.subr.bf16.mxu1 %v10216_v15  ;;  %v10226_v42 = vld [vmem:[#allocation111_spill] sm:$0xff]  ;;  %v10227_v15 = vld [vmem:[#allocation112_spill] sm:$0xff] }
 0x1a3   :  { %4547 = vmatpush1.bf16.msra.mxu0 %v10217_v47  ;;  %4611 = vmatpush1.bf16.msra.mxu1 %v10218_v46  ;;  %v10228_v47 = vld [vmem:[#allocation113_spill] sm:$0xff]  ;;  %v10229_v46 = vld [vmem:[#allocation114_spill] sm:$0xff] }
 0x1a4   :  { %4549 = vmatprep.subr.bf16.mxu0 %v10219_v7  ;;  %4613 = vmatprep.subr.bf16.mxu1 %v10220_v58  ;;  %v10230_v7 = vld [vmem:[#allocation115_spill] sm:$0xff]  ;;  %v10231_v58 = vld [vmem:[#allocation116_spill] sm:$0xff] }
 0x1a7   :  { %4551 = vmatpush1.bf16.msra.mxu0 %v10221_v12  ;;  %4615 = vmatpush1.bf16.msra.mxu1 %v10222_v30  ;;  %v10232_v12 = vld [vmem:[#allocation117_spill] sm:$0xff]  ;;  %v10233_v30 = vld [vmem:[#allocation118_spill] sm:$0xff] }
 0x1a8   :  { %4553 = vmatprep.subr.bf16.mxu0 %v10223_v41  ;;  %4617 = vmatprep.subr.bf16.mxu1 %v10224_v38  ;;  %v10234_v41 = vld [vmem:[#allocation119_spill] sm:$0xff]  ;;  %v10235_v38 = vld [vmem:[#allocation120_spill] sm:$0xff] }
 0x1ab   :  { %4555 = vmatpush1.bf16.msra.mxu0 %v10225_v56  ;;  %4619 = vmatpush1.bf16.msra.mxu1 %v10226_v42  ;;  %v10236_v56 = vld [vmem:[#allocation121_spill] sm:$0xff]  ;;  %v10237_v42 = vld [vmem:[#allocation122_spill] sm:$0xff] }
 0x1ac   :  { %4557 = vmatprep.subr.bf16.mxu0 %v10227_v15  ;;  %4621 = vmatprep.subr.bf16.mxu1 %v10228_v47  ;;  %v10238_v15 = vld [vmem:[#allocation123_spill] sm:$0xff]  ;;  %v10239_v47 = vld [vmem:[#allocation124_spill] sm:$0xff] }
 0x1af   :  { %4559 = vmatpush1.bf16.msra.mxu0 %v10229_v46  ;;  %4623 = vmatpush1.bf16.msra.mxu1 %v10230_v7  ;;  %v10240_v46 = vld [vmem:[#allocation125_spill] sm:$0xff] }
 0x1b0   :  { %4561 = vmatprep.subr.bf16.mxu0 %v10231_v58  ;;  %4625 = vmatprep.subr.bf16.mxu1 %v10232_v12 }
 0x1b3   :  { %4563 = vmatpush1.bf16.msra.mxu0 %v10233_v30  ;;  %4627 = vmatpush1.bf16.msra.mxu1 %v10234_v41 }
 0x1b4   :  { %4565 = vmatprep.subr.bf16.mxu0 %v10235_v38  ;;  %4629 = vmatprep.subr.bf16.mxu1 %v10236_v56 }
 0x1b7   :  { %4567 = vmatpush1.bf16.msra.mxu0 %v10237_v42  ;;  %4631 = vmatpush1.bf16.msra.mxu1 %v10238_v15 }
 0x1b8   :  { %4569 = vmatprep.subr.bf16.mxu0 %v10239_v47  ;;  %4633 = vmatprep.subr.bf16.mxu1 %v10240_v46 }
 0x1bb   :  { %4571 = vmatpush1.bf16.msra.mxu0 %v7789_v24  ;;  %4635 = vmatpush1.bf16.msra.mxu1 %v7793_v48 }
 0x1bc   :  { %4573 = vmatprep.subr.bf16.mxu0 %v7795_v5  ;;  %4637 = vmatprep.subr.bf16.mxu1 %v7807_v45 }
 0x1bf   :  { %4575 = vmatpush1.bf16.msra.mxu0 %v7825_v4  ;;  %4639 = vmatpush1.bf16.msra.mxu1 %v7829_v32 }
 0x1c0   :  { %4577 = vmatprep.subr.bf16.mxu0 %v7831_v28  ;;  %4641 = vmatprep.subr.bf16.mxu1 %v7840_v21 }
 0x1c3   :  { %4579 = vmatpush1.bf16.msra.mxu0 %v7849_v29  ;;  %4643 = vmatpush1.bf16.msra.mxu1 %v7853_v59 }
 0x1c4   :  { %4645 = vmatprep.subr.bf16.mxu0 %v6709_v3  ;;  %4709 = vmatprep.subr.bf16.mxu1 %v6722_v8 }
 0x1c6   :  { %872 = vmatmul.mubr.f32.vlgmr.msra.gmra.mrb[6].mxu0 %v7945_v11  ;;  %943 = vmatmul.mubr.f32.vlgmr.msra.gmra.mrb[6].mxu1 %v7945_v11  ;;  %v10241_v11 = vld [vmem:[#allocation43_spill] sm:$0xff] }
 0x1c7   :  { %4647 = vmatpush1.bf16.msra.mxu0 %v6724_v9  ;;  %4711 = vmatpush1.bf16.msra.mxu1 %v6736_v13 }
 0x1c8   :  { %4649 = vmatprep.subr.bf16.mxu0 %v6749_v17  ;;  %4713 = vmatprep.subr.bf16.mxu1 %v6751_v18 }
 0x1cb   :  { %4651 = vmatpush1.bf16.msra.mxu0 %v6763_v22  ;;  %4715 = vmatpush1.bf16.msra.mxu1 %v6776_v26 }
 0x1cc   :  { %4653 = vmatprep.subr.bf16.mxu0 %v6778_v27  ;;  %4717 = vmatprep.subr.bf16.mxu1 %v6789_v31 }
 0x1cf   :  { %4655 = vmatpush1.bf16.msra.mxu0 %v6801_v35  ;;  %4719 = vmatpush1.bf16.msra.mxu1 %v6814_v39 }
 0x1d0   :  { %4657 = vmatprep.subr.bf16.mxu0 %v6816_v40  ;;  %4721 = vmatprep.subr.bf16.mxu1 %v6828_v44 }
 0x1d3   :  { %4659 = vmatpush1.bf16.msra.mxu0 %v6849_v51  ;;  %4723 = vmatpush1.bf16.msra.mxu1 %v6853_v52 }
 0x1d4   :  { %4661 = vmatprep.subr.bf16.mxu0 %v6855_v53  ;;  %4725 = vmatprep.subr.bf16.mxu1 %v6867_v57 }
 0x1d7   :  { %4663 = vmatpush1.bf16.msra.mxu0 %v6885_v63  ;;  %4727 = vmatpush1.bf16.msra.mxu1 %v6889_v0 }
 0x1d8   :  { %4665 = vmatprep.subr.bf16.mxu0 %v6891_v1  ;;  %4729 = vmatprep.subr.bf16.mxu1 %v6903_v6 }
 0x1db   :  { %4667 = vmatpush1.bf16.msra.mxu0 %v6921_v16  ;;  %4731 = vmatpush1.bf16.msra.mxu1 %v6925_v19 }
 0x1dc   :  { %4669 = vmatprep.subr.bf16.mxu0 %v6927_v20  ;;  %4733 = vmatprep.subr.bf16.mxu1 %v6939_v25  ;;  %v10242_v25 = vld [vmem:[#allocation44_spill] sm:$0xff] }
 0x1df   :  { %4671 = vmatpush1.bf16.msra.mxu0 %v6957_v34  ;;  %4735 = vmatpush1.bf16.msra.mxu1 %v6961_v36  ;;  %v10243_v34 = vld [vmem:[#allocation45_spill] sm:$0xff]  ;;  %v10244_v36 = vld [vmem:[#allocation46_spill] sm:$0xff] }
 0x1e0   :  { %4673 = vmatprep.subr.bf16.mxu0 %v6963_v37  ;;  %4737 = vmatprep.subr.bf16.mxu1 %v6975_v43  ;;  %v10245_v37 = vld [vmem:[#allocation47_spill] sm:$0xff]  ;;  %v10246_v43 = vld [vmem:[#allocation48_spill] sm:$0xff] }
 0x1e3   :  { %4675 = vmatpush1.bf16.msra.mxu0 %v6993_v50  ;;  %4739 = vmatpush1.bf16.msra.mxu1 %v6997_v54  ;;  %v10247_v50 = vld [vmem:[#allocation49_spill] sm:$0xff]  ;;  %v10248_v54 = vld [vmem:[#allocation50_spill] sm:$0xff] }
 0x1e4   :  { %4677 = vmatprep.subr.bf16.mxu0 %v6999_v55  ;;  %4741 = vmatprep.subr.bf16.mxu1 %v7011_v60  ;;  %v10249_v55 = vld [vmem:[#allocation51_spill] sm:$0xff]  ;;  %v10250_v60 = vld [vmem:[#allocation52_spill] sm:$0xff] }
 0x1e7   :  { %4679 = vmatpush1.bf16.msra.mxu0 %v7029_v10  ;;  %4743 = vmatpush1.bf16.msra.mxu1 %v10241_v11  ;;  %v10251_v10 = vld [vmem:[#allocation53_spill] sm:$0xff]  ;;  %v10252_v11 = vld [vmem:[#allocation54_spill] sm:$0xff] }
 0x1e8   :  { %4681 = vmatprep.subr.bf16.mxu0 %v10242_v25  ;;  %4745 = vmatprep.subr.bf16.mxu1 %v10243_v34  ;;  %v10253_v25 = vld [vmem:[#allocation55_spill] sm:$0xff]  ;;  %v10254_v34 = vld [vmem:[#allocation56_spill] sm:$0xff] }
 0x1eb   :  { %4683 = vmatpush1.bf16.msra.mxu0 %v10244_v36  ;;  %4747 = vmatpush1.bf16.msra.mxu1 %v10245_v37  ;;  %v10255_v36 = vld [vmem:[#allocation57_spill] sm:$0xff]  ;;  %v10256_v37 = vld [vmem:[#allocation58_spill] sm:$0xff] }
 0x1ec   :  { %4685 = vmatprep.subr.bf16.mxu0 %v10246_v43  ;;  %4749 = vmatprep.subr.bf16.mxu1 %v10247_v50  ;;  %v10257_v43 = vld [vmem:[#allocation59_spill] sm:$0xff]  ;;  %v10258_v50 = vld [vmem:[#allocation60_spill] sm:$0xff] }
 0x1ef   :  { %4687 = vmatpush1.bf16.msra.mxu0 %v10248_v54  ;;  %4751 = vmatpush1.bf16.msra.mxu1 %v10249_v55  ;;  %v10259_v54 = vld [vmem:[#allocation61_spill] sm:$0xff]  ;;  %v10260_v55 = vld [vmem:[#allocation62_spill] sm:$0xff] }
 0x1f0   :  { %4689 = vmatprep.subr.bf16.mxu0 %v10250_v60  ;;  %4753 = vmatprep.subr.bf16.mxu1 %v10251_v10  ;;  %v10261_v60 = vld [vmem:[#allocation63_spill] sm:$0xff]  ;;  %v10262_v10 = vld [vmem:[#allocation64_spill] sm:$0xff] }
 0x1f3   :  { %4691 = vmatpush1.bf16.msra.mxu0 %v10252_v11  ;;  %4755 = vmatpush1.bf16.msra.mxu1 %v10253_v25  ;;  %v10263_v11 = vld [vmem:[#allocation65_spill] sm:$0xff]  ;;  %v10264_v25 = vld [vmem:[#allocation66_spill] sm:$0xff] }
 0x1f4   :  { %4693 = vmatprep.subr.bf16.mxu0 %v10254_v34  ;;  %4757 = vmatprep.subr.bf16.mxu1 %v10255_v36  ;;  %v10265_v34 = vld [vmem:[#allocation67_spill] sm:$0xff]  ;;  %v10266_v36 = vld [vmem:[#allocation68_spill] sm:$0xff] }
 0x1f7   :  { %4695 = vmatpush1.bf16.msra.mxu0 %v10256_v37  ;;  %4759 = vmatpush1.bf16.msra.mxu1 %v10257_v43  ;;  %v10267_v37 = vld [vmem:[#allocation69_spill] sm:$0xff]  ;;  %v10268_v43 = vld [vmem:[#allocation70_spill] sm:$0xff] }
 0x1f8   :  { %4697 = vmatprep.subr.bf16.mxu0 %v10258_v50  ;;  %4761 = vmatprep.subr.bf16.mxu1 %v10259_v54  ;;  %v10269_v50 = vld [vmem:[#allocation71_spill] sm:$0xff]  ;;  %v10270_v54 = vld [vmem:[#allocation72_spill] sm:$0xff] }
 0x1fb   :  { %4699 = vmatpush1.bf16.msra.mxu0 %v10260_v55  ;;  %4763 = vmatpush1.bf16.msra.mxu1 %v10261_v60  ;;  %v10271_v55 = vld [vmem:[#allocation73_spill] sm:$0xff] }
 0x1fc   :  { %4701 = vmatprep.subr.bf16.mxu0 %v10262_v10  ;;  %4765 = vmatprep.subr.bf16.mxu1 %v10263_v11 }
 0x1ff   :  { %4703 = vmatpush1.bf16.msra.mxu0 %v10264_v25  ;;  %4767 = vmatpush1.bf16.msra.mxu1 %v10265_v34 }
 0x200   :  { %4705 = vmatprep.subr.bf16.mxu0 %v10266_v36  ;;  %4769 = vmatprep.subr.bf16.mxu1 %v10267_v37 }
 0x203   :  { %4707 = vmatpush1.bf16.msra.mxu0 %v10268_v43  ;;  %4771 = vmatpush1.bf16.msra.mxu1 %v10269_v50  ;;  %v4021_v43 = vld [vmem:[%s9761_s0 + $0x10] sm:$0xff] }
 0x204   :  { %4773 = vmatprep.subr.bf16.mxu0 %v10270_v54  ;;  %4837 = vmatprep.subr.bf16.mxu1 %v10271_v55 }
 0x259   :  { %v731_v60 = vpop.f32.mrb[4].mxu0  ;;  %v802_v10 = vpop.f32.mrb[4].mxu1 }
 0x25a   :  { %v733_v20 = vpop.f32.mrb[5].mxu0  ;;  %v804_v11 = vpop.f32.mrb[5].mxu1 }
 0x25b   :  { %v957_v19 = vcombine.low %v731_v60, %v733_v20  ;;  %v958_v25 = vcombine.low %v802_v10, %v804_v11 }
 0x25d   :  { %v965_v34 = vrot.slane %v957_v19, %v7929_v14  ;;  %v972_v36 = vrot.slane %v958_v25, %v7929_v14 }
 0x25f   :  { %v973_v16 = vcombine.low %v965_v34, %v972_v36 }
 0x261   :  { %v993_v50 = vadd.f32 %v4021_v43, %v973_v16  ;;  %v4022_v16 = vld [vmem:[%s9761_s0 + $0x18] sm:$0xff] }
 0x263   :  { %v1002_v37 = vrot.slane %v993_v50, 4  ;;  %v4023_v6 = vmul.f32 -1.442695, %v993_v50 }
 0x265   :  { %v4024_v54 = vmul.f32 -1.442695, %v1002_v37 }
 0x267   :  { %6456 = vpow2.f32 %v4024_v54 }
 0x268   :  { %6458 = vpow2.f32 %v4023_v6 }
 0x271   :  { %v6457_v0 = vpop.eup %6456 }
 0x272   :  { %v6459_v10 = vpop.eup %6458  ;;  %v1007_v25 = vadd.f32 1.0, %v6457_v0 }
 0x273   :  { %v998_v63 = vadd.f32 1.0, %v6459_v10 }
 0x274   :  { %6460 = vrcp.f32 %v1007_v25 }
 0x275   :  { %6462 = vrcp.f32 %v998_v63 }
 0x27e   :  { %v6461_v54 = vpop.eup %6460 }
 0x299   :  { %v873_v55 = vpop.f32.mrb[6].mxu0  ;;  %v944_v1 = vpop.f32.mrb[6].mxu1 }
 0x29a   :  { %v875_v20 = vpop.f32.mrb[7].mxu0  ;;  %v946_v60 = vpop.f32.mrb[7].mxu1 }
 0x29b   :  { %v974_v19 = vcombine.low %v873_v55, %v875_v20  ;;  %v975_v11 = vcombine.low %v944_v1, %v946_v60  ;;  %v6463_v1 = vpop.eup %6462  ;;  %v1020_v55 = vmul.f32 %v6461_v54, %v7941_v49  ;;  %v10272_v49 = vld [vmem:[#allocation79_spill] sm:$0xff]  ;;  %v10278_v54 = vld [vmem:[#allocation85_spill] sm:$0xff] }
 0x29d   :  { %v982_v34 = vrot.slane %v974_v19, %v7929_v14  ;;  %v989_v36 = vrot.slane %v975_v11, %v7929_v14 }
 0x29f   :  { %v990_v37 = vcombine.low %v982_v34, %v989_v36 }
 0x2a1   :  { %v994_v6 = vadd.f32 %v4022_v16, %v990_v37  ;;  %v10273_v16 = vld [vmem:[#allocation80_spill] sm:$0xff]  ;;  %v10274_v37 = vld [vmem:[#allocation81_spill] sm:$0xff] }
 0x2a3   :  { %6464 = vtanh.f32 %v994_v6  ;;  %v1012_v43 = vrot.slane %v994_v6, 4  ;;  %v10275_v6 = vld [vmem:[#allocation82_spill] sm:$0xff] }
 0x2a5   :  { %v4025_v50 = vmul.f32 -1.442695, %v1012_v43  ;;  %v10276_v43 = vld [vmem:[#allocation83_spill] sm:$0xff] }
 0x2a7   :  { %6466 = vpow2.f32 %v4025_v50  ;;  %v10277_v50 = vld [vmem:[#allocation84_spill] sm:$0xff] }
 0x2ad   :  { %v6465_v0 = vpop.eup %6464 }
 0x2ae   :  { %v1021_v20 = vmul.f32 %v6465_v0, %v6463_v1  ;;  %v10279_v1 = vld [vmem:[#allocation86_spill] sm:$0xff]  ;;  %v10280_v0 = vld [vmem:[#allocation87_spill] sm:$0xff] }
 0x2b0   :  { %v8092_v60 = vadd.f32 %v1021_v20, %v1020_v55  ;;  %v10281_v55 = vld [vmem:[#allocation88_spill] sm:$0xff]  ;;  %v10282_v20 = vld [vmem:[#allocation89_spill] sm:$0xff] }
 0x2b1   :  { %v6467_v10 = vpop.eup %6466 }
 0x2b2   :  { %v1017_v19 = vadd.f32 1.0, %v6467_v10  ;;  %6468 = vtanh.f32 %v8092_v60  ;;  %v10283_v10 = vld [vmem:[#allocation90_spill] sm:$0xff] }
 0x2b4   :  { %6470 = vrcp.f32 %v1017_v19  ;;  %v10284_v19 = vld [vmem:[#allocation91_spill] sm:$0xff] }
 0x2bc   :  { %v6469_v11 = vpop.eup %6468 }
 0x2be   :  { %v6471_v25 = vpop.eup %6470 }
 0x2bf   :  { %v1024_v63 = vmul.f32 %v6471_v25, %v6469_v11  ;;  %v10285_v11 = vld [vmem:[#allocation92_spill] sm:$0xff]  ;;  %v10286_v25 = vld [vmem:[#allocation93_spill] sm:$0xff] }
 0x2c1   :  { %v8096_v34 = vrot.slane %v1024_v63, %v7929_v14  ;;  %v10287_v63 = vld [vmem:[#allocation94_spill] sm:$0xff] }
 0x2c3   :  { %v1036_v36 = vcombine.high %v8096_v34, %v8096_v34 }
 0x2c5   :  { %1103 = vmatprep.mubr.f32.mxu0 %v1036_v36  ;;  %1174 = vmatprep.mubr.f32.mxu1 %v1036_v36 }
 0x2c6   :  { %1104 = vmatmul.mubr.f32.vlgmr.msra.gmra.mrb[8].mxu0 %v8096_v34  ;;  %1175 = vmatmul.mubr.f32.vlgmr.msra.gmra.mrb[8].mxu1 %v8096_v34 }
 0x2c7   :  { %4775 = vmatpush1.bf16.msra.mxu0 %v10189_v62  ;;  %4839 = vmatpush1.bf16.msra.mxu1 %v10190_v33 }
 0x2c8   :  { %1245 = vmatprep.mubr.f32.mxu0 %v1036_v36  ;;  %1316 = vmatprep.mubr.f32.mxu1 %v1036_v36  ;;  %v10288_v36 = vld [vmem:[#allocation95_spill] sm:$0xff] }
 0x2c9   :  { %4777 = vmatprep.subr.bf16.mxu0 %v10191_v23  ;;  %4841 = vmatprep.subr.bf16.mxu1 %v10192_v2 }
 0x2cb   :  { %4779 = vmatpush1.bf16.msra.mxu0 %v10193_v61  ;;  %4843 = vmatpush1.bf16.msra.mxu1 %v10272_v49 }
 0x2cc   :  { %4781 = vmatprep.subr.bf16.mxu0 %v10273_v16  ;;  %4845 = vmatprep.subr.bf16.mxu1 %v10274_v37 }
 0x2cf   :  { %4783 = vmatpush1.bf16.msra.mxu0 %v10275_v6  ;;  %4847 = vmatpush1.bf16.msra.mxu1 %v10276_v43 }
 0x2d0   :  { %4785 = vmatprep.subr.bf16.mxu0 %v10277_v50  ;;  %4849 = vmatprep.subr.bf16.mxu1 %v10278_v54  ;;  %v10289_v54 = vld [vmem:[#allocation96_spill] sm:$0xff] }
 0x2d3   :  { %4787 = vmatpush1.bf16.msra.mxu0 %v10279_v1  ;;  %4851 = vmatpush1.bf16.msra.mxu1 %v10280_v0  ;;  %v10290_v1 = vld [vmem:[#allocation97_spill] sm:$0xff]  ;;  %v10291_v0 = vld [vmem:[#allocation98_spill] sm:$0xff] }
 0x2d4   :  { %4789 = vmatprep.subr.bf16.mxu0 %v10281_v55  ;;  %4853 = vmatprep.subr.bf16.mxu1 %v10282_v20  ;;  %v10292_v55 = vld [vmem:[#allocation99_spill] sm:$0xff]  ;;  %v10293_v20 = vld [vmem:[#allocation100_spill] sm:$0xff] }
 0x2d7   :  { %4791 = vmatpush1.bf16.msra.mxu0 %v10283_v10  ;;  %4855 = vmatpush1.bf16.msra.mxu1 %v10284_v19  ;;  %v10294_v10 = vld [vmem:[#allocation101_spill] sm:$0xff]  ;;  %v10295_v19 = vld [vmem:[#allocation102_spill] sm:$0xff] }
 0x2d8   :  { %4793 = vmatprep.subr.bf16.mxu0 %v10285_v11  ;;  %4857 = vmatprep.subr.bf16.mxu1 %v10286_v25  ;;  %v10296_v11 = vld [vmem:[#allocation103_spill] sm:$0xff]  ;;  %v10297_v25 = vld [vmem:[#allocation104_spill] sm:$0xff] }
 0x2db   :  { %4795 = vmatpush1.bf16.msra.mxu0 %v10287_v63  ;;  %4859 = vmatpush1.bf16.msra.mxu1 %v10288_v36  ;;  %v10298_v63 = vld [vmem:[#allocation105_spill] sm:$0xff]  ;;  %v10299_v36 = vld [vmem:[#allocation106_spill] sm:$0xff] }
 0x2dc   :  { %4797 = vmatprep.subr.bf16.mxu0 %v10289_v54  ;;  %4861 = vmatprep.subr.bf16.mxu1 %v10290_v1  ;;  %v10300_v54 = vld [vmem:[#allocation107_spill] sm:$0xff]  ;;  %v10301_v1 = vld [vmem:[#allocation108_spill] sm:$0xff] }
 0x2df   :  { %4799 = vmatpush1.bf16.msra.mxu0 %v10291_v0  ;;  %4863 = vmatpush1.bf16.msra.mxu1 %v10292_v55  ;;  %v10302_v0 = vld [vmem:[#allocation109_spill] sm:$0xff]  ;;  %v10303_v55 = vld [vmem:[#allocation110_spill] sm:$0xff] }
 0x2e0   :  { %4801 = vmatprep.subr.bf16.mxu0 %v10293_v20  ;;  %4865 = vmatprep.subr.bf16.mxu1 %v10294_v10  ;;  %v10304_v20 = vld [vmem:[#allocation111_spill] sm:$0xff]  ;;  %v10305_v10 = vld [vmem:[#allocation112_spill] sm:$0xff] }
 0x2e3   :  { %4803 = vmatpush1.bf16.msra.mxu0 %v10295_v19  ;;  %4867 = vmatpush1.bf16.msra.mxu1 %v10296_v11  ;;  %v10306_v19 = vld [vmem:[#allocation113_spill] sm:$0xff]  ;;  %v10307_v11 = vld [vmem:[#allocation114_spill] sm:$0xff] }
 0x2e4   :  { %4805 = vmatprep.subr.bf16.mxu0 %v10297_v25  ;;  %4869 = vmatprep.subr.bf16.mxu1 %v10298_v63 }
 0x2e7   :  { %4807 = vmatpush1.bf16.msra.mxu0 %v10299_v36  ;;  %4871 = vmatpush1.bf16.msra.mxu1 %v10300_v54 }
 0x2e8   :  { %4809 = vmatprep.subr.bf16.mxu0 %v10301_v1  ;;  %4873 = vmatprep.subr.bf16.mxu1 %v10302_v0 }
 0x2eb   :  { %4811 = vmatpush1.bf16.msra.mxu0 %v10303_v55  ;;  %4875 = vmatpush1.bf16.msra.mxu1 %v10304_v20 }
 0x2ec   :  { %4813 = vmatprep.subr.bf16.mxu0 %v10305_v10  ;;  %4877 = vmatprep.subr.bf16.mxu1 %v10306_v19 }
 0x2ef   :  { %4815 = vmatpush1.bf16.msra.mxu0 %v10307_v11  ;;  %4879 = vmatpush1.bf16.msra.mxu1 %v10230_v7 }
 0x2f0   :  { %4817 = vmatprep.subr.bf16.mxu0 %v10231_v58  ;;  %4881 = vmatprep.subr.bf16.mxu1 %v10232_v12 }
 0x2f3   :  { %4819 = vmatpush1.bf16.msra.mxu0 %v10233_v30  ;;  %4883 = vmatpush1.bf16.msra.mxu1 %v10234_v41 }
 0x2f4   :  { %4821 = vmatprep.subr.bf16.mxu0 %v10235_v38  ;;  %4885 = vmatprep.subr.bf16.mxu1 %v10236_v56 }
 0x2f7   :  { %4823 = vmatpush1.bf16.msra.mxu0 %v10237_v42  ;;  %4887 = vmatpush1.bf16.msra.mxu1 %v10238_v15 }
 0x2f8   :  { %4825 = vmatprep.subr.bf16.mxu0 %v10239_v47  ;;  %4889 = vmatprep.subr.bf16.mxu1 %v10240_v46 }
 0x2fb   :  { %4827 = vmatpush1.bf16.msra.mxu0 %v7789_v24  ;;  %4891 = vmatpush1.bf16.msra.mxu1 %v7793_v48 }
 0x2fc   :  { %4829 = vmatprep.subr.bf16.mxu0 %v7795_v5  ;;  %4893 = vmatprep.subr.bf16.mxu1 %v7807_v45 }
 0x2ff   :  { %4831 = vmatpush1.bf16.msra.mxu0 %v7825_v4  ;;  %4895 = vmatpush1.bf16.msra.mxu1 %v7829_v32 }
 0x300   :  { %4833 = vmatprep.subr.bf16.mxu0 %v7831_v28  ;;  %4897 = vmatprep.subr.bf16.mxu1 %v7840_v21 }
 0x303   :  { %4835 = vmatpush1.bf16.msra.mxu0 %v7849_v29  ;;  %4899 = vmatpush1.bf16.msra.mxu1 %v7853_v59 }
 0x304   :  { %4901 = vmatprep.subr.bf16.mxu0 %v6709_v3  ;;  %4965 = vmatprep.subr.bf16.mxu1 %v6722_v8 }
 0x306   :  { %1246 = vmatmul.mubr.f32.vlgmr.msra.gmra.mrb[10].mxu0 %v8096_v34  ;;  %1317 = vmatmul.mubr.f32.vlgmr.msra.gmra.mrb[10].mxu1 %v8096_v34  ;;  %v10308_v34 = vld [vmem:[#allocation26_spill] sm:$0xff] }
 0x307   :  { %4903 = vmatpush1.bf16.msra.mxu0 %v6724_v9  ;;  %4967 = vmatpush1.bf16.msra.mxu1 %v6736_v13 }
 0x308   :  { %4905 = vmatprep.subr.bf16.mxu0 %v6749_v17  ;;  %4969 = vmatprep.subr.bf16.mxu1 %v6751_v18 }
 0x30b   :  { %4907 = vmatpush1.bf16.msra.mxu0 %v6763_v22  ;;  %4971 = vmatpush1.bf16.msra.mxu1 %v6776_v26 }
 0x30c   :  { %4909 = vmatprep.subr.bf16.mxu0 %v6778_v27  ;;  %4973 = vmatprep.subr.bf16.mxu1 %v6789_v31  ;;  %v10309_v27 = vld [vmem:[#allocation27_spill] sm:$0xff]  ;;  %v10310_v31 = vld [vmem:[#allocation28_spill] sm:$0xff] }
 0x30f   :  { %4911 = vmatpush1.bf16.msra.mxu0 %v6801_v35  ;;  %4975 = vmatpush1.bf16.msra.mxu1 %v6814_v39  ;;  %v10311_v35 = vld [vmem:[#allocation29_spill] sm:$0xff]  ;;  %v10312_v39 = vld [vmem:[#allocation30_spill] sm:$0xff] }
 0x310   :  { %4913 = vmatprep.subr.bf16.mxu0 %v6816_v40  ;;  %4977 = vmatprep.subr.bf16.mxu1 %v6828_v44  ;;  %v10313_v40 = vld [vmem:[#allocation31_spill] sm:$0xff]  ;;  %v10314_v44 = vld [vmem:[#allocation32_spill] sm:$0xff] }
 0x313   :  { %4915 = vmatpush1.bf16.msra.mxu0 %v6849_v51  ;;  %4979 = vmatpush1.bf16.msra.mxu1 %v6853_v52  ;;  %v10315_v51 = vld [vmem:[#allocation33_spill] sm:$0xff]  ;;  %v10316_v52 = vld [vmem:[#allocation34_spill] sm:$0xff] }
 0x314   :  { %4917 = vmatprep.subr.bf16.mxu0 %v6855_v53  ;;  %4981 = vmatprep.subr.bf16.mxu1 %v6867_v57  ;;  %v10317_v53 = vld [vmem:[#allocation35_spill] sm:$0xff]  ;;  %v10318_v57 = vld [vmem:[#allocation36_spill] sm:$0xff] }
 0x317   :  { %4919 = vmatpush1.bf16.msra.mxu0 %v10308_v34  ;;  %4983 = vmatpush1.bf16.msra.mxu1 %v10309_v27  ;;  %v10319_v34 = vld [vmem:[#allocation37_spill] sm:$0xff]  ;;  %v10320_v27 = vld [vmem:[#allocation38_spill] sm:$0xff] }
 0x318   :  { %4921 = vmatprep.subr.bf16.mxu0 %v10310_v31  ;;  %4985 = vmatprep.subr.bf16.mxu1 %v10311_v35  ;;  %v10321_v31 = vld [vmem:[#allocation39_spill] sm:$0xff]  ;;  %v10322_v35 = vld [vmem:[#allocation40_spill] sm:$0xff] }
 0x31b   :  { %4923 = vmatpush1.bf16.msra.mxu0 %v10312_v39  ;;  %4987 = vmatpush1.bf16.msra.mxu1 %v10313_v40  ;;  %v10323_v39 = vld [vmem:[#allocation41_spill] sm:$0xff]  ;;  %v10324_v40 = vld [vmem:[#allocation42_spill] sm:$0xff] }
 0x31c   :  { %4925 = vmatprep.subr.bf16.mxu0 %v10314_v44  ;;  %4989 = vmatprep.subr.bf16.mxu1 %v10315_v51  ;;  %v10325_v44 = vld [vmem:[#allocation43_spill] sm:$0xff]  ;;  %v10326_v51 = vld [vmem:[#allocation44_spill] sm:$0xff] }
 0x31f   :  { %4927 = vmatpush1.bf16.msra.mxu0 %v10316_v52  ;;  %4991 = vmatpush1.bf16.msra.mxu1 %v10317_v53  ;;  %v10327_v52 = vld [vmem:[#allocation45_spill] sm:$0xff]  ;;  %v10328_v53 = vld [vmem:[#allocation46_spill] sm:$0xff] }
 0x320   :  { %4929 = vmatprep.subr.bf16.mxu0 %v10318_v57  ;;  %4993 = vmatprep.subr.bf16.mxu1 %v10319_v34  ;;  %v10329_v57 = vld [vmem:[#allocation47_spill] sm:$0xff]  ;;  %v10330_v34 = vld [vmem:[#allocation48_spill] sm:$0xff] }
 0x323   :  { %4931 = vmatpush1.bf16.msra.mxu0 %v10320_v27  ;;  %4995 = vmatpush1.bf16.msra.mxu1 %v10321_v31  ;;  %v10331_v27 = vld [vmem:[#allocation49_spill] sm:$0xff]  ;;  %v10332_v31 = vld [vmem:[#allocation50_spill] sm:$0xff] }
 0x324   :  { %4933 = vmatprep.subr.bf16.mxu0 %v10322_v35  ;;  %4997 = vmatprep.subr.bf16.mxu1 %v10323_v39  ;;  %v10333_v35 = vld [vmem:[#allocation51_spill] sm:$0xff]  ;;  %v10334_v39 = vld [vmem:[#allocation52_spill] sm:$0xff] }
 0x327   :  { %4935 = vmatpush1.bf16.msra.mxu0 %v10324_v40  ;;  %4999 = vmatpush1.bf16.msra.mxu1 %v10325_v44  ;;  %v10335_v40 = vld [vmem:[#allocation53_spill] sm:$0xff]  ;;  %v10336_v44 = vld [vmem:[#allocation54_spill] sm:$0xff] }
 0x328   :  { %4937 = vmatprep.subr.bf16.mxu0 %v10326_v51  ;;  %5001 = vmatprep.subr.bf16.mxu1 %v10327_v52  ;;  %v10337_v51 = vld [vmem:[#allocation55_spill] sm:$0xff]  ;;  %v10338_v52 = vld [vmem:[#allocation56_spill] sm:$0xff] }
 0x32b   :  { %4939 = vmatpush1.bf16.msra.mxu0 %v10328_v53  ;;  %5003 = vmatpush1.bf16.msra.mxu1 %v10329_v57  ;;  %v10339_v53 = vld [vmem:[#allocation57_spill] sm:$0xff]  ;;  %v10340_v57 = vld [vmem:[#allocation58_spill] sm:$0xff] }
 0x32c   :  { %4941 = vmatprep.subr.bf16.mxu0 %v10330_v34  ;;  %5005 = vmatprep.subr.bf16.mxu1 %v10331_v27  ;;  %v10341_v34 = vld [vmem:[#allocation59_spill] sm:$0xff]  ;;  %v10342_v27 = vld [vmem:[#allocation60_spill] sm:$0xff] }
 0x32f   :  { %4943 = vmatpush1.bf16.msra.mxu0 %v10332_v31  ;;  %5007 = vmatpush1.bf16.msra.mxu1 %v10333_v35  ;;  %v10343_v31 = vld [vmem:[#allocation61_spill] sm:$0xff]  ;;  %v10344_v35 = vld [vmem:[#allocation62_spill] sm:$0xff] }
 0x330   :  { %4945 = vmatprep.subr.bf16.mxu0 %v10334_v39  ;;  %5009 = vmatprep.subr.bf16.mxu1 %v10335_v40  ;;  %v10345_v39 = vld [vmem:[#allocation63_spill] sm:$0xff]  ;;  %v10346_v40 = vld [vmem:[#allocation64_spill] sm:$0xff] }
 0x333   :  { %4947 = vmatpush1.bf16.msra.mxu0 %v10336_v44  ;;  %5011 = vmatpush1.bf16.msra.mxu1 %v10337_v51  ;;  %v10347_v44 = vld [vmem:[#allocation65_spill] sm:$0xff]  ;;  %v10348_v51 = vld [vmem:[#allocation66_spill] sm:$0xff] }
 0x334   :  { %4949 = vmatprep.subr.bf16.mxu0 %v10338_v52  ;;  %5013 = vmatprep.subr.bf16.mxu1 %v10339_v53  ;;  %v10349_v52 = vld [vmem:[#allocation67_spill] sm:$0xff]  ;;  %v10350_v53 = vld [vmem:[#allocation68_spill] sm:$0xff] }
 0x337   :  { %4951 = vmatpush1.bf16.msra.mxu0 %v10340_v57  ;;  %5015 = vmatpush1.bf16.msra.mxu1 %v10341_v34  ;;  %v10351_v57 = vld [vmem:[#allocation69_spill] sm:$0xff]  ;;  %v10352_v34 = vld [vmem:[#allocation70_spill] sm:$0xff] }
 0x338   :  { %4953 = vmatprep.subr.bf16.mxu0 %v10342_v27  ;;  %5017 = vmatprep.subr.bf16.mxu1 %v10343_v31  ;;  %v10353_v27 = vld [vmem:[#allocation71_spill] sm:$0xff]  ;;  %v10354_v31 = vld [vmem:[#allocation72_spill] sm:$0xff] }
 0x33b   :  { %4955 = vmatpush1.bf16.msra.mxu0 %v10344_v35  ;;  %5019 = vmatpush1.bf16.msra.mxu1 %v10345_v39  ;;  %v10355_v35 = vld [vmem:[#allocation73_spill] sm:$0xff] }
 0x33c   :  { %4957 = vmatprep.subr.bf16.mxu0 %v10346_v40  ;;  %5021 = vmatprep.subr.bf16.mxu1 %v10347_v44 }
 0x33f   :  { %4959 = vmatpush1.bf16.msra.mxu0 %v10348_v51  ;;  %5023 = vmatpush1.bf16.msra.mxu1 %v10349_v52 }
 0x340   :  { %4961 = vmatprep.subr.bf16.mxu0 %v10350_v53  ;;  %5025 = vmatprep.subr.bf16.mxu1 %v10351_v57 }
 0x343   :  { %4963 = vmatpush1.bf16.msra.mxu0 %v10352_v34  ;;  %5027 = vmatpush1.bf16.msra.mxu1 %v10353_v27  ;;  %v4026_v34 = vld [vmem:[%s9761_s0 + $0x20] sm:$0xff] }
 0x344   :  { %5029 = vmatprep.subr.bf16.mxu0 %v10354_v31  ;;  %5093 = vmatprep.subr.bf16.mxu1 %v10355_v35 }
 0x399   :  { %v1105_v39 = vpop.f32.mrb[8].mxu0  ;;  %v1176_v40 = vpop.f32.mrb[8].mxu1 }
 0x39a   :  { %v1107_v26 = vpop.f32.mrb[9].mxu0  ;;  %v1178_v44 = vpop.f32.mrb[9].mxu1 }
 0x39b   :  { %v1331_v22 = vcombine.low %v1105_v39, %v1107_v26  ;;  %v1332_v51 = vcombine.low %v1176_v40, %v1178_v44 }
 0x39d   :  { %v1339_v52 = vrot.slane %v1331_v22, %v7929_v14  ;;  %v1346_v53 = vrot.slane %v1332_v51, %v7929_v14 }
 0x39f   :  { %v1347_v18 = vcombine.low %v1339_v52, %v1346_v53 }
 0x3a1   :  { %v1367_v27 = vadd.f32 %v4026_v34, %v1347_v18  ;;  %v4027_v18 = vld [vmem:[%s9761_s0 + $0x28] sm:$0xff] }
 0x3a3   :  { %v1376_v57 = vrot.slane %v1367_v27, 4  ;;  %v4028_v17 = vmul.f32 -1.442695, %v1367_v27 }
 0x3a5   :  { %v4029_v31 = vmul.f32 -1.442695, %v1376_v57 }
 0x3a7   :  { %6472 = vpow2.f32 %v4029_v31 }
 0x3a8   :  { %6474 = vpow2.f32 %v4028_v17 }
 0x3b1   :  { %v6473_v9 = vpop.eup %6472 }
 0x3b2   :  { %v6475_v40 = vpop.eup %6474  ;;  %v1381_v51 = vadd.f32 1.0, %v6473_v9 }
 0x3b3   :  { %v1372_v8 = vadd.f32 1.0, %v6475_v40 }
 0x3b4   :  { %6476 = vrcp.f32 %v1381_v51 }
 0x3b5   :  { %6478 = vrcp.f32 %v1372_v8 }
 0x3d9   :  { %v1247_v35 = vpop.f32.mrb[10].mxu0  ;;  %v1318_v13 = vpop.f32.mrb[10].mxu1 }
 0x3da   :  { %v1249_v26 = vpop.f32.mrb[11].mxu0  ;;  %v1320_v39 = vpop.f32.mrb[11].mxu1 }
 0x3db   :  { %v1348_v22 = vcombine.low %v1247_v35, %v1249_v26  ;;  %v1349_v44 = vcombine.low %v1318_v13, %v1320_v39  ;;  %v6477_v35 = vpop.eup %6476 }
 0x3dc   :  { %v6479_v13 = vpop.eup %6478  ;;  %v1394_v34 = vmul.f32 %v6477_v35, %v8092_v60  ;;  %v10356_v60 = vld [vmem:[#allocation85_spill] sm:$0xff]  ;;  %v10362_v35 = vld [vmem:[#allocation91_spill] sm:$0xff] }
 0x3dd   :  { %v1356_v52 = vrot.slane %v1348_v22, %v7929_v14  ;;  %v1363_v53 = vrot.slane %v1349_v44, %v7929_v14 }
 0x3df   :  { %v1364_v27 = vcombine.low %v1356_v52, %v1363_v53 }
 0x3e1   :  { %v1368_v17 = vadd.f32 %v4027_v18, %v1364_v27  ;;  %v10357_v18 = vld [vmem:[#allocation86_spill] sm:$0xff]  ;;  %v10358_v27 = vld [vmem:[#allocation87_spill] sm:$0xff] }
 0x3e3   :  { %6480 = vtanh.f32 %v1368_v17  ;;  %v1386_v31 = vrot.slane %v1368_v17, 4  ;;  %v10359_v17 = vld [vmem:[#allocation88_spill] sm:$0xff] }
 0x3e5   :  { %v4030_v57 = vmul.f32 -1.442695, %v1386_v31  ;;  %v10360_v31 = vld [vmem:[#allocation89_spill] sm:$0xff] }
 0x3e7   :  { %6482 = vpow2.f32 %v4030_v57  ;;  %v10361_v57 = vld [vmem:[#allocation90_spill] sm:$0xff] }
 0x3ed   :  { %v6481_v9 = vpop.eup %6480 }
 0x3ee   :  { %v1395_v26 = vmul.f32 %v6481_v9, %v6479_v13  ;;  %v10363_v13 = vld [vmem:[#allocation92_spill] sm:$0xff]  ;;  %v10364_v9 = vld [vmem:[#allocation93_spill] sm:$0xff] }
 0x3f0   :  { %v8243_v39 = vadd.f32 %v1395_v26, %v1394_v34  ;;  %v10365_v34 = vld [vmem:[#allocation94_spill] sm:$0xff]  ;;  %v10366_v26 = vld [vmem:[#allocation95_spill] sm:$0xff] }
 0x3f1   :  { %v6483_v40 = vpop.eup %6482 }
 0x3f2   :  { %v1391_v22 = vadd.f32 1.0, %v6483_v40  ;;  %6484 = vtanh.f32 %v8243_v39  ;;  %v10367_v40 = vld [vmem:[#allocation96_spill] sm:$0xff] }
 0x3f4   :  { %6486 = vrcp.f32 %v1391_v22  ;;  %v10368_v22 = vld [vmem:[#allocation97_spill] sm:$0xff] }
 0x3fc   :  { %v6485_v44 = vpop.eup %6484 }
 0x3fe   :  { %v6487_v51 = vpop.eup %6486 }
 0x3ff   :  { %v1398_v8 = vmul.f32 %v6487_v51, %v6485_v44  ;;  %v10369_v44 = vld [vmem:[#allocation98_spill] sm:$0xff]  ;;  %v10370_v51 = vld [vmem:[#allocation99_spill] sm:$0xff] }
 0x401   :  { %v8247_v52 = vrot.slane %v1398_v8, %v7929_v14  ;;  %v10371_v8 = vld [vmem:[#allocation100_spill] sm:$0xff] }
 0x403   :  { %v1410_v53 = vcombine.high %v8247_v52, %v8247_v52 }
 0x405   :  { %1477 = vmatprep.mubr.f32.mxu0 %v1410_v53  ;;  %1548 = vmatprep.mubr.f32.mxu1 %v1410_v53 }
 0x406   :  { %1478 = vmatmul.mubr.f32.vlgmr.msra.gmra.mrb[12].mxu0 %v8247_v52  ;;  %1549 = vmatmul.mubr.f32.vlgmr.msra.gmra.mrb[12].mxu1 %v8247_v52 }
 0x407   :  { %5031 = vmatpush1.bf16.msra.mxu0 %v10189_v62  ;;  %5095 = vmatpush1.bf16.msra.mxu1 %v10190_v33 }
 0x408   :  { %1619 = vmatprep.mubr.f32.mxu0 %v1410_v53  ;;  %1690 = vmatprep.mubr.f32.mxu1 %v1410_v53  ;;  %v10372_v53 = vld [vmem:[#allocation101_spill] sm:$0xff] }
 0x409   :  { %5033 = vmatprep.subr.bf16.mxu0 %v10191_v23  ;;  %5097 = vmatprep.subr.bf16.mxu1 %v10192_v2 }
 0x40b   :  { %5035 = vmatpush1.bf16.msra.mxu0 %v10193_v61  ;;  %5099 = vmatpush1.bf16.msra.mxu1 %v10272_v49 }
 0x40c   :  { %5037 = vmatprep.subr.bf16.mxu0 %v10273_v16  ;;  %5101 = vmatprep.subr.bf16.mxu1 %v10274_v37 }
 0x40f   :  { %5039 = vmatpush1.bf16.msra.mxu0 %v10275_v6  ;;  %5103 = vmatpush1.bf16.msra.mxu1 %v10276_v43 }
 0x410   :  { %5041 = vmatprep.subr.bf16.mxu0 %v10277_v50  ;;  %5105 = vmatprep.subr.bf16.mxu1 %v10356_v60 }
 0x413   :  { %5043 = vmatpush1.bf16.msra.mxu0 %v10357_v18  ;;  %5107 = vmatpush1.bf16.msra.mxu1 %v10358_v27 }
 0x414   :  { %5045 = vmatprep.subr.bf16.mxu0 %v10359_v17  ;;  %5109 = vmatprep.subr.bf16.mxu1 %v10360_v31 }
 0x417   :  { %5047 = vmatpush1.bf16.msra.mxu0 %v10361_v57  ;;  %5111 = vmatpush1.bf16.msra.mxu1 %v10362_v35  ;;  %v10373_v35 = vld [vmem:[#allocation102_spill] sm:$0xff] }
 0x418   :  { %5049 = vmatprep.subr.bf16.mxu0 %v10363_v13  ;;  %5113 = vmatprep.subr.bf16.mxu1 %v10364_v9  ;;  %v10374_v13 = vld [vmem:[#allocation103_spill] sm:$0xff] }
 0x41b   :  { %5051 = vmatpush1.bf16.msra.mxu0 %v10365_v34  ;;  %5115 = vmatpush1.bf16.msra.mxu1 %v10366_v26 }
 0x41c   :  { %5053 = vmatprep.subr.bf16.mxu0 %v10367_v40  ;;  %5117 = vmatprep.subr.bf16.mxu1 %v10368_v22 }
 0x41f   :  { %5055 = vmatpush1.bf16.msra.mxu0 %v10369_v44  ;;  %5119 = vmatpush1.bf16.msra.mxu1 %v10370_v51 }
 0x420   :  { %5057 = vmatprep.subr.bf16.mxu0 %v10371_v8  ;;  %5121 = vmatprep.subr.bf16.mxu1 %v10372_v53 }
 0x423   :  { %5059 = vmatpush1.bf16.msra.mxu0 %v10373_v35  ;;  %5123 = vmatpush1.bf16.msra.mxu1 %v10374_v13 }
 0x424   :  { %5061 = vmatprep.subr.bf16.mxu0 %v10297_v25  ;;  %5125 = vmatprep.subr.bf16.mxu1 %v10298_v63 }
 0x427   :  { %5063 = vmatpush1.bf16.msra.mxu0 %v10299_v36  ;;  %5127 = vmatpush1.bf16.msra.mxu1 %v10300_v54 }
 0x428   :  { %5065 = vmatprep.subr.bf16.mxu0 %v10301_v1  ;;  %5129 = vmatprep.subr.bf16.mxu1 %v10302_v0 }
 0x42b   :  { %5067 = vmatpush1.bf16.msra.mxu0 %v10303_v55  ;;  %5131 = vmatpush1.bf16.msra.mxu1 %v10304_v20 }
 0x42c   :  { %5069 = vmatprep.subr.bf16.mxu0 %v10305_v10  ;;  %5133 = vmatprep.subr.bf16.mxu1 %v10306_v19 }
 0x42f   :  { %5071 = vmatpush1.bf16.msra.mxu0 %v10307_v11  ;;  %5135 = vmatpush1.bf16.msra.mxu1 %v10230_v7 }
 0x430   :  { %5073 = vmatprep.subr.bf16.mxu0 %v10231_v58  ;;  %5137 = vmatprep.subr.bf16.mxu1 %v10232_v12 }
 0x433   :  { %5075 = vmatpush1.bf16.msra.mxu0 %v10233_v30  ;;  %5139 = vmatpush1.bf16.msra.mxu1 %v10234_v41 }
 0x434   :  { %5077 = vmatprep.subr.bf16.mxu0 %v10235_v38  ;;  %5141 = vmatprep.subr.bf16.mxu1 %v10236_v56 }
 0x437   :  { %5079 = vmatpush1.bf16.msra.mxu0 %v10237_v42  ;;  %5143 = vmatpush1.bf16.msra.mxu1 %v10238_v15 }
 0x438   :  { %5081 = vmatprep.subr.bf16.mxu0 %v10239_v47  ;;  %5145 = vmatprep.subr.bf16.mxu1 %v10240_v46 }
 0x43b   :  { %5083 = vmatpush1.bf16.msra.mxu0 %v7789_v24  ;;  %5147 = vmatpush1.bf16.msra.mxu1 %v7793_v48  ;;  %v10375_v24 = vld [vmem:[#allocation9_spill] sm:$0xff] }
 0x43c   :  { %5085 = vmatprep.subr.bf16.mxu0 %v7795_v5  ;;  %5149 = vmatprep.subr.bf16.mxu1 %v7807_v45  ;;  %v10376_v45 = vld [vmem:[#allocation10_spill] sm:$0xff]  ;;  %v10385_v5 = vld [vmem:[#allocation19_spill] sm:$0xff] }
 0x43f   :  { %5087 = vmatpush1.bf16.msra.mxu0 %v7825_v4  ;;  %5151 = vmatpush1.bf16.msra.mxu1 %v7829_v32  ;;  %v10377_v4 = vld [vmem:[#allocation11_spill] sm:$0xff]  ;;  %v10378_v32 = vld [vmem:[#allocation12_spill] sm:$0xff] }
 0x440   :  { %5089 = vmatprep.subr.bf16.mxu0 %v7831_v28  ;;  %5153 = vmatprep.subr.bf16.mxu1 %v7840_v21  ;;  %v10379_v28 = vld [vmem:[#allocation13_spill] sm:$0xff]  ;;  %v10380_v21 = vld [vmem:[#allocation14_spill] sm:$0xff] }
 0x443   :  { %5091 = vmatpush1.bf16.msra.mxu0 %v7849_v29  ;;  %5155 = vmatpush1.bf16.msra.mxu1 %v7853_v59  ;;  %v10381_v29 = vld [vmem:[#allocation15_spill] sm:$0xff]  ;;  %v10382_v59 = vld [vmem:[#allocation16_spill] sm:$0xff] }
 0x444   :  { %5157 = vmatprep.subr.bf16.mxu0 %v6709_v3  ;;  %5221 = vmatprep.subr.bf16.mxu1 %v10375_v24  ;;  %v10383_v3 = vld [vmem:[#allocation17_spill] sm:$0xff]  ;;  %v10384_v24 = vld [vmem:[#allocation18_spill] sm:$0xff] }
 0x446   :  { %1620 = vmatmul.mubr.f32.vlgmr.msra.gmra.mrb[14].mxu0 %v8247_v52  ;;  %1691 = vmatmul.mubr.f32.vlgmr.msra.gmra.mrb[14].mxu1 %v8247_v52  ;;  %v10386_v52 = vld [vmem:[#allocation20_spill] sm:$0xff] }
 0x447   :  { %5159 = vmatpush1.bf16.msra.mxu0 %v10376_v45  ;;  %5223 = vmatpush1.bf16.msra.mxu1 %v10377_v4  ;;  %v10387_v45 = vld [vmem:[#allocation21_spill] sm:$0xff]  ;;  %v10388_v4 = vld [vmem:[#allocation22_spill] sm:$0xff] }
 0x448   :  { %5161 = vmatprep.subr.bf16.mxu0 %v10378_v32  ;;  %5225 = vmatprep.subr.bf16.mxu1 %v10379_v28  ;;  %v10389_v32 = vld [vmem:[#allocation23_spill] sm:$0xff]  ;;  %v10390_v28 = vld [vmem:[#allocation24_spill] sm:$0xff] }
 0x44b   :  { %5163 = vmatpush1.bf16.msra.mxu0 %v10380_v21  ;;  %5227 = vmatpush1.bf16.msra.mxu1 %v10381_v29  ;;  %v10391_v21 = vld [vmem:[#allocation25_spill] sm:$0xff]  ;;  %v10392_v29 = vld [vmem:[#allocation26_spill] sm:$0xff] }
 0x44c   :  { %5165 = vmatprep.subr.bf16.mxu0 %v10382_v59  ;;  %5229 = vmatprep.subr.bf16.mxu1 %v10383_v3  ;;  %v10393_v59 = vld [vmem:[#allocation27_spill] sm:$0xff]  ;;  %v10394_v3 = vld [vmem:[#allocation28_spill] sm:$0xff] }
 0x44f   :  { %5167 = vmatpush1.bf16.msra.mxu0 %v10384_v24  ;;  %5231 = vmatpush1.bf16.msra.mxu1 %v10385_v5  ;;  %v10395_v24 = vld [vmem:[#allocation29_spill] sm:$0xff]  ;;  %v10396_v5 = vld [vmem:[#allocation30_spill] sm:$0xff] }
 0x450   :  { %5169 = vmatprep.subr.bf16.mxu0 %v10386_v52  ;;  %5233 = vmatprep.subr.bf16.mxu1 %v10387_v45  ;;  %v10397_v52 = vld [vmem:[#allocation31_spill] sm:$0xff]  ;;  %v10398_v45 = vld [vmem:[#allocation32_spill] sm:$0xff] }
 0x453   :  { %5171 = vmatpush1.bf16.msra.mxu0 %v10388_v4  ;;  %5235 = vmatpush1.bf16.msra.mxu1 %v10389_v32  ;;  %v10399_v4 = vld [vmem:[#allocation33_spill] sm:$0xff]  ;;  %v10400_v32 = vld [vmem:[#allocation34_spill] sm:$0xff] }
 0x454   :  { %5173 = vmatprep.subr.bf16.mxu0 %v10390_v28  ;;  %5237 = vmatprep.subr.bf16.mxu1 %v10391_v21  ;;  %v10401_v28 = vld [vmem:[#allocation35_spill] sm:$0xff]  ;;  %v10402_v21 = vld [vmem:[#allocation36_spill] sm:$0xff] }
 0x457   :  { %5175 = vmatpush1.bf16.msra.mxu0 %v10392_v29  ;;  %5239 = vmatpush1.bf16.msra.mxu1 %v10393_v59  ;;  %v10403_v29 = vld [vmem:[#allocation37_spill] sm:$0xff]  ;;  %v10404_v59 = vld [vmem:[#allocation38_spill] sm:$0xff] }
 0x458   :  { %5177 = vmatprep.subr.bf16.mxu0 %v10394_v3  ;;  %5241 = vmatprep.subr.bf16.mxu1 %v10395_v24  ;;  %v10405_v3 = vld [vmem:[#allocation39_spill] sm:$0xff]  ;;  %v10406_v24 = vld [vmem:[#allocation40_spill] sm:$0xff] }
 0x45b   :  { %5179 = vmatpush1.bf16.msra.mxu0 %v10396_v5  ;;  %5243 = vmatpush1.bf16.msra.mxu1 %v10397_v52  ;;  %v10407_v5 = vld [vmem:[#allocation41_spill] sm:$0xff]  ;;  %v10408_v52 = vld [vmem:[#allocation42_spill] sm:$0xff] }
 0x45c   :  { %5181 = vmatprep.subr.bf16.mxu0 %v10398_v45  ;;  %5245 = vmatprep.subr.bf16.mxu1 %v10399_v4  ;;  %v10409_v45 = vld [vmem:[#allocation43_spill] sm:$0xff]  ;;  %v10410_v4 = vld [vmem:[#allocation44_spill] sm:$0xff] }
 0x45f   :  { %5183 = vmatpush1.bf16.msra.mxu0 %v10400_v32  ;;  %5247 = vmatpush1.bf16.msra.mxu1 %v10401_v28  ;;  %v10411_v32 = vld [vmem:[#allocation45_spill] sm:$0xff]  ;;  %v10412_v28 = vld [vmem:[#allocation46_spill] sm:$0xff] }
 0x460   :  { %5185 = vmatprep.subr.bf16.mxu0 %v10402_v21  ;;  %5249 = vmatprep.subr.bf16.mxu1 %v10403_v29  ;;  %v10413_v21 = vld [vmem:[#allocation47_spill] sm:$0xff]  ;;  %v10414_v29 = vld [vmem:[#allocation48_spill] sm:$0xff] }
 0x463   :  { %5187 = vmatpush1.bf16.msra.mxu0 %v10404_v59  ;;  %5251 = vmatpush1.bf16.msra.mxu1 %v10405_v3  ;;  %v10415_v59 = vld [vmem:[#allocation49_spill] sm:$0xff]  ;;  %v10416_v3 = vld [vmem:[#allocation50_spill] sm:$0xff] }
 0x464   :  { %5189 = vmatprep.subr.bf16.mxu0 %v10406_v24  ;;  %5253 = vmatprep.subr.bf16.mxu1 %v10407_v5  ;;  %v10417_v24 = vld [vmem:[#allocation51_spill] sm:$0xff]  ;;  %v10418_v5 = vld [vmem:[#allocation52_spill] sm:$0xff] }
 0x467   :  { %5191 = vmatpush1.bf16.msra.mxu0 %v10408_v52  ;;  %5255 = vmatpush1.bf16.msra.mxu1 %v10409_v45  ;;  %v10419_v52 = vld [vmem:[#allocation53_spill] sm:$0xff]  ;;  %v10420_v45 = vld [vmem:[#allocation54_spill] sm:$0xff] }
 0x468   :  { %5193 = vmatprep.subr.bf16.mxu0 %v10410_v4  ;;  %5257 = vmatprep.subr.bf16.mxu1 %v10411_v32  ;;  %v10421_v4 = vld [vmem:[#allocation55_spill] sm:$0xff]  ;;  %v10422_v32 = vld [vmem:[#allocation56_spill] sm:$0xff] }
 0x46b   :  { %5195 = vmatpush1.bf16.msra.mxu0 %v10412_v28  ;;  %5259 = vmatpush1.bf16.msra.mxu1 %v10413_v21  ;;  %v10423_v28 = vld [vmem:[#allocation57_spill] sm:$0xff]  ;;  %v10424_v21 = vld [vmem:[#allocation58_spill] sm:$0xff] }
 0x46c   :  { %5197 = vmatprep.subr.bf16.mxu0 %v10414_v29  ;;  %5261 = vmatprep.subr.bf16.mxu1 %v10415_v59  ;;  %v10425_v29 = vld [vmem:[#allocation59_spill] sm:$0xff]  ;;  %v10426_v59 = vld [vmem:[#allocation60_spill] sm:$0xff] }
 0x46f   :  { %5199 = vmatpush1.bf16.msra.mxu0 %v10416_v3  ;;  %5263 = vmatpush1.bf16.msra.mxu1 %v10417_v24  ;;  %v10427_v3 = vld [vmem:[#allocation61_spill] sm:$0xff]  ;;  %v10428_v24 = vld [vmem:[#allocation62_spill] sm:$0xff] }
 0x470   :  { %5201 = vmatprep.subr.bf16.mxu0 %v10418_v5  ;;  %5265 = vmatprep.subr.bf16.mxu1 %v10419_v52  ;;  %v10429_v5 = vld [vmem:[#allocation63_spill] sm:$0xff]  ;;  %v10430_v52 = vld [vmem:[#allocation64_spill] sm:$0xff] }
 0x473   :  { %5203 = vmatpush1.bf16.msra.mxu0 %v10420_v45  ;;  %5267 = vmatpush1.bf16.msra.mxu1 %v10421_v4  ;;  %v10431_v45 = vld [vmem:[#allocation65_spill] sm:$0xff]  ;;  %v10432_v4 = vld [vmem:[#allocation66_spill] sm:$0xff] }
 0x474   :  { %5205 = vmatprep.subr.bf16.mxu0 %v10422_v32  ;;  %5269 = vmatprep.subr.bf16.mxu1 %v10423_v28  ;;  %v10433_v32 = vld [vmem:[#allocation67_spill] sm:$0xff]  ;;  %v10434_v28 = vld [vmem:[#allocation68_spill] sm:$0xff] }
 0x477   :  { %5207 = vmatpush1.bf16.msra.mxu0 %v10424_v21  ;;  %5271 = vmatpush1.bf16.msra.mxu1 %v10425_v29  ;;  %v10435_v21 = vld [vmem:[#allocation69_spill] sm:$0xff]  ;;  %v10436_v29 = vld [vmem:[#allocation70_spill] sm:$0xff] }
 0x478   :  { %5209 = vmatprep.subr.bf16.mxu0 %v10426_v59  ;;  %5273 = vmatprep.subr.bf16.mxu1 %v10427_v3  ;;  %v10437_v59 = vld [vmem:[#allocation71_spill] sm:$0xff]  ;;  %v10438_v3 = vld [vmem:[#allocation72_spill] sm:$0xff] }
 0x47b   :  { %5211 = vmatpush1.bf16.msra.mxu0 %v10428_v24  ;;  %5275 = vmatpush1.bf16.msra.mxu1 %v10429_v5  ;;  %v10439_v24 = vld [vmem:[#allocation73_spill] sm:$0xff] }
 0x47c   :  { %5213 = vmatprep.subr.bf16.mxu0 %v10430_v52  ;;  %5277 = vmatprep.subr.bf16.mxu1 %v10431_v45 }
 0x47f   :  { %5215 = vmatpush1.bf16.msra.mxu0 %v10432_v4  ;;  %5279 = vmatpush1.bf16.msra.mxu1 %v10433_v32 }
 0x480   :  { %5217 = vmatprep.subr.bf16.mxu0 %v10434_v28  ;;  %5281 = vmatprep.subr.bf16.mxu1 %v10435_v21 }
 0x483   :  { %5219 = vmatpush1.bf16.msra.mxu0 %v10436_v29  ;;  %5283 = vmatpush1.bf16.msra.mxu1 %v10437_v59  ;;  %v4031_v29 = vld [vmem:[%s9761_s0 + $0x30] sm:$0xff] }
 0x484   :  { %5285 = vmatprep.subr.bf16.mxu0 %v10438_v3  ;;  %5349 = vmatprep.subr.bf16.mxu1 %v10439_v24 }
 0x4d9   :  { %v1479_v5 = vpop.f32.mrb[12].mxu0  ;;  %v1550_v52 = vpop.f32.mrb[12].mxu1 }
 0x4da   :  { %v1481_v48 = vpop.f32.mrb[13].mxu0  ;;  %v1552_v45 = vpop.f32.mrb[13].mxu1 }
 0x4db   :  { %v1705_v46 = vcombine.low %v1479_v5, %v1481_v48  ;;  %v1706_v4 = vcombine.low %v1550_v52, %v1552_v45 }
 0x4dd   :  { %v1713_v32 = vrot.slane %v1705_v46, %v7929_v14  ;;  %v1720_v28 = vrot.slane %v1706_v4, %v7929_v14 }
 0x4df   :  { %v1721_v47 = vcombine.low %v1713_v32, %v1720_v28 }
 0x4e1   :  { %v1741_v59 = vadd.f32 %v4031_v29, %v1721_v47 }
 0x4e3   :  { %v1750_v21 = vrot.slane %v1741_v59, 4  ;;  %v4033_v15 = vmul.f32 -1.442695, %v1741_v59 }
 0x4e5   :  { %v4034_v3 = vmul.f32 -1.442695, %v1750_v21  ;;  %v4032_v21 = vld [vmem:[%s9761_s0 + $0x38] sm:$0xff] }
 0x4e7   :  { %6488 = vpow2.f32 %v4034_v3 }
 0x4e8   :  { %6490 = vpow2.f32 %v4033_v15 }
 0x4f1   :  { %v6489_v56 = vpop.eup %6488 }
 0x4f2   :  { %v6491_v45 = vpop.eup %6490  ;;  %v1755_v4 = vadd.f32 1.0, %v6489_v56 }
 0x4f3   :  { %v1746_v38 = vadd.f32 1.0, %v6491_v45 }
 0x4f4   :  { %6492 = vrcp.f32 %v1755_v4 }
 0x4f5   :  { %6494 = vrcp.f32 %v1746_v38 }
 0x519   :  { %v1621_v24 = vpop.f32.mrb[14].mxu0  ;;  %v1692_v42 = vpop.f32.mrb[14].mxu1 }
 0x51a   :  { %v1623_v5 = vpop.f32.mrb[15].mxu0  ;;  %v1694_v48 = vpop.f32.mrb[15].mxu1 }
 0x51b   :  { %v1722_v46 = vcombine.low %v1621_v24, %v1623_v5  ;;  %v1723_v52 = vcombine.low %v1692_v42, %v1694_v48  ;;  %v6493_v24 = vpop.eup %6492 }
 0x51c   :  { %v6495_v47 = vpop.eup %6494  ;;  %v1768_v42 = vmul.f32 %v6493_v24, %v8243_v39  ;;  %v10440_v39 = vld [vmem:[#allocation91_spill] sm:$0xff]  ;;  %v10446_v24 = vld [vmem:[#allocation124_spill] sm:$0xff] }
 0x51d   :  { %v1730_v28 = vrot.slane %v1722_v46, %v7929_v14  ;;  %v1737_v32 = vrot.slane %v1723_v52, %v7929_v14 }
 0x51f   :  { %v1738_v3 = vcombine.low %v1730_v28, %v1737_v32 }
 0x521   :  { %v1742_v29 = vadd.f32 %v4032_v21, %v1738_v3  ;;  %v10441_v21 = vld [vmem:[#allocation92_spill] sm:$0xff] }
 0x522   :  { %v10442_v3 = vld [vmem:[#allocation120_spill] sm:$0xff] }
 0x523   :  { %6496 = vtanh.f32 %v1742_v29  ;;  %v1760_v59 = vrot.slane %v1742_v29, 4  ;;  %v10443_v29 = vld [vmem:[#allocation121_spill] sm:$0xff] }
 0x525   :  { %v4035_v15 = vmul.f32 -1.442695, %v1760_v59  ;;  %v10444_v59 = vld [vmem:[#allocation122_spill] sm:$0xff] }
 0x527   :  { %6498 = vpow2.f32 %v4035_v15  ;;  %v10445_v15 = vld [vmem:[#allocation123_spill] sm:$0xff] }
 0x52d   :  { %v6497_v56 = vpop.eup %6496 }
 0x52e   :  { %v1769_v5 = vmul.f32 %v6497_v56, %v6495_v47  ;;  %v10447_v47 = vld [vmem:[#allocation125_spill] sm:$0xff]  ;;  %v10448_v56 = vld [vmem:[#allocation126_spill] sm:$0xff] }
 0x530   :  { %v8394_v48 = vadd.f32 %v1769_v5, %v1768_v42  ;;  %v10449_v42 = vld [vmem:[#allocation127_spill] sm:$0xff]  ;;  %v10450_v5 = vld [vmem:[#allocation128_spill] sm:$0xff] }
 0x531   :  { %v6499_v45 = vpop.eup %6498 }
 0x532   :  { %v1765_v46 = vadd.f32 1.0, %v6499_v45  ;;  %6500 = vtanh.f32 %v8394_v48  ;;  %v10451_v45 = vld [vmem:[#allocation129_spill] sm:$0xff] }
 0x534   :  { %6502 = vrcp.f32 %v1765_v46  ;;  %v10452_v46 = vld [vmem:[#allocation130_spill] sm:$0xff] }
 0x53c   :  { %v6501_v52 = vpop.eup %6500 }
 0x53e   :  { %v6503_v4 = vpop.eup %6502 }
 0x53f   :  { %v1772_v38 = vmul.f32 %v6503_v4, %v6501_v52  ;;  %v10453_v52 = vld [vmem:[#allocation131_spill] sm:$0xff]  ;;  %v10454_v4 = vld [vmem:[#allocation132_spill] sm:$0xff] }
 0x541   :  { %v8398_v28 = vrot.slane %v1772_v38, %v7929_v14  ;;  %v10455_v38 = vld [vmem:[#allocation133_spill] sm:$0xff] }
 0x543   :  { %v1784_v32 = vcombine.high %v8398_v28, %v8398_v28 }
 0x545   :  { %1851 = vmatprep.mubr.f32.mxu0 %v1784_v32  ;;  %1922 = vmatprep.mubr.f32.mxu1 %v1784_v32 }
 0x546   :  { %1852 = vmatmul.mubr.f32.vlgmr.msra.gmra.mrb[16].mxu0 %v8398_v28  ;;  %1923 = vmatmul.mubr.f32.vlgmr.msra.gmra.mrb[16].mxu1 %v8398_v28 }
 0x547   :  { %5287 = vmatpush1.bf16.msra.mxu0 %v10189_v62  ;;  %5351 = vmatpush1.bf16.msra.mxu1 %v10190_v33 }
 0x548   :  { %1993 = vmatprep.mubr.f32.mxu0 %v1784_v32  ;;  %2064 = vmatprep.mubr.f32.mxu1 %v1784_v32  ;;  %v10456_v32 = vld [vmem:[#allocation134_spill] sm:$0xff] }
 0x549   :  { %5289 = vmatprep.subr.bf16.mxu0 %v10191_v23  ;;  %5353 = vmatprep.subr.bf16.mxu1 %v10192_v2 }
 0x54b   :  { %5291 = vmatpush1.bf16.msra.mxu0 %v10193_v61  ;;  %5355 = vmatpush1.bf16.msra.mxu1 %v10272_v49 }
 0x54c   :  { %5293 = vmatprep.subr.bf16.mxu0 %v10273_v16  ;;  %5357 = vmatprep.subr.bf16.mxu1 %v10274_v37 }
 0x54f   :  { %5295 = vmatpush1.bf16.msra.mxu0 %v10275_v6  ;;  %5359 = vmatpush1.bf16.msra.mxu1 %v10276_v43 }
 0x550   :  { %5297 = vmatprep.subr.bf16.mxu0 %v10277_v50  ;;  %5361 = vmatprep.subr.bf16.mxu1 %v10356_v60 }
 0x553   :  { %5299 = vmatpush1.bf16.msra.mxu0 %v10357_v18  ;;  %5363 = vmatpush1.bf16.msra.mxu1 %v10358_v27 }
 0x554   :  { %5301 = vmatprep.subr.bf16.mxu0 %v10359_v17  ;;  %5365 = vmatprep.subr.bf16.mxu1 %v10360_v31 }
 0x557   :  { %5303 = vmatpush1.bf16.msra.mxu0 %v10361_v57  ;;  %5367 = vmatpush1.bf16.msra.mxu1 %v10440_v39 }
 0x558   :  { %5305 = vmatprep.subr.bf16.mxu0 %v10441_v21  ;;  %5369 = vmatprep.subr.bf16.mxu1 %v10364_v9 }
 0x55b   :  { %5307 = vmatpush1.bf16.msra.mxu0 %v10365_v34  ;;  %5371 = vmatpush1.bf16.msra.mxu1 %v10366_v26 }
 0x55c   :  { %5309 = vmatprep.subr.bf16.mxu0 %v10367_v40  ;;  %5373 = vmatprep.subr.bf16.mxu1 %v10368_v22 }
 0x55f   :  { %5311 = vmatpush1.bf16.msra.mxu0 %v10369_v44  ;;  %5375 = vmatpush1.bf16.msra.mxu1 %v10370_v51 }
 0x560   :  { %5313 = vmatprep.subr.bf16.mxu0 %v10371_v8  ;;  %5377 = vmatprep.subr.bf16.mxu1 %v10372_v53 }
 0x563   :  { %5315 = vmatpush1.bf16.msra.mxu0 %v10373_v35  ;;  %5379 = vmatpush1.bf16.msra.mxu1 %v10374_v13 }
 0x564   :  { %5317 = vmatprep.subr.bf16.mxu0 %v10297_v25  ;;  %5381 = vmatprep.subr.bf16.mxu1 %v10298_v63 }
 0x567   :  { %5319 = vmatpush1.bf16.msra.mxu0 %v10299_v36  ;;  %5383 = vmatpush1.bf16.msra.mxu1 %v10300_v54 }
 0x568   :  { %5321 = vmatprep.subr.bf16.mxu0 %v10301_v1  ;;  %5385 = vmatprep.subr.bf16.mxu1 %v10302_v0 }
 0x56b   :  { %5323 = vmatpush1.bf16.msra.mxu0 %v10303_v55  ;;  %5387 = vmatpush1.bf16.msra.mxu1 %v10304_v20 }
 0x56c   :  { %5325 = vmatprep.subr.bf16.mxu0 %v10305_v10  ;;  %5389 = vmatprep.subr.bf16.mxu1 %v10306_v19 }
 0x56f   :  { %5327 = vmatpush1.bf16.msra.mxu0 %v10307_v11  ;;  %5391 = vmatpush1.bf16.msra.mxu1 %v10230_v7 }
 0x570   :  { %5329 = vmatprep.subr.bf16.mxu0 %v10231_v58  ;;  %5393 = vmatprep.subr.bf16.mxu1 %v10232_v12 }
 0x573   :  { %5331 = vmatpush1.bf16.msra.mxu0 %v10233_v30  ;;  %5395 = vmatpush1.bf16.msra.mxu1 %v10234_v41 }
 0x574   :  { %5333 = vmatprep.subr.bf16.mxu0 %v10442_v3  ;;  %5397 = vmatprep.subr.bf16.mxu1 %v10443_v29 }
 0x577   :  { %5335 = vmatpush1.bf16.msra.mxu0 %v10444_v59  ;;  %5399 = vmatpush1.bf16.msra.mxu1 %v10445_v15 }
 0x578   :  { %5337 = vmatprep.subr.bf16.mxu0 %v10446_v24  ;;  %5401 = vmatprep.subr.bf16.mxu1 %v10447_v47  ;;  %v10457_v24 = vld [vmem:[#allocation135_spill] sm:$0xff]  ;;  %v10458_v47 = vld [vmem:[#allocation8_spill] sm:$0xff] }
 0x57b   :  { %5339 = vmatpush1.bf16.msra.mxu0 %v10448_v56  ;;  %5403 = vmatpush1.bf16.msra.mxu1 %v10449_v42  ;;  %v10459_v56 = vld [vmem:[#allocation9_spill] sm:$0xff] }
 0x57c   :  { %5341 = vmatprep.subr.bf16.mxu0 %v10450_v5  ;;  %5405 = vmatprep.subr.bf16.mxu1 %v10451_v45  ;;  %v10460_v45 = vld [vmem:[#allocation10_spill] sm:$0xff]  ;;  %v10469_v5 = vld [vmem:[#allocation19_spill] sm:$0xff] }
 0x57f   :  { %5343 = vmatpush1.bf16.msra.mxu0 %v10452_v46  ;;  %5407 = vmatpush1.bf16.msra.mxu1 %v10453_v52  ;;  %v10461_v46 = vld [vmem:[#allocation11_spill] sm:$0xff]  ;;  %v10462_v52 = vld [vmem:[#allocation12_spill] sm:$0xff] }
 0x580   :  { %5345 = vmatprep.subr.bf16.mxu0 %v10454_v4  ;;  %5409 = vmatprep.subr.bf16.mxu1 %v10455_v38  ;;  %v10463_v4 = vld [vmem:[#allocation13_spill] sm:$0xff]  ;;  %v10464_v38 = vld [vmem:[#allocation14_spill] sm:$0xff] }
 0x583   :  { %5347 = vmatpush1.bf16.msra.mxu0 %v10456_v32  ;;  %5411 = vmatpush1.bf16.msra.mxu1 %v10457_v24  ;;  %v10465_v32 = vld [vmem:[#allocation15_spill] sm:$0xff]  ;;  %v10466_v24 = vld [vmem:[#allocation16_spill] sm:$0xff] }
 0x584   :  { %5413 = vmatprep.subr.bf16.mxu0 %v10458_v47  ;;  %5477 = vmatprep.subr.bf16.mxu1 %v10459_v56  ;;  %v10467_v47 = vld [vmem:[#allocation17_spill] sm:$0xff]  ;;  %v10468_v56 = vld [vmem:[#allocation18_spill] sm:$0xff] }
 0x586   :  { %1994 = vmatmul.mubr.f32.vlgmr.msra.gmra.mrb[18].mxu0 %v8398_v28  ;;  %2065 = vmatmul.mubr.f32.vlgmr.msra.gmra.mrb[18].mxu1 %v8398_v28  ;;  %v10470_v28 = vld [vmem:[#allocation20_spill] sm:$0xff] }
 0x587   :  { %5415 = vmatpush1.bf16.msra.mxu0 %v10460_v45  ;;  %5479 = vmatpush1.bf16.msra.mxu1 %v10461_v46  ;;  %v10471_v45 = vld [vmem:[#allocation21_spill] sm:$0xff]  ;;  %v10472_v46 = vld [vmem:[#allocation22_spill] sm:$0xff] }
 0x588   :  { %5417 = vmatprep.subr.bf16.mxu0 %v10462_v52  ;;  %5481 = vmatprep.subr.bf16.mxu1 %v10463_v4  ;;  %v10473_v52 = vld [vmem:[#allocation23_spill] sm:$0xff]  ;;  %v10474_v4 = vld [vmem:[#allocation24_spill] sm:$0xff] }
 0x58b   :  { %5419 = vmatpush1.bf16.msra.mxu0 %v10464_v38  ;;  %5483 = vmatpush1.bf16.msra.mxu1 %v10465_v32  ;;  %v10475_v38 = vld [vmem:[#allocation25_spill] sm:$0xff]  ;;  %v10476_v32 = vld [vmem:[#allocation26_spill] sm:$0xff] }
 0x58c   :  { %5421 = vmatprep.subr.bf16.mxu0 %v10466_v24  ;;  %5485 = vmatprep.subr.bf16.mxu1 %v10467_v47  ;;  %v10477_v24 = vld [vmem:[#allocation27_spill] sm:$0xff]  ;;  %v10478_v47 = vld [vmem:[#allocation28_spill] sm:$0xff] }
 0x58f   :  { %5423 = vmatpush1.bf16.msra.mxu0 %v10468_v56  ;;  %5487 = vmatpush1.bf16.msra.mxu1 %v10469_v5  ;;  %v10479_v56 = vld [vmem:[#allocation29_spill] sm:$0xff]  ;;  %v10480_v5 = vld [vmem:[#allocation30_spill] sm:$0xff] }
 0x590   :  { %5425 = vmatprep.subr.bf16.mxu0 %v10470_v28  ;;  %5489 = vmatprep.subr.bf16.mxu1 %v10471_v45  ;;  %v10481_v28 = vld [vmem:[#allocation31_spill] sm:$0xff]  ;;  %v10482_v45 = vld [vmem:[#allocation32_spill] sm:$0xff] }
 0x593   :  { %5427 = vmatpush1.bf16.msra.mxu0 %v10472_v46  ;;  %5491 = vmatpush1.bf16.msra.mxu1 %v10473_v52  ;;  %v10483_v46 = vld [vmem:[#allocation33_spill] sm:$0xff]  ;;  %v10484_v52 = vld [vmem:[#allocation34_spill] sm:$0xff] }
 0x594   :  { %5429 = vmatprep.subr.bf16.mxu0 %v10474_v4  ;;  %5493 = vmatprep.subr.bf16.mxu1 %v10475_v38  ;;  %v10485_v4 = vld [vmem:[#allocation35_spill] sm:$0xff]  ;;  %v10486_v38 = vld [vmem:[#allocation36_spill] sm:$0xff] }
 0x597   :  { %5431 = vmatpush1.bf16.msra.mxu0 %v10476_v32  ;;  %5495 = vmatpush1.bf16.msra.mxu1 %v10477_v24  ;;  %v10487_v32 = vld [vmem:[#allocation37_spill] sm:$0xff]  ;;  %v10488_v24 = vld [vmem:[#allocation38_spill] sm:$0xff] }
 0x598   :  { %5433 = vmatprep.subr.bf16.mxu0 %v10478_v47  ;;  %5497 = vmatprep.subr.bf16.mxu1 %v10479_v56  ;;  %v10489_v47 = vld [vmem:[#allocation39_spill] sm:$0xff]  ;;  %v10490_v56 = vld [vmem:[#allocation40_spill] sm:$0xff] }
 0x59b   :  { %5435 = vmatpush1.bf16.msra.mxu0 %v10480_v5  ;;  %5499 = vmatpush1.bf16.msra.mxu1 %v10481_v28  ;;  %v10491_v5 = vld [vmem:[#allocation41_spill] sm:$0xff]  ;;  %v10492_v28 = vld [vmem:[#allocation42_spill] sm:$0xff] }
 0x59c   :  { %5437 = vmatprep.subr.bf16.mxu0 %v10482_v45  ;;  %5501 = vmatprep.subr.bf16.mxu1 %v10483_v46  ;;  %v10493_v45 = vld [vmem:[#allocation43_spill] sm:$0xff]  ;;  %v10494_v46 = vld [vmem:[#allocation44_spill] sm:$0xff] }
 0x59f   :  { %5439 = vmatpush1.bf16.msra.mxu0 %v10484_v52  ;;  %5503 = vmatpush1.bf16.msra.mxu1 %v10485_v4  ;;  %v10495_v52 = vld [vmem:[#allocation45_spill] sm:$0xff]  ;;  %v10496_v4 = vld [vmem:[#allocation46_spill] sm:$0xff] }
 0x5a0   :  { %5441 = vmatprep.subr.bf16.mxu0 %v10486_v38  ;;  %5505 = vmatprep.subr.bf16.mxu1 %v10487_v32  ;;  %v10497_v38 = vld [vmem:[#allocation47_spill] sm:$0xff]  ;;  %v10498_v32 = vld [vmem:[#allocation48_spill] sm:$0xff] }
 0x5a3   :  { %5443 = vmatpush1.bf16.msra.mxu0 %v10488_v24  ;;  %5507 = vmatpush1.bf16.msra.mxu1 %v10489_v47  ;;  %v10499_v24 = vld [vmem:[#allocation49_spill] sm:$0xff]  ;;  %v10500_v47 = vld [vmem:[#allocation50_spill] sm:$0xff] }
 0x5a4   :  { %5445 = vmatprep.subr.bf16.mxu0 %v10490_v56  ;;  %5509 = vmatprep.subr.bf16.mxu1 %v10491_v5  ;;  %v10501_v56 = vld [vmem:[#allocation51_spill] sm:$0xff]  ;;  %v10502_v5 = vld [vmem:[#allocation52_spill] sm:$0xff] }
 0x5a7   :  { %5447 = vmatpush1.bf16.msra.mxu0 %v10492_v28  ;;  %5511 = vmatpush1.bf16.msra.mxu1 %v10493_v45  ;;  %v10503_v28 = vld [vmem:[#allocation53_spill] sm:$0xff]  ;;  %v10504_v45 = vld [vmem:[#allocation54_spill] sm:$0xff] }
 0x5a8   :  { %5449 = vmatprep.subr.bf16.mxu0 %v10494_v46  ;;  %5513 = vmatprep.subr.bf16.mxu1 %v10495_v52  ;;  %v10505_v46 = vld [vmem:[#allocation55_spill] sm:$0xff]  ;;  %v10506_v52 = vld [vmem:[#allocation56_spill] sm:$0xff] }
 0x5ab   :  { %5451 = vmatpush1.bf16.msra.mxu0 %v10496_v4  ;;  %5515 = vmatpush1.bf16.msra.mxu1 %v10497_v38  ;;  %v10507_v4 = vld [vmem:[#allocation57_spill] sm:$0xff]  ;;  %v10508_v38 = vld [vmem:[#allocation58_spill] sm:$0xff] }
 0x5ac   :  { %5453 = vmatprep.subr.bf16.mxu0 %v10498_v32  ;;  %5517 = vmatprep.subr.bf16.mxu1 %v10499_v24  ;;  %v10509_v32 = vld [vmem:[#allocation59_spill] sm:$0xff]  ;;  %v10510_v24 = vld [vmem:[#allocation60_spill] sm:$0xff] }
 0x5af   :  { %5455 = vmatpush1.bf16.msra.mxu0 %v10500_v47  ;;  %5519 = vmatpush1.bf16.msra.mxu1 %v10501_v56  ;;  %v10511_v47 = vld [vmem:[#allocation61_spill] sm:$0xff]  ;;  %v10512_v56 = vld [vmem:[#allocation62_spill] sm:$0xff] }
 0x5b0   :  { %5457 = vmatprep.subr.bf16.mxu0 %v10502_v5  ;;  %5521 = vmatprep.subr.bf16.mxu1 %v10503_v28  ;;  %v10513_v5 = vld [vmem:[#allocation63_spill] sm:$0xff]  ;;  %v10514_v28 = vld [vmem:[#allocation64_spill] sm:$0xff] }
 0x5b3   :  { %5459 = vmatpush1.bf16.msra.mxu0 %v10504_v45  ;;  %5523 = vmatpush1.bf16.msra.mxu1 %v10505_v46  ;;  %v10515_v45 = vld [vmem:[#allocation65_spill] sm:$0xff]  ;;  %v10516_v46 = vld [vmem:[#allocation66_spill] sm:$0xff] }
 0x5b4   :  { %5461 = vmatprep.subr.bf16.mxu0 %v10506_v52  ;;  %5525 = vmatprep.subr.bf16.mxu1 %v10507_v4  ;;  %v10517_v52 = vld [vmem:[#allocation67_spill] sm:$0xff]  ;;  %v10518_v4 = vld [vmem:[#allocation68_spill] sm:$0xff] }
 0x5b7   :  { %5463 = vmatpush1.bf16.msra.mxu0 %v10508_v38  ;;  %5527 = vmatpush1.bf16.msra.mxu1 %v10509_v32  ;;  %v10519_v38 = vld [vmem:[#allocation69_spill] sm:$0xff]  ;;  %v10520_v32 = vld [vmem:[#allocation70_spill] sm:$0xff] }
 0x5b8   :  { %5465 = vmatprep.subr.bf16.mxu0 %v10510_v24  ;;  %5529 = vmatprep.subr.bf16.mxu1 %v10511_v47  ;;  %v10521_v24 = vld [vmem:[#allocation71_spill] sm:$0xff]  ;;  %v10522_v47 = vld [vmem:[#allocation72_spill] sm:$0xff] }
 0x5bb   :  { %5467 = vmatpush1.bf16.msra.mxu0 %v10512_v56  ;;  %5531 = vmatpush1.bf16.msra.mxu1 %v10513_v5  ;;  %v10523_v56 = vld [vmem:[#allocation73_spill] sm:$0xff] }
 0x5bc   :  { %5469 = vmatprep.subr.bf16.mxu0 %v10514_v28  ;;  %5533 = vmatprep.subr.bf16.mxu1 %v10515_v45 }
 0x5bf   :  { %5471 = vmatpush1.bf16.msra.mxu0 %v10516_v46  ;;  %5535 = vmatpush1.bf16.msra.mxu1 %v10517_v52 }
 0x5c0   :  { %5473 = vmatprep.subr.bf16.mxu0 %v10518_v4  ;;  %5537 = vmatprep.subr.bf16.mxu1 %v10519_v38 }
 0x5c3   :  { %5475 = vmatpush1.bf16.msra.mxu0 %v10520_v32  ;;  %5539 = vmatpush1.bf16.msra.mxu1 %v10521_v24  ;;  %v4036_v32 = vld [vmem:[%s9761_s0 + $0x40] sm:$0xff] }
 0x5c4   :  { %5541 = vmatprep.subr.bf16.mxu0 %v10522_v47  ;;  %5605 = vmatprep.subr.bf16.mxu1 %v10523_v56 }
 0x619   :  { %v1853_v5 = vpop.f32.mrb[16].mxu0  ;;  %v1924_v28 = vpop.f32.mrb[16].mxu1 }
 0x61a   :  { %v1855_v42 = vpop.f32.mrb[17].mxu0  ;;  %v1926_v45 = vpop.f32.mrb[17].mxu1 }
 0x61b   :  { %v2079_v15 = vcombine.low %v1853_v5, %v1855_v42  ;;  %v2080_v46 = vcombine.low %v1924_v28, %v1926_v45 }
 0x61d   :  { %v2087_v52 = vrot.slane %v2079_v15, %v7929_v14  ;;  %v2094_v4 = vrot.slane %v2080_v46, %v7929_v14 }
 0x61f   :  { %v2095_v59 = vcombine.low %v2087_v52, %v2094_v4 }
 0x621   :  { %v2115_v24 = vadd.f32 %v4036_v32, %v2095_v59  ;;  %v4037_v59 = vld [vmem:[%s9761_s0 + $0x48] sm:$0xff] }
 0x623   :  { %v2124_v38 = vrot.slane %v2115_v24, 4  ;;  %v4038_v29 = vmul.f32 -1.442695, %v2115_v24 }
 0x625   :  { %v4039_v47 = vmul.f32 -1.442695, %v2124_v38 }
 0x627   :  { %6504 = vpow2.f32 %v4039_v47 }
 0x628   :  { %6506 = vpow2.f32 %v4038_v29 }
 0x631   :  { %v6505_v41 = vpop.eup %6504 }
 0x632   :  { %v6507_v45 = vpop.eup %6506  ;;  %v2129_v46 = vadd.f32 1.0, %v6505_v41 }
 0x633   :  { %v2120_v30 = vadd.f32 1.0, %v6507_v45 }
 0x634   :  { %6508 = vrcp.f32 %v2129_v46 }
 0x635   :  { %6510 = vrcp.f32 %v2120_v30 }
 0x659   :  { %v1995_v56 = vpop.f32.mrb[18].mxu0  ;;  %v2066_v3 = vpop.f32.mrb[18].mxu1 }
 0x65a   :  { %v1997_v42 = vpop.f32.mrb[19].mxu0  ;;  %v2068_v5 = vpop.f32.mrb[19].mxu1 }
 0x65b   :  { %v2096_v15 = vcombine.low %v1995_v56, %v1997_v42  ;;  %v2097_v28 = vcombine.low %v2066_v3, %v2068_v5  ;;  %v6509_v56 = vpop.eup %6508 }
 0x65c   :  { %v6511_v3 = vpop.eup %6510  ;;  %v2142_v32 = vmul.f32 %v6509_v56, %v8394_v48  ;;  %v10524_v48 = vld [vmem:[#allocation118_spill] sm:$0xff]  ;;  %v10530_v56 = vld [vmem:[#allocation124_spill] sm:$0xff] }
 0x65d   :  { %v2104_v52 = vrot.slane %v2096_v15, %v7929_v14  ;;  %v2111_v4 = vrot.slane %v2097_v28, %v7929_v14 }
 0x65f   :  { %v2112_v24 = vcombine.low %v2104_v52, %v2111_v4 }
 0x661   :  { %v2116_v29 = vadd.f32 %v4037_v59, %v2112_v24  ;;  %v10525_v59 = vld [vmem:[#allocation119_spill] sm:$0xff]  ;;  %v10526_v24 = vld [vmem:[#allocation120_spill] sm:$0xff] }
 0x663   :  { %6512 = vtanh.f32 %v2116_v29  ;;  %v2134_v47 = vrot.slane %v2116_v29, 4  ;;  %v10527_v29 = vld [vmem:[#allocation121_spill] sm:$0xff] }
 0x665   :  { %v4040_v38 = vmul.f32 -1.442695, %v2134_v47  ;;  %v10528_v47 = vld [vmem:[#allocation122_spill] sm:$0xff] }
 0x667   :  { %6514 = vpow2.f32 %v4040_v38  ;;  %v10529_v38 = vld [vmem:[#allocation123_spill] sm:$0xff] }
 0x66d   :  { %v6513_v41 = vpop.eup %6512 }
 0x66e   :  { %v2143_v42 = vmul.f32 %v6513_v41, %v6511_v3  ;;  %v10531_v3 = vld [vmem:[#allocation125_spill] sm:$0xff]  ;;  %v10532_v41 = vld [vmem:[#allocation126_spill] sm:$0xff] }
 0x670   :  { %v8545_v5 = vadd.f32 %v2143_v42, %v2142_v32  ;;  %v10533_v32 = vld [vmem:[#allocation127_spill] sm:$0xff]  ;;  %v10534_v42 = vld [vmem:[#allocation128_spill] sm:$0xff] }
 0x671   :  { %v6515_v45 = vpop.eup %6514 }
 0x672   :  { %v2139_v15 = vadd.f32 1.0, %v6515_v45  ;;  %6516 = vtanh.f32 %v8545_v5  ;;  %v10535_v45 = vld [vmem:[#allocation129_spill] sm:$0xff] }
 0x674   :  { %6518 = vrcp.f32 %v2139_v15  ;;  %v10536_v15 = vld [vmem:[#allocation130_spill] sm:$0xff] }
 0x67c   :  { %v6517_v28 = vpop.eup %6516 }
 0x67e   :  { %v6519_v46 = vpop.eup %6518 }
 0x67f   :  { %v2146_v30 = vmul.f32 %v6519_v46, %v6517_v28  ;;  %v10537_v28 = vld [vmem:[#allocation131_spill] sm:$0xff]  ;;  %v10538_v46 = vld [vmem:[#allocation132_spill] sm:$0xff] }
 0x681   :  { %v8549_v52 = vrot.slane %v2146_v30, %v7929_v14  ;;  %v10539_v30 = vld [vmem:[#allocation133_spill] sm:$0xff] }
 0x683   :  { %v2158_v4 = vcombine.high %v8549_v52, %v8549_v52 }
 0x685   :  { %2225 = vmatprep.mubr.f32.mxu0 %v2158_v4  ;;  %2296 = vmatprep.mubr.f32.mxu1 %v2158_v4 }
 0x686   :  { %2226 = vmatmul.mubr.f32.vlgmr.msra.gmra.mrb[20].mxu0 %v8549_v52  ;;  %2297 = vmatmul.mubr.f32.vlgmr.msra.gmra.mrb[20].mxu1 %v8549_v52 }
 0x687   :  { %5543 = vmatpush1.bf16.msra.mxu0 %v10189_v62  ;;  %5607 = vmatpush1.bf16.msra.mxu1 %v10190_v33 }
 0x688   :  { %2367 = vmatprep.mubr.f32.mxu0 %v2158_v4  ;;  %2438 = vmatprep.mubr.f32.mxu1 %v2158_v4  ;;  %v10540_v4 = vld [vmem:[#allocation134_spill] sm:$0xff] }
 0x689   :  { %5545 = vmatprep.subr.bf16.mxu0 %v10191_v23  ;;  %5609 = vmatprep.subr.bf16.mxu1 %v10192_v2 }
 0x68b   :  { %5547 = vmatpush1.bf16.msra.mxu0 %v10193_v61  ;;  %5611 = vmatpush1.bf16.msra.mxu1 %v10272_v49 }
 0x68c   :  { %5549 = vmatprep.subr.bf16.mxu0 %v10273_v16  ;;  %5613 = vmatprep.subr.bf16.mxu1 %v10274_v37 }
 0x68f   :  { %5551 = vmatpush1.bf16.msra.mxu0 %v10275_v6  ;;  %5615 = vmatpush1.bf16.msra.mxu1 %v10276_v43 }
 0x690   :  { %5553 = vmatprep.subr.bf16.mxu0 %v10277_v50  ;;  %5617 = vmatprep.subr.bf16.mxu1 %v10356_v60 }
 0x693   :  { %5555 = vmatpush1.bf16.msra.mxu0 %v10357_v18  ;;  %5619 = vmatpush1.bf16.msra.mxu1 %v10358_v27 }
 0x694   :  { %5557 = vmatprep.subr.bf16.mxu0 %v10359_v17  ;;  %5621 = vmatprep.subr.bf16.mxu1 %v10360_v31 }
 0x697   :  { %5559 = vmatpush1.bf16.msra.mxu0 %v10361_v57  ;;  %5623 = vmatpush1.bf16.msra.mxu1 %v10440_v39 }
 0x698   :  { %5561 = vmatprep.subr.bf16.mxu0 %v10441_v21  ;;  %5625 = vmatprep.subr.bf16.mxu1 %v10364_v9 }
 0x69b   :  { %5563 = vmatpush1.bf16.msra.mxu0 %v10365_v34  ;;  %5627 = vmatpush1.bf16.msra.mxu1 %v10366_v26 }
 0x69c   :  { %5565 = vmatprep.subr.bf16.mxu0 %v10367_v40  ;;  %5629 = vmatprep.subr.bf16.mxu1 %v10368_v22 }
 0x69f   :  { %5567 = vmatpush1.bf16.msra.mxu0 %v10369_v44  ;;  %5631 = vmatpush1.bf16.msra.mxu1 %v10370_v51 }
 0x6a0   :  { %5569 = vmatprep.subr.bf16.mxu0 %v10371_v8  ;;  %5633 = vmatprep.subr.bf16.mxu1 %v10372_v53 }
 0x6a3   :  { %5571 = vmatpush1.bf16.msra.mxu0 %v10373_v35  ;;  %5635 = vmatpush1.bf16.msra.mxu1 %v10374_v13 }
 0x6a4   :  { %5573 = vmatprep.subr.bf16.mxu0 %v10297_v25  ;;  %5637 = vmatprep.subr.bf16.mxu1 %v10298_v63 }
 0x6a7   :  { %5575 = vmatpush1.bf16.msra.mxu0 %v10299_v36  ;;  %5639 = vmatpush1.bf16.msra.mxu1 %v10300_v54 }
 0x6a8   :  { %5577 = vmatprep.subr.bf16.mxu0 %v10301_v1  ;;  %5641 = vmatprep.subr.bf16.mxu1 %v10302_v0 }
 0x6ab   :  { %5579 = vmatpush1.bf16.msra.mxu0 %v10303_v55  ;;  %5643 = vmatpush1.bf16.msra.mxu1 %v10304_v20 }
 0x6ac   :  { %5581 = vmatprep.subr.bf16.mxu0 %v10305_v10  ;;  %5645 = vmatprep.subr.bf16.mxu1 %v10306_v19 }
 0x6af   :  { %5583 = vmatpush1.bf16.msra.mxu0 %v10307_v11  ;;  %5647 = vmatpush1.bf16.msra.mxu1 %v10230_v7 }
 0x6b0   :  { %5585 = vmatprep.subr.bf16.mxu0 %v10231_v58  ;;  %5649 = vmatprep.subr.bf16.mxu1 %v10232_v12 }
 0x6b3   :  { %5587 = vmatpush1.bf16.msra.mxu0 %v10524_v48  ;;  %5651 = vmatpush1.bf16.msra.mxu1 %v10525_v59 }
 0x6b4   :  { %5589 = vmatprep.subr.bf16.mxu0 %v10526_v24  ;;  %5653 = vmatprep.subr.bf16.mxu1 %v10527_v29 }
 0x6b7   :  { %5591 = vmatpush1.bf16.msra.mxu0 %v10528_v47  ;;  %5655 = vmatpush1.bf16.msra.mxu1 %v10529_v38 }
 0x6b8   :  { %5593 = vmatprep.subr.bf16.mxu0 %v10530_v56  ;;  %5657 = vmatprep.subr.bf16.mxu1 %v10531_v3  ;;  %v10541_v56 = vld [vmem:[#allocation135_spill] sm:$0xff]  ;;  %v10542_v3 = vld [vmem:[#allocation8_spill] sm:$0xff] }
 0x6bb   :  { %5595 = vmatpush1.bf16.msra.mxu0 %v10532_v41  ;;  %5659 = vmatpush1.bf16.msra.mxu1 %v10533_v32  ;;  %v10543_v41 = vld [vmem:[#allocation9_spill] sm:$0xff] }
 0x6bc   :  { %5597 = vmatprep.subr.bf16.mxu0 %v10534_v42  ;;  %5661 = vmatprep.subr.bf16.mxu1 %v10535_v45  ;;  %v10544_v45 = vld [vmem:[#allocation10_spill] sm:$0xff]  ;;  %v10553_v42 = vld [vmem:[#allocation19_spill] sm:$0xff] }
 0x6bf   :  { %5599 = vmatpush1.bf16.msra.mxu0 %v10536_v15  ;;  %5663 = vmatpush1.bf16.msra.mxu1 %v10537_v28  ;;  %v10545_v15 = vld [vmem:[#allocation11_spill] sm:$0xff]  ;;  %v10546_v28 = vld [vmem:[#allocation12_spill] sm:$0xff] }
 0x6c0   :  { %5601 = vmatprep.subr.bf16.mxu0 %v10538_v46  ;;  %5665 = vmatprep.subr.bf16.mxu1 %v10539_v30  ;;  %v10547_v46 = vld [vmem:[#allocation13_spill] sm:$0xff]  ;;  %v10548_v30 = vld [vmem:[#allocation14_spill] sm:$0xff] }
 0x6c3   :  { %5603 = vmatpush1.bf16.msra.mxu0 %v10540_v4  ;;  %5667 = vmatpush1.bf16.msra.mxu1 %v10541_v56  ;;  %v10549_v4 = vld [vmem:[#allocation15_spill] sm:$0xff]  ;;  %v10550_v56 = vld [vmem:[#allocation16_spill] sm:$0xff] }
 0x6c4   :  { %5669 = vmatprep.subr.bf16.mxu0 %v10542_v3  ;;  %5733 = vmatprep.subr.bf16.mxu1 %v10543_v41  ;;  %v10551_v3 = vld [vmem:[#allocation17_spill] sm:$0xff]  ;;  %v10552_v41 = vld [vmem:[#allocation18_spill] sm:$0xff] }
 0x6c6   :  { %2368 = vmatmul.mubr.f32.vlgmr.msra.gmra.mrb[22].mxu0 %v8549_v52  ;;  %2439 = vmatmul.mubr.f32.vlgmr.msra.gmra.mrb[22].mxu1 %v8549_v52  ;;  %v10554_v52 = vld [vmem:[#allocation20_spill] sm:$0xff] }
 0x6c7   :  { %5671 = vmatpush1.bf16.msra.mxu0 %v10544_v45  ;;  %5735 = vmatpush1.bf16.msra.mxu1 %v10545_v15  ;;  %v10555_v45 = vld [vmem:[#allocation21_spill] sm:$0xff]  ;;  %v10556_v15 = vld [vmem:[#allocation22_spill] sm:$0xff] }
 0x6c8   :  { %5673 = vmatprep.subr.bf16.mxu0 %v10546_v28  ;;  %5737 = vmatprep.subr.bf16.mxu1 %v10547_v46  ;;  %v10557_v28 = vld [vmem:[#allocation23_spill] sm:$0xff]  ;;  %v10558_v46 = vld [vmem:[#allocation24_spill] sm:$0xff] }
 0x6cb   :  { %5675 = vmatpush1.bf16.msra.mxu0 %v10548_v30  ;;  %5739 = vmatpush1.bf16.msra.mxu1 %v10549_v4  ;;  %v10559_v30 = vld [vmem:[#allocation25_spill] sm:$0xff]  ;;  %v10560_v4 = vld [vmem:[#allocation26_spill] sm:$0xff] }
 0x6cc   :  { %5677 = vmatprep.subr.bf16.mxu0 %v10550_v56  ;;  %5741 = vmatprep.subr.bf16.mxu1 %v10551_v3  ;;  %v10561_v56 = vld [vmem:[#allocation27_spill] sm:$0xff]  ;;  %v10562_v3 = vld [vmem:[#allocation28_spill] sm:$0xff] }
 0x6cf   :  { %5679 = vmatpush1.bf16.msra.mxu0 %v10552_v41  ;;  %5743 = vmatpush1.bf16.msra.mxu1 %v10553_v42  ;;  %v10563_v41 = vld [vmem:[#allocation29_spill] sm:$0xff]  ;;  %v10564_v42 = vld [vmem:[#allocation30_spill] sm:$0xff] }
 0x6d0   :  { %5681 = vmatprep.subr.bf16.mxu0 %v10554_v52  ;;  %5745 = vmatprep.subr.bf16.mxu1 %v10555_v45  ;;  %v10565_v52 = vld [vmem:[#allocation31_spill] sm:$0xff]  ;;  %v10566_v45 = vld [vmem:[#allocation32_spill] sm:$0xff] }
 0x6d3   :  { %5683 = vmatpush1.bf16.msra.mxu0 %v10556_v15  ;;  %5747 = vmatpush1.bf16.msra.mxu1 %v10557_v28  ;;  %v10567_v15 = vld [vmem:[#allocation33_spill] sm:$0xff]  ;;  %v10568_v28 = vld [vmem:[#allocation34_spill] sm:$0xff] }
 0x6d4   :  { %5685 = vmatprep.subr.bf16.mxu0 %v10558_v46  ;;  %5749 = vmatprep.subr.bf16.mxu1 %v10559_v30  ;;  %v10569_v46 = vld [vmem:[#allocation35_spill] sm:$0xff]  ;;  %v10570_v30 = vld [vmem:[#allocation36_spill] sm:$0xff] }
 0x6d7   :  { %5687 = vmatpush1.bf16.msra.mxu0 %v10560_v4  ;;  %5751 = vmatpush1.bf16.msra.mxu1 %v10561_v56  ;;  %v10571_v4 = vld [vmem:[#allocation37_spill] sm:$0xff]  ;;  %v10572_v56 = vld [vmem:[#allocation38_spill] sm:$0xff] }
 0x6d8   :  { %5689 = vmatprep.subr.bf16.mxu0 %v10562_v3  ;;  %5753 = vmatprep.subr.bf16.mxu1 %v10563_v41  ;;  %v10573_v3 = vld [vmem:[#allocation39_spill] sm:$0xff]  ;;  %v10574_v41 = vld [vmem:[#allocation40_spill] sm:$0xff] }
 0x6db   :  { %5691 = vmatpush1.bf16.msra.mxu0 %v10564_v42  ;;  %5755 = vmatpush1.bf16.msra.mxu1 %v10565_v52  ;;  %v10575_v42 = vld [vmem:[#allocation41_spill] sm:$0xff]  ;;  %v10576_v52 = vld [vmem:[#allocation42_spill] sm:$0xff] }
 0x6dc   :  { %5693 = vmatprep.subr.bf16.mxu0 %v10566_v45  ;;  %5757 = vmatprep.subr.bf16.mxu1 %v10567_v15  ;;  %v10577_v45 = vld [vmem:[#allocation43_spill] sm:$0xff]  ;;  %v10578_v15 = vld [vmem:[#allocation44_spill] sm:$0xff] }
 0x6df   :  { %5695 = vmatpush1.bf16.msra.mxu0 %v10568_v28  ;;  %5759 = vmatpush1.bf16.msra.mxu1 %v10569_v46  ;;  %v10579_v28 = vld [vmem:[#allocation45_spill] sm:$0xff]  ;;  %v10580_v46 = vld [vmem:[#allocation46_spill] sm:$0xff] }
 0x6e0   :  { %5697 = vmatprep.subr.bf16.mxu0 %v10570_v30  ;;  %5761 = vmatprep.subr.bf16.mxu1 %v10571_v4  ;;  %v10581_v30 = vld [vmem:[#allocation47_spill] sm:$0xff]  ;;  %v10582_v4 = vld [vmem:[#allocation48_spill] sm:$0xff] }
 0x6e3   :  { %5699 = vmatpush1.bf16.msra.mxu0 %v10572_v56  ;;  %5763 = vmatpush1.bf16.msra.mxu1 %v10573_v3  ;;  %v10583_v56 = vld [vmem:[#allocation49_spill] sm:$0xff]  ;;  %v10584_v3 = vld [vmem:[#allocation50_spill] sm:$0xff] }
 0x6e4   :  { %5701 = vmatprep.subr.bf16.mxu0 %v10574_v41  ;;  %5765 = vmatprep.subr.bf16.mxu1 %v10575_v42  ;;  %v10585_v41 = vld [vmem:[#allocation51_spill] sm:$0xff]  ;;  %v10586_v42 = vld [vmem:[#allocation52_spill] sm:$0xff] }
 0x6e7   :  { %5703 = vmatpush1.bf16.msra.mxu0 %v10576_v52  ;;  %5767 = vmatpush1.bf16.msra.mxu1 %v10577_v45  ;;  %v10587_v52 = vld [vmem:[#allocation53_spill] sm:$0xff]  ;;  %v10588_v45 = vld [vmem:[#allocation54_spill] sm:$0xff] }
 0x6e8   :  { %5705 = vmatprep.subr.bf16.mxu0 %v10578_v15  ;;  %5769 = vmatprep.subr.bf16.mxu1 %v10579_v28  ;;  %v10589_v15 = vld [vmem:[#allocation55_spill] sm:$0xff]  ;;  %v10590_v28 = vld [vmem:[#allocation56_spill] sm:$0xff] }
 0x6eb   :  { %5707 = vmatpush1.bf16.msra.mxu0 %v10580_v46  ;;  %5771 = vmatpush1.bf16.msra.mxu1 %v10581_v30  ;;  %v10591_v46 = vld [vmem:[#allocation57_spill] sm:$0xff]  ;;  %v10592_v30 = vld [vmem:[#allocation58_spill] sm:$0xff] }
 0x6ec   :  { %5709 = vmatprep.subr.bf16.mxu0 %v10582_v4  ;;  %5773 = vmatprep.subr.bf16.mxu1 %v10583_v56  ;;  %v10593_v4 = vld [vmem:[#allocation59_spill] sm:$0xff]  ;;  %v10594_v56 = vld [vmem:[#allocation60_spill] sm:$0xff] }
 0x6ef   :  { %5711 = vmatpush1.bf16.msra.mxu0 %v10584_v3  ;;  %5775 = vmatpush1.bf16.msra.mxu1 %v10585_v41  ;;  %v10595_v3 = vld [vmem:[#allocation61_spill] sm:$0xff]  ;;  %v10596_v41 = vld [vmem:[#allocation62_spill] sm:$0xff] }
 0x6f0   :  { %5713 = vmatprep.subr.bf16.mxu0 %v10586_v42  ;;  %5777 = vmatprep.subr.bf16.mxu1 %v10587_v52  ;;  %v10597_v42 = vld [vmem:[#allocation63_spill] sm:$0xff]  ;;  %v10598_v52 = vld [vmem:[#allocation64_spill] sm:$0xff] }
 0x6f3   :  { %5715 = vmatpush1.bf16.msra.mxu0 %v10588_v45  ;;  %5779 = vmatpush1.bf16.msra.mxu1 %v10589_v15  ;;  %v10599_v45 = vld [vmem:[#allocation65_spill] sm:$0xff]  ;;  %v10600_v15 = vld [vmem:[#allocation66_spill] sm:$0xff] }
 0x6f4   :  { %5717 = vmatprep.subr.bf16.mxu0 %v10590_v28  ;;  %5781 = vmatprep.subr.bf16.mxu1 %v10591_v46  ;;  %v10601_v28 = vld [vmem:[#allocation67_spill] sm:$0xff]  ;;  %v10602_v46 = vld [vmem:[#allocation68_spill] sm:$0xff] }
 0x6f7   :  { %5719 = vmatpush1.bf16.msra.mxu0 %v10592_v30  ;;  %5783 = vmatpush1.bf16.msra.mxu1 %v10593_v4  ;;  %v10603_v30 = vld [vmem:[#allocation69_spill] sm:$0xff]  ;;  %v10604_v4 = vld [vmem:[#allocation70_spill] sm:$0xff] }
 0x6f8   :  { %5721 = vmatprep.subr.bf16.mxu0 %v10594_v56  ;;  %5785 = vmatprep.subr.bf16.mxu1 %v10595_v3  ;;  %v10605_v56 = vld [vmem:[#allocation71_spill] sm:$0xff]  ;;  %v10606_v3 = vld [vmem:[#allocation72_spill] sm:$0xff] }
 0x6fb   :  { %5723 = vmatpush1.bf16.msra.mxu0 %v10596_v41  ;;  %5787 = vmatpush1.bf16.msra.mxu1 %v10597_v42  ;;  %v10607_v41 = vld [vmem:[#allocation73_spill] sm:$0xff] }
 0x6fc   :  { %5725 = vmatprep.subr.bf16.mxu0 %v10598_v52  ;;  %5789 = vmatprep.subr.bf16.mxu1 %v10599_v45 }
 0x6ff   :  { %5727 = vmatpush1.bf16.msra.mxu0 %v10600_v15  ;;  %5791 = vmatpush1.bf16.msra.mxu1 %v10601_v28 }
 0x700   :  { %5729 = vmatprep.subr.bf16.mxu0 %v10602_v46  ;;  %5793 = vmatprep.subr.bf16.mxu1 %v10603_v30 }
 0x703   :  { %5731 = vmatpush1.bf16.msra.mxu0 %v10604_v4  ;;  %5795 = vmatpush1.bf16.msra.mxu1 %v10605_v56  ;;  %v4041_v4 = vld [vmem:[%s9761_s0 + $0x50] sm:$0xff] }
 0x704   :  { %5797 = vmatprep.subr.bf16.mxu0 %v10606_v3  ;;  %5861 = vmatprep.subr.bf16.mxu1 %v10607_v41 }
 0x759   :  { %v2227_v42 = vpop.f32.mrb[20].mxu0  ;;  %v2298_v52 = vpop.f32.mrb[20].mxu1 }
 0x75a   :  { %v2229_v32 = vpop.f32.mrb[21].mxu0  ;;  %v2300_v45 = vpop.f32.mrb[21].mxu1 }
 0x75b   :  { %v2453_v38 = vcombine.low %v2227_v42, %v2229_v32  ;;  %v2454_v15 = vcombine.low %v2298_v52, %v2300_v45 }
 0x75d   :  { %v2461_v28 = vrot.slane %v2453_v38, %v7929_v14  ;;  %v2468_v46 = vrot.slane %v2454_v15, %v7929_v14 }
 0x75f   :  { %v2469_v47 = vcombine.low %v2461_v28, %v2468_v46 }
 0x761   :  { %v2489_v56 = vadd.f32 %v4041_v4, %v2469_v47  ;;  %v4042_v47 = vld [vmem:[%s9761_s0 + $0x58] sm:$0xff] }
 0x763   :  { %v2498_v30 = vrot.slane %v2489_v56, 4  ;;  %v4043_v29 = vmul.f32 -1.442695, %v2489_v56 }
 0x765   :  { %v4044_v3 = vmul.f32 -1.442695, %v2498_v30 }
 0x767   :  { %6520 = vpow2.f32 %v4044_v3 }
 0x768   :  { %6522 = vpow2.f32 %v4043_v29 }
 0x771   :  { %v6521_v59 = vpop.eup %6520 }
 0x772   :  { %v6523_v45 = vpop.eup %6522  ;;  %v2503_v15 = vadd.f32 1.0, %v6521_v59 }
 0x773   :  { %v2494_v48 = vadd.f32 1.0, %v6523_v45 }
 0x774   :  { %6524 = vrcp.f32 %v2503_v15 }
 0x775   :  { %6526 = vrcp.f32 %v2494_v48 }
 0x799   :  { %v2369_v41 = vpop.f32.mrb[22].mxu0  ;;  %v2440_v24 = vpop.f32.mrb[22].mxu1 }
 0x79a   :  { %v2371_v32 = vpop.f32.mrb[23].mxu0  ;;  %v2442_v42 = vpop.f32.mrb[23].mxu1 }
 0x79b   :  { %v2470_v38 = vcombine.low %v2369_v41, %v2371_v32  ;;  %v2471_v52 = vcombine.low %v2440_v24, %v2442_v42  ;;  %v6525_v41 = vpop.eup %6524 }
 0x79c   :  { %v6527_v24 = vpop.eup %6526  ;;  %v2516_v4 = vmul.f32 %v6525_v41, %v8545_v5  ;;  %v10608_v5 = vld [vmem:[#allocation118_spill] sm:$0xff]  ;;  %v10614_v41 = vld [vmem:[#allocation124_spill] sm:$0xff] }
 0x79d   :  { %v2478_v28 = vrot.slane %v2470_v38, %v7929_v14  ;;  %v2485_v46 = vrot.slane %v2471_v52, %v7929_v14 }
 0x79f   :  { %v2486_v56 = vcombine.low %v2478_v28, %v2485_v46 }
 0x7a1   :  { %v2490_v29 = vadd.f32 %v4042_v47, %v2486_v56  ;;  %v10609_v47 = vld [vmem:[#allocation119_spill] sm:$0xff]  ;;  %v10610_v56 = vld [vmem:[#allocation120_spill] sm:$0xff] }
 0x7a3   :  { %6528 = vtanh.f32 %v2490_v29  ;;  %v2508_v3 = vrot.slane %v2490_v29, 4  ;;  %v10611_v29 = vld [vmem:[#allocation121_spill] sm:$0xff] }
 0x7a5   :  { %v4045_v30 = vmul.f32 -1.442695, %v2508_v3  ;;  %v10612_v3 = vld [vmem:[#allocation122_spill] sm:$0xff] }
 0x7a7   :  { %6530 = vpow2.f32 %v4045_v30  ;;  %v10613_v30 = vld [vmem:[#allocation123_spill] sm:$0xff] }
 0x7ad   :  { %v6529_v59 = vpop.eup %6528 }
 0x7ae   :  { %v2517_v32 = vmul.f32 %v6529_v59, %v6527_v24  ;;  %v10615_v24 = vld [vmem:[#allocation125_spill] sm:$0xff]  ;;  %v10616_v59 = vld [vmem:[#allocation126_spill] sm:$0xff] }
 0x7b0   :  { %v8696_v42 = vadd.f32 %v2517_v32, %v2516_v4  ;;  %v10617_v4 = vld [vmem:[#allocation127_spill] sm:$0xff]  ;;  %v10618_v32 = vld [vmem:[#allocation128_spill] sm:$0xff] }
 0x7b1   :  { %v6531_v45 = vpop.eup %6530 }
 0x7b2   :  { %v2513_v38 = vadd.f32 1.0, %v6531_v45  ;;  %6532 = vtanh.f32 %v8696_v42  ;;  %v10619_v45 = vld [vmem:[#allocation129_spill] sm:$0xff] }
 0x7b4   :  { %6534 = vrcp.f32 %v2513_v38  ;;  %v10620_v38 = vld [vmem:[#allocation130_spill] sm:$0xff] }
 0x7bc   :  { %v6533_v52 = vpop.eup %6532 }
 0x7be   :  { %v6535_v15 = vpop.eup %6534 }
 0x7bf   :  { %v2520_v48 = vmul.f32 %v6535_v15, %v6533_v52  ;;  %v10621_v52 = vld [vmem:[#allocation131_spill] sm:$0xff]  ;;  %v10622_v15 = vld [vmem:[#allocation132_spill] sm:$0xff] }
 0x7c1   :  { %v8700_v28 = vrot.slane %v2520_v48, %v7929_v14  ;;  %v10623_v48 = vld [vmem:[#allocation133_spill] sm:$0xff] }
 0x7c3   :  { %v2532_v46 = vcombine.high %v8700_v28, %v8700_v28 }
 0x7c5   :  { %2599 = vmatprep.mubr.f32.mxu0 %v2532_v46  ;;  %2670 = vmatprep.mubr.f32.mxu1 %v2532_v46 }
 0x7c6   :  { %2600 = vmatmul.mubr.f32.vlgmr.msra.gmra.mrb[24].mxu0 %v8700_v28  ;;  %2671 = vmatmul.mubr.f32.vlgmr.msra.gmra.mrb[24].mxu1 %v8700_v28 }
 0x7c7   :  { %5799 = vmatpush1.bf16.msra.mxu0 %v10189_v62  ;;  %5863 = vmatpush1.bf16.msra.mxu1 %v10190_v33 }
 0x7c8   :  { %2741 = vmatprep.mubr.f32.mxu0 %v2532_v46  ;;  %2812 = vmatprep.mubr.f32.mxu1 %v2532_v46  ;;  %v10624_v46 = vld [vmem:[#allocation134_spill] sm:$0xff] }
 0x7c9   :  { %5801 = vmatprep.subr.bf16.mxu0 %v10191_v23  ;;  %5865 = vmatprep.subr.bf16.mxu1 %v10192_v2 }
 0x7cb   :  { %5803 = vmatpush1.bf16.msra.mxu0 %v10193_v61  ;;  %5867 = vmatpush1.bf16.msra.mxu1 %v10272_v49 }
 0x7cc   :  { %5805 = vmatprep.subr.bf16.mxu0 %v10273_v16  ;;  %5869 = vmatprep.subr.bf16.mxu1 %v10274_v37 }
 0x7cf   :  { %5807 = vmatpush1.bf16.msra.mxu0 %v10275_v6  ;;  %5871 = vmatpush1.bf16.msra.mxu1 %v10276_v43 }
 0x7d0   :  { %5809 = vmatprep.subr.bf16.mxu0 %v10277_v50  ;;  %5873 = vmatprep.subr.bf16.mxu1 %v10356_v60 }
 0x7d3   :  { %5811 = vmatpush1.bf16.msra.mxu0 %v10357_v18  ;;  %5875 = vmatpush1.bf16.msra.mxu1 %v10358_v27 }
 0x7d4   :  { %5813 = vmatprep.subr.bf16.mxu0 %v10359_v17  ;;  %5877 = vmatprep.subr.bf16.mxu1 %v10360_v31 }
 0x7d7   :  { %5815 = vmatpush1.bf16.msra.mxu0 %v10361_v57  ;;  %5879 = vmatpush1.bf16.msra.mxu1 %v10440_v39 }
 0x7d8   :  { %5817 = vmatprep.subr.bf16.mxu0 %v10441_v21  ;;  %5881 = vmatprep.subr.bf16.mxu1 %v10364_v9 }
 0x7db   :  { %5819 = vmatpush1.bf16.msra.mxu0 %v10365_v34  ;;  %5883 = vmatpush1.bf16.msra.mxu1 %v10366_v26 }
 0x7dc   :  { %5821 = vmatprep.subr.bf16.mxu0 %v10367_v40  ;;  %5885 = vmatprep.subr.bf16.mxu1 %v10368_v22 }
 0x7df   :  { %5823 = vmatpush1.bf16.msra.mxu0 %v10369_v44  ;;  %5887 = vmatpush1.bf16.msra.mxu1 %v10370_v51 }
 0x7e0   :  { %5825 = vmatprep.subr.bf16.mxu0 %v10371_v8  ;;  %5889 = vmatprep.subr.bf16.mxu1 %v10372_v53 }
 0x7e3   :  { %5827 = vmatpush1.bf16.msra.mxu0 %v10373_v35  ;;  %5891 = vmatpush1.bf16.msra.mxu1 %v10374_v13 }
 0x7e4   :  { %5829 = vmatprep.subr.bf16.mxu0 %v10297_v25  ;;  %5893 = vmatprep.subr.bf16.mxu1 %v10298_v63 }
 0x7e7   :  { %5831 = vmatpush1.bf16.msra.mxu0 %v10299_v36  ;;  %5895 = vmatpush1.bf16.msra.mxu1 %v10300_v54 }
 0x7e8   :  { %5833 = vmatprep.subr.bf16.mxu0 %v10301_v1  ;;  %5897 = vmatprep.subr.bf16.mxu1 %v10302_v0 }
 0x7eb   :  { %5835 = vmatpush1.bf16.msra.mxu0 %v10303_v55  ;;  %5899 = vmatpush1.bf16.msra.mxu1 %v10304_v20 }
 0x7ec   :  { %5837 = vmatprep.subr.bf16.mxu0 %v10305_v10  ;;  %5901 = vmatprep.subr.bf16.mxu1 %v10306_v19 }
 0x7ef   :  { %5839 = vmatpush1.bf16.msra.mxu0 %v10307_v11  ;;  %5903 = vmatpush1.bf16.msra.mxu1 %v10230_v7 }
 0x7f0   :  { %5841 = vmatprep.subr.bf16.mxu0 %v10231_v58  ;;  %5905 = vmatprep.subr.bf16.mxu1 %v10232_v12 }
 0x7f3   :  { %5843 = vmatpush1.bf16.msra.mxu0 %v10608_v5  ;;  %5907 = vmatpush1.bf16.msra.mxu1 %v10609_v47 }
 0x7f4   :  { %5845 = vmatprep.subr.bf16.mxu0 %v10610_v56  ;;  %5909 = vmatprep.subr.bf16.mxu1 %v10611_v29 }
 0x7f7   :  { %5847 = vmatpush1.bf16.msra.mxu0 %v10612_v3  ;;  %5911 = vmatpush1.bf16.msra.mxu1 %v10613_v30 }
 0x7f8   :  { %5849 = vmatprep.subr.bf16.mxu0 %v10614_v41  ;;  %5913 = vmatprep.subr.bf16.mxu1 %v10615_v24  ;;  %v10625_v41 = vld [vmem:[#allocation135_spill] sm:$0xff]  ;;  %v10626_v24 = vld [vmem:[#allocation8_spill] sm:$0xff] }
 0x7fb   :  { %5851 = vmatpush1.bf16.msra.mxu0 %v10616_v59  ;;  %5915 = vmatpush1.bf16.msra.mxu1 %v10617_v4  ;;  %v10627_v59 = vld [vmem:[#allocation9_spill] sm:$0xff] }
 0x7fc   :  { %5853 = vmatprep.subr.bf16.mxu0 %v10618_v32  ;;  %5917 = vmatprep.subr.bf16.mxu1 %v10619_v45  ;;  %v10628_v45 = vld [vmem:[#allocation10_spill] sm:$0xff]  ;;  %v10637_v32 = vld [vmem:[#allocation19_spill] sm:$0xff] }
 0x7ff   :  { %5855 = vmatpush1.bf16.msra.mxu0 %v10620_v38  ;;  %5919 = vmatpush1.bf16.msra.mxu1 %v10621_v52  ;;  %v10629_v38 = vld [vmem:[#allocation11_spill] sm:$0xff]  ;;  %v10630_v52 = vld [vmem:[#allocation12_spill] sm:$0xff] }
 0x800   :  { %5857 = vmatprep.subr.bf16.mxu0 %v10622_v15  ;;  %5921 = vmatprep.subr.bf16.mxu1 %v10623_v48  ;;  %v10631_v15 = vld [vmem:[#allocation13_spill] sm:$0xff]  ;;  %v10632_v48 = vld [vmem:[#allocation14_spill] sm:$0xff] }
 0x803   :  { %5859 = vmatpush1.bf16.msra.mxu0 %v10624_v46  ;;  %5923 = vmatpush1.bf16.msra.mxu1 %v10625_v41  ;;  %v10633_v46 = vld [vmem:[#allocation15_spill] sm:$0xff]  ;;  %v10634_v41 = vld [vmem:[#allocation16_spill] sm:$0xff] }
 0x804   :  { %5925 = vmatprep.subr.bf16.mxu0 %v10626_v24  ;;  %5989 = vmatprep.subr.bf16.mxu1 %v10627_v59  ;;  %v10635_v24 = vld [vmem:[#allocation17_spill] sm:$0xff]  ;;  %v10636_v59 = vld [vmem:[#allocation18_spill] sm:$0xff] }
 0x806   :  { %2742 = vmatmul.mubr.f32.vlgmr.msra.gmra.mrb[26].mxu0 %v8700_v28  ;;  %2813 = vmatmul.mubr.f32.vlgmr.msra.gmra.mrb[26].mxu1 %v8700_v28  ;;  %v10638_v28 = vld [vmem:[#allocation20_spill] sm:$0xff] }
 0x807   :  { %5927 = vmatpush1.bf16.msra.mxu0 %v10628_v45  ;;  %5991 = vmatpush1.bf16.msra.mxu1 %v10629_v38  ;;  %v10639_v45 = vld [vmem:[#allocation21_spill] sm:$0xff]  ;;  %v10640_v38 = vld [vmem:[#allocation22_spill] sm:$0xff] }
 0x808   :  { %5929 = vmatprep.subr.bf16.mxu0 %v10630_v52  ;;  %5993 = vmatprep.subr.bf16.mxu1 %v10631_v15  ;;  %v10641_v52 = vld [vmem:[#allocation23_spill] sm:$0xff]  ;;  %v10642_v15 = vld [vmem:[#allocation24_spill] sm:$0xff] }
 0x80b   :  { %5931 = vmatpush1.bf16.msra.mxu0 %v10632_v48  ;;  %5995 = vmatpush1.bf16.msra.mxu1 %v10633_v46  ;;  %v10643_v48 = vld [vmem:[#allocation25_spill] sm:$0xff]  ;;  %v10644_v46 = vld [vmem:[#allocation26_spill] sm:$0xff] }
 0x80c   :  { %5933 = vmatprep.subr.bf16.mxu0 %v10634_v41  ;;  %5997 = vmatprep.subr.bf16.mxu1 %v10635_v24  ;;  %v10645_v41 = vld [vmem:[#allocation27_spill] sm:$0xff]  ;;  %v10646_v24 = vld [vmem:[#allocation28_spill] sm:$0xff] }
 0x80f   :  { %5935 = vmatpush1.bf16.msra.mxu0 %v10636_v59  ;;  %5999 = vmatpush1.bf16.msra.mxu1 %v10637_v32  ;;  %v10647_v59 = vld [vmem:[#allocation29_spill] sm:$0xff]  ;;  %v10648_v32 = vld [vmem:[#allocation30_spill] sm:$0xff] }
 0x810   :  { %5937 = vmatprep.subr.bf16.mxu0 %v10638_v28  ;;  %6001 = vmatprep.subr.bf16.mxu1 %v10639_v45  ;;  %v10649_v28 = vld [vmem:[#allocation31_spill] sm:$0xff]  ;;  %v10650_v45 = vld [vmem:[#allocation32_spill] sm:$0xff] }
 0x813   :  { %5939 = vmatpush1.bf16.msra.mxu0 %v10640_v38  ;;  %6003 = vmatpush1.bf16.msra.mxu1 %v10641_v52  ;;  %v10651_v38 = vld [vmem:[#allocation33_spill] sm:$0xff]  ;;  %v10652_v52 = vld [vmem:[#allocation34_spill] sm:$0xff] }
 0x814   :  { %5941 = vmatprep.subr.bf16.mxu0 %v10642_v15  ;;  %6005 = vmatprep.subr.bf16.mxu1 %v10643_v48  ;;  %v10653_v15 = vld [vmem:[#allocation35_spill] sm:$0xff]  ;;  %v10654_v48 = vld [vmem:[#allocation36_spill] sm:$0xff] }
 0x817   :  { %5943 = vmatpush1.bf16.msra.mxu0 %v10644_v46  ;;  %6007 = vmatpush1.bf16.msra.mxu1 %v10645_v41  ;;  %v10655_v46 = vld [vmem:[#allocation37_spill] sm:$0xff]  ;;  %v10656_v41 = vld [vmem:[#allocation38_spill] sm:$0xff] }
 0x818   :  { %5945 = vmatprep.subr.bf16.mxu0 %v10646_v24  ;;  %6009 = vmatprep.subr.bf16.mxu1 %v10647_v59  ;;  %v10657_v24 = vld [vmem:[#allocation39_spill] sm:$0xff]  ;;  %v10658_v59 = vld [vmem:[#allocation40_spill] sm:$0xff] }
 0x81b   :  { %5947 = vmatpush1.bf16.msra.mxu0 %v10648_v32  ;;  %6011 = vmatpush1.bf16.msra.mxu1 %v10649_v28  ;;  %v10659_v32 = vld [vmem:[#allocation41_spill] sm:$0xff]  ;;  %v10660_v28 = vld [vmem:[#allocation42_spill] sm:$0xff] }
 0x81c   :  { %5949 = vmatprep.subr.bf16.mxu0 %v10650_v45  ;;  %6013 = vmatprep.subr.bf16.mxu1 %v10651_v38  ;;  %v10661_v45 = vld [vmem:[#allocation43_spill] sm:$0xff]  ;;  %v10662_v38 = vld [vmem:[#allocation44_spill] sm:$0xff] }
 0x81f   :  { %5951 = vmatpush1.bf16.msra.mxu0 %v10652_v52  ;;  %6015 = vmatpush1.bf16.msra.mxu1 %v10653_v15  ;;  %v10663_v52 = vld [vmem:[#allocation45_spill] sm:$0xff]  ;;  %v10664_v15 = vld [vmem:[#allocation46_spill] sm:$0xff] }
 0x820   :  { %5953 = vmatprep.subr.bf16.mxu0 %v10654_v48  ;;  %6017 = vmatprep.subr.bf16.mxu1 %v10655_v46  ;;  %v10665_v48 = vld [vmem:[#allocation47_spill] sm:$0xff]  ;;  %v10666_v46 = vld [vmem:[#allocation48_spill] sm:$0xff] }
 0x823   :  { %5955 = vmatpush1.bf16.msra.mxu0 %v10656_v41  ;;  %6019 = vmatpush1.bf16.msra.mxu1 %v10657_v24  ;;  %v10667_v41 = vld [vmem:[#allocation49_spill] sm:$0xff]  ;;  %v10668_v24 = vld [vmem:[#allocation50_spill] sm:$0xff] }
 0x824   :  { %5957 = vmatprep.subr.bf16.mxu0 %v10658_v59  ;;  %6021 = vmatprep.subr.bf16.mxu1 %v10659_v32  ;;  %v10669_v59 = vld [vmem:[#allocation51_spill] sm:$0xff]  ;;  %v10670_v32 = vld [vmem:[#allocation52_spill] sm:$0xff] }
 0x827   :  { %5959 = vmatpush1.bf16.msra.mxu0 %v10660_v28  ;;  %6023 = vmatpush1.bf16.msra.mxu1 %v10661_v45  ;;  %v10671_v28 = vld [vmem:[#allocation53_spill] sm:$0xff]  ;;  %v10672_v45 = vld [vmem:[#allocation54_spill] sm:$0xff] }
 0x828   :  { %5961 = vmatprep.subr.bf16.mxu0 %v10662_v38  ;;  %6025 = vmatprep.subr.bf16.mxu1 %v10663_v52  ;;  %v10673_v38 = vld [vmem:[#allocation55_spill] sm:$0xff]  ;;  %v10674_v52 = vld [vmem:[#allocation56_spill] sm:$0xff] }
 0x82b   :  { %5963 = vmatpush1.bf16.msra.mxu0 %v10664_v15  ;;  %6027 = vmatpush1.bf16.msra.mxu1 %v10665_v48  ;;  %v10675_v15 = vld [vmem:[#allocation57_spill] sm:$0xff]  ;;  %v10676_v48 = vld [vmem:[#allocation58_spill] sm:$0xff] }
 0x82c   :  { %5965 = vmatprep.subr.bf16.mxu0 %v10666_v46  ;;  %6029 = vmatprep.subr.bf16.mxu1 %v10667_v41  ;;  %v10677_v46 = vld [vmem:[#allocation59_spill] sm:$0xff]  ;;  %v10678_v41 = vld [vmem:[#allocation60_spill] sm:$0xff] }
 0x82f   :  { %5967 = vmatpush1.bf16.msra.mxu0 %v10668_v24  ;;  %6031 = vmatpush1.bf16.msra.mxu1 %v10669_v59  ;;  %v10679_v24 = vld [vmem:[#allocation61_spill] sm:$0xff]  ;;  %v10680_v59 = vld [vmem:[#allocation62_spill] sm:$0xff] }
 0x830   :  { %5969 = vmatprep.subr.bf16.mxu0 %v10670_v32  ;;  %6033 = vmatprep.subr.bf16.mxu1 %v10671_v28  ;;  %v10681_v32 = vld [vmem:[#allocation63_spill] sm:$0xff]  ;;  %v10682_v28 = vld [vmem:[#allocation64_spill] sm:$0xff] }
 0x833   :  { %5971 = vmatpush1.bf16.msra.mxu0 %v10672_v45  ;;  %6035 = vmatpush1.bf16.msra.mxu1 %v10673_v38  ;;  %v10683_v45 = vld [vmem:[#allocation65_spill] sm:$0xff]  ;;  %v10684_v38 = vld [vmem:[#allocation66_spill] sm:$0xff] }
 0x834   :  { %5973 = vmatprep.subr.bf16.mxu0 %v10674_v52  ;;  %6037 = vmatprep.subr.bf16.mxu1 %v10675_v15  ;;  %v10685_v52 = vld [vmem:[#allocation67_spill] sm:$0xff]  ;;  %v10686_v15 = vld [vmem:[#allocation68_spill] sm:$0xff] }
 0x837   :  { %5975 = vmatpush1.bf16.msra.mxu0 %v10676_v48  ;;  %6039 = vmatpush1.bf16.msra.mxu1 %v10677_v46  ;;  %v10687_v48 = vld [vmem:[#allocation69_spill] sm:$0xff]  ;;  %v10688_v46 = vld [vmem:[#allocation70_spill] sm:$0xff] }
 0x838   :  { %5977 = vmatprep.subr.bf16.mxu0 %v10678_v41  ;;  %6041 = vmatprep.subr.bf16.mxu1 %v10679_v24  ;;  %v10689_v41 = vld [vmem:[#allocation71_spill] sm:$0xff]  ;;  %v10690_v24 = vld [vmem:[#allocation72_spill] sm:$0xff] }
 0x83b   :  { %5979 = vmatpush1.bf16.msra.mxu0 %v10680_v59  ;;  %6043 = vmatpush1.bf16.msra.mxu1 %v10681_v32  ;;  %v10691_v59 = vld [vmem:[#allocation73_spill] sm:$0xff] }
 0x83c   :  { %5981 = vmatprep.subr.bf16.mxu0 %v10682_v28  ;;  %6045 = vmatprep.subr.bf16.mxu1 %v10683_v45 }
 0x83f   :  { %5983 = vmatpush1.bf16.msra.mxu0 %v10684_v38  ;;  %6047 = vmatpush1.bf16.msra.mxu1 %v10685_v52 }
 0x840   :  { %5985 = vmatprep.subr.bf16.mxu0 %v10686_v15  ;;  %6049 = vmatprep.subr.bf16.mxu1 %v10687_v48  ;;  %v4046_v48 = vld [vmem:[%s9761_s0 + $0x60] sm:$0xff] }
 0x843   :  { %5987 = vmatpush1.bf16.msra.mxu0 %v10688_v46  ;;  %6051 = vmatpush1.bf16.msra.mxu1 %v10689_v41 }
 0x844   :  { %6053 = vmatprep.subr.bf16.mxu0 %v10690_v24  ;;  %6117 = vmatprep.subr.bf16.mxu1 %v10691_v59 }
 0x899   :  { %v2601_v32 = vpop.f32.mrb[24].mxu0  ;;  %v2672_v28 = vpop.f32.mrb[24].mxu1 }
 0x89a   :  { %v2603_v4 = vpop.f32.mrb[25].mxu0  ;;  %v2674_v45 = vpop.f32.mrb[25].mxu1 }
 0x89b   :  { %v2827_v30 = vcombine.low %v2601_v32, %v2603_v4  ;;  %v2828_v38 = vcombine.low %v2672_v28, %v2674_v45 }
 0x89d   :  { %v2835_v52 = vrot.slane %v2827_v30, %v7929_v14  ;;  %v2842_v15 = vrot.slane %v2828_v38, %v7929_v14 }
 0x89f   :  { %v2843_v3 = vcombine.low %v2835_v52, %v2842_v15 }
 0x8a1   :  { %v2863_v46 = vadd.f32 %v4046_v48, %v2843_v3  ;;  %v4047_v3 = vld [vmem:[%s9761_s0 + $0x68] sm:$0xff] }
 0x8a3   :  { %v2872_v41 = vrot.slane %v2863_v46, 4  ;;  %v4048_v29 = vmul.f32 -1.442695, %v2863_v46 }
 0x8a5   :  { %v4049_v24 = vmul.f32 -1.442695, %v2872_v41 }
 0x8a7   :  { %6536 = vpow2.f32 %v4049_v24 }
 0x8a8   :  { %6538 = vpow2.f32 %v4048_v29 }
 0x8b1   :  { %v6537_v47 = vpop.eup %6536 }
 0x8b2   :  { %v6539_v28 = vpop.eup %6538  ;;  %v2877_v38 = vadd.f32 1.0, %v6537_v47 }
 0x8b3   :  { %v2868_v5 = vadd.f32 1.0, %v6539_v28 }
 0x8b4   :  { %6540 = vrcp.f32 %v2877_v38 }
 0x8b5   :  { %6542 = vrcp.f32 %v2868_v5 }
 0x8be   :  { %v6541_v24 = vpop.eup %6540 }
 0x8d9   :  { %v2743_v59 = vpop.f32.mrb[26].mxu0  ;;  %v2814_v56 = vpop.f32.mrb[26].mxu1 }
 0x8da   :  { %v2745_v4 = vpop.f32.mrb[27].mxu0  ;;  %v2816_v32 = vpop.f32.mrb[27].mxu1 }
 0x8db   :  { %v2844_v30 = vcombine.low %v2743_v59, %v2745_v4  ;;  %v2845_v45 = vcombine.low %v2814_v56, %v2816_v32  ;;  %v6543_v56 = vpop.eup %6542  ;;  %v2890_v59 = vmul.f32 %v6541_v24, %v8696_v42  ;;  %v3303_v42 = vld [vmem:[%s9764_s3 + $0x168] sm:$0xff] }
 0x8dd   :  { %v2852_v52 = vrot.slane %v2844_v30, %v7929_v14  ;;  %v2859_v15 = vrot.slane %v2845_v45, %v7929_v14 }
 0x8df   :  { %v2860_v48 = vcombine.low %v2852_v52, %v2859_v15 }
 0x8e1   :  { %v2864_v29 = vadd.f32 %v4047_v3, %v2860_v48 }
 0x8e3   :  { %6544 = vtanh.f32 %v2864_v29  ;;  %v2882_v46 = vrot.slane %v2864_v29, 4  ;;  %v3294_v29 = vld [vmem:[%s9764_s3 + $0x100] sm:$0xff] }
 0x8e5   :  { %v4050_v41 = vmul.f32 -1.442695, %v2882_v46  ;;  %v3300_v46 = vld [vmem:[%s9764_s3 + $0x140] sm:$0xff] }
 0x8e7   :  { %6546 = vpow2.f32 %v4050_v41 }
 0x8ed   :  { %v6545_v47 = vpop.eup %6544 }
 0x8ee   :  { %v2891_v4 = vmul.f32 %v6545_v47, %v6543_v56  ;;  %v3307_v56 = vld [vmem:[%s9764_s3 + $0x188] sm:$0xff] }
 0x8f0   :  { %v8847_v32 = vadd.f32 %v2891_v4, %v2890_v59  ;;  %v3296_v59 = vld [vmem:[%s9764_s3 + $0x120] sm:$0xff] }
 0x8f1   :  { %v6547_v28 = vpop.eup %6546  ;;  %v3302_v4 = vld [vmem:[%s9764_s3 + $0x160] sm:$0xff] }
 0x8f2   :  { %v2887_v30 = vadd.f32 1.0, %v6547_v28  ;;  %6548 = vtanh.f32 %v8847_v32  ;;  %v3313_v28 = vld [vmem:[%s9764_s3 + $0x1c8] sm:$0xff] }
 0x8f4   :  { %6550 = vrcp.f32 %v2887_v30  ;;  %v3309_v30 = vld [vmem:[%s9764_s3 + $0x1a8] sm:$0xff] }
 0x8fc   :  { %v6549_v45 = vpop.eup %6548 }
 0x8fe   :  { %v6551_v38 = vpop.eup %6550 }
 0x8ff   :  { %v2894_v5 = vmul.f32 %v6551_v38, %v6549_v45  ;;  %v3315_v45 = vld [vmem:[%s9764_s3 + $0x1e8] sm:$0xff]  ;;  %v6190_v38 = vpack.c.bf16 %v3300_v46, %v3294_v29  ;;  %v3354_v29 = vld [vmem:[%s9764_s3 + $0x380] sm:$0xff] }
 0x900   :  { %v3360_v46 = vld [vmem:[%s9764_s3 + $0x3c0] sm:$0xff] }
 0x901   :  { %v8851_v52 = vrot.slane %v2894_v5, %v7929_v14  ;;  %v3306_v5 = vld [vmem:[%s9764_s3 + $0x180] sm:$0xff] }
 0x903   :  { %v2906_v15 = vcombine.high %v8851_v52, %v8851_v52 }
 0x905   :  { %2973 = vmatprep.mubr.f32.mxu0 %v2906_v15  ;;  %3044 = vmatprep.mubr.f32.mxu1 %v2906_v15 }
 0x906   :  { %2974 = vmatmul.mubr.f32.vlgmr.msra.gmra.mrb[28].mxu0 %v8851_v52  ;;  %3045 = vmatmul.mubr.f32.vlgmr.msra.gmra.mrb[28].mxu1 %v8851_v52 }
 0x907   :  { %6055 = vmatpush1.bf16.msra.mxu0 %v10189_v62  ;;  %6119 = vmatpush1.bf16.msra.mxu1 %v10190_v33  ;;  %v10692_v62 = vld [vmem:[#allocation118_spill] sm:$0xff]  ;;  %v10693_v33 = vld [vmem:[#allocation119_spill] sm:$0xff] }
 0x908   :  { %3115 = vmatprep.mubr.f32.mxu0 %v2906_v15  ;;  %3186 = vmatprep.mubr.f32.mxu1 %v2906_v15  ;;  %v6254_v15 = vpack.c.bf16 %v3302_v4, %v3296_v59  ;;  %v3356_v59 = vld [vmem:[%s9764_s3 + $0x3a0] sm:$0xff] }
 0x909   :  { %6057 = vmatprep.subr.bf16.mxu0 %v10191_v23  ;;  %6121 = vmatprep.subr.bf16.mxu1 %v10192_v2  ;;  %v10694_v23 = vld [vmem:[#allocation120_spill] sm:$0xff]  ;;  %v10695_v2 = vld [vmem:[#allocation121_spill] sm:$0xff] }
 0x90a   :  { %v3362_v4 = vld [vmem:[%s9764_s3 + $0x3e0] sm:$0xff] }
 0x90b   :  { %6059 = vmatpush1.bf16.msra.mxu0 %v10193_v61  ;;  %6123 = vmatpush1.bf16.msra.mxu1 %v10272_v49  ;;  %v10696_v61 = vld [vmem:[#allocation122_spill] sm:$0xff]  ;;  %v10697_v49 = vld [vmem:[#allocation123_spill] sm:$0xff] }
 0x90c   :  { %6061 = vmatprep.subr.bf16.mxu0 %v10273_v16  ;;  %6125 = vmatprep.subr.bf16.mxu1 %v10274_v37  ;;  %v10698_v16 = vld [vmem:[#allocation124_spill] sm:$0xff]  ;;  %v10699_v37 = vld [vmem:[#allocation125_spill] sm:$0xff] }
 0x90f   :  { %6063 = vmatpush1.bf16.msra.mxu0 %v10275_v6  ;;  %6127 = vmatpush1.bf16.msra.mxu1 %v10276_v43  ;;  %v10703_v6 = vld [vmem:[#allocation129_spill] sm:$0xff] }
 0x910   :  { %6065 = vmatprep.subr.bf16.mxu0 %v10277_v50  ;;  %6129 = vmatprep.subr.bf16.mxu1 %v10356_v60  ;;  %v3271_v43 = vld [vmem:[%s9764_s3 + $0x8] sm:$0xff]  ;;  %v3272_v60 = vld [vmem:[%s9764_s3 + $0x20] sm:$0xff] }
 0x911   :  { %v3277_v50 = vld [vmem:[%s9764_s3 + $0x48] sm:$0xff] }
 0x913   :  { %6067 = vmatpush1.bf16.msra.mxu0 %v10357_v18  ;;  %6131 = vmatpush1.bf16.msra.mxu1 %v10358_v27  ;;  %v3278_v18 = vld [vmem:[%s9764_s3 + $0x60] sm:$0xff]  ;;  %v3289_v27 = vld [vmem:[%s9764_s3 + $0xc8] sm:$0xff] }
 0x914   :  { %6069 = vmatprep.subr.bf16.mxu0 %v10359_v17  ;;  %6133 = vmatprep.subr.bf16.mxu1 %v10360_v31  ;;  %v3285_v17 = vld [vmem:[%s9764_s3 + $0xa8] sm:$0xff] }
 0x915   :  { %v3291_v31 = vld [vmem:[%s9764_s3 + $0xe8] sm:$0xff] }
 0x917   :  { %6071 = vmatpush1.bf16.msra.mxu0 %v10361_v57  ;;  %6135 = vmatpush1.bf16.msra.mxu1 %v10440_v39  ;;  %v8956_v57 = vld.sshfl [vmem:[%s9763_s2] sm:$0x33 pattern:$0x76325410]  ;;  %v3301_v39 = vld [vmem:[%s9764_s3 + $0x148] sm:$0xff] }
 0x918   :  { %6073 = vmatprep.subr.bf16.mxu0 %v10441_v21  ;;  %6137 = vmatprep.subr.bf16.mxu1 %v10364_v9  ;;  %v3297_v21 = vld [vmem:[%s9764_s3 + $0x128] sm:$0xff]  ;;  %v8986_v3 = vcombine.high %v8956_v57, %v8956_v57 }
 0x919   :  { %v6252_v47 = vpack.c.bf16 %v3303_v42, %v3297_v21  ;;  %v3357_v21 = vld [vmem:[%s9764_s3 + $0x3a8] sm:$0xff] }
 0x91a   :  { %v3363_v42 = vld [vmem:[%s9764_s3 + $0x3e8] sm:$0xff] }
 0x91b   :  { %6075 = vmatpush1.bf16.msra.mxu0 %v10365_v34  ;;  %6139 = vmatpush1.bf16.msra.mxu1 %v10366_v26  ;;  %v3282_v34 = vld [vmem:[%s9764_s3 + $0x80] sm:$0xff] }
 0x91c   :  { %6077 = vmatprep.subr.bf16.mxu0 %v10367_v40  ;;  %6141 = vmatprep.subr.bf16.mxu1 %v10368_v22  ;;  %v3288_v26 = vld [vmem:[%s9764_s3 + $0xc0] sm:$0xff]  ;;  %v6246_v40 = vpack.c.bf16 %v3278_v18, %v3272_v60  ;;  %v3343_v60 = vld [vmem:[%s9764_s3 + $0x308] sm:$0xff] }
 0x91d   :  { %v6186_v48 = vpack.c.bf16 %v3288_v26, %v3282_v34  ;;  %v3342_v34 = vld [vmem:[%s9764_s3 + $0x300] sm:$0xff] }
 0x91e   :  { %v3348_v26 = vld [vmem:[%s9764_s3 + $0x340] sm:$0xff] }
 0x91f   :  { %6079 = vmatpush1.bf16.msra.mxu0 %v10369_v44  ;;  %6143 = vmatpush1.bf16.msra.mxu1 %v10370_v51  ;;  %v3295_v44 = vld [vmem:[%s9764_s3 + $0x108] sm:$0xff]  ;;  %v6248_v51 = vpack.c.bf16 %v3291_v31, %v3285_v17  ;;  %v3338_v17 = vld [vmem:[%s9764_s3 + $0x2e0] sm:$0xff] }
 0x920   :  { %6081 = vmatprep.subr.bf16.mxu0 %v10371_v8  ;;  %6145 = vmatprep.subr.bf16.mxu1 %v10372_v53  ;;  %v3284_v8 = vld [vmem:[%s9764_s3 + $0xa0] sm:$0xff]  ;;  %v6188_v24 = vpack.c.bf16 %v3301_v39, %v3295_v44  ;;  %v3349_v31 = vld [vmem:[%s9764_s3 + $0x348] sm:$0xff] }
 0x921   :  { %v3290_v53 = vld [vmem:[%s9764_s3 + $0xe0] sm:$0xff]  ;;  %v3355_v44 = vld [vmem:[%s9764_s3 + $0x388] sm:$0xff] }
 0x922   :  { %v6250_v41 = vpack.c.bf16 %v3290_v53, %v3284_v8  ;;  %v3344_v8 = vld [vmem:[%s9764_s3 + $0x320] sm:$0xff]  ;;  %v3361_v39 = vld [vmem:[%s9764_s3 + $0x3c8] sm:$0xff] }
 0x923   :  { %6083 = vmatpush1.bf16.msra.mxu0 %v10373_v35  ;;  %6147 = vmatpush1.bf16.msra.mxu1 %v10374_v13  ;;  %v10708_v35 = vld [vmem:[#allocation134_spill] sm:$0xff]  ;;  %v10709_v13 = vld [vmem:[#allocation135_spill] sm:$0xff] }
 0x924   :  { %6085 = vmatprep.subr.bf16.mxu0 %v10297_v25  ;;  %6149 = vmatprep.subr.bf16.mxu1 %v10298_v63  ;;  %v6180_v25 = vpack.c.bf16 %v3277_v50, %v3271_v43  ;;  %v3283_v63 = vld [vmem:[%s9764_s3 + $0x88] sm:$0xff]  ;;  %v3350_v53 = vld [vmem:[%s9764_s3 + $0x360] sm:$0xff] }
 0x925   :  { %v6184_v22 = vpack.c.bf16 %v3289_v27, %v3283_v63  ;;  %v3331_v50 = vld [vmem:[%s9764_s3 + $0x288] sm:$0xff]  ;;  %v3332_v27 = vld [vmem:[%s9764_s3 + $0x2a0] sm:$0xff] }
 0x927   :  { %6087 = vmatpush1.bf16.msra.mxu0 %v10299_v36  ;;  %6151 = vmatpush1.bf16.msra.mxu1 %v10300_v54  ;;  %v3273_v54 = vld [vmem:[%s9764_s3 + $0x28] sm:$0xff] }
 0x928   :  { %6089 = vmatprep.subr.bf16.mxu0 %v10301_v1  ;;  %6153 = vmatprep.subr.bf16.mxu1 %v10302_v0  ;;  %v3279_v1 = vld [vmem:[%s9764_s3 + $0x68] sm:$0xff]  ;;  %v10704_v0 = vld [vmem:[#allocation130_spill] sm:$0xff] }
 0x929   :  { %v6244_v36 = vpack.c.bf16 %v3279_v1, %v3273_v54  ;;  %v3320_v1 = vld [vmem:[%s9764_s3 + $0x220] sm:$0xff] }
 0x92b   :  { %6091 = vmatpush1.bf16.msra.mxu0 %v10303_v55  ;;  %6155 = vmatpush1.bf16.msra.mxu1 %v10304_v20  ;;  %v10705_v55 = vld [vmem:[#allocation131_spill] sm:$0xff] }
 0x92c   :  { %6093 = vmatprep.subr.bf16.mxu0 %v10305_v10  ;;  %6157 = vmatprep.subr.bf16.mxu1 %v10306_v19  ;;  %v3270_v20 = vld [vmem:[%s9764_s3] sm:$0xff] }
 0x92d   :  { %v3276_v10 = vld [vmem:[%s9764_s3 + $0x40] sm:$0xff] }
 0x92e   :  { %v10706_v19 = vld [vmem:[#allocation132_spill] sm:$0xff]  ;;  %v6182_v9 = vpack.c.bf16 %v3276_v10, %v3270_v20 }
 0x92f   :  { %6095 = vmatpush1.bf16.msra.mxu0 %v10307_v11  ;;  %6159 = vmatpush1.bf16.msra.mxu1 %v10230_v7  ;;  %v10700_v7 = vld [vmem:[#allocation126_spill] sm:$0xff]  ;;  %v10707_v11 = vld [vmem:[#allocation133_spill] sm:$0xff] }
 0x930   :  { %6097 = vmatprep.subr.bf16.mxu0 %v10231_v58  ;;  %6161 = vmatprep.subr.bf16.mxu1 %v10232_v12  ;;  %v10701_v58 = vld [vmem:[#allocation127_spill] sm:$0xff]  ;;  %v10702_v12 = vld [vmem:[#allocation128_spill] sm:$0xff] }
 0x931   :  { %v3333_v20 = vld [vmem:[%s9764_s3 + $0x2a8] sm:$0xff] }
 0x932   :  { %v3339_v10 = vld [vmem:[%s9764_s3 + $0x2e8] sm:$0xff] }
 0x933   :  { %6099 = vmatpush1.bf16.msra.mxu0 %v10692_v62  ;;  %6163 = vmatpush1.bf16.msra.mxu1 %v10693_v33  ;;  %v6192_v62 = vpack.c.bf16 %v3313_v28, %v3307_v56  ;;  %v3319_v33 = vld [vmem:[%s9764_s3 + $0x208] sm:$0xff]  ;;  %v6264_v18 = vpack.c.bf16 %v3339_v10, %v3333_v20 }
 0x934   :  { %6101 = vmatprep.subr.bf16.mxu0 %v10694_v23  ;;  %6165 = vmatprep.subr.bf16.mxu1 %v10695_v2  ;;  %v6256_v23 = vpack.c.bf16 %v3315_v45, %v3309_v30  ;;  %v3308_v2 = vld [vmem:[%s9764_s3 + $0x1a0] sm:$0xff]  ;;  %v3367_v56 = vld [vmem:[%s9764_s3 + $0x408] sm:$0xff] }
 0x935   :  { %v3373_v28 = vld [vmem:[%s9764_s3 + $0x448] sm:$0xff] }
 0x936   :  { %v3369_v30 = vld [vmem:[%s9764_s3 + $0x428] sm:$0xff] }
 0x937   :  { %6103 = vmatpush1.bf16.msra.mxu0 %v10696_v61  ;;  %6167 = vmatpush1.bf16.msra.mxu1 %v10697_v49  ;;  %v3314_v61 = vld [vmem:[%s9764_s3 + $0x1e0] sm:$0xff]  ;;  %v3325_v49 = vld [vmem:[%s9764_s3 + $0x248] sm:$0xff] }
 0x938   :  { %6105 = vmatprep.subr.bf16.mxu0 %v10698_v16  ;;  %6169 = vmatprep.subr.bf16.mxu1 %v10699_v37  ;;  %v3321_v16 = vld [vmem:[%s9764_s3 + $0x228] sm:$0xff]  ;;  %v6196_v43 = vpack.c.bf16 %v3325_v49, %v3319_v33 }
 0x939   :  { %v3327_v37 = vld [vmem:[%s9764_s3 + $0x268] sm:$0xff] }
 0x93a   :  { %v6260_v54 = vpack.c.bf16 %v3327_v37, %v3321_v16  ;;  %v3375_v45 = vld [vmem:[%s9764_s3 + $0x468] sm:$0xff] }
 0x93b   :  { %6107 = vmatpush1.bf16.msra.mxu0 %v10700_v7  ;;  %6171 = vmatpush1.bf16.msra.mxu1 %v10701_v58  ;;  %v3318_v58 = vld [vmem:[%s9764_s3 + $0x200] sm:$0xff]  ;;  %v3379_v33 = vld [vmem:[%s9764_s3 + $0x488] sm:$0xff] }
 0x93c   :  { %6109 = vmatprep.subr.bf16.mxu0 %v10702_v12  ;;  %6173 = vmatprep.subr.bf16.mxu1 %v10703_v6  ;;  %v3324_v12 = vld [vmem:[%s9764_s3 + $0x240] sm:$0xff]  ;;  %v6258_v6 = vpack.c.bf16 %v3314_v61, %v3308_v2  ;;  %v3385_v49 = vld [vmem:[%s9764_s3 + $0x4c8] sm:$0xff] }
 0x93d   :  { %v3368_v2 = vld [vmem:[%s9764_s3 + $0x420] sm:$0xff]  ;;  %v3381_v16 = vld [vmem:[%s9764_s3 + $0x4a8] sm:$0xff] }
 0x93e   :  { %v3374_v61 = vld [vmem:[%s9764_s3 + $0x460] sm:$0xff]  ;;  %v3387_v37 = vld [vmem:[%s9764_s3 + $0x4e8] sm:$0xff] }
 0x93f   :  { %6111 = vmatpush1.bf16.msra.mxu0 %v10704_v0  ;;  %6175 = vmatpush1.bf16.msra.mxu1 %v10705_v55  ;;  %v3326_v0 = vld [vmem:[%s9764_s3 + $0x260] sm:$0xff]  ;;  %v3337_v55 = vld [vmem:[%s9764_s3 + $0x2c8] sm:$0xff] }
 0x940   :  { %6113 = vmatprep.subr.bf16.mxu0 %v10706_v19  ;;  %6177 = vmatprep.subr.bf16.mxu1 %v10707_v11  ;;  %v6198_v19 = vpack.c.bf16 %v3324_v12, %v3318_v58  ;;  %v3330_v11 = vld [vmem:[%s9764_s3 + $0x280] sm:$0xff]  ;;  %v6262_v63 = vpack.c.bf16 %v3326_v0, %v3320_v1  ;;  %v3393_v20 = vld [vmem:[%s9764_s3 + $0x528] sm:$0xff] }
 0x941   :  { %v3378_v58 = vld [vmem:[%s9764_s3 + $0x480] sm:$0xff]  ;;  %v3399_v10 = vld [vmem:[%s9764_s3 + $0x568] sm:$0xff] }
 0x942   :  { %v3384_v12 = vld [vmem:[%s9764_s3 + $0x4c0] sm:$0xff] }
 0x943   :  { %6115 = vmatpush1.bf16.msra.mxu0 %v10708_v35  ;;  %6179 = vmatpush1.bf16.msra.mxu1 %v10709_v13  ;;  %v3345_v35 = vld [vmem:[%s9764_s3 + $0x328] sm:$0xff]  ;;  %v3380_v1 = vld [vmem:[%s9764_s3 + $0x4a0] sm:$0xff] }
 0x944   :  { %6181 = vmatprep.subr.bf16.mxu0 %v6180_v25  ;;  %6245 = vmatprep.subr.bf16.mxu1 %v6244_v36  ;;  %v3336_v25 = vld [vmem:[%s9764_s3 + $0x2c0] sm:$0xff]  ;;  %v6200_v36 = vpack.c.bf16 %v3337_v55, %v3331_v50  ;;  %v3351_v13 = vld [vmem:[%s9764_s3 + $0x368] sm:$0xff] }
 0x945   :  { %v3391_v50 = vld [vmem:[%s9764_s3 + $0x508] sm:$0xff]  ;;  %v3386_v0 = vld [vmem:[%s9764_s3 + $0x4e0] sm:$0xff] }
 0x946   :  { %3116 = vmatmul.mubr.f32.vlgmr.msra.gmra.mrb[30].mxu0 %v8851_v52  ;;  %3187 = vmatmul.mubr.f32.vlgmr.msra.gmra.mrb[30].mxu1 %v8851_v52  ;;  %v3312_v52 = vld [vmem:[%s9764_s3 + $0x1c0] sm:$0xff]  ;;  %v3397_v55 = vld [vmem:[%s9764_s3 + $0x548] sm:$0xff] }
 0x947   :  { %6183 = vmatpush1.bf16.msra.mxu0 %v6182_v9  ;;  %6247 = vmatpush1.bf16.msra.mxu1 %v6246_v40  ;;  %v6194_v7 = vpack.c.bf16 %v3312_v52, %v3306_v5  ;;  %v6202_v9 = vpack.c.bf16 %v3336_v25, %v3330_v11  ;;  %v6266_v40 = vpack.c.bf16 %v3338_v17, %v3332_v27  ;;  %v3366_v5 = vld [vmem:[%s9764_s3 + $0x400] sm:$0xff] }
 0x948   :  { %6185 = vmatprep.subr.bf16.mxu0 %v6184_v22  ;;  %6249 = vmatprep.subr.bf16.mxu1 %v6248_v51  ;;  %v6204_v22 = vpack.c.bf16 %v3349_v31, %v3343_v60  ;;  %v6268_v51 = vpack.c.bf16 %v3351_v13, %v3345_v35  ;;  %v3372_v52 = vld [vmem:[%s9764_s3 + $0x440] sm:$0xff]  ;;  %v3403_v60 = vld [vmem:[%s9764_s3 + $0x588] sm:$0xff] }
 0x949   :  { %3569 = vmatprep.mubr.f32.mxu0 %v8986_v3  ;;  %3640 = vmatprep.mubr.f32.mxu1 %v8986_v3  ;;  %v3390_v11 = vld [vmem:[%s9764_s3 + $0x500] sm:$0xff]  ;;  %v3409_v31 = vld [vmem:[%s9764_s3 + $0x5c8] sm:$0xff] }
 0x94a   :  { %v3396_v25 = vld [vmem:[%s9764_s3 + $0x540] sm:$0xff]  ;;  %v3405_v35 = vld [vmem:[%s9764_s3 + $0x5a8] sm:$0xff] }
 0x94b   :  { %6187 = vmatpush1.bf16.msra.mxu0 %v6186_v48  ;;  %6251 = vmatpush1.bf16.msra.mxu1 %v6250_v41  ;;  %v6206_v48 = vpack.c.bf16 %v3348_v26, %v3342_v34  ;;  %v6270_v41 = vpack.c.bf16 %v3350_v53, %v3344_v8  ;;  %v3392_v27 = vld [vmem:[%s9764_s3 + $0x520] sm:$0xff]  ;;  %v3411_v13 = vld [vmem:[%s9764_s3 + $0x5e8] sm:$0xff] }
 0x94c   :  { %6189 = vmatprep.subr.bf16.mxu0 %v6188_v24  ;;  %6253 = vmatprep.subr.bf16.mxu1 %v6252_v47  ;;  %v6208_v24 = vpack.c.bf16 %v3361_v39, %v3355_v44  ;;  %v6272_v47 = vpack.c.bf16 %v3363_v42, %v3357_v21  ;;  %v3398_v17 = vld [vmem:[%s9764_s3 + $0x560] sm:$0xff]  ;;  %v3415_v44 = vld [vmem:[%s9764_s3 + $0x608] sm:$0xff] }
 0x94d   :  { %v3402_v34 = vld [vmem:[%s9764_s3 + $0x580] sm:$0xff]  ;;  %v3421_v39 = vld [vmem:[%s9764_s3 + $0x648] sm:$0xff] }
 0x94e   :  { %v3408_v26 = vld [vmem:[%s9764_s3 + $0x5c0] sm:$0xff]  ;;  %v3417_v21 = vld [vmem:[%s9764_s3 + $0x628] sm:$0xff] }
 0x94f   :  { %6191 = vmatpush1.bf16.msra.mxu0 %v6190_v38  ;;  %6255 = vmatpush1.bf16.msra.mxu1 %v6254_v15  ;;  %v6210_v38 = vpack.c.bf16 %v3360_v46, %v3354_v29  ;;  %v6274_v15 = vpack.c.bf16 %v3362_v4, %v3356_v59  ;;  %v3404_v8 = vld [vmem:[%s9764_s3 + $0x5a0] sm:$0xff]  ;;  %v3423_v42 = vld [vmem:[%s9764_s3 + $0x668] sm:$0xff] }
 0x950   :  { %6193 = vmatprep.subr.bf16.mxu0 %v6192_v62  ;;  %6257 = vmatprep.subr.bf16.mxu1 %v6256_v23  ;;  %v6212_v62 = vpack.c.bf16 %v3373_v28, %v3367_v56  ;;  %v6276_v23 = vpack.c.bf16 %v3375_v45, %v3369_v30  ;;  %v3410_v53 = vld [vmem:[%s9764_s3 + $0x5e0] sm:$0xff]  ;;  %v3427_v56 = vld [vmem:[%s9764_s3 + $0x688] sm:$0xff] }
 0x951   :  { %v3414_v29 = vld [vmem:[%s9764_s3 + $0x600] sm:$0xff]  ;;  %v3433_v28 = vld [vmem:[%s9764_s3 + $0x6c8] sm:$0xff] }
 0x952   :  { %v3420_v46 = vld [vmem:[%s9764_s3 + $0x640] sm:$0xff]  ;;  %v3429_v30 = vld [vmem:[%s9764_s3 + $0x6a8] sm:$0xff] }
 0x953   :  { %6195 = vmatpush1.bf16.msra.mxu0 %v6194_v7  ;;  %6259 = vmatpush1.bf16.msra.mxu1 %v6258_v6  ;;  %v6214_v7 = vpack.c.bf16 %v3372_v52, %v3366_v5  ;;  %v6278_v6 = vpack.c.bf16 %v3374_v61, %v3368_v2  ;;  %v3416_v59 = vld [vmem:[%s9764_s3 + $0x620] sm:$0xff]  ;;  %v3435_v45 = vld [vmem:[%s9764_s3 + $0x6e8] sm:$0xff] }
 0x954   :  { %6197 = vmatprep.subr.bf16.mxu0 %v6196_v43  ;;  %6261 = vmatprep.subr.bf16.mxu1 %v6260_v54  ;;  %v6216_v43 = vpack.c.bf16 %v3385_v49, %v3379_v33  ;;  %v6280_v54 = vpack.c.bf16 %v3387_v37, %v3381_v16  ;;  %v3422_v4 = vld [vmem:[%s9764_s3 + $0x660] sm:$0xff]  ;;  %v3439_v33 = vld [vmem:[%s9764_s3 + $0x708] sm:$0xff] }
 0x955   :  { %v3426_v5 = vld [vmem:[%s9764_s3 + $0x680] sm:$0xff]  ;;  %v3445_v49 = vld [vmem:[%s9764_s3 + $0x748] sm:$0xff] }
 0x956   :  { %v3432_v52 = vld [vmem:[%s9764_s3 + $0x6c0] sm:$0xff]  ;;  %v3441_v16 = vld [vmem:[%s9764_s3 + $0x728] sm:$0xff] }
 0x957   :  { %6199 = vmatpush1.bf16.msra.mxu0 %v6198_v19  ;;  %6263 = vmatpush1.bf16.msra.mxu1 %v6262_v63  ;;  %v6218_v19 = vpack.c.bf16 %v3384_v12, %v3378_v58  ;;  %v6282_v63 = vpack.c.bf16 %v3386_v0, %v3380_v1  ;;  %v3428_v2 = vld [vmem:[%s9764_s3 + $0x6a0] sm:$0xff]  ;;  %v3447_v37 = vld [vmem:[%s9764_s3 + $0x768] sm:$0xff] }
 0x958   :  { %6201 = vmatprep.subr.bf16.mxu0 %v6200_v36  ;;  %6265 = vmatprep.subr.bf16.mxu1 %v6264_v18  ;;  %v6220_v36 = vpack.c.bf16 %v3397_v55, %v3391_v50  ;;  %v6284_v18 = vpack.c.bf16 %v3399_v10, %v3393_v20  ;;  %v3434_v61 = vld [vmem:[%s9764_s3 + $0x6e0] sm:$0xff]  ;;  %v3451_v50 = vld [vmem:[%s9764_s3 + $0x788] sm:$0xff] }
 0x959   :  { %v3438_v58 = vld [vmem:[%s9764_s3 + $0x700] sm:$0xff]  ;;  %v3457_v55 = vld [vmem:[%s9764_s3 + $0x7c8] sm:$0xff] }
 0x95a   :  { %v3444_v12 = vld [vmem:[%s9764_s3 + $0x740] sm:$0xff]  ;;  %v3453_v20 = vld [vmem:[%s9764_s3 + $0x7a8] sm:$0xff] }
 0x95b   :  { %6203 = vmatpush1.bf16.msra.mxu0 %v6202_v9  ;;  %6267 = vmatpush1.bf16.msra.mxu1 %v6266_v40  ;;  %v6222_v9 = vpack.c.bf16 %v3396_v25, %v3390_v11  ;;  %v6286_v40 = vpack.c.bf16 %v3398_v17, %v3392_v27  ;;  %v3440_v1 = vld [vmem:[%s9764_s3 + $0x720] sm:$0xff]  ;;  %v3459_v10 = vld [vmem:[%s9764_s3 + $0x7e8] sm:$0xff]  ;;  %v3275_v17 = vld [vmem:[%s9764_s3 + $0x38] sm:$0xff] }
 0x95c   :  { %6205 = vmatprep.subr.bf16.mxu0 %v6204_v22  ;;  %6269 = vmatprep.subr.bf16.mxu1 %v6268_v51  ;;  %v6224_v22 = vpack.c.bf16 %v3409_v31, %v3403_v60  ;;  %v6288_v51 = vpack.c.bf16 %v3411_v13, %v3405_v35  ;;  %v3446_v0 = vld [vmem:[%s9764_s3 + $0x760] sm:$0xff]  ;;  %v6304_v60 = vpack.c.bf16 %v3459_v10, %v3453_v20  ;;  %v3281_v31 = vld [vmem:[%s9764_s3 + $0x78] sm:$0xff] }
 0x95d   :  { %v3450_v11 = vld [vmem:[%s9764_s3 + $0x780] sm:$0xff]  ;;  %v6302_v25 = vpack.c.bf16 %v3446_v0, %v3440_v1  ;;  %v3364_v1 = vld [vmem:[%s9764_s3 + $0x3f0] sm:$0xff]  ;;  %v3371_v0 = vld [vmem:[%s9764_s3 + $0x438] sm:$0xff] }
 0x95e   :  { %v3458_v27 = vld [vmem:[%s9764_s3 + $0x7e0] sm:$0xff] }
 0x95f   :  { %6207 = vmatpush1.bf16.msra.mxu0 %v6206_v48  ;;  %6271 = vmatpush1.bf16.msra.mxu1 %v6270_v41  ;;  %v6226_v48 = vpack.c.bf16 %v3408_v26, %v3402_v34  ;;  %v6290_v41 = vpack.c.bf16 %v3410_v53, %v3404_v8  ;;  %v3274_v34 = vld [vmem:[%s9764_s3 + $0x30] sm:$0xff] }
 0x960   :  { %6209 = vmatprep.subr.bf16.mxu0 %v6208_v24  ;;  %6273 = vmatprep.subr.bf16.mxu1 %v6272_v47  ;;  %v6228_v24 = vpack.c.bf16 %v3421_v39, %v3415_v44  ;;  %v6292_v47 = vpack.c.bf16 %v3423_v42, %v3417_v21  ;;  %v3280_v26 = vld [vmem:[%s9764_s3 + $0x70] sm:$0xff]  ;;  %v3299_v39 = vld [vmem:[%s9764_s3 + $0x138] sm:$0xff] }
 0x961   :  { %v6310_v44 = vpack.c.bf16 %v3280_v26, %v3274_v34  ;;  %v3286_v8 = vld [vmem:[%s9764_s3 + $0xb0] sm:$0xff]  ;;  %v3305_v21 = vld [vmem:[%s9764_s3 + $0x178] sm:$0xff] }
 0x962   :  { %v3292_v53 = vld [vmem:[%s9764_s3 + $0xf0] sm:$0xff]  ;;  %v3407_v26 = vld [vmem:[%s9764_s3 + $0x5b8] sm:$0xff] }
 0x963   :  { %6211 = vmatpush1.bf16.msra.mxu0 %v6210_v38  ;;  %6275 = vmatpush1.bf16.msra.mxu1 %v6274_v15  ;;  %v6230_v38 = vpack.c.bf16 %v3420_v46, %v3414_v29  ;;  %v6294_v15 = vpack.c.bf16 %v3422_v4, %v3416_v59  ;;  %v6314_v42 = vpack.c.bf16 %v3292_v53, %v3286_v8  ;;  %v3298_v29 = vld [vmem:[%s9764_s3 + $0x130] sm:$0xff]  ;;  %v3323_v4 = vld [vmem:[%s9764_s3 + $0x238] sm:$0xff] }
 0x964   :  { %6213 = vmatprep.subr.bf16.mxu0 %v6212_v62  ;;  %6277 = vmatprep.subr.bf16.mxu1 %v6276_v23  ;;  %v6232_v62 = vpack.c.bf16 %v3433_v28, %v3427_v56  ;;  %v6296_v23 = vpack.c.bf16 %v3435_v45, %v3429_v30  ;;  %v3304_v46 = vld [vmem:[%s9764_s3 + $0x170] sm:$0xff]  ;;  %v3329_v28 = vld [vmem:[%s9764_s3 + $0x278] sm:$0xff] }
 0x965   :  { %v3316_v59 = vld [vmem:[%s9764_s3 + $0x1f0] sm:$0xff]  ;;  %v6324_v45 = vpack.c.bf16 %v3329_v28, %v3323_v4  ;;  %v3419_v53 = vld [vmem:[%s9764_s3 + $0x638] sm:$0xff] }
 0x966   :  { %v3400_v34 = vld [vmem:[%s9764_s3 + $0x570] sm:$0xff]  ;;  %v3449_v4 = vld [vmem:[%s9764_s3 + $0x778] sm:$0xff] }
 0x967   :  { %6215 = vmatpush1.bf16.msra.mxu0 %v6214_v7  ;;  %6279 = vmatpush1.bf16.msra.mxu1 %v6278_v6  ;;  %v6234_v7 = vpack.c.bf16 %v3432_v52, %v3426_v5  ;;  %v6298_v6 = vpack.c.bf16 %v3434_v61, %v3428_v2  ;;  %v3328_v5 = vld [vmem:[%s9764_s3 + $0x270] sm:$0xff]  ;;  %v3335_v52 = vld [vmem:[%s9764_s3 + $0x2b8] sm:$0xff] }
 0x968   :  { %6217 = vmatprep.subr.bf16.mxu0 %v6216_v43  ;;  %6281 = vmatprep.subr.bf16.mxu1 %v6280_v54  ;;  %v6236_v43 = vpack.c.bf16 %v3445_v49, %v3439_v33  ;;  %v6300_v54 = vpack.c.bf16 %v3447_v37, %v3441_v16  ;;  %v3340_v2 = vld [vmem:[%s9764_s3 + $0x2f0] sm:$0xff]  ;;  %v3347_v61 = vld [vmem:[%s9764_s3 + $0x338] sm:$0xff] }
 0x969   :  { %v3353_v49 = vld [vmem:[%s9764_s3 + $0x378] sm:$0xff]  ;;  %v3412_v8 = vld [vmem:[%s9764_s3 + $0x5f0] sm:$0xff] }
 0x96a   :  { %v6332_v37 = vpack.c.bf16 %v3353_v49, %v3347_v61 }
 0x96b   :  { %6219 = vmatpush1.bf16.msra.mxu0 %v6218_v19  ;;  %6283 = vmatpush1.bf16.msra.mxu1 %v6282_v63  ;;  %v6238_v19 = vpack.c.bf16 %v3444_v12, %v3438_v58  ;;  %v6240_v63 = vpack.c.bf16 %v3457_v55, %v3451_v50  ;;  %v3352_v58 = vld [vmem:[%s9764_s3 + $0x370] sm:$0xff]  ;;  %v3359_v12 = vld [vmem:[%s9764_s3 + $0x3b8] sm:$0xff] }
 0x96c   :  { %6221 = vmatprep.subr.bf16.mxu0 %v6220_v36  ;;  %6285 = vmatprep.subr.bf16.mxu1 %v6284_v18  ;;  %v3456_v36 = vld [vmem:[%s9764_s3 + $0x7c0] sm:$0xff]  ;;  %v3377_v55 = vld [vmem:[%s9764_s3 + $0x478] sm:$0xff] }
 0x96d   :  { %v3452_v18 = vld [vmem:[%s9764_s3 + $0x7a0] sm:$0xff]  ;;  %v6242_v35 = vpack.c.bf16 %v3456_v36, %v3450_v11  ;;  %v6340_v10 = vpack.c.bf16 %v3377_v55, %v3371_v0  ;;  %v3376_v11 = vld [vmem:[%s9764_s3 + $0x470] sm:$0xff] }
 0x96e   :  { %v6306_v13 = vpack.c.bf16 %v3458_v27, %v3452_v18  ;;  %v3382_v18 = vld [vmem:[%s9764_s3 + $0x4b0] sm:$0xff] }
 0x96f   :  { %6223 = vmatpush1.bf16.msra.mxu0 %v6222_v9  ;;  %6287 = vmatpush1.bf16.msra.mxu1 %v6286_v40  ;;  %v6308_v9 = vpack.c.bf16 %v3281_v31, %v3275_v17  ;;  %v3287_v40 = vld [vmem:[%s9764_s3 + $0xb8] sm:$0xff]  ;;  %v3388_v27 = vld [vmem:[%s9764_s3 + $0x4f0] sm:$0xff] }
 0x970   :  { %6225 = vmatprep.subr.bf16.mxu0 %v6224_v22  ;;  %6289 = vmatprep.subr.bf16.mxu1 %v6288_v51  ;;  %v3293_v22 = vld [vmem:[%s9764_s3 + $0xf8] sm:$0xff] }
 0x971   :  { %v6312_v51 = vpack.c.bf16 %v3293_v22, %v3287_v40  ;;  %v3395_v17 = vld [vmem:[%s9764_s3 + $0x538] sm:$0xff] }
 0x972   :  { %v3401_v31 = vld [vmem:[%s9764_s3 + $0x578] sm:$0xff] }
 0x973   :  { %6227 = vmatpush1.bf16.msra.mxu0 %v6226_v48  ;;  %6291 = vmatpush1.bf16.msra.mxu1 %v6290_v41  ;;  %v6316_v48 = vpack.c.bf16 %v3305_v21, %v3299_v39  ;;  %v3311_v41 = vld [vmem:[%s9764_s3 + $0x1b8] sm:$0xff] }
 0x974   :  { %6229 = vmatprep.subr.bf16.mxu0 %v6228_v24  ;;  %6293 = vmatprep.subr.bf16.mxu1 %v6292_v47  ;;  %v3317_v24 = vld [vmem:[%s9764_s3 + $0x1f8] sm:$0xff]  ;;  %v3310_v47 = vld [vmem:[%s9764_s3 + $0x1b0] sm:$0xff] }
 0x975   :  { %v6320_v56 = vpack.c.bf16 %v3317_v24, %v3311_v41  ;;  %v6322_v30 = vpack.c.bf16 %v3316_v59, %v3310_v47  ;;  %v3413_v40 = vld [vmem:[%s9764_s3 + $0x5f8] sm:$0xff]  ;;  %v3436_v47 = vld [vmem:[%s9764_s3 + $0x6f0] sm:$0xff] }
 0x976   :  { %v3425_v39 = vld [vmem:[%s9764_s3 + $0x678] sm:$0xff] }
 0x977   :  { %6231 = vmatpush1.bf16.msra.mxu0 %v6230_v38  ;;  %6295 = vmatpush1.bf16.msra.mxu1 %v6294_v15  ;;  %v3322_v38 = vld [vmem:[%s9764_s3 + $0x230] sm:$0xff]  ;;  %v3341_v15 = vld [vmem:[%s9764_s3 + $0x2f8] sm:$0xff] }
 0x978   :  { %6233 = vmatprep.subr.bf16.mxu0 %v6232_v62  ;;  %6297 = vmatprep.subr.bf16.mxu1 %v6296_v23  ;;  %v6326_v62 = vpack.c.bf16 %v3328_v5, %v3322_v38  ;;  %v6328_v33 = vpack.c.bf16 %v3341_v15, %v3335_v52  ;;  %v3334_v23 = vld [vmem:[%s9764_s3 + $0x2b0] sm:$0xff]  ;;  %v3437_v41 = vld [vmem:[%s9764_s3 + $0x6f8] sm:$0xff] }
 0x979   :  { %v6330_v16 = vpack.c.bf16 %v3340_v2, %v3334_v23  ;;  %v3443_v59 = vld [vmem:[%s9764_s3 + $0x738] sm:$0xff]  ;;  %v3448_v38 = vld [vmem:[%s9764_s3 + $0x770] sm:$0xff] }
 0x97a   :  { %v3455_v5 = vld [vmem:[%s9764_s3 + $0x7b8] sm:$0xff]  ;;  %v3460_v23 = vld [vmem:[%s9764_s3 + $0x7f0] sm:$0xff] }
 0x97b   :  { %6235 = vmatpush1.bf16.msra.mxu0 %v6234_v7  ;;  %6299 = vmatpush1.bf16.msra.mxu1 %v6298_v6  ;;  %v3346_v7 = vld [vmem:[%s9764_s3 + $0x330] sm:$0xff]  ;;  %v3365_v6 = vld [vmem:[%s9764_s3 + $0x3f8] sm:$0xff] }
 0x97c   :  { %6237 = vmatprep.subr.bf16.mxu0 %v6236_v43  ;;  %6301 = vmatprep.subr.bf16.mxu1 %v6300_v54  ;;  %v6334_v43 = vpack.c.bf16 %v3352_v58, %v3346_v7  ;;  %v6336_v50 = vpack.c.bf16 %v3365_v6, %v3359_v12  ;;  %v3358_v54 = vld [vmem:[%s9764_s3 + $0x3b0] sm:$0xff]  ;;  %v3461_v52 = vld [vmem:[%s9764_s3 + $0x7f8] sm:$0xff] }
 0x97d   :  { %v6338_v20 = vpack.c.bf16 %v3364_v1, %v3358_v54 }
 0x97f   :  { %6239 = vmatpush1.bf16.msra.mxu0 %v6238_v19  ;;  %6303 = vmatpush1.bf16.msra.mxu1 %v6302_v25  ;;  %v3370_v19 = vld [vmem:[%s9764_s3 + $0x430] sm:$0xff]  ;;  %v3383_v25 = vld [vmem:[%s9764_s3 + $0x4b8] sm:$0xff] }
 0x980   :  { %6241 = vmatprep.subr.bf16.mxu0 %v6240_v63  ;;  %6305 = vmatprep.subr.bf16.mxu1 %v6304_v60  ;;  %v3389_v63 = vld [vmem:[%s9764_s3 + $0x4f8] sm:$0xff]  ;;  %v6342_v36 = vpack.c.bf16 %v3376_v11, %v3370_v19  ;;  %v3782_v19 = vld [vmem:[%s9767_s6] sm:$0xff]  ;;  %v3783_v11 = vld [vmem:[%s9767_s6 + $0x8] sm:$0xff] }
 0x981   :  { %v6344_v60 = vpack.c.bf16 %v3389_v63, %v3383_v25  ;;  %v6374_v25 = vpack.c.bf16 %v3783_v11, %v3782_v19 }
 0x983   :  { %6243 = vmatpush1.bf16.msra.mxu0 %v6242_v35  ;;  %6307 = vmatpush1.bf16.msra.mxu1 %v6306_v13  ;;  %v6346_v35 = vpack.c.bf16 %v3388_v27, %v3382_v18  ;;  %v6348_v13 = vpack.c.bf16 %v3401_v31, %v3395_v17  ;;  %v3800_v17 = vld [vmem:[%s9767_s6 + $0x90] sm:$0xff]  ;;  %v3801_v31 = vld [vmem:[%s9767_s6 + $0x98] sm:$0xff] }
 0x984   :  { %6309 = vmatprep.subr.bf16.mxu0 %v6308_v9  ;;  %v3394_v9 = vld [vmem:[%s9764_s3 + $0x530] sm:$0xff] }
 0x985   :  { %v6350_v22 = vpack.c.bf16 %v3400_v34, %v3394_v9  ;;  %v6376_v34 = vpack.c.bf16 %v3801_v31, %v3800_v17  ;;  %v3767_v17 = vld [vmem:[%s9766_s5 + $0x88] sm:$0xff] }
 0x986   :  { %3570 = vmatmul.mubr.f32.vlgmr.msra.gmra.mrb[32].mxu0 %v8956_v57  ;;  %3641 = vmatmul.mubr.f32.vlgmr.msra.gmra.mrb[32].mxu1 %v8956_v57 }
 0x987   :  { %6311 = vmatpush1.bf16.msra.mxu0 %v6310_v44  ;;  %3711 = vmatprep.mubr.f32.mxu0 %v8986_v3  ;;  %v6318_v3 = vpack.c.bf16 %v3304_v46, %v3298_v29  ;;  %v6352_v44 = vpack.c.bf16 %v3413_v40, %v3407_v26  ;;  %v3424_v29 = vld [vmem:[%s9764_s3 + $0x670] sm:$0xff]  ;;  %v3431_v46 = vld [vmem:[%s9764_s3 + $0x6b8] sm:$0xff] }
 0x988   :  { %6313 = vmatprep.subr.bf16.mxu0 %v6312_v51  ;;  %v3406_v51 = vld [vmem:[%s9764_s3 + $0x5b0] sm:$0xff]  ;;  %v3785_v40 = vld [vmem:[%s9767_s6 + $0x18] sm:$0xff] }
 0x989   :  { %v6354_v21 = vpack.c.bf16 %v3412_v8, %v3406_v51  ;;  %v3784_v26 = vld [vmem:[%s9767_s6 + $0x10] sm:$0xff] }
 0x98b   :  { %6315 = vmatpush1.bf16.msra.mxu0 %v6314_v42  ;;  %v6356_v42 = vpack.c.bf16 %v3425_v39, %v3419_v53  ;;  %v4052_v39 = vld [vmem:[%s9761_s0 + $0x78] sm:$0xff] }
 0x98c   :  { %6317 = vmatprep.subr.bf16.mxu0 %v6316_v48  ;;  %v3418_v48 = vld [vmem:[%s9764_s3 + $0x630] sm:$0xff] }
 0x98d   :  { %v6358_v24 = vpack.c.bf16 %v3424_v29, %v3418_v48 }
 0x98f   :  { %6319 = vmatpush1.bf16.msra.mxu0 %v6318_v3  ;;  %v6360_v3 = vpack.c.bf16 %v3437_v41, %v3431_v46  ;;  %v3786_v46 = vld [vmem:[%s9767_s6 + $0x20] sm:$0xff]  ;;  %v3787_v41 = vld [vmem:[%s9767_s6 + $0x28] sm:$0xff] }
 0x990   :  { %6321 = vmatprep.subr.bf16.mxu0 %v6320_v56  ;;  %v3430_v56 = vld [vmem:[%s9764_s3 + $0x6b0] sm:$0xff] }
 0x991   :  { %v6362_v28 = vpack.c.bf16 %v3436_v47, %v3430_v56  ;;  %v3804_v56 = vld [vmem:[%s9767_s6 + $0xb0] sm:$0xff]  ;;  %v3805_v47 = vld [vmem:[%s9767_s6 + $0xb8] sm:$0xff] }
 0x993   :  { %6323 = vmatpush1.bf16.msra.mxu0 %v6322_v30  ;;  %v6364_v30 = vpack.c.bf16 %v3449_v4, %v3443_v59  ;;  %v6384_v4 = vpack.c.bf16 %v3805_v47, %v3804_v56 }
 0x994   :  { %6325 = vmatprep.subr.bf16.mxu0 %v6324_v45  ;;  %v3442_v45 = vld [vmem:[%s9764_s3 + $0x730] sm:$0xff] }
 0x995   :  { %v6366_v15 = vpack.c.bf16 %v3448_v38, %v3442_v45 }
 0x997   :  { %6327 = vmatpush1.bf16.msra.mxu0 %v6326_v62  ;;  %v6368_v62 = vpack.c.bf16 %v3461_v52, %v3455_v5  ;;  %v3806_v5 = vld [vmem:[%s9767_s6 + $0xc0] sm:$0xff]  ;;  %v3807_v52 = vld [vmem:[%s9767_s6 + $0xc8] sm:$0xff] }
 0x998   :  { %6329 = vmatprep.subr.bf16.mxu0 %v6328_v33  ;;  %v3454_v33 = vld [vmem:[%s9764_s3 + $0x7b0] sm:$0xff] }
 0x999   :  { %v6370_v2 = vpack.c.bf16 %v3460_v23, %v3454_v33  ;;  %v3791_v33 = vld [vmem:[%s9767_s6 + $0x48] sm:$0xff] }
 0x99b   :  { %6331 = vmatpush1.bf16.msra.mxu0 %v6330_v16 }
 0x99c   :  { %6333 = vmatprep.subr.bf16.mxu0 %v6332_v37 }
 0x99f   :  { %6335 = vmatpush1.bf16.msra.mxu0 %v6334_v43 }
 0x9a0   :  { %6337 = vmatprep.subr.bf16.mxu0 %v6336_v50  ;;  %v4051_v50 = vld [vmem:[%s9761_s0 + $0x70] sm:$0xff] }
 0x9a3   :  { %6339 = vmatpush1.bf16.msra.mxu0 %v6338_v20  ;;  %v3799_v20 = vld [vmem:[%s9767_s6 + $0x88] sm:$0xff] }
 0x9a4   :  { %6341 = vmatprep.subr.bf16.mxu0 %v6340_v10 }
 0x9a7   :  { %6343 = vmatpush1.bf16.msra.mxu0 %v6342_v36 }
 0x9a8   :  { %6345 = vmatprep.subr.bf16.mxu0 %v6344_v60 }
 0x9ab   :  { %6347 = vmatpush1.bf16.msra.mxu0 %v6346_v35 }
 0x9ac   :  { %6349 = vmatprep.subr.bf16.mxu0 %v6348_v13 }
 0x9af   :  { %6351 = vmatpush1.bf16.msra.mxu0 %v6350_v22  ;;  %v6378_v22 = vpack.c.bf16 %v3785_v40, %v3784_v26  ;;  %v3462_v40 = vld [vmem:[%s9765_s4] sm:$0xff] }
 0x9b0   :  { %6353 = vmatprep.subr.bf16.mxu0 %v6352_v44 }
 0x9b3   :  { %6355 = vmatpush1.bf16.msra.mxu0 %v6354_v21  ;;  %v3802_v21 = vld [vmem:[%s9767_s6 + $0xa0] sm:$0xff] }
 0x9b4   :  { %6357 = vmatprep.subr.bf16.mxu0 %v6356_v42  ;;  %v3803_v42 = vld [vmem:[%s9767_s6 + $0xa8] sm:$0xff] }
 0x9b5   :  { %v6380_v29 = vpack.c.bf16 %v3803_v42, %v3802_v21 }
 0x9b7   :  { %6359 = vmatpush1.bf16.msra.mxu0 %v6358_v24  ;;  %v6382_v24 = vpack.c.bf16 %v3787_v41, %v3786_v46 }
 0x9b8   :  { %6361 = vmatprep.subr.bf16.mxu0 %v6360_v3 }
 0x9bb   :  { %6363 = vmatpush1.bf16.msra.mxu0 %v6362_v28  ;;  %v3788_v28 = vld [vmem:[%s9767_s6 + $0x30] sm:$0xff] }
 0x9bc   :  { %6365 = vmatprep.subr.bf16.mxu0 %v6364_v30  ;;  %v3789_v30 = vld [vmem:[%s9767_s6 + $0x38] sm:$0xff] }
 0x9bd   :  { %v6386_v45 = vpack.c.bf16 %v3789_v30, %v3788_v28 }
 0x9bf   :  { %6367 = vmatpush1.bf16.msra.mxu0 %v6366_v15  ;;  %v6388_v15 = vpack.c.bf16 %v3807_v52, %v3806_v5 }
 0x9c0   :  { %6369 = vmatprep.subr.bf16.mxu0 %v6368_v62  ;;  %v3790_v62 = vld [vmem:[%s9767_s6 + $0x40] sm:$0xff] }
 0x9c1   :  { %v6390_v23 = vpack.c.bf16 %v3791_v33, %v3790_v62 }
 0x9c3   :  { %6371 = vmatpush1.bf16.msra.mxu0 %v6370_v2  ;;  %v3808_v2 = vld [vmem:[%s9767_s6 + $0xd0] sm:$0xff] }
 0x9c6   :  { %3712 = vmatmul.mubr.f32.vlgmr.msra.gmra.mrb[34].mxu0 %v8956_v57  ;;  %v3798_v57 = vld [vmem:[%s9767_s6 + $0x80] sm:$0xff] }
 0x9c7   :  { %v6372_v10 = vpack.c.bf16 %v3799_v20, %v3798_v57  ;;  %v3813_v57 = vld [vmem:[%s9767_s6 + $0xf8] sm:$0xff] }
 0x9c9   :  { %6373 = vmatprep.subr.bf16.mxu1 %v6372_v10 }
 0x9ca   :  { %6375 = vmatpush3.bf16.msra.mxu1 %v6374_v25  ;;  %v3796_v25 = vld [vmem:[%s9767_s6 + $0x70] sm:$0xff] }
 0x9cb   :  { %6377 = vmatprep.subr.bf16.mxu1 %v6376_v34  ;;  %v10710_v34 = vld [vmem:[#allocation136_spill] sm:$0xff] }
 0x9cc   :  { %v3466_v26 = vsub.s32 0, %v10710_v34  ;;  %v3474_v41 = vsub.s32 4, %v10710_v34 }
 0x9ce   :  { %6379 = vmatpush3.bf16.msra.mxu1 %v6378_v22  ;;  %v3470_v22 = vsub.s32 1, %v10710_v34 }
 0x9cf   :  { %6381 = vmatprep.subr.bf16.mxu1 %v6380_v29 }
 0x9d2   :  { %6383 = vmatpush3.bf16.msra.mxu1 %v6382_v24  ;;  %v3478_v24 = vsub.s32 5, %v10710_v34 }
 0x9d3   :  { %6385 = vmatprep.subr.bf16.mxu1 %v6384_v4 }
 0x9d4   :  { %v3479_v56 = vrot.slane %v3462_v40, %v3478_v24  ;;  %v3777_v24 = vld [vmem:[%s9766_s5 + $0xd8] sm:$0xff] }
 0x9d6   :  { %6387 = vmatpush3.bf16.msra.mxu1 %v6386_v45 }
 0x9d7   :  { %6389 = vmatprep.subr.bf16.mxu1 %v6388_v15 }
 0x9d9   :  { %v2975_v61 = vpop.f32.mrb[28].mxu0  ;;  %v3046_v49 = vpop.f32.mrb[28].mxu1 }
 0x9da   :  { %v2977_v16 = vpop.f32.mrb[29].mxu0  ;;  %v3048_v37 = vpop.f32.mrb[29].mxu1  ;;  %6391 = vmatpush3.bf16.msra.mxu1 %v6390_v23  ;;  %v3482_v23 = vsub.s32 6, %v10710_v34 }
 0x9db   :  { %v3201_v7 = vcombine.low %v2975_v61, %v2977_v16  ;;  %v3202_v58 = vcombine.low %v3046_v49, %v3048_v37  ;;  %v3809_v61 = vld [vmem:[%s9767_s6 + $0xd8] sm:$0xff]  ;;  %v3792_v37 = vld [vmem:[%s9767_s6 + $0x50] sm:$0xff] }
 0x9dc   :  { %v6392_v16 = vpack.c.bf16 %v3809_v61, %v3808_v2  ;;  %v3486_v2 = vsub.s32 7, %v10710_v34  ;;  %v3483_v61 = vrot.slane %v3462_v40, %v3482_v23  ;;  %v3754_v34 = vld [vmem:[%s9766_s5 + $0x20] sm:$0xff]  ;;  %v3764_v23 = vld [vmem:[%s9766_s5 + $0x70] sm:$0xff] }
 0x9dd   :  { %v3209_v12 = vrot.slane %v3201_v7, %v7929_v14  ;;  %v3216_v6 = vrot.slane %v3202_v58, %v7929_v14  ;;  %v3793_v7 = vld [vmem:[%s9767_s6 + $0x58] sm:$0xff] }
 0x9de   :  { %6393 = vmatprep.subr.bf16.mxu1 %v6392_v16 }
 0x9df   :  { %v3217_v43 = vcombine.low %v3209_v12, %v3216_v6  ;;  %v6394_v12 = vpack.c.bf16 %v3793_v7, %v3792_v37  ;;  %v3810_v6 = vld [vmem:[%s9767_s6 + $0xe0] sm:$0xff] }
 0x9e1   :  { %v3237_v54 = vadd.f32 %v4051_v50, %v3217_v43  ;;  %v3811_v43 = vld [vmem:[%s9767_s6 + $0xe8] sm:$0xff]  ;;  %v3794_v50 = vld [vmem:[%s9767_s6 + $0x60] sm:$0xff]  ;;  %6395 = vmatpush3.bf16.msra.mxu1 %v6394_v12 }
 0x9e3   :  { %v3246_v1 = vrot.slane %v3237_v54, 4  ;;  %v4053_v55 = vmul.f32 -1.442695, %v3237_v54 }
 0x9e5   :  { %v4054_v0 = vmul.f32 -1.442695, %v3246_v1  ;;  %v6396_v1 = vpack.c.bf16 %v3811_v43, %v3810_v6 }
 0x9e7   :  { %6552 = vpow2.f32 %v4054_v0  ;;  %v3795_v0 = vld [vmem:[%s9767_s6 + $0x68] sm:$0xff]  ;;  %6397 = vmatprep.subr.bf16.mxu1 %v6396_v1 }
 0x9e8   :  { %6554 = vpow2.f32 %v4053_v55  ;;  %v3812_v55 = vld [vmem:[%s9767_s6 + $0xf0] sm:$0xff]  ;;  %v6398_v10 = vpack.c.bf16 %v3795_v0, %v3794_v50 }
 0x9e9   :  { %v6400_v11 = vpack.c.bf16 %v3813_v57, %v3812_v55  ;;  %v3750_v57 = vld [vmem:[%s9766_s5] sm:$0xff] }
 0x9ea   :  { %6399 = vmatpush3.bf16.msra.mxu1 %v6398_v10 }
 0x9eb   :  { %6401 = vmatprep.subr.bf16.mxu1 %v6400_v11  ;;  %v3768_v11 = vld [vmem:[%s9766_s5 + $0x90] sm:$0xff] }
 0x9f1   :  { %v6553_v60 = vpop.eup %6552 }
 0x9f2   :  { %v6555_v35 = vpop.eup %6554  ;;  %v3251_v44 = vadd.f32 1.0, %v6553_v60 }
 0x9f3   :  { %v3242_v53 = vadd.f32 1.0, %v6555_v35 }
 0x9f4   :  { %6556 = vrcp.f32 %v3251_v44  ;;  %v3467_v44 = vrot.slane %v3462_v40, %v3466_v26  ;;  %v3755_v26 = vld [vmem:[%s9766_s5 + $0x28] sm:$0xff] }
 0x9f5   :  { %6558 = vrcp.f32 %v3242_v53 }
 0x9fe   :  { %v6557_v49 = vpop.eup %6556 }
 0x9ff   :  { %v6559_v58 = vpop.eup %6558  ;;  %v3264_v19 = vmul.f32 %v6557_v49, %v8847_v32  ;;  %v3766_v32 = vld [vmem:[%s9766_s5 + $0x80] sm:$0xff]  ;;  %v3487_v49 = vrot.slane %v3462_v40, %v3486_v2  ;;  %v3765_v2 = vld [vmem:[%s9766_s5 + $0x78] sm:$0xff] }
 0xa00   :  { %v6404_v31 = vpack.c.bf16 %v3767_v17, %v3766_v32  ;;  %v3752_v32 = vld [vmem:[%s9766_s5 + $0x10] sm:$0xff] }
 0xa19   :  { %v3117_v63 = vpop.f32.mrb[30].mxu0  ;;  %v3188_v36 = vpop.f32.mrb[30].mxu1 }
 0xa1a   :  { %v3119_v18 = vpop.f32.mrb[31].mxu0  ;;  %v3190_v27 = vpop.f32.mrb[31].mxu1 }
 0xa1b   :  { %v3218_v13 = vcombine.low %v3117_v63, %v3119_v18  ;;  %v3219_v9 = vcombine.low %v3188_v36, %v3190_v27  ;;  %v3797_v63 = vld [vmem:[%s9767_s6 + $0x78] sm:$0xff] }
 0xa1c   :  { %v6402_v27 = vpack.c.bf16 %v3797_v63, %v3796_v25  ;;  %v3769_v25 = vld [vmem:[%s9766_s5 + $0x98] sm:$0xff] }
 0xa1d   :  { %v3226_v51 = vrot.slane %v3218_v13, %v7929_v14  ;;  %v3233_v8 = vrot.slane %v3219_v9, %v7929_v14 }
 0xa1e   :  { %6403 = vmatpush3.bf16.msra.mxu1 %v6402_v27  ;;  %v6408_v27 = vpack.c.bf16 %v3769_v25, %v3768_v11 }
 0xa1f   :  { %v3234_v48 = vcombine.low %v3226_v51, %v3233_v8  ;;  %6405 = vmatprep.subr.bf16.mxu1 %v6404_v31  ;;  %v3471_v51 = vrot.slane %v3462_v40, %v3470_v22  ;;  %v3770_v31 = vld [vmem:[%s9766_s5 + $0xa0] sm:$0xff]  ;;  %v3773_v22 = vld [vmem:[%s9766_s5 + $0xb8] sm:$0xff] }
 0xa21   :  { %v3238_v3 = vadd.f32 %v4052_v39, %v3234_v48 }
 0xa23   :  { %6560 = vtanh.f32 %v3238_v3  ;;  %v3256_v59 = vrot.slane %v3238_v3, 4  ;;  %v3475_v3 = vrot.slane %v3462_v40, %v3474_v41  ;;  %v3772_v40 = vld [vmem:[%s9766_s5 + $0xb0] sm:$0xff] }
 0xa24   :  { %v3776_v41 = vld [vmem:[%s9766_s5 + $0xd0] sm:$0xff] }
 0xa25   :  { %v4055_v38 = vmul.f32 -1.442695, %v3256_v59 }
 0xa27   :  { %6562 = vpow2.f32 %v4055_v38 }
 0xa2d   :  { %v6561_v54 = vpop.eup %6560 }
 0xa2e   :  { %v3265_v20 = vmul.f32 %v6561_v54, %v6559_v58 }
 0xa30   :  { %v3266_v36 = vadd.f32 %v3265_v20, %v3264_v19  ;;  %v3751_v20 = vld [vmem:[%s9766_s5 + $0x8] sm:$0xff] }
 0xa31   :  { %v6563_v60 = vpop.eup %6562 }
 0xa32   :  { %v3261_v18 = vadd.f32 1.0, %v6563_v60  ;;  %6564 = vtanh.f32 %v3266_v36 }
 0xa34   :  { %6566 = vrcp.f32 %v3261_v18  ;;  %v6406_v18 = vpack.c.bf16 %v3751_v20, %v3750_v57 }
 0xa3c   :  { %v6565_v35 = vpop.eup %6564 }
 0xa3e   :  { %v6567_v13 = vpop.eup %6566 }
 0xa3f   :  { %v3268_v9 = vmul.f32 %v6567_v13, %v6565_v35  ;;  %v3771_v35 = vld [vmem:[%s9766_s5 + $0xa8] sm:$0xff] }
 0xa41   :  { %v9641_v19 = vrot.slane %v3268_v9, %v7929_v14  ;;  %v3753_v14 = vld [vmem:[%s9766_s5 + $0x18] sm:$0xff]  ;;  %v6412_v9 = vpack.c.bf16 %v3771_v35, %v3770_v31 }
 0xa42   :  { %v6410_v13 = vpack.c.bf16 %v3753_v14, %v3752_v32 }
 0xa43   :  { %v3892_v17 = vcombine.high %v9641_v19, %v9641_v19 }
 0xa59   :  { %v3571_v8 = vpop.f32.mrb[32].mxu0  ;;  %v3642_v53 = vpop.f32.mrb[32].mxu1 }
 0xa5a   :  { %v3572_v39 = vadd.f32 %v3571_v8, %v3467_v44  ;;  %v3573_v21 = vpop.f32.mrb[33].mxu0  ;;  %v3644_v42 = vpop.f32.mrb[33].mxu1  ;;  %v3643_v47 = vadd.f32 %v3642_v53, %v3475_v3  ;;  %v6414_v44 = vpack.c.bf16 %v3755_v26, %v3754_v34  ;;  %v3756_v8 = vld [vmem:[%s9766_s5 + $0x30] sm:$0xff]  ;;  %v3757_v53 = vld [vmem:[%s9766_s5 + $0x38] sm:$0xff] }
 0xa5b   :  { %v3574_v48 = vadd.f32 %v3573_v21, %v3471_v51  ;;  %v3645_v59 = vadd.f32 %v3644_v42, %v3479_v56  ;;  %v6416_v51 = vpack.c.bf16 %v3773_v22, %v3772_v40  ;;  %v3775_v21 = vld [vmem:[%s9766_s5 + $0xc8] sm:$0xff]  ;;  %v6418_v42 = vpack.c.bf16 %v3757_v53, %v3756_v8 }
 0xa5c   :  { %v4057_v29 = vmul.f32 -1.442695, %v3572_v39  ;;  %v3774_v39 = vld [vmem:[%s9766_s5 + $0xc0] sm:$0xff]  ;;  %v6424_v56 = vpack.c.bf16 %v3777_v24, %v3776_v41 }
 0xa5d   :  { %v4058_v46 = vmul.f32 -1.442695, %v3574_v48  ;;  %v6420_v48 = vpack.c.bf16 %v3775_v21, %v3774_v39 }
 0xa5e   :  { %6568 = vpow2.f32 %v4057_v29  ;;  %v3758_v29 = vld [vmem:[%s9766_s5 + $0x40] sm:$0xff] }
 0xa5f   :  { %6570 = vpow2.f32 %v4058_v46  ;;  %v3759_v46 = vld [vmem:[%s9766_s5 + $0x48] sm:$0xff] }
 0xa60   :  { %6572 = vtanh.f32 %v3643_v47  ;;  %v6422_v3 = vpack.c.bf16 %v3759_v46, %v3758_v29  ;;  %v3760_v47 = vld [vmem:[%s9766_s5 + $0x50] sm:$0xff] }
 0xa61   :  { %6574 = vtanh.f32 %v3645_v59  ;;  %v3761_v59 = vld [vmem:[%s9766_s5 + $0x58] sm:$0xff] }
 0xa68   :  { %v6569_v4 = vpop.eup %6568 }
 0xa69   :  { %v6571_v28 = vpop.eup %6570  ;;  %v3724_v30 = vadd.f32 1.0, %v6569_v4  ;;  %v3778_v4 = vld [vmem:[%s9766_s5 + $0xe0] sm:$0xff] }
 0xa6a   :  { %v3725_v45 = vadd.f32 1.0, %v6571_v28  ;;  %v6573_v38 = vpop.eup %6572  ;;  %v3779_v28 = vld [vmem:[%s9766_s5 + $0xe8] sm:$0xff] }
 0xa6b   :  { %6576 = vrcp.f32 %v3724_v30  ;;  %v6575_v5 = vpop.eup %6574  ;;  %v6426_v30 = vpack.c.bf16 %v3761_v59, %v3760_v47 }
 0xa6c   :  { %6578 = vrcp.f32 %v3725_v45  ;;  %v6428_v45 = vpack.c.bf16 %v3779_v28, %v3778_v4 }
 0xa75   :  { %v6577_v52 = vpop.eup %6576 }
 0xa76   :  { %v6579_v15 = vpop.eup %6578  ;;  %v3744_v62 = vmul.f32 %v6577_v52, %v6573_v38  ;;  %v3762_v38 = vld [vmem:[%s9766_s5 + $0x60] sm:$0xff]  ;;  %v3780_v52 = vld [vmem:[%s9766_s5 + $0xf0] sm:$0xff] }
 0xa77   :  { %v3745_v33 = vmul.f32 %v6579_v15, %v6575_v5  ;;  %v3763_v5 = vld [vmem:[%s9766_s5 + $0x68] sm:$0xff]  ;;  %v3781_v15 = vld [vmem:[%s9766_s5 + $0xf8] sm:$0xff]  ;;  %s6648_s5 = smov [#allocation2]  }
 0xa78   :  { %s3996_s22 = sshll.u32 %s6648_s5, 4  ;;  %s3997_s22 = int_to_ptr.vmem [resolvable:$true] %s3996_s22 }
 0xa79   :  { %s6598_s24 = scalar_lea.vmem %s3997_s22, 32  ;;  %p6603_p1 = scmp.lt.s32.totalorder %s3997_s22, %s3997_s22 }
 0xa7a   :  { %p6599_p0 = scmp.ne.s32.totalorder %s3997_s22, %s6598_s24  ;;  %p6604_p2 = scmp.lt.s32.totalorder %s6598_s24, %s6598_s24 }
 0xa7c   :  { %p6605_p3 = por %p6604_p2, %p6603_p1 }
 0xa7e   :  { %p6606_p4 = pnand %p6605_p3, %p6599_p0 }
 0xa99   :  { %v3713_v16 = vpop.f32.mrb[34].mxu0 }
 0xa9a   :  { %v3714_v37 = vadd.f32 %v3713_v16, %v3483_v61  ;;  %v3715_v7 = vpop.f32.mrb[35].mxu0  ;;  %v6434_v61 = vpack.c.bf16 %v3765_v2, %v3764_v23 }
 0xa9b   :  { %v3716_v58 = vadd.f32 %v3715_v7, %v3487_v49 }
 0xa9c   :  { %v4059_v12 = vmul.f32 -1.442695, %v3714_v37 }
 0xa9d   :  { %v4060_v6 = vmul.f32 -1.442695, %v3716_v58 }
 0xa9e   :  { %6580 = vpow2.f32 %v4059_v12 }
 0xa9f   :  { %6582 = vpow2.f32 %v4060_v6  ;;  %v4061_v6 = vld [vmem:[%s9768_s7] ss:$0 sm:$0xff]  ;;  %s6649_s7 = smov [#allocation4]  }
 0xaa0   :  { %6584 = vtanh.f32 %v3744_v62  ;;  %v6430_v62 = vpack.c.bf16 %v3763_v5, %v3762_v38  ;;  %s4006_s23 = sshll.u32 %s6649_s7, 4  ;;  %s4007_s23 = int_to_ptr.vmem [resolvable:$true] %s4006_s23 }
 0xaa1   :  { %6586 = vtanh.f32 %v3745_v33  ;;  %v6432_v33 = vpack.c.bf16 %v3781_v15, %v3780_v52 }
 0xaa8   :  { %v6581_v43 = vpop.eup %6580 }
 0xaa9   :  { %v6583_v50 = vpop.eup %6582  ;;  %v3738_v54 = vadd.f32 1.0, %v6581_v43 }
 0xaaa   :  { %v3739_v1 = vadd.f32 1.0, %v6583_v50  ;;  %v6585_v0 = vpop.eup %6584 }
 0xaab   :  { %6588 = vrcp.f32 %v3738_v54  ;;  %v6587_v55 = vpop.eup %6586 }
 0xaac   :  { %6590 = vrcp.f32 %v3739_v1 }
 0xab5   :  { %v6589_v10 = vpop.eup %6588 }
 0xab6   :  { %v6591_v63 = vpop.eup %6590  ;;  %v3748_v36 = vmul.f32 %v6589_v10, %v6585_v0 }
 0xab7   :  { %v3749_v60 = vmul.f32 %v6591_v63, %v6587_v55 }
 0xab9   :  { %3878 = vmatprep.mubr.f32.mxu1 %v3749_v60 }
 0xaba   :  { %3879 = vmatmul.mubr.f32.vlgmr.msra.gmra.mrb[34].mxu1 %v3748_v36 }
 0xabb   :  { %6407 = vmatpush3.bf16.msra.mxu1 %v6406_v18  ;;  %3959 = vmatprep.mubr.f32.mxu1 %v3892_v17 }
 0xabc   :  { %6409 = vmatprep.subr.bf16.mxu1 %v6408_v27 }
 0xabf   :  { %6411 = vmatpush3.bf16.msra.mxu1 %v6410_v13 }
 0xac0   :  { %6413 = vmatprep.subr.bf16.mxu1 %v6412_v9 }
 0xac3   :  { %6415 = vmatpush3.bf16.msra.mxu1 %v6414_v44 }
 0xac4   :  { %6417 = vmatprep.subr.bf16.mxu1 %v6416_v51 }
 0xac7   :  { %6419 = vmatpush3.bf16.msra.mxu1 %v6418_v42 }
 0xac8   :  { %6421 = vmatprep.subr.bf16.mxu1 %v6420_v48 }
 0xacb   :  { %6423 = vmatpush3.bf16.msra.mxu1 %v6422_v3 }
 0xacc   :  { %6425 = vmatprep.subr.bf16.mxu1 %v6424_v56 }
 0xacf   :  { %6427 = vmatpush3.bf16.msra.mxu1 %v6426_v30 }
 0xad0   :  { %6429 = vmatprep.subr.bf16.mxu1 %v6428_v45 }
 0xad3   :  { %6431 = vmatpush3.bf16.msra.mxu1 %v6430_v62 }
 0xad4   :  { %6433 = vmatprep.subr.bf16.mxu1 %v6432_v33 }
 0xad7   :  { %6435 = vmatpush3.bf16.msra.mxu1 %v6434_v61 }
 0xada   :  { %3960 = vmatmul.mubr.f32.vlgmr.msra.gmra.mrb[36].mxu1 %v9641_v19 }
 0xb8d   :  { %v4094_v49 = vpop.f32.mrb[34].mxu1 }
 0xb8e   :  { %v4095_v16 = vpop.f32.mrb[35].mxu1 }
 0xb8f   :  { %v4096_v37 = vadd.f32 %v4095_v16, %v4094_v49 }
 0xbad   :  { %v4129_v7 = vpop.f32.mrb[36].mxu1 }
 0xbae   :  { %v4130_v58 = vpop.f32.mrb[37].mxu1 }
 0xbaf   :  { %v4131_v12 = vadd.f32 %v4130_v58, %v4129_v7 }
 0xbb1   :  { %v3962_v43 = vadd.f32 %v4131_v12, %v4096_v37 }
 0xbb3   :  { %v3972_v50 = vadd.f32 %v4061_v6, %v3962_v43 }
 0xbb5   :  { %v3974_v54 = vsel %vm3973_vm0, %v3972_v50, -inf }
 0xbb6   :  { %3975 = vmax.xlane.f32.xlu0 %v3974_v54 }
 0xc43   :  { %v3976_v1 = vpop.xlane.xlu0 %3975 }
 0xc44   :  { %v3977_v0 = vsub.f32 %v3972_v50, %v3976_v1 }
 0xc46   :  { %v3978_v55 = vmul.f32 1.442695, %v3977_v0 }
 0xc48   :  { %6592 = vpow2.f32 %v3978_v55 }
 0xc52   :  { %v6593_v57 = vpop.eup %6592 }
 0xc53   :  { %v3980_v20 = vsel %vm3973_vm0, %v6593_v57, 0.0 }
 0xc54   :  { %3981 = vadd.xlane.f32.xlu0 %v3980_v20 }
 0xce1   :  { %v3982_v10 = vpop.xlane.xlu0 %3981 }
 0xce2   :  { %6594 = vrcp.f32 %v3982_v10 }
 0xce3   :  { %6596 = vlog2.f32 %v3982_v10 }
 0xcec   :  { %v6595_v19 = vpop.eup %6594 }
 0xced   :  { %v6597_v11 = vpop.eup %6596  ;;  %v3984_v25 = vmul.f32 %v6595_v19, %v6593_v57 }
 0xcee   :  { %v3987_v63 = vmul.f32 0.6931472, %v6597_v11 }
 0xcef   :  { %3985 = vst.msk [vmem:[#allocation2] sm:$0x3] %vm3973_vm0, %v3984_v25 }
 0xcf0   :  { %6609 = shalt.err (!%p6606_p4)
}
 0xcf1   :  { %s6610_s27 = scalar_lea.hbm %s9769_s8, 32 }
 0xcf2   :  { %p6611_p5 = scmp.ne.s32.totalorder %s9769_s8, %s6610_s27  ;;  %p6614_p6 = scmp.lt.u32.totalorder %s6610_s27, %s9769_s8 }
 0xcf4   :  { %p6616_p7 = pnand %p6614_p6, %p6611_p5 }
 0xcf6   :  { %6619 = shalt.err (!%p6616_p7)
}
 0xcf7   :  { %3999 = dma.vmem_to_hbm [thread:$0]  %s3997_s22, 32, %s9769_s8, [#allocation3]   ;;  %v3988_v36 = vsub.f32 %v3977_v0, %v3987_v63 }
 0xcf8   :  { %s6620_s12 = scalar_lea.vmem %s4007_s23, 32  ;;  %p6625_p9 = scmp.lt.s32.totalorder %s4007_s23, %s4007_s23 }
 0xcf9   :  { %3989 = vst.msk [vmem:[#allocation4] sm:$0x3] %vm3973_vm0, %v3988_v36  ;;  %p6621_p8 = scmp.ne.s32.totalorder %s4007_s23, %s6620_s12  ;;  %p6626_p10 = scmp.lt.s32.totalorder %s6620_s12, %s6620_s12 }
 0xcfb   :  { %p6627_p11 = por %p6626_p10, %p6625_p9 }
 0xcfd   :  { %p6628_p12 = pnand %p6627_p11, %p6621_p8 }
 0xcff   :  { %6631 = shalt.err (!%p6628_p12)
}
 0xd00   :  { %s6632_s15 = scalar_lea.hbm %s9770_s9, 32 }
 0xd01   :  { %p6633_p13 = scmp.ne.s32.totalorder %s9770_s9, %s6632_s15  ;;  %p6636_p0 = scmp.lt.u32.totalorder %s6632_s15, %s9770_s9 }
 0xd03   :  { %p6638_p1 = pnand %p6636_p0, %p6633_p13 }
 0xd05   :  { %6641 = shalt.err (!%p6638_p1)
}
 0xd06   :  { %4009 = dma.vmem_to_hbm [thread:$0]  %s4007_s23, 32, %s9770_s9, [#allocation5]  }
 0xd07   :  { %6642 = dma.done.wait [#allocation3], 32  }
 0xd08   :  { %6643 = vsyncadd [#allocation3], 4294967264 }
 0xd09   :  { %6644 = dma.done.wait [#allocation5], 32  }
 0xd0a   :  { %6645 = vsyncadd [#allocation5], 4294967264 }
 0xd0b   :  { %4016 = vsyncpa [#allocation3], 1 }
 0xd0c   :  { %4017 = vsyncpa [#allocation5], 1 }

</bundles_post_ra>
